<compile_context>
chip_gen: v5e
topology: v5e:2x2
jax: 0.10.0
libtpu: 0.0.40
codegen_flags: <defaults>
</compile_context>

<pallas_src>
import functools

import jax
import jax.numpy as jnp
from jax.experimental import pallas as pl
from jax.experimental.pallas import tpu as pltpu

EPS = 1e-5  # PyTorch GroupNorm default eps


def _hardswish(x):
    # reference-side helper: x * relu6(x + 3) / 6
    return x * jnp.clip(x + 3.0, 0.0, 6.0) * (1.0 / 6.0)


def _gn_per_sample_hswish6(y, n_bb, g, beta, seg, seg_t, inv_cnt0, inv_cnt1):
    """GroupNorm(1,C) per (branch, sample) followed by 6*hardswish.

    y      : (Ctot, L) fp32, L = Bt*HW, columns grouped by sample.
    g/beta : (Ctot, 1) fp32 affine.
    seg    : (L, P) fp32 one-hot sample-segment matrix (P >= Bt, pad cols = 0).
    seg_t  : (P, L) transpose of seg.
    Stats: segmented lane-sum via MXU dot, tiny per-branch sublane reduce,
    fp32 one-pass variance; scale/shift broadcast back with another MXU dot.
    The trailing 1/6 of hardswish is folded into the next layer's weights.
    """
    sums = jnp.dot(y, seg, preferred_element_type=jnp.float32)        # (Ctot, P)
    sqs = jnp.dot(y * y, seg, preferred_element_type=jnp.float32)     # (Ctot, P)
    s0 = jnp.sum(sums[:n_bb], axis=0, keepdims=True)                  # (1, P)
    s1 = jnp.sum(sums[n_bb:], axis=0, keepdims=True)
    q0 = jnp.sum(sqs[:n_bb], axis=0, keepdims=True)
    q1 = jnp.sum(sqs[n_bb:], axis=0, keepdims=True)
    m0 = s0 * inv_cnt0
    m1 = s1 * inv_cnt1
    v0 = jnp.maximum(q0 * inv_cnt0 - m0 * m0, 0.0)
    v1 = jnp.maximum(q1 * inv_cnt1 - m1 * m1, 0.0)
    r0 = jax.lax.rsqrt(v0 + EPS)
    r1 = jax.lax.rsqrt(v1 + EPS)
    row = jax.lax.broadcasted_iota(jnp.int32, (y.shape[0], 1), 0)
    is_bb = row < n_bb
    rstd = jnp.where(is_bb, r0, r1)                                   # (Ctot, P)
    mean = jnp.where(is_bb, m0, m1)                                   # (Ctot, P)
    scale_cs = rstd * g                                               # (Ctot, P)
    shift_cs = beta - mean * scale_cs                                 # (Ctot, P)
    scale = jnp.dot(scale_cs, seg_t, preferred_element_type=jnp.float32)  # (Ctot, L)
    shift = jnp.dot(shift_cs, seg_t, preferred_element_type=jnp.float32)
    z = y * scale + shift
    return z * jnp.clip(z + 3.0, 0.0, 6.0)          # == 6 * hardswish(z)


# ----------------------------------------------------------------------------
# Fused kernel: [conv1x1+GN+hswish] -> [dw3x3+GN+hswish] -> [conv1x1 heads]
# for BOTH branches, Bt batch samples per grid step.
# ----------------------------------------------------------------------------
def _det_fused_kernel(x_ref, w1_ref, pv_ref, mk_ref, seg_ref, segt_ref,
                      wo_ref, bo_ref, o_ref, *, W, n_bb, inv_cnt0, inv_cnt1):
    x = x_ref[0]                                   # (Cin, L) bf16
    pv = pv_ref[...]                               # (Ctot, 16) f32 packed vectors
    wd = pv[:, 0:9]                                # depthwise taps (pre /6)
    b1 = pv[:, 9:10]
    g1 = pv[:, 10:11]
    be1 = pv[:, 11:12]
    bd = pv[:, 12:13]
    gd = pv[:, 13:14]
    bed = pv[:, 14:15]
    seg = seg_ref[...]                             # (L, P)
    seg_t = segt_ref[...]                          # (P, L)
    L = x.shape[1]

    # 1) fused 1x1 convs (rows 0..n_bb-1 = bbox branch, rest = clss branch).
    y = jnp.dot(w1_ref[...], x, preferred_element_type=jnp.float32) + b1
    h1 = _gn_per_sample_hswish6(y, n_bb, g1, be1, seg, seg_t, inv_cnt0, inv_cnt1)

    # 2) depthwise 3x3 (padding=1): 8 XLU lane rolls + precomputed 0/1 masks.
    #    The mask kills both zero-padding taps and the circular-roll wrap
    #    across rows / sample boundaries.
    acc = h1 * wd[:, 4:5]                          # center tap: always valid
    for k in range(9):                             # static unroll
        if k == 4:
            continue
        s = (k // 3 - 1) * W + (k % 3 - 1)
        shifted = pltpu.roll(h1, shift=(-s) % L, axis=1)   # [:, p] <- h1[:, p+s]
        acc = acc + shifted * mk_ref[k:k + 1, :] * wd[:, k:k + 1]
    acc = acc + bd
    h2 = _gn_per_sample_hswish6(acc, n_bb, gd, bed, seg, seg_t, inv_cnt0, inv_cnt1)
    # nn.Dropout is the identity in eval mode.
    # TODO(synk): training-mode Dropout (RNG masking) not implemented.

    # 3) fused 1x1 heads; rows pre-permuted to the module's final
    #    anchor-interleaved order and padded to a multiple of 8 -> dense store.
    o_ref[0] = (jnp.dot(wo_ref[...], h2.astype(jnp.bfloat16),
                        preferred_element_type=jnp.float32) + bo_ref[...])


def det_predictor_fused(x, w1, pvec, masks, seg, seg_t, wo, bo,
                        *, W, n_bb, inv_cnt0, inv_cnt1):
    nb, Cin, L = x.shape
    Cout_p = wo.shape[0]

    def fixed(a):
        return pl.BlockSpec(a.shape, lambda i, n=a.ndim: (0,) * n)

    kern = functools.partial(_det_fused_kernel, W=W, n_bb=n_bb,
                             inv_cnt0=inv_cnt0, inv_cnt1=inv_cnt1)
    return pl.pallas_call(
        kern,
        out_shape=jax.ShapeDtypeStruct((nb, Cout_p, L), jnp.float32),
        grid=(nb,),
        in_specs=[
            pl.BlockSpec((1, Cin, L), lambda i: (i, 0, 0)),
            fixed(w1), fixed(pvec), fixed(masks),
            fixed(seg), fixed(seg_t), fixed(wo), fixed(bo),
        ],
        out_specs=pl.BlockSpec((1, Cout_p, L), lambda i: (i, 0, 0)),
        compiler_params=pltpu.CompilerParams(
            dimension_semantics=("parallel",)),   # batch blocks -> both TCs on v7x
    )(x, w1, pvec, masks, seg, seg_t, wo, bo)


# ----------------------------------------------------------------------------
# Parameter construction (deterministic, synthetic — torch-shaped layouts)
# ----------------------------------------------------------------------------
def init_params(key, in_planes, hidden_planes, num_anchors, bbox_dim, num_classes):
    def nrm(k, shape, scale=0.1):
        return (scale * jax.random.normal(k, shape)).astype(jnp.float32)

    keys = iter(jax.random.split(key, 32))
    p = {}

    def branch(prefix, cin, cmid, cout):
        p[prefix + "w1"] = nrm(next(keys), (cmid, cin))     # torch (Cmid,Cin,1,1)
        p[prefix + "b1"] = nrm(next(keys), (cmid,))
        p[prefix + "g1"] = 1.0 + nrm(next(keys), (cmid,))
        p[prefix + "be1"] = nrm(next(keys), (cmid,))
        p[prefix + "wd"] = nrm(next(keys), (cmid, 9))       # torch (Cmid,1,3,3) flat
        p[prefix + "bd"] = nrm(next(keys), (cmid,))
        p[prefix + "gd"] = 1.0 + nrm(next(keys), (cmid,))
        p[prefix + "bed"] = nrm(next(keys), (cmid,))
        p[prefix + "wo"] = nrm(next(keys), (cout, cmid))    # torch (Cout,Cmid,1,1)
        p[prefix + "bo"] = nrm(next(keys), (cout,))

    branch("bb_", in_planes, in_planes, num_anchors * bbox_dim)
    branch("cl_", in_planes, hidden_planes, num_anchors * num_classes)
    return p


# ----------------------------------------------------------------------------
# Full forward pass (wrapper does cheap weight packing + layout plumbing only)
# ----------------------------------------------------------------------------
def det_predictor_forward(x_nchw, params, num_anchors, bbox_dim, num_classes,
                          block_batch=None):
    B, Cin, H, W = x_nchw.shape
    hidden = params["cl_w1"].shape[0]
    A, D, K = num_anchors, bbox_dim, num_classes
    Ctot = Cin + hidden
    Cout = A * (D + K)
    Cout_p = -(-Cout // 8) * 8         # pad head rows -> unmasked output vst
    HW = H * W

    # Batch blocking: biggest divisor of B that keeps >= 2 grid steps, so both
    # v7x TensorCores get work; on single-TC v5e/v6e the extra step costs
    # ~0.35us.  Override with block_batch if desired.
    if block_batch is None:
        bt = max(1, B // 2)
        while B % bt:
            bt -= 1
    else:
        bt = block_batch
        assert B % bt == 0
    nb = B // bt
    L = bt * HW

    # Activations -> (nb, Cin, Bt*HW) lane-dense slabs, bf16 for 1-pass MXU.
    x = (x_nchw.reshape(nb, bt, Cin, HW).transpose(0, 2, 1, 3)
         .reshape(nb, Cin, L).astype(jnp.bfloat16))

    cat = lambda a, b: jnp.concatenate([a, b], axis=0)
    col = lambda v: v.reshape(-1, 1).astype(jnp.float32)

    w1 = cat(params["bb_w1"], params["cl_w1"]).astype(jnp.bfloat16)   # (Ctot, Cin)

    # Packed per-channel operand (Ctot, 16):
    #   cols 0..8  depthwise taps, pre-scaled by 1/6 (hardswish fold)
    #   cols 9..14 b1, g1, be1, bd, gd, bed ; col 15 pad
    wd = cat(params["bb_wd"], params["cl_wd"]) * (1.0 / 6.0)
    pvec = jnp.concatenate([
        wd.astype(jnp.float32),
        col(cat(params["bb_b1"], params["cl_b1"])),
        col(cat(params["bb_g1"], params["cl_g1"])),
        col(cat(params["bb_be1"], params["cl_be1"])),
        col(cat(params["bb_bd"], params["cl_bd"])),
        col(cat(params["bb_gd"], params["cl_gd"])),
        col(cat(params["bb_bed"], params["cl_bed"])),
        jnp.zeros((Ctot, 1), jnp.float32),
    ], axis=1)

    # Head weights: block-diagonal over the fused hidden axis, rows permuted to
    # the final anchor-interleaved order (cat([bbox, clss], dim=2)), padded to
    # Cout_p rows, and /6-folded (second hardswish).
    wo_bb, bo_bb = params["bb_wo"], params["bb_bo"]
    wo_cl, bo_cl = params["cl_wo"], params["cl_bo"]
    bb_rows = jnp.concatenate(
        [wo_bb, jnp.zeros((A * D, hidden), jnp.float32)], axis=1).reshape(A, D, Ctot)
    cl_rows = jnp.concatenate(
        [jnp.zeros((A * K, Cin), jnp.float32), wo_cl], axis=1).reshape(A, K, Ctot)
    wo = jnp.concatenate([bb_rows, cl_rows], axis=1).reshape(Cout, Ctot)
    wo = jnp.concatenate([wo, jnp.zeros((Cout_p - Cout, Ctot), jnp.float32)], axis=0)
    wo = (wo * (1.0 / 6.0)).astype(jnp.bfloat16)
    bo = jnp.concatenate(
        [bo_bb.reshape(A, D), bo_cl.reshape(A, K)], axis=1).reshape(Cout)
    bo = jnp.concatenate(
        [bo, jnp.zeros((Cout_p - Cout,), jnp.float32)]).reshape(Cout_p, 1)

    # Depthwise validity masks (9, L): 1 where the tap's source pixel exists in
    # the SAME sample; kills zero-padding taps and circular-roll wrap.
    pos = jnp.arange(HW)
    hh, ww = pos // W, pos % W
    mrows = []
    for k in range(9):
        oy, ox = k // 3 - 1, k % 3 - 1
        ok = ((hh + oy >= 0) & (hh + oy < H) & (ww + ox >= 0) & (ww + ox < W))
        mrows.append(jnp.tile(ok.astype(jnp.float32), bt))
    masks = jnp.stack(mrows, axis=0)                                   # (9, L)

    # Per-sample segment one-hots for GN stats / broadcast (padded to >= 8
    # columns; zero columns are mathematically inert).
    P = max(8, -(-bt // 8) * 8)
    lane_sample = jnp.arange(L) // HW
    seg = (lane_sample[:, None] == jnp.arange(P)[None, :]).astype(jnp.float32)
    seg_t = (jnp.arange(P)[:, None] == lane_sample[None, :]).astype(jnp.float32)

    out = det_predictor_fused(
        x, w1, pvec, masks, seg, seg_t, wo, bo,
        W=W, n_bb=Cin,
        inv_cnt0=1.0 / (Cin * HW), inv_cnt1=1.0 / (hidden * HW))

    out = (out.reshape(nb, Cout_p, bt, HW).transpose(0, 2, 1, 3)
           .reshape(B, Cout_p, H, W)[:, :Cout])
    return out


# ----------------------------------------------------------------------------
# Pure-JAX reference (independent implementation, for correctness check)
# ----------------------------------------------------------------------------
def _ref_forward(x_nchw, params, num_anchors, bbox_dim, num_classes):
    hp = jax.lax.Precision.HIGHEST

    def gn(y, g, be):
        m = jnp.mean(y, axis=(1, 2, 3), keepdims=True)
        v = jnp.mean((y - m) ** 2, axis=(1, 2, 3), keepdims=True)
        yn = (y - m) * jax.lax.rsqrt(v + EPS)
        return yn * g[None, :, None, None] + be[None, :, None, None]

    def conv1x1(y, w, b):
        return (jnp.einsum("bchw,oc->bohw", y, w, precision=hp)
                + b[None, :, None, None])

    def dw3x3(y, w, b):
        B, C, H, W = y.shape
        yp = jnp.pad(y, ((0, 0), (0, 0), (1, 1), (1, 1)))
        acc = jnp.zeros_like(y)
        for k in range(9):
            dy, dx = k // 3, k % 3
            acc = acc + yp[:, :, dy:dy + H, dx:dx + W] * w[None, :, k, None, None]
        return acc + b[None, :, None, None]

    def branch(prefix):
        h = _hardswish(gn(conv1x1(x_nchw, params[prefix + "w1"], params[prefix + "b1"]),
                          params[prefix + "g1"], params[prefix + "be1"]))
        h = _hardswish(gn(dw3x3(h, params[prefix + "wd"], params[prefix + "bd"]),
                          params[prefix + "gd"], params[prefix + "bed"]))
        return conv1x1(h, params[prefix + "wo"], params[prefix + "bo"])

    B, _, H, W = x_nchw.shape
    A = num_anchors
    p_bbox = branch("bb_").reshape(B, A, bbox_dim, H, W)
    p_clss = branch("cl_").reshape(B, A, num_classes, H, W)
    return jnp.concatenate([p_bbox, p_clss], axis=2).reshape(B, -1, H, W)


if __name__ == "__main__":
    B, C_IN, H, W = 4, 16, 16, 16
    HIDDEN = 32
    NUM_ANCHORS = 3
    BBOX_DIM = 4
    NUM_CLASSES = 8

    key = jax.random.PRNGKey(0)
    k_x, k_p = jax.random.split(key)
    x = jax.random.normal(k_x, (B, C_IN, H, W), dtype=jnp.float32)
    params = init_params(k_p, C_IN, HIDDEN, NUM_ANCHORS, BBOX_DIM, NUM_CLASSES)

    fwd = jax.jit(functools.partial(det_predictor_forward,
                                    num_anchors=NUM_ANCHORS,
                                    bbox_dim=BBOX_DIM,
                                    num_classes=NUM_CLASSES))
    out = jax.block_until_ready(fwd(x, params))

    expected_shape = (B, NUM_ANCHORS * (BBOX_DIM + NUM_CLASSES), H, W)
    assert out.shape == expected_shape, (out.shape, expected_shape)
    assert bool(jnp.all(jnp.isfinite(out)))

    ref = _ref_forward(x, params, NUM_ANCHORS, BBOX_DIM, NUM_CLASSES)
    max_err = float(jnp.max(jnp.abs(out - ref)))
    mean_err = float(jnp.mean(jnp.abs(out - ref)))
    # Kernel uses bf16 MXU operands (per perf review) vs a HIGHEST-precision
    # fp32 reference; structural bugs would produce O(1) errors, bf16 rounding
    # stays ~1e-2.  Check both max and mean absolute error.
    assert max_err < 5e-2, f"mismatch vs pure-JAX reference: max abs err {max_err}"
    assert mean_err < 5e-3, f"mismatch vs pure-JAX reference: mean abs err {mean_err}"
    print("KERNEL_OK")
</pallas_src>

<mosaic_0001>
module attributes {stable_mosaic.version = 11 : i64} {
  func.func @_det_fused_kernel(%arg0: i32, %arg1: memref<1x16x512xbf16, #tpu.memory_space<vmem>>, %arg2: memref<48x16xbf16, #tpu.memory_space<vmem>>, %arg3: memref<48x16xf32, #tpu.memory_space<vmem>>, %arg4: memref<9x512xf32, #tpu.memory_space<vmem>>, %arg5: memref<512x8xf32, #tpu.memory_space<vmem>>, %arg6: memref<8x512xf32, #tpu.memory_space<vmem>>, %arg7: memref<40x48xbf16, #tpu.memory_space<vmem>>, %arg8: memref<40x1xf32, #tpu.memory_space<vmem>>, %arg9: memref<1x40x512xf32, #tpu.memory_space<vmem>>) attributes {dimension_semantics = [#tpu.dimension_semantics<parallel>], iteration_bounds = array<i64: 2>, scalar_prefetch = 0 : i64, scratch_operands = 0 : i64, tpu.core_type = #tpu.core_type<tc>, window_params = [{transform_indices = @transform_0, window_bounds = array<i64: 1, 16, 512>}, {pipeline_mode = #tpu.pipeline_mode<synchronous>, transform_indices = @transform_1, window_bounds = array<i64: 48, 16>}, {pipeline_mode = #tpu.pipeline_mode<synchronous>, transform_indices = @transform_2, window_bounds = array<i64: 48, 16>}, {pipeline_mode = #tpu.pipeline_mode<synchronous>, transform_indices = @transform_3, window_bounds = array<i64: 9, 512>}, {pipeline_mode = #tpu.pipeline_mode<synchronous>, transform_indices = @transform_4, window_bounds = array<i64: 512, 8>}, {pipeline_mode = #tpu.pipeline_mode<synchronous>, transform_indices = @transform_5, window_bounds = array<i64: 8, 512>}, {pipeline_mode = #tpu.pipeline_mode<synchronous>, transform_indices = @transform_6, window_bounds = array<i64: 40, 48>}, {pipeline_mode = #tpu.pipeline_mode<synchronous>, transform_indices = @transform_7, window_bounds = array<i64: 40, 1>}, {transform_indices = @transform_8, window_bounds = array<i64: 1, 40, 512>}]} {
    %c0 = arith.constant 0 : index
    %c0_0 = arith.constant 0 : index
    %c0_1 = arith.constant 0 : index
    %0 = vector.load %arg1[%c0, %c0_0, %c0_1] : memref<1x16x512xbf16, #tpu.memory_space<vmem>>, vector<1x16x512xbf16>
    %1 = vector.shape_cast %0 : vector<1x16x512xbf16> to vector<16x512xbf16>
    %c0_2 = arith.constant 0 : index
    %c0_3 = arith.constant 0 : index
    %2 = vector.load %arg3[%c0_2, %c0_3] : memref<48x16xf32, #tpu.memory_space<vmem>>, vector<48x16xf32>
    %3 = vector.extract_strided_slice %2 {offsets = [0, 0], sizes = [48, 9], strides = [1, 1]} : vector<48x16xf32> to vector<48x9xf32>
    %4 = vector.extract_strided_slice %2 {offsets = [0, 9], sizes = [48, 1], strides = [1, 1]} : vector<48x16xf32> to vector<48x1xf32>
    %5 = vector.extract_strided_slice %2 {offsets = [0, 10], sizes = [48, 1], strides = [1, 1]} : vector<48x16xf32> to vector<48x1xf32>
    %6 = vector.extract_strided_slice %2 {offsets = [0, 11], sizes = [48, 1], strides = [1, 1]} : vector<48x16xf32> to vector<48x1xf32>
    %7 = vector.extract_strided_slice %2 {offsets = [0, 12], sizes = [48, 1], strides = [1, 1]} : vector<48x16xf32> to vector<48x1xf32>
    %8 = vector.extract_strided_slice %2 {offsets = [0, 13], sizes = [48, 1], strides = [1, 1]} : vector<48x16xf32> to vector<48x1xf32>
    %9 = vector.extract_strided_slice %2 {offsets = [0, 14], sizes = [48, 1], strides = [1, 1]} : vector<48x16xf32> to vector<48x1xf32>
    %c0_4 = arith.constant 0 : index
    %c0_5 = arith.constant 0 : index
    %10 = vector.load %arg5[%c0_4, %c0_5] : memref<512x8xf32, #tpu.memory_space<vmem>>, vector<512x8xf32>
    %c0_6 = arith.constant 0 : index
    %c0_7 = arith.constant 0 : index
    %11 = vector.load %arg6[%c0_6, %c0_7] : memref<8x512xf32, #tpu.memory_space<vmem>>, vector<8x512xf32>
    %c0_8 = arith.constant 0 : index
    %c0_9 = arith.constant 0 : index
    %12 = vector.load %arg2[%c0_8, %c0_9] : memref<48x16xbf16, #tpu.memory_space<vmem>>, vector<48x16xbf16>
    %cst = arith.constant dense<0.000000e+00> : vector<48x512xf32>
    %13 = tpu.matmul %12, %1, %cst {dimension_numbers = #tpu.dot_dimension_numbers<[1], [0], [0], [1], [0, 0, 1, 1], [], []>} : vector<48x16xbf16>, vector<16x512xbf16>, vector<48x512xf32> -> vector<48x512xf32>
    %14 = vector.broadcast %4 : vector<48x1xf32> to vector<48x512xf32>
    %15 = arith.addf %13, %14 : vector<48x512xf32>
    %cst_10 = arith.constant dense<0.000000e+00> : vector<48x8xf32>
    %16 = tpu.matmul %15, %10, %cst_10 {dimension_numbers = #tpu.dot_dimension_numbers<[1], [0], [0], [1], [0, 0, 1, 1], [], []>} : vector<48x512xf32>, vector<512x8xf32>, vector<48x8xf32> -> vector<48x8xf32>
    %17 = arith.mulf %15, %15 : vector<48x512xf32>
    %cst_11 = arith.constant dense<0.000000e+00> : vector<48x8xf32>
    %18 = tpu.matmul %17, %10, %cst_11 {dimension_numbers = #tpu.dot_dimension_numbers<[1], [0], [0], [1], [0, 0, 1, 1], [], []>} : vector<48x512xf32>, vector<512x8xf32>, vector<48x8xf32> -> vector<48x8xf32>
    %19 = vector.extract_strided_slice %16 {offsets = [0, 0], sizes = [16, 8], strides = [1, 1]} : vector<48x8xf32> to vector<16x8xf32>
    %cst_12 = arith.constant dense<0.000000e+00> : vector<8xf32>
    %20 = vector.multi_reduction <add>, %19, %cst_12 [0] : vector<16x8xf32> to vector<8xf32>
    %21 = vector.shape_cast %20 : vector<8xf32> to vector<1x8xf32>
    %22 = vector.extract_strided_slice %16 {offsets = [16, 0], sizes = [32, 8], strides = [1, 1]} : vector<48x8xf32> to vector<32x8xf32>
    %cst_13 = arith.constant dense<0.000000e+00> : vector<8xf32>
    %23 = vector.multi_reduction <add>, %22, %cst_13 [0] : vector<32x8xf32> to vector<8xf32>
    %24 = vector.shape_cast %23 : vector<8xf32> to vector<1x8xf32>
    %25 = vector.extract_strided_slice %18 {offsets = [0, 0], sizes = [16, 8], strides = [1, 1]} : vector<48x8xf32> to vector<16x8xf32>
    %cst_14 = arith.constant dense<0.000000e+00> : vector<8xf32>
    %26 = vector.multi_reduction <add>, %25, %cst_14 [0] : vector<16x8xf32> to vector<8xf32>
    %27 = vector.shape_cast %26 : vector<8xf32> to vector<1x8xf32>
    %28 = vector.extract_strided_slice %18 {offsets = [16, 0], sizes = [32, 8], strides = [1, 1]} : vector<48x8xf32> to vector<32x8xf32>
    %cst_15 = arith.constant dense<0.000000e+00> : vector<8xf32>
    %29 = vector.multi_reduction <add>, %28, %cst_15 [0] : vector<32x8xf32> to vector<8xf32>
    %30 = vector.shape_cast %29 : vector<8xf32> to vector<1x8xf32>
    %cst_16 = arith.constant 2.44140625E-4 : f32
    %31 = vector.broadcast %cst_16 : f32 to vector<1x8xf32>
    %32 = arith.mulf %21, %31 : vector<1x8xf32>
    %cst_17 = arith.constant 1.22070313E-4 : f32
    %33 = vector.broadcast %cst_17 : f32 to vector<1x8xf32>
    %34 = arith.mulf %24, %33 : vector<1x8xf32>
    %cst_18 = arith.constant 2.44140625E-4 : f32
    %35 = vector.broadcast %cst_18 : f32 to vector<1x8xf32>
    %36 = arith.mulf %27, %35 : vector<1x8xf32>
    %37 = arith.mulf %32, %32 : vector<1x8xf32>
    %38 = arith.subf %36, %37 : vector<1x8xf32>
    %cst_19 = arith.constant 0.000000e+00 : f32
    %39 = vector.broadcast %cst_19 : f32 to vector<1x8xf32>
    %40 = arith.maximumf %38, %39 : vector<1x8xf32>
    %cst_20 = arith.constant 1.22070313E-4 : f32
    %41 = vector.broadcast %cst_20 : f32 to vector<1x8xf32>
    %42 = arith.mulf %30, %41 : vector<1x8xf32>
    %43 = arith.mulf %34, %34 : vector<1x8xf32>
    %44 = arith.subf %42, %43 : vector<1x8xf32>
    %cst_21 = arith.constant 0.000000e+00 : f32
    %45 = vector.broadcast %cst_21 : f32 to vector<1x8xf32>
    %46 = arith.maximumf %44, %45 : vector<1x8xf32>
    %cst_22 = arith.constant 9.99999974E-6 : f32
    %47 = vector.broadcast %cst_22 : f32 to vector<1x8xf32>
    %48 = arith.addf %40, %47 : vector<1x8xf32>
    %49 = math.rsqrt %48 : vector<1x8xf32>
    %cst_23 = arith.constant 9.99999974E-6 : f32
    %50 = vector.broadcast %cst_23 : f32 to vector<1x8xf32>
    %51 = arith.addf %46, %50 : vector<1x8xf32>
    %52 = math.rsqrt %51 : vector<1x8xf32>
    %53 = tpu.iota {dimensions = array<i32: 0>} : vector<48x1xi32>
    %c16_i32 = arith.constant 16 : i32
    %54 = vector.broadcast %c16_i32 : i32 to vector<48x1xi32>
    %55 = arith.cmpi slt, %53, %54 : vector<48x1xi32>
    %56 = vector.shape_cast %55 : vector<48x1xi1> to vector<48x1xi1>
    %57 = vector.broadcast %56 : vector<48x1xi1> to vector<48x8xi1>
    %58 = vector.shape_cast %49 : vector<1x8xf32> to vector<1x8xf32>
    %59 = vector.broadcast %58 : vector<1x8xf32> to vector<48x8xf32>
    %60 = vector.shape_cast %52 : vector<1x8xf32> to vector<1x8xf32>
    %61 = vector.broadcast %60 : vector<1x8xf32> to vector<48x8xf32>
    %62 = arith.select %57, %59, %61 : vector<48x8xi1>, vector<48x8xf32>
    %63 = vector.shape_cast %55 : vector<48x1xi1> to vector<48x1xi1>
    %64 = vector.broadcast %63 : vector<48x1xi1> to vector<48x8xi1>
    %65 = vector.shape_cast %32 : vector<1x8xf32> to vector<1x8xf32>
    %66 = vector.broadcast %65 : vector<1x8xf32> to vector<48x8xf32>
    %67 = vector.shape_cast %34 : vector<1x8xf32> to vector<1x8xf32>
    %68 = vector.broadcast %67 : vector<1x8xf32> to vector<48x8xf32>
    %69 = arith.select %64, %66, %68 : vector<48x8xi1>, vector<48x8xf32>
    %70 = vector.broadcast %5 : vector<48x1xf32> to vector<48x8xf32>
    %71 = arith.mulf %62, %70 : vector<48x8xf32>
    %72 = arith.mulf %69, %71 : vector<48x8xf32>
    %73 = vector.broadcast %6 : vector<48x1xf32> to vector<48x8xf32>
    %74 = arith.subf %73, %72 : vector<48x8xf32>
    %cst_24 = arith.constant dense<0.000000e+00> : vector<48x512xf32>
    %75 = tpu.matmul %71, %11, %cst_24 {dimension_numbers = #tpu.dot_dimension_numbers<[1], [0], [0], [1], [0, 0, 1, 1], [], []>} : vector<48x8xf32>, vector<8x512xf32>, vector<48x512xf32> -> vector<48x512xf32>
    %cst_25 = arith.constant dense<0.000000e+00> : vector<48x512xf32>
    %76 = tpu.matmul %74, %11, %cst_25 {dimension_numbers = #tpu.dot_dimension_numbers<[1], [0], [0], [1], [0, 0, 1, 1], [], []>} : vector<48x8xf32>, vector<8x512xf32>, vector<48x512xf32> -> vector<48x512xf32>
    %77 = arith.mulf %15, %75 : vector<48x512xf32>
    %78 = arith.addf %77, %76 : vector<48x512xf32>
    %cst_26 = arith.constant 3.000000e+00 : f32
    %79 = vector.broadcast %cst_26 : f32 to vector<48x512xf32>
    %80 = arith.addf %78, %79 : vector<48x512xf32>
    %cst_27 = arith.constant 0.000000e+00 : f32
    %cst_28 = arith.constant 6.000000e+00 : f32
    %81 = vector.broadcast %cst_27 : f32 to vector<48x512xf32>
    %82 = arith.maximumf %81, %80 : vector<48x512xf32>
    %83 = vector.broadcast %cst_28 : f32 to vector<48x512xf32>
    %84 = arith.minimumf %83, %82 : vector<48x512xf32>
    %85 = arith.mulf %78, %84 : vector<48x512xf32>
    %86 = vector.extract_strided_slice %3 {offsets = [0, 4], sizes = [48, 1], strides = [1, 1]} : vector<48x9xf32> to vector<48x1xf32>
    %87 = vector.broadcast %86 : vector<48x1xf32> to vector<48x512xf32>
    %88 = arith.mulf %85, %87 : vector<48x512xf32>
    %c17_i32 = arith.constant 17 : i32
    %89 = tpu.dynamic_rotate %85 by %c17_i32 dim 1 : vector<48x512xf32>, i32 -> vector<48x512xf32>
    %c0_29 = arith.constant 0 : index
    %c0_30 = arith.constant 0 : index
    %90 = vector.load %arg4[%c0_29, %c0_30] : memref<9x512xf32, #tpu.memory_space<vmem>>, vector<1x512xf32>
    %91 = vector.broadcast %90 : vector<1x512xf32> to vector<48x512xf32>
    %92 = arith.mulf %89, %91 : vector<48x512xf32>
    %93 = vector.extract_strided_slice %3 {offsets = [0, 0], sizes = [48, 1], strides = [1, 1]} : vector<48x9xf32> to vector<48x1xf32>
    %94 = vector.broadcast %93 : vector<48x1xf32> to vector<48x512xf32>
    %95 = arith.mulf %92, %94 : vector<48x512xf32>
    %96 = arith.addf %88, %95 : vector<48x512xf32>
    %c16_i32_31 = arith.constant 16 : i32
    %97 = tpu.dynamic_rotate %85 by %c16_i32_31 dim 1 : vector<48x512xf32>, i32 -> vector<48x512xf32>
    %c1 = arith.constant 1 : index
    %c0_32 = arith.constant 0 : index
    %98 = vector.load %arg4[%c1, %c0_32] : memref<9x512xf32, #tpu.memory_space<vmem>>, vector<1x512xf32>
    %99 = vector.broadcast %98 : vector<1x512xf32> to vector<48x512xf32>
    %100 = arith.mulf %97, %99 : vector<48x512xf32>
    %101 = vector.extract_strided_slice %3 {offsets = [0, 1], sizes = [48, 1], strides = [1, 1]} : vector<48x9xf32> to vector<48x1xf32>
    %102 = vector.broadcast %101 : vector<48x1xf32> to vector<48x512xf32>
    %103 = arith.mulf %100, %102 : vector<48x512xf32>
    %104 = arith.addf %96, %103 : vector<48x512xf32>
    %c15_i32 = arith.constant 15 : i32
    %105 = tpu.dynamic_rotate %85 by %c15_i32 dim 1 : vector<48x512xf32>, i32 -> vector<48x512xf32>
    %c2 = arith.constant 2 : index
    %c0_33 = arith.constant 0 : index
    %106 = vector.load %arg4[%c2, %c0_33] : memref<9x512xf32, #tpu.memory_space<vmem>>, vector<1x512xf32>
    %107 = vector.broadcast %106 : vector<1x512xf32> to vector<48x512xf32>
    %108 = arith.mulf %105, %107 : vector<48x512xf32>
    %109 = vector.extract_strided_slice %3 {offsets = [0, 2], sizes = [48, 1], strides = [1, 1]} : vector<48x9xf32> to vector<48x1xf32>
    %110 = vector.broadcast %109 : vector<48x1xf32> to vector<48x512xf32>
    %111 = arith.mulf %108, %110 : vector<48x512xf32>
    %112 = arith.addf %104, %111 : vector<48x512xf32>
    %c1_i32 = arith.constant 1 : i32
    %113 = tpu.dynamic_rotate %85 by %c1_i32 dim 1 : vector<48x512xf32>, i32 -> vector<48x512xf32>
    %c3 = arith.constant 3 : index
    %c0_34 = arith.constant 0 : index
    %114 = vector.load %arg4[%c3, %c0_34] : memref<9x512xf32, #tpu.memory_space<vmem>>, vector<1x512xf32>
    %115 = vector.broadcast %114 : vector<1x512xf32> to vector<48x512xf32>
    %116 = arith.mulf %113, %115 : vector<48x512xf32>
    %117 = vector.extract_strided_slice %3 {offsets = [0, 3], sizes = [48, 1], strides = [1, 1]} : vector<48x9xf32> to vector<48x1xf32>
    %118 = vector.broadcast %117 : vector<48x1xf32> to vector<48x512xf32>
    %119 = arith.mulf %116, %118 : vector<48x512xf32>
    %120 = arith.addf %112, %119 : vector<48x512xf32>
    %c511_i32 = arith.constant 511 : i32
    %121 = tpu.dynamic_rotate %85 by %c511_i32 dim 1 : vector<48x512xf32>, i32 -> vector<48x512xf32>
    %c5 = arith.constant 5 : index
    %c0_35 = arith.constant 0 : index
    %122 = vector.load %arg4[%c5, %c0_35] : memref<9x512xf32, #tpu.memory_space<vmem>>, vector<1x512xf32>
    %123 = vector.broadcast %122 : vector<1x512xf32> to vector<48x512xf32>
    %124 = arith.mulf %121, %123 : vector<48x512xf32>
    %125 = vector.extract_strided_slice %3 {offsets = [0, 5], sizes = [48, 1], strides = [1, 1]} : vector<48x9xf32> to vector<48x1xf32>
    %126 = vector.broadcast %125 : vector<48x1xf32> to vector<48x512xf32>
    %127 = arith.mulf %124, %126 : vector<48x512xf32>
    %128 = arith.addf %120, %127 : vector<48x512xf32>
    %c497_i32 = arith.constant 497 : i32
    %129 = tpu.dynamic_rotate %85 by %c497_i32 dim 1 : vector<48x512xf32>, i32 -> vector<48x512xf32>
    %c6 = arith.constant 6 : index
    %c0_36 = arith.constant 0 : index
    %130 = vector.load %arg4[%c6, %c0_36] : memref<9x512xf32, #tpu.memory_space<vmem>>, vector<1x512xf32>
    %131 = vector.broadcast %130 : vector<1x512xf32> to vector<48x512xf32>
    %132 = arith.mulf %129, %131 : vector<48x512xf32>
    %133 = vector.extract_strided_slice %3 {offsets = [0, 6], sizes = [48, 1], strides = [1, 1]} : vector<48x9xf32> to vector<48x1xf32>
    %134 = vector.broadcast %133 : vector<48x1xf32> to vector<48x512xf32>
    %135 = arith.mulf %132, %134 : vector<48x512xf32>
    %136 = arith.addf %128, %135 : vector<48x512xf32>
    %c496_i32 = arith.constant 496 : i32
    %137 = tpu.dynamic_rotate %85 by %c496_i32 dim 1 : vector<48x512xf32>, i32 -> vector<48x512xf32>
    %c7 = arith.constant 7 : index
    %c0_37 = arith.constant 0 : index
    %138 = vector.load %arg4[%c7, %c0_37] : memref<9x512xf32, #tpu.memory_space<vmem>>, vector<1x512xf32>
    %139 = vector.broadcast %138 : vector<1x512xf32> to vector<48x512xf32>
    %140 = arith.mulf %137, %139 : vector<48x512xf32>
    %141 = vector.extract_strided_slice %3 {offsets = [0, 7], sizes = [48, 1], strides = [1, 1]} : vector<48x9xf32> to vector<48x1xf32>
    %142 = vector.broadcast %141 : vector<48x1xf32> to vector<48x512xf32>
    %143 = arith.mulf %140, %142 : vector<48x512xf32>
    %144 = arith.addf %136, %143 : vector<48x512xf32>
    %c495_i32 = arith.constant 495 : i32
    %145 = tpu.dynamic_rotate %85 by %c495_i32 dim 1 : vector<48x512xf32>, i32 -> vector<48x512xf32>
    %c8 = arith.constant 8 : index
    %c0_38 = arith.constant 0 : index
    %146 = vector.load %arg4[%c8, %c0_38] : memref<9x512xf32, #tpu.memory_space<vmem>>, vector<1x512xf32>
    %147 = vector.broadcast %146 : vector<1x512xf32> to vector<48x512xf32>
    %148 = arith.mulf %145, %147 : vector<48x512xf32>
    %149 = vector.extract_strided_slice %3 {offsets = [0, 8], sizes = [48, 1], strides = [1, 1]} : vector<48x9xf32> to vector<48x1xf32>
    %150 = vector.broadcast %149 : vector<48x1xf32> to vector<48x512xf32>
    %151 = arith.mulf %148, %150 : vector<48x512xf32>
    %152 = arith.addf %144, %151 : vector<48x512xf32>
    %153 = vector.broadcast %7 : vector<48x1xf32> to vector<48x512xf32>
    %154 = arith.addf %152, %153 : vector<48x512xf32>
    %cst_39 = arith.constant dense<0.000000e+00> : vector<48x8xf32>
    %155 = tpu.matmul %154, %10, %cst_39 {dimension_numbers = #tpu.dot_dimension_numbers<[1], [0], [0], [1], [0, 0, 1, 1], [], []>} : vector<48x512xf32>, vector<512x8xf32>, vector<48x8xf32> -> vector<48x8xf32>
    %156 = arith.mulf %154, %154 : vector<48x512xf32>
    %cst_40 = arith.constant dense<0.000000e+00> : vector<48x8xf32>
    %157 = tpu.matmul %156, %10, %cst_40 {dimension_numbers = #tpu.dot_dimension_numbers<[1], [0], [0], [1], [0, 0, 1, 1], [], []>} : vector<48x512xf32>, vector<512x8xf32>, vector<48x8xf32> -> vector<48x8xf32>
    %158 = vector.extract_strided_slice %155 {offsets = [0, 0], sizes = [16, 8], strides = [1, 1]} : vector<48x8xf32> to vector<16x8xf32>
    %cst_41 = arith.constant dense<0.000000e+00> : vector<8xf32>
    %159 = vector.multi_reduction <add>, %158, %cst_41 [0] : vector<16x8xf32> to vector<8xf32>
    %160 = vector.shape_cast %159 : vector<8xf32> to vector<1x8xf32>
    %161 = vector.extract_strided_slice %155 {offsets = [16, 0], sizes = [32, 8], strides = [1, 1]} : vector<48x8xf32> to vector<32x8xf32>
    %cst_42 = arith.constant dense<0.000000e+00> : vector<8xf32>
    %162 = vector.multi_reduction <add>, %161, %cst_42 [0] : vector<32x8xf32> to vector<8xf32>
    %163 = vector.shape_cast %162 : vector<8xf32> to vector<1x8xf32>
    %164 = vector.extract_strided_slice %157 {offsets = [0, 0], sizes = [16, 8], strides = [1, 1]} : vector<48x8xf32> to vector<16x8xf32>
    %cst_43 = arith.constant dense<0.000000e+00> : vector<8xf32>
    %165 = vector.multi_reduction <add>, %164, %cst_43 [0] : vector<16x8xf32> to vector<8xf32>
    %166 = vector.shape_cast %165 : vector<8xf32> to vector<1x8xf32>
    %167 = vector.extract_strided_slice %157 {offsets = [16, 0], sizes = [32, 8], strides = [1, 1]} : vector<48x8xf32> to vector<32x8xf32>
    %cst_44 = arith.constant dense<0.000000e+00> : vector<8xf32>
    %168 = vector.multi_reduction <add>, %167, %cst_44 [0] : vector<32x8xf32> to vector<8xf32>
    %169 = vector.shape_cast %168 : vector<8xf32> to vector<1x8xf32>
    %cst_45 = arith.constant 2.44140625E-4 : f32
    %170 = vector.broadcast %cst_45 : f32 to vector<1x8xf32>
    %171 = arith.mulf %160, %170 : vector<1x8xf32>
    %cst_46 = arith.constant 1.22070313E-4 : f32
    %172 = vector.broadcast %cst_46 : f32 to vector<1x8xf32>
    %173 = arith.mulf %163, %172 : vector<1x8xf32>
    %cst_47 = arith.constant 2.44140625E-4 : f32
    %174 = vector.broadcast %cst_47 : f32 to vector<1x8xf32>
    %175 = arith.mulf %166, %174 : vector<1x8xf32>
    %176 = arith.mulf %171, %171 : vector<1x8xf32>
    %177 = arith.subf %175, %176 : vector<1x8xf32>
    %cst_48 = arith.constant 0.000000e+00 : f32
    %178 = vector.broadcast %cst_48 : f32 to vector<1x8xf32>
    %179 = arith.maximumf %177, %178 : vector<1x8xf32>
    %cst_49 = arith.constant 1.22070313E-4 : f32
    %180 = vector.broadcast %cst_49 : f32 to vector<1x8xf32>
    %181 = arith.mulf %169, %180 : vector<1x8xf32>
    %182 = arith.mulf %173, %173 : vector<1x8xf32>
    %183 = arith.subf %181, %182 : vector<1x8xf32>
    %cst_50 = arith.constant 0.000000e+00 : f32
    %184 = vector.broadcast %cst_50 : f32 to vector<1x8xf32>
    %185 = arith.maximumf %183, %184 : vector<1x8xf32>
    %cst_51 = arith.constant 9.99999974E-6 : f32
    %186 = vector.broadcast %cst_51 : f32 to vector<1x8xf32>
    %187 = arith.addf %179, %186 : vector<1x8xf32>
    %188 = math.rsqrt %187 : vector<1x8xf32>
    %cst_52 = arith.constant 9.99999974E-6 : f32
    %189 = vector.broadcast %cst_52 : f32 to vector<1x8xf32>
    %190 = arith.addf %185, %189 : vector<1x8xf32>
    %191 = math.rsqrt %190 : vector<1x8xf32>
    %192 = tpu.iota {dimensions = array<i32: 0>} : vector<48x1xi32>
    %c16_i32_53 = arith.constant 16 : i32
    %193 = vector.broadcast %c16_i32_53 : i32 to vector<48x1xi32>
    %194 = arith.cmpi slt, %192, %193 : vector<48x1xi32>
    %195 = vector.shape_cast %194 : vector<48x1xi1> to vector<48x1xi1>
    %196 = vector.broadcast %195 : vector<48x1xi1> to vector<48x8xi1>
    %197 = vector.shape_cast %188 : vector<1x8xf32> to vector<1x8xf32>
    %198 = vector.broadcast %197 : vector<1x8xf32> to vector<48x8xf32>
    %199 = vector.shape_cast %191 : vector<1x8xf32> to vector<1x8xf32>
    %200 = vector.broadcast %199 : vector<1x8xf32> to vector<48x8xf32>
    %201 = arith.select %196, %198, %200 : vector<48x8xi1>, vector<48x8xf32>
    %202 = vector.shape_cast %194 : vector<48x1xi1> to vector<48x1xi1>
    %203 = vector.broadcast %202 : vector<48x1xi1> to vector<48x8xi1>
    %204 = vector.shape_cast %171 : vector<1x8xf32> to vector<1x8xf32>
    %205 = vector.broadcast %204 : vector<1x8xf32> to vector<48x8xf32>
    %206 = vector.shape_cast %173 : vector<1x8xf32> to vector<1x8xf32>
    %207 = vector.broadcast %206 : vector<1x8xf32> to vector<48x8xf32>
    %208 = arith.select %203, %205, %207 : vector<48x8xi1>, vector<48x8xf32>
    %209 = vector.broadcast %8 : vector<48x1xf32> to vector<48x8xf32>
    %210 = arith.mulf %201, %209 : vector<48x8xf32>
    %211 = arith.mulf %208, %210 : vector<48x8xf32>
    %212 = vector.broadcast %9 : vector<48x1xf32> to vector<48x8xf32>
    %213 = arith.subf %212, %211 : vector<48x8xf32>
    %cst_54 = arith.constant dense<0.000000e+00> : vector<48x512xf32>
    %214 = tpu.matmul %210, %11, %cst_54 {dimension_numbers = #tpu.dot_dimension_numbers<[1], [0], [0], [1], [0, 0, 1, 1], [], []>} : vector<48x8xf32>, vector<8x512xf32>, vector<48x512xf32> -> vector<48x512xf32>
    %cst_55 = arith.constant dense<0.000000e+00> : vector<48x512xf32>
    %215 = tpu.matmul %213, %11, %cst_55 {dimension_numbers = #tpu.dot_dimension_numbers<[1], [0], [0], [1], [0, 0, 1, 1], [], []>} : vector<48x8xf32>, vector<8x512xf32>, vector<48x512xf32> -> vector<48x512xf32>
    %216 = arith.mulf %154, %214 : vector<48x512xf32>
    %217 = arith.addf %216, %215 : vector<48x512xf32>
    %cst_56 = arith.constant 3.000000e+00 : f32
    %218 = vector.broadcast %cst_56 : f32 to vector<48x512xf32>
    %219 = arith.addf %217, %218 : vector<48x512xf32>
    %cst_57 = arith.constant 0.000000e+00 : f32
    %cst_58 = arith.constant 6.000000e+00 : f32
    %220 = vector.broadcast %cst_57 : f32 to vector<48x512xf32>
    %221 = arith.maximumf %220, %219 : vector<48x512xf32>
    %222 = vector.broadcast %cst_58 : f32 to vector<48x512xf32>
    %223 = arith.minimumf %222, %221 : vector<48x512xf32>
    %224 = arith.mulf %217, %223 : vector<48x512xf32>
    %c0_59 = arith.constant 0 : index
    %c0_60 = arith.constant 0 : index
    %225 = vector.load %arg7[%c0_59, %c0_60] : memref<40x48xbf16, #tpu.memory_space<vmem>>, vector<40x48xbf16>
    %226 = arith.truncf %224 : vector<48x512xf32> to vector<48x512xbf16>
    %cst_61 = arith.constant dense<0.000000e+00> : vector<40x512xf32>
    %227 = tpu.matmul %225, %226, %cst_61 {dimension_numbers = #tpu.dot_dimension_numbers<[1], [0], [0], [1], [0, 0, 1, 1], [], []>} : vector<40x48xbf16>, vector<48x512xbf16>, vector<40x512xf32> -> vector<40x512xf32>
    %c0_62 = arith.constant 0 : index
    %c0_63 = arith.constant 0 : index
    %228 = vector.load %arg8[%c0_62, %c0_63] : memref<40x1xf32, #tpu.memory_space<vmem>>, vector<40x1xf32>
    %229 = vector.broadcast %228 : vector<40x1xf32> to vector<40x512xf32>
    %230 = arith.addf %227, %229 : vector<40x512xf32>
    %c0_64 = arith.constant 0 : index
    %c0_65 = arith.constant 0 : index
    %c0_66 = arith.constant 0 : index
    %231 = vector.load %arg9[%c0_64, %c0_65, %c0_66] : memref<1x40x512xf32, #tpu.memory_space<vmem>>, vector<1x40x512xf32>
    %232 = vector.shape_cast %231 : vector<1x40x512xf32> to vector<40x512xf32>
    %233 = vector.shape_cast %230 : vector<40x512xf32> to vector<1x40x512xf32>
    tpu.vector_store %arg9[%c0_64, %c0_65, %c0_66], %233 {strides = array<i32>} : memref<1x40x512xf32, #tpu.memory_space<vmem>>, vector<1x40x512xf32>,
    return
  }
  func.func @transform_0(%arg0: i32) -> (i32, i32, i32) {
    %c0_i32 = arith.constant 0 : i32
    %c0_i32_0 = arith.constant 0 : i32
    %c0_i32_1 = arith.constant 0 : i32
    return %arg0, %c0_i32, %c0_i32_0 : i32, i32, i32
  }
  func.func @transform_1(%arg0: i32) -> (i32, i32) {
    %c0_i32 = arith.constant 0 : i32
    %c0_i32_0 = arith.constant 0 : i32
    %c0_i32_1 = arith.constant 0 : i32
    return %c0_i32, %c0_i32_0 : i32, i32
  }
  func.func @transform_2(%arg0: i32) -> (i32, i32) {
    %c0_i32 = arith.constant 0 : i32
    %c0_i32_0 = arith.constant 0 : i32
    %c0_i32_1 = arith.constant 0 : i32
    return %c0_i32, %c0_i32_0 : i32, i32
  }
  func.func @transform_3(%arg0: i32) -> (i32, i32) {
    %c0_i32 = arith.constant 0 : i32
    %c0_i32_0 = arith.constant 0 : i32
    %c0_i32_1 = arith.constant 0 : i32
    return %c0_i32, %c0_i32_0 : i32, i32
  }
  func.func @transform_4(%arg0: i32) -> (i32, i32) {
    %c0_i32 = arith.constant 0 : i32
    %c0_i32_0 = arith.constant 0 : i32
    %c0_i32_1 = arith.constant 0 : i32
    return %c0_i32, %c0_i32_0 : i32, i32
  }
  func.func @transform_5(%arg0: i32) -> (i32, i32) {
    %c0_i32 = arith.constant 0 : i32
    %c0_i32_0 = arith.constant 0 : i32
    %c0_i32_1 = arith.constant 0 : i32
    return %c0_i32, %c0_i32_0 : i32, i32
  }
  func.func @transform_6(%arg0: i32) -> (i32, i32) {
    %c0_i32 = arith.constant 0 : i32
    %c0_i32_0 = arith.constant 0 : i32
    %c0_i32_1 = arith.constant 0 : i32
    return %c0_i32, %c0_i32_0 : i32, i32
  }
  func.func @transform_7(%arg0: i32) -> (i32, i32) {
    %c0_i32 = arith.constant 0 : i32
    %c0_i32_0 = arith.constant 0 : i32
    %c0_i32_1 = arith.constant 0 : i32
    return %c0_i32, %c0_i32_0 : i32, i32
  }
  func.func @transform_8(%arg0: i32) -> (i32, i32, i32) {
    %c0_i32 = arith.constant 0 : i32
    %c0_i32_0 = arith.constant 0 : i32
    %c0_i32_1 = arith.constant 0 : i32
    return %arg0, %c0_i32, %c0_i32_0 : i32, i32, i32
  }
}

</mosaic_0001>

<bundles_post_ra>
// kernel: det_predictor_forward.1
= control target key start
LH: loop header
LB: loop body
LE: loop exit
PB: predicated region body
PF: predicated region fallthrough
CT: control target
= control target key end

     0   :  { %s4641_s27 = smov 0   ;;  %s8957_s0 = inlined_call_operand.vmem [shape: bf16[2,16,512], index: 0, kind: input, shape index: {}]   ;;  %s8958_s1 = inlined_call_operand.vmem [shape: bf16[48,16], index: 1, kind: input, shape index: {}]   ;;  %s8959_s2 = inlined_call_operand.vmem [shape: f32[48,16], index: 2, kind: input, shape index: {}]   ;;  %s8960_s3 = inlined_call_operand.vmem [shape: f32[9,512], index: 3, kind: input, shape index: {}]   ;;  %s8961_s4 = inlined_call_operand.vmem [shape: f32[512,8], index: 4, kind: input, shape index: {}]   ;;  %s8962_s5 = inlined_call_operand.vmem [shape: f32[8,512], index: 5, kind: input, shape index: {}]   ;;  %s8963_s6 = inlined_call_operand.vmem [shape: bf16[40,48], index: 6, kind: input, shape index: {}]   ;;  %s8964_s7 = inlined_call_operand.vmem [shape: f32[40,1], index: 7, kind: input, shape index: {}]   ;;  %s8965_s8 = inlined_call_operand.vmem [shape: f32[2,40,512], index: 8, kind: output, shape index: {}]  }
   0x1 LB: > { %s4198_s28 = sadd.s32 4294967295, %s4571_s27   ;;  %p4202_p0 = scmp.ge.s32.totalorder %s4571_s27, 1  ;;  %s4571_s27 = sphi %s4641_s27, %s18_s27  }
   0x2   : > { %p262_p1 = scmp.lt.s32.totalorder %s4571_s27, 3 }
   0x4   : > { %p263_p2 = pnand %p4202_p0, %p262_p1 }
   0x6   : > { %266 = sbr.rel (%p263_p2) target bundleno = 1934 (0x78e), region = 52 }
   0xb   : > { %p296_p3 = scmp.lt.s32.totalorder %s4198_s28, 1  ;;  %v4652_v0 = vld [vmem:[%s8959_s2] sm:$0xff]  ;;  %v4573_v1 = vmov 9   ;;  %v4657_v2 = vld [vmem:[%s8959_s2 + $0x10] sm:$0xff]  ;;  %v4673_v15 = vld [vmem:[%s8959_s2 + $0x8] sm:$0xff]  ;;  %vm456_vm0 = vcmask 130048  }
   0xc   : > { %4413 = vset.pattern.permute.xlu0 %v4573_v1  ;;  %4414 = vset.pattern.permute.xlu1 %v4573_v1  ;;  %9321 = vst [vmem:[#allocation2_spill] sm:$0xff] %v4657_v2  ;;  %v4376_v6 = vld [vmem:[%s8958_s1] sm:$0xff]  ;;  %v4683_v17 = vld [vmem:[%s8959_s2 + $0x18] sm:$0xff]  ;;  %v4705_v21 = vld [vmem:[%s8961_s4 + $0x70] sm:$0xff]  ;;  %vm866_vm1 = vcmask 64512   ;;  %s4586_s25 = smov 15  }
   0xd   : > { %s10053_s28 = smov (!%p296_p3, %s4198_s28), 1  ;;  %393 = vperm.xlu0 %4413, %v4652_v0   ;;  %403 = vperm.xlu1 %4414, %v4657_v2   ;;  %9322 = vst [vmem:[#allocation3_spill] sm:$0xff] %v4683_v17  ;;  %v4688_v18 = vld [vmem:[%s8959_s2 + $0x20] sm:$0xff]  ;;  %v4695_v19 = vld [vmem:[%s8961_s4 + $0x78] sm:$0xff]  ;;  %v4712_v22 = vld [vmem:[%s8961_s4 + $0xf0] sm:$0xff]  ;;  %s4587_s26 = smov 16  }
   0xe   : > { %4415 = vset.pattern.permute.xlu2 %v4573_v1  ;;  %s4371_s11 = sshll.u32 %s10053_s28, 5  ;;  %9323 = vst [vmem:[#allocation4_spill] sm:$0xff] %v4688_v18  ;;  %v4700_v20 = vld [vmem:[%s8961_s4 + $0xf8] sm:$0xff]  ;;  %v4717_v23 = vld [vmem:[%s8961_s4 + $0x68] sm:$0xff]  ;;  %v4734_v26 = vld [vmem:[%s8961_s4 + $0x60] sm:$0xff]  ;;  %s4588_s29 = smov 17  }
   0xf   : > { %s300_s14 = scalar_lea.vmem %s8957_s0, %s4371_s11  ;;  %413 = vperm.xlu2 %4415, %v4688_v18   ;;  %v4722_v24 = vld [vmem:[%s8961_s4 + $0xe8] sm:$0xff]  ;;  %v4727_v25 = vld [vmem:[%s8961_s4 + $0x178] sm:$0xff]  ;;  %v4744_v28 = vld [vmem:[%s8961_s4 + $0xe0] sm:$0xff]  ;;  %s4589_s30 = smov 127  }
  0x10   : > { %v4220_v3 = vld [vmem:[%s300_s14] sm:$0xf]  ;;  %v4374_v4 = vld [vmem:[%s300_s14 + $0xc] sm:$0xf0]  ;;  %v4372_v5 = vld [vmem:[%s300_s14 + $0x4] sm:$0xf] }
  0x11   : > { %v4221_v7 = vor.u32 %v4374_v4, %v4220_v3  ;;  %v4222_v8 = vld [vmem:[%s300_s14 + $0x10] sm:$0xf0]  ;;  %v4228_v9 = vld [vmem:[%s300_s14 + $0x8] sm:$0xf]  ;;  %v4375_v10 = vld [vmem:[%s300_s14 + $0x14] sm:$0xf0] }
  0x12   : > { %v4225_v11 = vor.u32 %v4372_v5, %v4222_v8  ;;  %v4229_v12 = vor.u32 %v4375_v10, %v4228_v9  ;;  %v4373_v13 = vld [vmem:[%s300_s14 + $0xc] sm:$0xf]  ;;  %v4230_v14 = vld [vmem:[%s300_s14 + $0x18] sm:$0xf0]  ;;  %v4751_v29 = vld [vmem:[%s8961_s4 + $0x170] sm:$0xff]  ;;  %s4590_s9 = smov 1  }
  0x13   : > { %473 = vmatpush.bf16.msra.mxu0 %v4221_v7  ;;  %v4233_v16 = vor.u32 %v4373_v13, %v4230_v14  ;;  %v4739_v27 = vld [vmem:[%s8961_s4 + $0x1f8] sm:$0xff]  ;;  %v4756_v30 = vld [vmem:[%s8961_s4 + $0x1f0] sm:$0xff]  ;;  %v4761_v31 = vld [vmem:[%s8959_s2 + $0x28] sm:$0xff]  ;;  %s4591_s10 = smov 113   ;;  %s4592_s11 = smov 111  }
  0x14   : > { %497 = vmatpush.bf16.msra.mxu1 %v4225_v11  ;;  %521 = vmatpush.bf16.msra.mxu2 %v4229_v12  ;;  %9324 = vst [vmem:[#allocation5_spill] sm:$0xff] %v4761_v31  ;;  %v4768_v32 = vld [vmem:[%s8961_s4 + $0x168] sm:$0xff]  ;;  %v4773_v33 = vld [vmem:[%s8961_s4 + $0x58] sm:$0xff]  ;;  %v4792_v36 = vld [vmem:[%s8961_s4 + $0x160] sm:$0xff]  ;;  %s4593_s12 = smov 112   ;;  %s4381_s22 = smul.u32 160, %s10053_s28 }
  0x15   : > { %545 = vmatpush.bf16.msra.mxu3 %v4233_v16  ;;  %398 = vperm.xlu0 %4413, %v4673_v15   ;;  %v4778_v34 = vld [vmem:[%s8961_s4 + $0xd8] sm:$0xff]  ;;  %v4787_v35 = vld [vmem:[%s8961_s4 + $0x1e8] sm:$0xff]  ;;  %v4798_v37 = vld [vmem:[%s8961_s4 + $0x50] sm:$0xff] }
  0x16   : > { %4234 = vmatmul.msk.bf16.vlgmr.msra.gmra.mxu0 %vm456_vm0, %v4376_v6  ;;  %408 = vperm.xlu1 %4414, %v4683_v17   ;;  %v4803_v38 = vld [vmem:[%s8961_s4 + $0xd0] sm:$0xff]  ;;  %v4377_v39 = vld [vmem:[%s8958_s1 + $0x8] sm:$0xff]  ;;  %v4814_v40 = vld [vmem:[%s8961_s4 + $0x1e0] sm:$0xff]  ;;  %s8932_s24 = scalar_lea.vmem %s8965_s8, %s4381_s22 }
  0x17   : > { %4237 = vmatmul.msk.bf16.vlgmr.msra.gmra.mxu1 %vm456_vm0, %v4376_v6  ;;  %4240 = vmatmul.msk.bf16.vlgmr.msra.gmra.mxu2 %vm456_vm0, %v4376_v6  ;;  %v4819_v41 = vld [vmem:[%s8961_s4 + $0x158] sm:$0xff]  ;;  %v4825_v42 = vld [vmem:[%s8961_s4 + $0xc8] sm:$0xff]  ;;  %v4842_v44 = vld [vmem:[%s8961_s4 + $0xc0] sm:$0xff] }
  0x18   : > { %4243 = vmatmul.msk.bf16.vlgmr.msra.gmra.mxu3 %vm456_vm0, %v4376_v6  ;;  %562 = vmatpush.msrb.mxu0 %v4695_v19  ;;  %v4833_v43 = vld [vmem:[%s8961_s4 + $0x48] sm:$0xff]  ;;  %v4847_v45 = vld [vmem:[%s8961_s4 + $0x1d8] sm:$0xff]  ;;  %v4854_v46 = vld [vmem:[%s8961_s4 + $0x40] sm:$0xff] }
  0x19   : > { %597 = vmatpush.msrb.mxu1 %v4700_v20  ;;  %632 = vmatpush.msrb.mxu2 %v4727_v25  ;;  %v4859_v47 = vld [vmem:[%s8961_s4 + $0x150] sm:$0xff]  ;;  %v4866_v48 = vld [vmem:[%s8961_s4 + $0xb8] sm:$0xff]  ;;  %v4883_v51 = vld [vmem:[%s8961_s4 + $0x148] sm:$0xff] }
  0x1a   : > { %563 = vmatpush.msrb.mxu0 %v4705_v21  ;;  %667 = vmatpush.msrb.mxu3 %v4739_v27  ;;  %v4871_v49 = vld [vmem:[%s8961_s4 + $0x1d0] sm:$0xff]  ;;  %v4878_v50 = vld [vmem:[%s8961_s4 + $0x38] sm:$0xff]  ;;  %v4895_v53 = vld [vmem:[%s8961_s4 + $0x1c8] sm:$0xff] }
  0x1b   : > { %598 = vmatpush.msrb.mxu1 %v4712_v22  ;;  %633 = vmatpush.msrb.mxu2 %v4751_v29  ;;  %v4890_v52 = vld [vmem:[%s8961_s4 + $0xb0] sm:$0xff]  ;;  %v4907_v55 = vld [vmem:[%s8961_s4 + $0x140] sm:$0xff]  ;;  %v4914_v56 = vld [vmem:[%s8961_s4 + $0xa8] sm:$0xff] }
  0x1c   : > { %564 = vmatpush.msrb.mxu0 %v4717_v23  ;;  %668 = vmatpush.msrb.mxu3 %v4756_v30  ;;  %v4902_v54 = vld [vmem:[%s8961_s4 + $0x30] sm:$0xff]  ;;  %v4919_v57 = vld [vmem:[%s8961_s4 + $0x1c0] sm:$0xff]  ;;  %v4926_v58 = vld [vmem:[%s8961_s4 + $0x28] sm:$0xff] }
  0x1d   : > { %599 = vmatpush.msrb.mxu1 %v4722_v24  ;;  %418 = vperm.xlu2 %4415, %v4761_v31   ;;  %v4931_v59 = vld [vmem:[%s8961_s4 + $0x138] sm:$0xff]  ;;  %v4938_v60 = vld [vmem:[%s8961_s4 + $0xa0] sm:$0xff]  ;;  %v4955_v63 = vld [vmem:[%s8961_s4 + $0x130] sm:$0xff] }
  0x1e   : > { %565 = vmatpush.msrb.mxu0 %v4734_v26  ;;  %634 = vmatpush.msrb.mxu2 %v4768_v32  ;;  %v4943_v61 = vld [vmem:[%s8961_s4 + $0x1b8] sm:$0xff]  ;;  %v4950_v62 = vld [vmem:[%s8961_s4 + $0x20] sm:$0xff]  ;;  %v4967_v3 = vld [vmem:[%s8961_s4 + $0x1b0] sm:$0xff] }
  0x1f   : > { %600 = vmatpush.msrb.mxu1 %v4744_v28  ;;  %669 = vmatpush.msrb.mxu3 %v4787_v35  ;;  %v4962_v1 = vld [vmem:[%s8961_s4 + $0x98] sm:$0xff]  ;;  %v4378_v5 = vld [vmem:[%s8958_s1 + $0x10] sm:$0xff]  ;;  %v5001_v8 = vld [vmem:[%s8961_s4 + $0x128] sm:$0xff] }
  0x20   : > { %566 = vmatpush.msrb.mxu0 %v4773_v33  ;;  %635 = vmatpush.msrb.mxu2 %v4792_v36  ;;  %v4974_v4 = vld [vmem:[%s8961_s4 + $0x18] sm:$0xff]  ;;  %v4991_v6 = vld [vmem:[%s8961_s4 + $0x10] sm:$0xff]  ;;  %v5008_v9 = vld [vmem:[%s8961_s4 + $0x1a8] sm:$0xff] }
  0x21   : > { %601 = vmatpush.msrb.mxu1 %v4778_v34  ;;  %670 = vmatpush.msrb.mxu3 %v4814_v40  ;;  %v4996_v7 = vld [vmem:[%s8961_s4 + $0x90] sm:$0xff]  ;;  %v5015_v10 = vld [vmem:[%s8961_s4 + $0x8] sm:$0xff]  ;;  %v5025_v12 = vld [vmem:[%s8961_s4 + $0x120] sm:$0xff] }
  0x22   : > { %567 = vmatpush.msrb.mxu0 %v4798_v37  ;;  %636 = vmatpush.msrb.mxu2 %v4819_v41  ;;  %v5020_v11 = vld [vmem:[%s8961_s4 + $0x88] sm:$0xff]  ;;  %v5032_v13 = vld [vmem:[%s8961_s4 + $0x1a0] sm:$0xff]  ;;  %v5061_v18 = vld [vmem:[%s8961_s4 + $0x110] sm:$0xff] }
  0x23   : > { %602 = vmatpush.msrb.mxu1 %v4803_v38  ;;  %671 = vmatpush.msrb.mxu3 %v4847_v45  ;;  %9325 = vst [vmem:[#allocation6_spill] sm:$0xff] %v5032_v13  ;;  %v5039_v14 = vld [vmem:[%s8961_s4] sm:$0xff]  ;;  %v5066_v31 = vld [vmem:[%s8961_s4 + $0x190] sm:$0xff]  ;;  %v5077_v17 = vld [vmem:[%s8961_s4 + $0x108] sm:$0xff] }
  0x24   : > { %568 = vmatpush.msrb.mxu0 %v4833_v43  ;;  %637 = vmatpush.msrb.mxu2 %v4859_v47  ;;  %v5044_v16 = vld [vmem:[%s8961_s4 + $0x80] sm:$0xff]  ;;  %9328 = vst [vmem:[#allocation9_spill] sm:$0xff] %v5061_v18  ;;  %v5082_v2 = vld [vmem:[%s8961_s4 + $0x188] sm:$0xff] }
  0x25   : > { %603 = vmatpush.msrb.mxu1 %v4825_v42  ;;  %672 = vmatpush.msrb.mxu3 %v4871_v49  ;;  %9329 = vst [vmem:[#allocation10_spill] sm:$0xff] %v5066_v31 }
  0x26   : > { %4235 = vmatmul.msk.bf16.gmra.mxu0 %vm456_vm0, %v4377_v39  ;;  %638 = vmatpush.msrb.mxu2 %v4883_v51  ;;  %9330 = vst [vmem:[#allocation11_spill] sm:$0xff] %v5077_v17 }
  0x27   : > { %4238 = vmatmul.msk.bf16.gmra.mxu1 %vm456_vm0, %v4377_v39  ;;  %4241 = vmatmul.msk.bf16.gmra.mxu2 %vm456_vm0, %v4377_v39  ;;  %9331 = vst [vmem:[#allocation12_spill] sm:$0xff] %v5082_v2 }
  0x28   : > { %4244 = vmatmul.msk.bf16.gmra.mxu3 %vm456_vm0, %v4377_v39  ;;  %604 = vmatpush.msrb.mxu1 %v4842_v44  ;;  %v5049_v39 = vld [vmem:[%s8961_s4 + $0x118] sm:$0xff] }
  0x29   : > { %569 = vmatpush.msrb.mxu0 %v4854_v46  ;;  %673 = vmatpush.msrb.mxu3 %v4895_v53  ;;  %9326 = vst [vmem:[#allocation7_spill] sm:$0xff] %v5049_v39 }
  0x2a   : > { %605 = vmatpush.msrb.mxu1 %v4866_v48  ;;  %639 = vmatpush.msrb.mxu2 %v4907_v55 }
  0x2b   : > { %570 = vmatpush.msrb.mxu0 %v4878_v50  ;;  %674 = vmatpush.msrb.mxu3 %v4919_v57 }
  0x2c   : > { %606 = vmatpush.msrb.mxu1 %v4890_v52  ;;  %640 = vmatpush.msrb.mxu2 %v4931_v59 }
  0x2d   : > { %571 = vmatpush.msrb.mxu0 %v4902_v54  ;;  %675 = vmatpush.msrb.mxu3 %v4943_v61 }
  0x2e   : > { %607 = vmatpush.msrb.mxu1 %v4914_v56  ;;  %641 = vmatpush.msrb.mxu2 %v4955_v63 }
  0x2f   : > { %572 = vmatpush.msrb.mxu0 %v4926_v58  ;;  %676 = vmatpush.msrb.mxu3 %v4967_v3 }
  0x30   : > { %608 = vmatpush.msrb.mxu1 %v4938_v60  ;;  %642 = vmatpush.msrb.mxu2 %v5001_v8 }
  0x31   : > { %573 = vmatpush.msrb.mxu0 %v4950_v62  ;;  %677 = vmatpush.msrb.mxu3 %v5008_v9 }
  0x32   : > { %609 = vmatpush.msrb.mxu1 %v4962_v1  ;;  %643 = vmatpush.msrb.mxu2 %v5025_v12 }
  0x33   : > { %574 = vmatpush.msrb.mxu0 %v4974_v4  ;;  %678 = vmatpush.msrb.mxu3 %v5032_v13 }
  0x34   : > { %610 = vmatpush.msrb.mxu1 %v4996_v7  ;;  %644 = vmatpush.msrb.mxu2 %v5049_v39 }
  0x35   : > { %575 = vmatpush.msrb.mxu0 %v4991_v6 }
  0x36   : > { %4236 = vmatmul.msk.bf16.gmra.mxu0 %vm456_vm0, %v4378_v5  ;;  %611 = vmatpush.msrb.mxu1 %v5020_v11 }
  0x37   : > { %4239 = vmatmul.msk.bf16.gmra.mxu1 %vm456_vm0, %v4378_v5  ;;  %4242 = vmatmul.msk.bf16.gmra.mxu2 %vm456_vm0, %v4378_v5 }
  0x38   : > { %4245 = vmatmul.msk.bf16.gmra.mxu3 %vm456_vm0, %v4378_v5  ;;  %576 = vmatpush.msrb.mxu0 %v5015_v10  ;;  %v5056_v5 = vld [vmem:[%s8961_s4 + $0x198] sm:$0xff] }
  0x39   : > { %612 = vmatpush.msrb.mxu1 %v5044_v16  ;;  %9327 = vst [vmem:[#allocation8_spill] sm:$0xff] %v5056_v5  ;;  %679 = vmatpush.msrb.mxu3 %v5056_v5 }
  0x3a   : > { %577 = vmatpush.msrb.mxu0 %v5039_v14  ;;  %645 = vmatpush.msrb.mxu2 %v5061_v18 }
  0x3b   : > { %761 = vmatpush.msra.mxu1 %v4700_v20  ;;  %680 = vmatpush.msrb.mxu3 %v5066_v31  ;;  %v5096_v20 = vld [vmem:[%s8961_s4 + $0x180] sm:$0xff] }
  0x3c   : > { %726 = vmatpush.msra.mxu0 %v4695_v19  ;;  %646 = vmatpush.msrb.mxu2 %v5077_v17  ;;  %v5091_v19 = vld [vmem:[%s8961_s4 + $0x100] sm:$0xff]  ;;  %9333 = vst [vmem:[#allocation14_spill] sm:$0xff] %v5096_v20 }
  0x3d   : > { %762 = vmatpush.msra.mxu1 %v4712_v22  ;;  %681 = vmatpush.msrb.mxu3 %v5082_v2  ;;  %9332 = vst [vmem:[#allocation13_spill] sm:$0xff] %v5091_v19 }
  0x3e   : > { %727 = vmatpush.msra.mxu0 %v4705_v21  ;;  %647 = vmatpush.msrb.mxu2 %v5091_v19 }
  0x3f   : > { %763 = vmatpush.msra.mxu1 %v4722_v24  ;;  %682 = vmatpush.msrb.mxu3 %v5096_v20 }
  0x40   : > { %728 = vmatpush.msra.mxu0 %v4717_v23  ;;  %796 = vmatpush.msra.mxu2 %v4727_v25 }
  0x41   : > { %764 = vmatpush.msra.mxu1 %v4744_v28  ;;  %831 = vmatpush.msra.mxu3 %v4739_v27 }
  0x42   : > { %729 = vmatpush.msra.mxu0 %v4734_v26  ;;  %797 = vmatpush.msra.mxu2 %v4751_v29 }
  0x43   : > { %765 = vmatpush.msra.mxu1 %v4778_v34  ;;  %832 = vmatpush.msra.mxu3 %v4756_v30 }
  0x44   : > { %730 = vmatpush.msra.mxu0 %v4773_v33  ;;  %798 = vmatpush.msra.mxu2 %v4768_v32 }
  0x45   : > { %766 = vmatpush.msra.mxu1 %v4803_v38  ;;  %833 = vmatpush.msra.mxu3 %v4787_v35 }
  0x46   : > { %731 = vmatpush.msra.mxu0 %v4798_v37  ;;  %799 = vmatpush.msra.mxu2 %v4792_v36 }
  0x47   : > { %767 = vmatpush.msra.mxu1 %v4825_v42  ;;  %834 = vmatpush.msra.mxu3 %v4814_v40 }
  0x48   : > { %732 = vmatpush.msra.mxu0 %v4833_v43  ;;  %800 = vmatpush.msra.mxu2 %v4819_v41 }
  0x49   : > { %768 = vmatpush.msra.mxu1 %v4842_v44  ;;  %835 = vmatpush.msra.mxu3 %v4847_v45 }
  0x4a   : > { %733 = vmatpush.msra.mxu0 %v4854_v46  ;;  %801 = vmatpush.msra.mxu2 %v4859_v47 }
  0x4b   : > { %769 = vmatpush.msra.mxu1 %v4866_v48  ;;  %836 = vmatpush.msra.mxu3 %v4871_v49 }
  0x4c   : > { %734 = vmatpush.msra.mxu0 %v4878_v50  ;;  %802 = vmatpush.msra.mxu2 %v4883_v51 }
  0x4d   : > { %770 = vmatpush.msra.mxu1 %v4890_v52  ;;  %837 = vmatpush.msra.mxu3 %v4895_v53 }
  0x4e   : > { %735 = vmatpush.msra.mxu0 %v4902_v54  ;;  %803 = vmatpush.msra.mxu2 %v4907_v55 }
  0x4f   : > { %771 = vmatpush.msra.mxu1 %v4914_v56  ;;  %838 = vmatpush.msra.mxu3 %v4919_v57 }
  0x50   : > { %736 = vmatpush.msra.mxu0 %v4926_v58  ;;  %804 = vmatpush.msra.mxu2 %v4931_v59 }
  0x51   : > { %772 = vmatpush.msra.mxu1 %v4938_v60  ;;  %839 = vmatpush.msra.mxu3 %v4943_v61 }
  0x52   : > { %737 = vmatpush.msra.mxu0 %v4950_v62  ;;  %805 = vmatpush.msra.mxu2 %v4955_v63 }
  0x53   : > { %773 = vmatpush.msra.mxu1 %v4962_v1  ;;  %840 = vmatpush.msra.mxu3 %v4967_v3 }
  0x54   : > { %738 = vmatpush.msra.mxu0 %v4974_v4  ;;  %806 = vmatpush.msra.mxu2 %v5001_v8 }
  0x55   : > { %774 = vmatpush.msra.mxu1 %v4996_v7  ;;  %841 = vmatpush.msra.mxu3 %v5008_v9 }
  0x56   : > { %739 = vmatpush.msra.mxu0 %v4991_v6  ;;  %807 = vmatpush.msra.mxu2 %v5025_v12 }
  0x57   : > { %775 = vmatpush.msra.mxu1 %v5020_v11  ;;  %842 = vmatpush.msra.mxu3 %v5032_v13 }
  0x58   : > { %740 = vmatpush.msra.mxu0 %v5015_v10  ;;  %808 = vmatpush.msra.mxu2 %v5049_v39 }
  0x59   : > { %776 = vmatpush.msra.mxu1 %v5044_v16  ;;  %843 = vmatpush.msra.mxu3 %v5056_v5 }
  0x5a   : > { %741 = vmatpush.msra.mxu0 %v5039_v14  ;;  %809 = vmatpush.msra.mxu2 %v5061_v18 }
  0x5b   : > { %844 = vmatpush.msra.mxu3 %v5066_v31 }
  0x5c   : > { %810 = vmatpush.msra.mxu2 %v5077_v17 }
  0x5d   : > { %845 = vmatpush.msra.mxu3 %v5082_v2 }
  0x5e   : > { %811 = vmatpush.msra.mxu2 %v5091_v19 }
  0x5f   : > { %846 = vmatpush.msra.mxu3 %v5096_v20 }
  0x7f   : > { %v394_v21 = vpop.permute.xlu0 %393  ;;  %v404_v43 = vpop.permute.xlu1 %403 }
  0x87   : > { %v399_v28 = vpop.permute.xlu0 %398 }
  0x88   : > { %v409_v1 = vpop.permute.xlu1 %408 }
  0x93   : > { %v475_v22 = vpop.f32.mrf.mxu0 }
  0x94   : > { %v5144_v23 = vadd.f32 %v475_v22, %v394_v21  ;;  %v499_v24 = vpop.f32.mrf.mxu1  ;;  %v414_v22 = vpop.permute.xlu2 %413 }
  0x95   : > { %v5148_v26 = vadd.f32 %v499_v24, %v394_v21 }
  0x96   : > { %9334 = vst [vmem:[#allocation15_spill] sm:$0xff] %v5144_v23  ;;  %578 = vmatmul.f32.vlgmr.msrb.gmra.mxu0 %v5144_v23 }
  0x97   : > { %9335 = vst [vmem:[#allocation16_spill] sm:$0xff] %v5148_v26  ;;  %613 = vmatmul.f32.vlgmr.msrb.gmra.mxu1 %v5148_v26 }
  0x9a   : > { %v523_v33 = vpop.f32.mrf.mxu2 }
  0x9b   : > { %v5160_v34 = vadd.f32 %v523_v33, %v394_v21  ;;  %v547_v36 = vpop.f32.mrf.mxu3  ;;  %v477_v37 = vpop.f32.mrf.mxu0 }
  0x9c   : > { %v5164_v38 = vadd.f32 %v547_v36, %v394_v21  ;;  %v5166_v40 = vadd.f32 %v477_v37, %v399_v28  ;;  %v501_v41 = vpop.f32.mrf.mxu1 }
  0x9d   : > { %9336 = vst [vmem:[#allocation17_spill] sm:$0xff] %v5160_v34  ;;  %v5168_v42 = vadd.f32 %v501_v41, %v399_v28  ;;  %648 = vmatmul.f32.vlgmr.msrb.gmra.mxu2 %v5160_v34 }
  0x9e   : > { %9337 = vst [vmem:[#allocation18_spill] sm:$0xff] %v5164_v38  ;;  %683 = vmatmul.f32.vlgmr.msrb.gmra.mxu3 %v5164_v38  ;;  %581 = vmatmul.f32.gmra.mxu0 %v5166_v40 }
  0x9f   : > { %9338 = vst [vmem:[#allocation19_spill] sm:$0xff] %v5166_v40  ;;  %616 = vmatmul.f32.gmra.mxu1 %v5168_v42 }
  0xa0   : > { %9339 = vst [vmem:[#allocation20_spill] sm:$0xff] %v5168_v42 }
  0xa2   : > { %v525_v44 = vpop.f32.mrf.mxu2 }
  0xa3   : > { %v5178_v46 = vadd.f32 %v525_v44, %v399_v28  ;;  %v549_v48 = vpop.f32.mrf.mxu3  ;;  %v480_v52 = vpop.f32.mrf.mxu0 }
  0xa4   : > { %v5180_v56 = vadd.f32 %v549_v48, %v399_v28  ;;  %v5182_v58 = vadd.f32 %v480_v52, %v404_v43  ;;  %v504_v60 = vpop.f32.mrf.mxu1  ;;  %v419_v48 = vpop.permute.xlu2 %418 }
  0xa5   : > { %9340 = vst [vmem:[#allocation21_spill] sm:$0xff] %v5178_v46  ;;  %v5184_v62 = vadd.f32 %v504_v60, %v404_v43  ;;  %651 = vmatmul.f32.gmra.mxu2 %v5178_v46 }
  0xa6   : > { %9341 = vst [vmem:[#allocation22_spill] sm:$0xff] %v5180_v56  ;;  %686 = vmatmul.f32.gmra.mxu3 %v5180_v56  ;;  %584 = vmatmul.f32.gmra.mxu0 %v5182_v58 }
  0xa7   : > { %9342 = vst [vmem:[#allocation23_spill] sm:$0xff] %v5182_v58  ;;  %619 = vmatmul.f32.gmra.mxu1 %v5184_v62 }
  0xa8   : > { %9343 = vst [vmem:[#allocation24_spill] sm:$0xff] %v5184_v62 }
  0xaa   : > { %v528_v4 = vpop.f32.mrf.mxu2 }
  0xab   : > { %v5190_v6 = vadd.f32 %v528_v4, %v404_v43  ;;  %v552_v7 = vpop.f32.mrf.mxu3  ;;  %v482_v10 = vpop.f32.mrf.mxu0 }
  0xac   : > { %v5192_v11 = vadd.f32 %v552_v7, %v404_v43  ;;  %v5194_v14 = vadd.f32 %v482_v10, %v409_v1  ;;  %v506_v16 = vpop.f32.mrf.mxu1 }
  0xad   : > { %9344 = vst [vmem:[#allocation25_spill] sm:$0xff] %v5190_v6  ;;  %v5196_v21 = vadd.f32 %v506_v16, %v409_v1  ;;  %654 = vmatmul.f32.gmra.mxu2 %v5190_v6 }
  0xae   : > { %9345 = vst [vmem:[#allocation26_spill] sm:$0xff] %v5192_v11  ;;  %689 = vmatmul.f32.gmra.mxu3 %v5192_v11  ;;  %587 = vmatmul.f32.gmra.mxu0 %v5194_v14 }
  0xaf   : > { %9346 = vst [vmem:[#allocation27_spill] sm:$0xff] %v5194_v14  ;;  %622 = vmatmul.f32.gmra.mxu1 %v5196_v21 }
  0xb0   : > { %9347 = vst [vmem:[#allocation28_spill] sm:$0xff] %v5196_v21 }
  0xb2   : > { %v530_v24 = vpop.f32.mrf.mxu2 }
  0xb3   : > { %v5202_v28 = vadd.f32 %v530_v24, %v409_v1  ;;  %v554_v33 = vpop.f32.mrf.mxu3  ;;  %v485_v36 = vpop.f32.mrf.mxu0 }
  0xb4   : > { %v5204_v37 = vadd.f32 %v554_v33, %v409_v1  ;;  %v5206_v41 = vadd.f32 %v485_v36, %v414_v22  ;;  %v509_v43 = vpop.f32.mrf.mxu1 }
  0xb5   : > { %9348 = vst [vmem:[#allocation29_spill] sm:$0xff] %v5202_v28  ;;  %v5208_v44 = vadd.f32 %v509_v43, %v414_v22  ;;  %657 = vmatmul.f32.gmra.mxu2 %v5202_v28 }
  0xb6   : > { %9349 = vst [vmem:[#allocation30_spill] sm:$0xff] %v5204_v37  ;;  %692 = vmatmul.f32.gmra.mxu3 %v5204_v37  ;;  %590 = vmatmul.f32.gmra.mxu0 %v5206_v41 }
  0xb7   : > { %9350 = vst [vmem:[#allocation31_spill] sm:$0xff] %v5206_v41  ;;  %625 = vmatmul.f32.gmra.mxu1 %v5208_v44 }
  0xb8   : > { %9351 = vst [vmem:[#allocation32_spill] sm:$0xff] %v5208_v44 }
  0xba   : > { %v533_v52 = vpop.f32.mrf.mxu2 }
  0xbb   : > { %v5214_v60 = vadd.f32 %v533_v52, %v414_v22  ;;  %v557_v4 = vpop.f32.mrf.mxu3  ;;  %v487_v1 = vpop.f32.mrf.mxu0 }
  0xbc   : > { %v5216_v7 = vadd.f32 %v557_v4, %v414_v22  ;;  %v5218_v10 = vadd.f32 %v487_v1, %v419_v48  ;;  %v511_v16 = vpop.f32.mrf.mxu1  ;;  %v702_v22 = vmul.f32 %v5144_v23, %v5144_v23  ;;  %v703_v4 = vmul.f32 %v5148_v26, %v5148_v26 }
  0xbd   : > { %9352 = vst [vmem:[#allocation33_spill] sm:$0xff] %v5214_v60  ;;  %v5220_v24 = vadd.f32 %v511_v16, %v419_v48  ;;  %660 = vmatmul.f32.gmra.mxu2 %v5214_v60  ;;  %v704_v1 = vmul.f32 %v5160_v34, %v5160_v34  ;;  %v705_v16 = vmul.f32 %v5164_v38, %v5164_v38 }
  0xbe   : > { %9353 = vst [vmem:[#allocation34_spill] sm:$0xff] %v5216_v7  ;;  %695 = vmatmul.f32.gmra.mxu3 %v5216_v7  ;;  %593 = vmatmul.f32.gmra.mxu0 %v5218_v10 }
  0xbf   : > { %9354 = vst [vmem:[#allocation35_spill] sm:$0xff] %v5218_v10  ;;  %628 = vmatmul.f32.gmra.mxu1 %v5220_v24 }
  0xc0   : > { %9355 = vst [vmem:[#allocation36_spill] sm:$0xff] %v5220_v24 }
  0xc2   : > { %v535_v33 = vpop.f32.mrf.mxu2 }
  0xc3   : > { %v5226_v36 = vadd.f32 %v535_v33, %v419_v48  ;;  %v559_v43 = vpop.f32.mrf.mxu3  ;;  %v706_v33 = vmul.f32 %v5166_v40, %v5166_v40  ;;  %v711_v40 = vmul.f32 %v5184_v62, %v5184_v62 }
  0xc4   : > { %v5230_v52 = vadd.f32 %v559_v43, %v419_v48  ;;  %v707_v48 = vmul.f32 %v5168_v42, %v5168_v42  ;;  %v708_v43 = vmul.f32 %v5178_v46, %v5178_v46 }
  0xc5   : > { %9356 = vst [vmem:[#allocation37_spill] sm:$0xff] %v5226_v36  ;;  %663 = vmatmul.f32.gmra.mxu2 %v5226_v36 }
  0xc6   : > { %9357 = vst [vmem:[#allocation38_spill] sm:$0xff] %v5230_v52  ;;  %698 = vmatmul.f32.gmra.mxu3 %v5230_v52  ;;  %742 = vmatmul.f32.vlgmr.msra.gmra.mxu0 %v702_v22  ;;  %v709_v22 = vmul.f32 %v5180_v56, %v5180_v56 }
  0xc7   : > { %777 = vmatmul.f32.vlgmr.msra.gmra.mxu1 %v703_v4  ;;  %v710_v4 = vmul.f32 %v5182_v58, %v5182_v58 }
  0xcd   : > { %812 = vmatmul.f32.vlgmr.msra.gmra.mxu2 %v704_v1  ;;  %v4574_v1 = vmov 10  }
  0xce   : > { %847 = vmatmul.f32.vlgmr.msra.gmra.mxu3 %v705_v16  ;;  %745 = vmatmul.f32.gmra.mxu0 %v706_v33  ;;  %v9358_v16 = vld [vmem:[#allocation2_spill] sm:$0xff]  ;;  %v712_v33 = vmul.f32 %v5190_v6, %v5190_v6  ;;  %v716_v6 = vmul.f32 %v5202_v28, %v5202_v28  ;;  %v722_v28 = vmul.f32 %v5218_v10, %v5218_v10 }
  0xcf   : > { %780 = vmatmul.f32.gmra.mxu1 %v707_v48  ;;  %4417 = vset.pattern.permute.xlu1 %v4574_v1  ;;  %v713_v48 = vmul.f32 %v5192_v11, %v5192_v11  ;;  %v717_v11 = vmul.f32 %v5204_v37, %v5204_v37 }
  0xd0   : > { %985 = vperm.xlu1 %4417, %v4673_v15   ;;  %4416 = vset.pattern.permute.xlu0 %v4574_v1 }
  0xd1   : > { %981 = vperm.xlu0 %4416, %v4652_v0   ;;  %4418 = vset.pattern.permute.xlu2 %v4574_v1  ;;  %v9361_v1 = vld [vmem:[#allocation4_spill] sm:$0xff] }
  0xd2   : > { %989 = vperm.xlu2 %4418, %v9358_v16  }
  0xd5   : > { %815 = vmatmul.f32.gmra.mxu2 %v708_v43  ;;  %v714_v43 = vmul.f32 %v5194_v14, %v5194_v14 }
  0xd6   : > { %850 = vmatmul.f32.gmra.mxu3 %v709_v22  ;;  %748 = vmatmul.f32.gmra.mxu0 %v710_v4  ;;  %v9359_v22 = vld [vmem:[#allocation3_spill] sm:$0xff]  ;;  %v9360_v4 = vld [vmem:[#allocation5_spill] sm:$0xff] }
  0xd7   : > { %783 = vmatmul.f32.gmra.mxu1 %v711_v40  ;;  %v715_v40 = vmul.f32 %v5196_v21, %v5196_v21 }
  0xd8   : > { %993 = vperm.xlu1 %4417, %v9359_v22  }
  0xd9   : > { %1001 = vperm.xlu0 %4416, %v9360_v4  }
  0xda   : > { %997 = vperm.xlu2 %4418, %v9361_v1  }
  0xdd   : > { %818 = vmatmul.f32.gmra.mxu2 %v712_v33  ;;  %v718_v33 = vmul.f32 %v5206_v41, %v5206_v41  ;;  %v723_v41 = vmul.f32 %v5220_v24, %v5220_v24 }
  0xde   : > { %853 = vmatmul.f32.gmra.mxu3 %v713_v48  ;;  %751 = vmatmul.f32.gmra.mxu0 %v714_v43  ;;  %v719_v48 = vmul.f32 %v5208_v44, %v5208_v44  ;;  %v720_v43 = vmul.f32 %v5214_v60, %v5214_v60 }
  0xdf   : > { %786 = vmatmul.f32.gmra.mxu1 %v715_v40  ;;  %v721_v40 = vmul.f32 %v5216_v7, %v5216_v7 }
  0xe5   : > { %821 = vmatmul.f32.gmra.mxu2 %v716_v6  ;;  %v724_v6 = vmul.f32 %v5226_v36, %v5226_v36 }
  0xe6   : > { %856 = vmatmul.f32.gmra.mxu3 %v717_v11  ;;  %754 = vmatmul.f32.gmra.mxu0 %v718_v33  ;;  %v725_v11 = vmul.f32 %v5230_v52, %v5230_v52  ;;  %v4575_v33 = vmov 11  }
  0xe7   : > { %789 = vmatmul.f32.gmra.mxu1 %v719_v48  ;;  %4419 = vset.pattern.permute.xlu1 %v4575_v33 }
  0xe8   : > { %1017 = vperm.xlu1 %4419, %v4652_v0   ;;  %4420 = vset.pattern.permute.xlu2 %v4575_v33 }
  0xe9   : > { %1021 = vperm.xlu2 %4420, %v4673_v15   ;;  %4421 = vset.pattern.permute.xlu0 %v4575_v33 }
  0xea   : > { %1025 = vperm.xlu0 %4421, %v9358_v16  }
  0xed   : > { %824 = vmatmul.f32.gmra.mxu2 %v720_v43 }
  0xee   : > { %859 = vmatmul.f32.gmra.mxu3 %v721_v40  ;;  %757 = vmatmul.f32.gmra.mxu0 %v722_v28 }
  0xef   : > { %792 = vmatmul.f32.gmra.mxu1 %v723_v41 }
  0xf0   : > { %1029 = vperm.xlu1 %4419, %v9359_v22  }
  0xf1   : > { %1033 = vperm.xlu2 %4420, %v9361_v1  }
  0xf5   : > { %827 = vmatmul.f32.gmra.mxu2 %v724_v6 }
  0xf6   : > { %862 = vmatmul.f32.gmra.mxu3 %v725_v11 }
  0xf8   : > { %1037 = vperm.xlu1 %4419, %v9360_v4  }
 0x113   : > { %v579_v28 = vpop.f32.mrf.mxu0 }
 0x114   : > { %v614_v41 = vpop.f32.mrf.mxu1 }
 0x115   : > { %v615_v21 = vadd.f32 %v614_v41, %v579_v28 }
 0x11b   : > { %v582_v48 = vpop.f32.mrf.mxu0 }
 0x11c   : > { %v617_v43 = vpop.f32.mrf.mxu1 }
 0x11d   : > { %v618_v44 = vadd.f32 %v617_v43, %v582_v48 }
 0x120   : > { %v649_v40 = vpop.f32.mrf.mxu2 }
 0x121   : > { %v684_v6 = vpop.f32.mrf.mxu3  ;;  %v650_v58 = vadd.f32 %v649_v40, %v615_v21 }
 0x123   : > { %v585_v11 = vpop.f32.mrf.mxu0  ;;  %v685_v38 = vadd.f32 %v684_v6, %v650_v58 }
 0x124   : > { %v620_v0 = vpop.f32.mrf.mxu1 }
 0x125   : > { %v867_v20 = vsel %vm866_vm1, %v685_v38, 0.0 }
 0x128   : > { %v652_v52 = vpop.f32.mrf.mxu2 }
 0x129   : > { %v687_v36 = vpop.f32.mrf.mxu3  ;;  %v653_v14 = vadd.f32 %v652_v52, %v618_v44 }
 0x12b   : > { %v588_v15 = vpop.f32.mrf.mxu0  ;;  %v688_v42 = vadd.f32 %v687_v36, %v653_v14 }
 0x12c   : > { %v623_v33 = vpop.f32.mrf.mxu1 }
 0x12d   : > { %v868_v26 = vsel %vm866_vm1, %v688_v42, 0.0  ;;  %v624_v38 = vadd.f32 %v623_v33, %v588_v15 }
 0x12e   : > { %v869_v2 = vadd.f32 %v868_v26, %v867_v20  ;;  %v621_v20 = vadd.f32 %v620_v0, %v585_v11 }
 0x130   : > { %v655_v24 = vpop.f32.mrf.mxu2  ;;  %v870_v48 = vrot.slane %v869_v2, 4 }
 0x131   : > { %v690_v16 = vpop.f32.mrf.mxu3 }
 0x132   : > { %v871_v52 = vadd.f32 %v870_v48, %v869_v2  ;;  %v656_v48 = vadd.f32 %v655_v24, %v621_v20 }
 0x133   : > { %v591_v10 = vpop.f32.mrf.mxu0 }
 0x134   : > { %v626_v22 = vpop.f32.mrf.mxu1  ;;  %v872_v36 = vrot.slane %v871_v52, 2  ;;  %v691_v0 = vadd.f32 %v690_v16, %v656_v48  ;;  %v384_v16 = vld [vmem:[%s8962_s5 + $0x18] sm:$0xff] }
 0x135   : > { %v627_v5 = vadd.f32 %v626_v22, %v591_v10  ;;  %1184 = vmatpush.msrb.mxu3 %v384_v16 }
 0x136   : > { %v873_v26 = vadd.f32 %v872_v36, %v871_v52 }
 0x137   : > { %1342 = vmatpush.msra.mxu3 %v384_v16 }
 0x138   : > { %v658_v7 = vpop.f32.mrf.mxu2 }
 0x139   : > { %v693_v1 = vpop.f32.mrf.mxu3  ;;  %v659_v39 = vadd.f32 %v658_v7, %v624_v38 }
 0x13b   : > { %v594_v60 = vpop.f32.mrf.mxu0 }
 0x13c   : > { %v629_v4 = vpop.f32.mrf.mxu1 }
 0x140   : > { %v661_v37 = vpop.f32.mrf.mxu2 }
 0x141   : > { %v696_v62 = vpop.f32.mrf.mxu3 }
 0x143   : > { %v743_v56 = vpop.f32.mrf.mxu0 }
 0x144   : > { %v778_v46 = vpop.f32.mrf.mxu1 }
 0x145   : > { %v779_v44 = vadd.f32 %v778_v46, %v743_v56 }
 0x148   : > { %v664_v34 = vpop.f32.mrf.mxu2 }
 0x149   : > { %v699_v23 = vpop.f32.mrf.mxu3 }
 0x14b   : > { %v746_v19 = vpop.f32.mrf.mxu0 }
 0x14c   : > { %v781_v17 = vpop.f32.mrf.mxu1 }
 0x14d   : > { %v782_v58 = vadd.f32 %v781_v17, %v746_v19  ;;  %v874_v19 = vrot.slane %v873_v26, 1 }
 0x14f   : > { %v875_v7 = vadd.f32 %v874_v19, %v873_v26 }
 0x150   : > { %v813_v43 = vpop.f32.mrf.mxu2 }
 0x151   : > { %v848_v28 = vpop.f32.mrf.mxu3  ;;  %v814_v21 = vadd.f32 %v813_v43, %v779_v44  ;;  %v630_v43 = vadd.f32 %v629_v4, %v594_v60  ;;  %v662_v44 = vadd.f32 %v661_v37, %v627_v5  ;;  %v876_v60 = vsel %vm866_vm1, %v691_v0, 0.0  ;;  %v381_v37 = vld [vmem:[%s8962_s5] sm:$0xff] }
 0x152   : > { %1079 = vmatpush.msrb.mxu0 %v381_v37 }
 0x153   : > { %v5294_v41 = vpop.f32.mrf.mxu0  ;;  %v849_v42 = vadd.f32 %v848_v28, %v814_v21  ;;  %v665_v15 = vadd.f32 %v664_v34, %v630_v43  ;;  %v697_v10 = vadd.f32 %v696_v62, %v662_v44  ;;  %v5312_v34 = vmul.f32 0.00024414063, %v875_v7 }
 0x154   : > { %v5296_v14 = vpop.f32.mrf.mxu1  ;;  %1237 = vmatpush.msra.mxu0 %v381_v37 }
 0x155   : > { %v889_v46 = vsel %vm866_vm1, %v849_v42, 0.0  ;;  %v879_v5 = vsel %vm866_vm1, %v697_v10, 0.0  ;;  %v914_v26 = vmul.f32 %v5312_v34, %v5312_v34 }
 0x158   : > { %v816_v40 = vpop.f32.mrf.mxu2 }
 0x159   : > { %v817_v6 = vadd.f32 %v816_v40, %v782_v58  ;;  %v851_v31 = vpop.f32.mrf.mxu3  ;;  %v694_v58 = vadd.f32 %v693_v1, %v659_v39  ;;  %v383_v39 = vld [vmem:[%s8962_s5 + $0x10] sm:$0xff] }
 0x15a   : > { %1149 = vmatpush.msrb.mxu2 %v383_v39 }
 0x15b   : > { %v852_v18 = vadd.f32 %v851_v31, %v817_v6  ;;  %v752_v17 = vpop.f32.mrf.mxu0  ;;  %v877_v22 = vsel %vm866_vm1, %v694_v58, 0.0 }
 0x15c   : > { %v787_v28 = vpop.f32.mrf.mxu1  ;;  %1307 = vmatpush.msra.mxu2 %v383_v39 }
 0x15d   : > { %v890_v2 = vsel %vm866_vm1, %v852_v18, 0.0  ;;  %v700_v18 = vadd.f32 %v699_v23, %v665_v15  ;;  %v878_v23 = vadd.f32 %v877_v22, %v876_v60 }
 0x15e   : > { %v891_v56 = vadd.f32 %v890_v2, %v889_v46  ;;  %v788_v46 = vadd.f32 %v787_v28, %v752_v17 }
 0x15f   : > { %v881_v1 = vsel %vm866_vm1, %v700_v18, 0.0  ;;  %v880_v36 = vadd.f32 %v879_v5, %v878_v23 }
 0x160   : > { %v892_v13 = vrot.slane %v891_v56, 4  ;;  %v819_v21 = vpop.f32.mrf.mxu2 }
 0x161   : > { %v854_v31 = vpop.f32.mrf.mxu3  ;;  %v882_v38 = vadd.f32 %v881_v1, %v880_v36 }
 0x162   : > { %v893_v11 = vadd.f32 %v892_v13, %v891_v56  ;;  %v382_v13 = vld [vmem:[%s8962_s5 + $0x8] sm:$0xff]  ;;  %v785_v56 = vadd.f32 %v5296_v14, %v5294_v41 }
 0x163   : > { %1114 = vmatpush.msrb.mxu1 %v382_v13  ;;  %v755_v42 = vpop.f32.mrf.mxu0  ;;  %v883_v44 = vrot.slane %v882_v38, 4 }
 0x164   : > { %v894_v33 = vrot.slane %v893_v11, 2  ;;  %v790_v6 = vpop.f32.mrf.mxu1  ;;  %v820_v15 = vadd.f32 %v819_v21, %v785_v56 }
 0x165   : > { %1272 = vmatpush.msra.mxu1 %v382_v13  ;;  %v791_v48 = vadd.f32 %v790_v6, %v755_v42 }
 0x166   : > { %v895_v52 = vadd.f32 %v894_v33, %v893_v11  ;;  %v884_v33 = vadd.f32 %v883_v44, %v882_v38 }
 0x168   : > { %v896_v62 = vrot.slane %v895_v52, 1  ;;  %v822_v24 = vpop.f32.mrf.mxu2  ;;  %v885_v41 = vrot.slane %v884_v33, 2 }
 0x169   : > { %v857_v4 = vpop.f32.mrf.mxu3  ;;  %v823_v43 = vadd.f32 %v822_v24, %v788_v46  ;;  %v982_v46 = vpop.permute.xlu0 %981 }
 0x16a   : > { %v897_v40 = vadd.f32 %v896_v62, %v895_v52  ;;  %v855_v52 = vadd.f32 %v854_v31, %v820_v15  ;;  %v886_v16 = vadd.f32 %v885_v41, %v884_v33  ;;  %v5357_v33 = vld [vmem:[%s8961_s4 + $0x70] sm:$0xff]  ;;  %v5416_v41 = vld [vmem:[%s8959_s2 + $0x8] sm:$0xff] }
 0x16b   : > { %v858_v7 = vadd.f32 %v857_v4, %v823_v43  ;;  %v758_v22 = vpop.f32.mrf.mxu0 }
 0x16c   : > { %v913_v20 = vmul.f32 0.00024414063, %v897_v40  ;;  %v793_v18 = vpop.f32.mrf.mxu1  ;;  %v898_v5 = vsel %vm866_vm1, %v855_v52, 0.0  ;;  %v887_v42 = vrot.slane %v886_v16, 1  ;;  %v5373_v52 = vld [vmem:[%s8961_s4 + $0x68] sm:$0xff] }
 0x16d   : > { %v899_v28 = vsel %vm866_vm1, %v858_v7, 0.0  ;;  %v794_v60 = vadd.f32 %v793_v18, %v758_v22  ;;  %v5363_v22 = vld [vmem:[%s8961_s4 + $0xf0] sm:$0xff] }
 0x16e   : > { %v915_v2 = vsub.f32 %v913_v20, %v914_v26  ;;  %v900_v39 = vadd.f32 %v899_v28, %v898_v5  ;;  %v4576_v28 = vmov 4   ;;  %v5428_v5 = vld [vmem:[%s8961_s4 + $0x160] sm:$0xff] }
 0x16f   : > { %4424 = vset.pattern.permute.xlu1 %v4576_v28  ;;  %4422 = vset.pattern.permute.xlu2 %v4576_v28 }
 0x170   : > { %v825_v19 = vpop.f32.mrf.mxu2  ;;  %v916_v58 = vmax.f32 %v915_v2, 0.0  ;;  %v888_v2 = vadd.f32 %v887_v42, %v886_v16  ;;  %4423 = vset.pattern.permute.xlu0 %v4576_v28  ;;  %v5474_v16 = vld [vmem:[%s8959_s2 + $0x20] sm:$0xff]  ;;  %v9007_v42 = vmov 0  }
 0x171   : > { %v826_v11 = vadd.f32 %v825_v19, %v791_v48  ;;  %v860_v0 = vpop.f32.mrf.mxu3  ;;  %1511 = vperm.xlu0 %4423, %v5416_v41   ;;  %v5655_v28 = vld [vmem:[%s8961_s4] sm:$0xff] }
 0x172   : > { %v921_v10 = vadd.f32 1e-05, %v916_v58  ;;  %v5328_v19 = vmul.f32 0.00012207031, %v888_v2  ;;  %v9364_v2 = vld [vmem:[#allocation8_spill] sm:$0xff] }
 0x173   : > { %v861_v17 = vadd.f32 %v860_v0, %v826_v11  ;;  %v5341_v11 = vld [vmem:[%s8961_s4 + $0x78] sm:$0xff] }
 0x174   : > { %4472 = vrsqrt.f32 %v921_v10  ;;  %vm928_vm3 = vweird.f32 %v921_v10  ;;  %v5347_v0 = vld [vmem:[%s8961_s4 + $0xf8] sm:$0xff]  ;;  %v918_v7 = vmul.f32 %v5328_v19, %v5328_v19 }
 0x175   : > { %v901_v37 = vsel %vm866_vm1, %v861_v17, 0.0  ;;  %v5379_v17 = vld [vmem:[%s8961_s4 + $0xe8] sm:$0xff] }
 0x176   : > { %v902_v1 = vadd.f32 %v901_v37, %v900_v39  ;;  %v5434_v37 = vld [vmem:[%s8961_s4 + $0x1e0] sm:$0xff]  ;;  %v5452_v39 = vld [vmem:[%s8961_s4 + $0x158] sm:$0xff] }
 0x178   : > { %v828_v14 = vpop.f32.mrf.mxu2 }
 0x179   : > { %v829_v21 = vadd.f32 %v828_v14, %v794_v60  ;;  %v863_v23 = vpop.f32.mrf.mxu3  ;;  %v5410_v60 = vld [vmem:[%s8961_s4 + $0x60] sm:$0xff]  ;;  %4425 = vset.pattern.permute.xlu0 %v9007_v42 }
 0x17a   : > { %v4473_v13 = vpop.eup %4472  ;;  %v5422_v14 = vld [vmem:[%s8961_s4 + $0xe0] sm:$0xff] }
 0x17b   : > { %v864_v62 = vadd.f32 %v863_v23, %v829_v21  ;;  %v923_v24 = vmul.f32 %v4473_v13, %v921_v10  ;;  %vm929_vm2 = vweird.f32 %v4473_v13  ;;  %v5440_v21 = vld [vmem:[%s8961_s4 + $0x58] sm:$0xff]  ;;  %v5459_v23 = vld [vmem:[%s8961_s4 + $0x50] sm:$0xff] }
 0x17c   : > { %vm930_vm4 = vmor %vm928_vm3, %vm929_vm2 }
 0x17d   : > { %v903_v31 = vsel %vm866_vm1, %v864_v62, 0.0  ;;  %v924_v4 = vmul.f32 %v4473_v13, %v923_v24  ;;  %v5465_v62 = vld [vmem:[%s8961_s4 + $0xd0] sm:$0xff] }
 0x17e   : > { %v904_v36 = vadd.f32 %v903_v31, %v902_v1  ;;  %v5480_v1 = vld [vmem:[%s8959_s2 + $0x18] sm:$0xff] }
 0x17f   : > { %v925_v40 = vmul.f32 0.5, %v924_v4  ;;  %v5500_v4 = vld [vmem:[%s8961_s4 + $0x40] sm:$0xff] }
 0x180   : > { %v905_v6 = vrot.slane %v904_v36, 4 }
 0x181   : > { %v926_v38 = vsub.f32 1.5, %v925_v40 }
 0x182   : > { %v906_v20 = vadd.f32 %v905_v6, %v904_v36  ;;  %v5506_v36 = vld [vmem:[%s8961_s4 + $0xc0] sm:$0xff]  ;;  %v5548_v6 = vld [vmem:[%s8961_s4 + $0x28] sm:$0xff] }
 0x183   : > { %v927_v26 = vmul.f32 %v4473_v13, %v926_v38  ;;  %v5554_v38 = vld [vmem:[%s8961_s4 + $0xa8] sm:$0xff] }
 0x184   : > { %v907_v56 = vrot.slane %v906_v20, 2 }
 0x185   : > { %v931_v48 = vsel %vm930_vm4, %v4473_v13, %v927_v26  ;;  %v5446_v13 = vld [vmem:[%s8961_s4 + $0xd8] sm:$0xff] }
 0x186   : > { %v908_v43 = vadd.f32 %v907_v56, %v906_v20  ;;  %v5326_v44 = vmul.f32 %v982_v46, %v931_v48  ;;  %v9362_v20 = vld [vmem:[#allocation6_spill] sm:$0xff]  ;;  %v5591_v26 = vld [vmem:[%s8961_s4 + $0x18] sm:$0xff]  ;;  %v5613_v56 = vld [vmem:[%s8961_s4 + $0x10] sm:$0xff] }
 0x187   : > { %v5597_v46 = vld [vmem:[%s8961_s4 + $0x98] sm:$0xff] }
 0x188   : > { %v909_v58 = vrot.slane %v908_v43, 1  ;;  %4246 = vmatmul.msk.f32.vlgmr.msrb.gmra.mxu0 %vm866_vm1, %v5326_v44  ;;  %4252 = vmatmul.msk.f32.vlgmr.msrb.gmra.mxu1 %vm866_vm1, %v5326_v44 }
 0x189   : > { %4258 = vmatmul.msk.f32.vlgmr.msrb.gmra.mxu2 %vm866_vm1, %v5326_v44  ;;  %4264 = vmatmul.msk.f32.vlgmr.msrb.gmra.mxu3 %vm866_vm1, %v5326_v44 }
 0x18a   : > { %v910_v15 = vadd.f32 %v909_v58, %v908_v43  ;;  %3043 = vmatpush.msrb.mxu0 %v5341_v11  ;;  %3078 = vmatpush.msrb.mxu1 %v5347_v0  ;;  %v4578_v43 = vmov 1  }
 0x18b   : > { %3113 = vmatpush.msrb.mxu2 %v4727_v25  ;;  %3148 = vmatpush.msrb.mxu3 %v4739_v27  ;;  %v986_v25 = vpop.permute.xlu1 %985 }
 0x18c   : > { %v917_v10 = vmul.f32 0.00012207031, %v910_v15  ;;  %3044 = vmatpush.msrb.mxu0 %v5357_v33  ;;  %3079 = vmatpush.msrb.mxu1 %v5363_v22  ;;  %v5368_v18 = vmul.f32 %v986_v25, %v931_v48  ;;  %v5619_v48 = vld [vmem:[%s8961_s4 + $0x90] sm:$0xff]  ;;  %v5633_v25 = vld [vmem:[%s8961_s4 + $0x8] sm:$0xff] }
 0x18d   : > { %3114 = vmatpush.msrb.mxu2 %v4751_v29  ;;  %3149 = vmatpush.msrb.mxu3 %v4756_v30 }
 0x18e   : > { %v919_v27 = vsub.f32 %v917_v10, %v918_v7  ;;  %3045 = vmatpush.msrb.mxu0 %v5373_v52  ;;  %3080 = vmatpush.msrb.mxu1 %v5379_v17  ;;  %v9365_v10 = vld [vmem:[#allocation9_spill] sm:$0xff]  ;;  %v9366_v7 = vld [vmem:[#allocation10_spill] sm:$0xff] }
 0x18f   : > { %3115 = vmatpush.msrb.mxu2 %v4768_v32  ;;  %3150 = vmatpush.msrb.mxu3 %v4787_v35  ;;  %v5397_v32 = vld [vmem:[%s8959_s2 + $0x10] sm:$0xff]  ;;  %v5403_v35 = vld [vmem:[%s8959_s2] sm:$0xff] }
 0x190   : > { %v920_v29 = vmax.f32 %v919_v27, 0.0  ;;  %4247 = vmatmul.msk.f32.gmra.mxu0 %vm866_vm1, %v5368_v18  ;;  %4253 = vmatmul.msk.f32.gmra.mxu1 %vm866_vm1, %v5368_v18  ;;  %v5647_v27 = vld [vmem:[%s8961_s4 + $0x88] sm:$0xff] }
 0x191   : > { %4259 = vmatmul.msk.f32.gmra.mxu2 %vm866_vm1, %v5368_v18  ;;  %4265 = vmatmul.msk.f32.gmra.mxu3 %vm866_vm1, %v5368_v18 }
 0x192   : > { %v5392_v30 = vadd.f32 1e-05, %v920_v29  ;;  %1515 = vperm.xlu1 %4424, %v5397_v32   ;;  %1507 = vperm.xlu2 %4422, %v5403_v35   ;;  %v9367_v29 = vld [vmem:[#allocation11_spill] sm:$0xff] }
 0x193   : > { %3046 = vmatpush.msrb.mxu0 %v5410_v60  ;;  %3081 = vmatpush.msrb.mxu1 %v5422_v14 }
 0x194   : > { %4474 = vrsqrt.f32 %v5392_v30  ;;  %3116 = vmatpush.msrb.mxu2 %v5428_v5  ;;  %3151 = vmatpush.msrb.mxu3 %v5434_v37  ;;  %vm939_vm6 = vweird.f32 %v5392_v30 }
 0x195   : > { %3047 = vmatpush.msrb.mxu0 %v5440_v21  ;;  %3082 = vmatpush.msrb.mxu1 %v5446_v13 }
 0x196   : > { %3117 = vmatpush.msrb.mxu2 %v5452_v39  ;;  %3152 = vmatpush.msrb.mxu3 %v4847_v45 }
 0x197   : > { %3048 = vmatpush.msrb.mxu0 %v5459_v23  ;;  %3083 = vmatpush.msrb.mxu1 %v5465_v62 }
 0x198   : > { %3118 = vmatpush.msrb.mxu2 %v4859_v47  ;;  %3153 = vmatpush.msrb.mxu3 %v4871_v49  ;;  %v5486_v47 = vld [vmem:[%s8961_s4 + $0x48] sm:$0xff] }
 0x199   : > { %3049 = vmatpush.msrb.mxu0 %v5486_v47  ;;  %v5492_v49 = vld [vmem:[%s8961_s4 + $0xc8] sm:$0xff]  ;;  %1664 = vperm.xlu0 %4425, %v5403_v35  }
 0x19a   : > { %v4475_v24 = vpop.eup %4474  ;;  %1523 = vperm.xlu1 %4424, %v5474_v16   ;;  %1519 = vperm.xlu2 %4422, %v5480_v1  }
 0x19b   : > { %v934_v45 = vmul.f32 %v4475_v24, %v5392_v30  ;;  %3084 = vmatpush.msrb.mxu1 %v5492_v49  ;;  %3119 = vmatpush.msrb.mxu2 %v4883_v51  ;;  %v5515_v51 = vld [vmem:[%s8961_s4 + $0xb8] sm:$0xff]  ;;  %vm940_vm5 = vweird.f32 %v4475_v24  ;;  %v9368_v30 = vld [vmem:[#allocation12_spill] sm:$0xff] }
 0x19c   : > { %3154 = vmatpush.msrb.mxu3 %v4895_v53  ;;  %3050 = vmatpush.msrb.mxu0 %v5500_v4  ;;  %vm941_vm7 = vmor %vm939_vm6, %vm940_vm5 }
 0x19d   : > { %v935_v31 = vmul.f32 %v4475_v24, %v934_v45  ;;  %3085 = vmatpush.msrb.mxu1 %v5506_v36  ;;  %3120 = vmatpush.msrb.mxu2 %v4907_v55  ;;  %v1002_v45 = vpop.permute.xlu0 %1001 }
 0x19e   : > { %3155 = vmatpush.msrb.mxu3 %v4919_v57  ;;  %3051 = vmatpush.msrb.mxu0 %v4878_v50  ;;  %v5527_v50 = vld [vmem:[%s8959_s2 + $0x28] sm:$0xff]  ;;  %v990_v57 = vpop.permute.xlu2 %989 }
 0x19f   : > { %v936_v40 = vmul.f32 0.5, %v935_v31  ;;  %3086 = vmatpush.msrb.mxu1 %v5515_v51  ;;  %3121 = vmatpush.msrb.mxu2 %v4931_v59 }
 0x1a0   : > { %3156 = vmatpush.msrb.mxu3 %v4943_v61  ;;  %3052 = vmatpush.msrb.mxu0 %v4902_v54  ;;  %v5537_v54 = vld [vmem:[%s8961_s4 + $0xb0] sm:$0xff] }
 0x1a1   : > { %v937_v53 = vsub.f32 1.5, %v936_v40  ;;  %3087 = vmatpush.msrb.mxu1 %v5537_v54  ;;  %3122 = vmatpush.msrb.mxu2 %v4955_v63  ;;  %v5571_v63 = vld [vmem:[%s8961_s4 + $0x20] sm:$0xff]  ;;  %v9369_v40 = vld [vmem:[#allocation13_spill] sm:$0xff] }
 0x1a2   : > { %4426 = vset.pattern.permute.xlu1 %v9007_v42  ;;  %1527 = vperm.xlu2 %4422, %v5527_v50  }
 0x1a3   : > { %v938_v55 = vmul.f32 %v4475_v24, %v937_v53  ;;  %1668 = vperm.xlu1 %4426, %v5416_v41   ;;  %3157 = vmatpush.msrb.mxu3 %v4967_v3  ;;  %v994_v3 = vpop.permute.xlu1 %993  ;;  %v9370_v53 = vld [vmem:[#allocation14_spill] sm:$0xff] }
 0x1a4   : > { %3053 = vmatpush.msrb.mxu0 %v5548_v6  ;;  %3088 = vmatpush.msrb.mxu1 %v5554_v38 }
 0x1a5   : > { %v5532_v59 = vsel %vm941_vm7, %v4475_v24, %v938_v55  ;;  %3123 = vmatpush.msrb.mxu2 %v5001_v8  ;;  %3158 = vmatpush.msrb.mxu3 %v5008_v9  ;;  %v5580_v8 = vld [vmem:[%s8961_s4 + $0xa0] sm:$0xff]  ;;  %v1010_v55 = vmul.f32 %v5326_v44, %v5312_v34 }
 0x1a6   : > { %v5542_v61 = vmul.f32 %v990_v57, %v5532_v59  ;;  %3054 = vmatpush.msrb.mxu0 %v5571_v63  ;;  %1684 = vperm.xlu0 %4425, %v5527_v50   ;;  %v5584_v9 = vmul.f32 %v994_v3, %v5532_v59  ;;  %v998_v58 = vpop.permute.xlu2 %997  ;;  %v5661_v24 = vld [vmem:[%s8961_s4 + $0x80] sm:$0xff]  ;;  %v5667_v31 = vmul.f32 %v1002_v45, %v5532_v59  ;;  %v9009_v45 = vmov 8  }
 0x1a7   : > { %3089 = vmatpush.msrb.mxu1 %v5580_v8  ;;  %3124 = vmatpush.msrb.mxu2 %v5025_v12  ;;  %v9363_v12 = vld [vmem:[#allocation7_spill] sm:$0xff]  ;;  %v5625_v15 = vmul.f32 %v998_v58, %v5532_v59  ;;  %v1011_v3 = vmul.f32 %v5368_v18, %v5312_v34  ;;  %v4521_v34 = vld [vmem:[%s8961_s4 + $0x170] sm:$0xff] }
 0x1a8   : > { %4248 = vmatmul.msk.f32.gmra.mxu0 %vm866_vm1, %v5542_v61  ;;  %4254 = vmatmul.msk.f32.gmra.mxu1 %vm866_vm1, %v5542_v61  ;;  %v1012_v18 = vmul.f32 %v5542_v61, %v5328_v19 }
 0x1a9   : > { %4260 = vmatmul.msk.f32.gmra.mxu2 %vm866_vm1, %v5542_v61  ;;  %4266 = vmatmul.msk.f32.gmra.mxu3 %vm866_vm1, %v5542_v61 }
 0x1aa   : > { %4427 = vset.pattern.permute.xlu2 %v9007_v42  ;;  %3159 = vmatpush.msrb.mxu3 %v9362_v20  ;;  %v4520_v20 = vld [vmem:[%s8961_s4 + $0x1f8] sm:$0xff] }
 0x1ab   : > { %1676 = vperm.xlu1 %4426, %v5480_v1   ;;  %1672 = vperm.xlu2 %4427, %v5397_v32   ;;  %v1018_v57 = vpop.permute.xlu1 %1017 }
 0x1ac   : > { %3055 = vmatpush.msrb.mxu0 %v5591_v26  ;;  %3090 = vmatpush.msrb.mxu1 %v5597_v46  ;;  %v1040_v59 = vsub.f32 %v1018_v57, %v1010_v55 }
 0x1ad   : > { %3125 = vmatpush.msrb.mxu2 %v9363_v12  ;;  %3160 = vmatpush.msrb.mxu3 %v9364_v2  ;;  %v1026_v12 = vpop.permute.xlu0 %1025  ;;  %v4534_v2 = vld [vmem:[%s8961_s4 + $0x1b8] sm:$0xff] }
 0x1ae   : > { %3056 = vmatpush.msrb.mxu0 %v5613_v56  ;;  %3091 = vmatpush.msrb.mxu1 %v5619_v48  ;;  %v1022_v44 = vpop.permute.xlu2 %1021  ;;  %v1042_v61 = vsub.f32 %v1026_v12, %v1012_v18 }
 0x1af   : > { %4430 = vset.pattern.permute.xlu0 %v4578_v43  ;;  %3126 = vmatpush.msrb.mxu2 %v9365_v10  ;;  %v4537_v10 = vld [vmem:[%s8961_s4 + $0x1b0] sm:$0xff] }
 0x1b0   : > { %4249 = vmatmul.msk.f32.gmra.mxu0 %vm866_vm1, %v5584_v9  ;;  %4255 = vmatmul.msk.f32.gmra.mxu1 %vm866_vm1, %v5584_v9 }
 0x1b1   : > { %4261 = vmatmul.msk.f32.gmra.mxu2 %vm866_vm1, %v5584_v9  ;;  %4267 = vmatmul.msk.f32.gmra.mxu3 %vm866_vm1, %v5584_v9 }
 0x1b2   : > { %1852 = vperm.xlu0 %4430, %v5397_v32   ;;  %3161 = vmatpush.msrb.mxu3 %v9366_v7 }
 0x1b3   : > { %4428 = vset.pattern.permute.xlu1 %v4578_v43  ;;  %1680 = vperm.xlu2 %4427, %v5474_v16  }
 0x1b4   : > { %1844 = vperm.xlu1 %4428, %v5403_v35   ;;  %3057 = vmatpush.msrb.mxu0 %v5633_v25 }
 0x1b5   : > { %3092 = vmatpush.msrb.mxu1 %v5647_v27  ;;  %3127 = vmatpush.msrb.mxu2 %v9367_v29  ;;  %v4538_v29 = vld [vmem:[%s8961_s4 + $0x128] sm:$0xff] }
 0x1b6   : > { %3162 = vmatpush.msrb.mxu3 %v9368_v30  ;;  %3058 = vmatpush.msrb.mxu0 %v5655_v28  ;;  %v4539_v30 = vld [vmem:[%s8961_s4 + $0x1a8] sm:$0xff] }
 0x1b7   : > { %3093 = vmatpush.msrb.mxu1 %v5661_v24  ;;  %3128 = vmatpush.msrb.mxu2 %v9369_v40  ;;  %v4545_v40 = vld [vmem:[%s8961_s4 + $0x190] sm:$0xff] }
 0x1b8   : > { %4250 = vmatmul.msk.f32.gmra.mxu0 %vm866_vm1, %v5625_v15  ;;  %4256 = vmatmul.msk.f32.gmra.mxu1 %vm866_vm1, %v5625_v15 }
 0x1b9   : > { %4262 = vmatmul.msk.f32.gmra.mxu2 %vm866_vm1, %v5625_v15  ;;  %4268 = vmatmul.msk.f32.gmra.mxu3 %vm866_vm1, %v5625_v15 }
 0x1ba   : > { %3163 = vmatpush.msrb.mxu3 %v9370_v53 }
 0x1bb   : > { %4429 = vset.pattern.permute.xlu2 %v4578_v43  ;;  %v4535_v43 = vld [vmem:[%s8961_s4 + $0x30] sm:$0xff] }
 0x1bc   : > { %1856 = vperm.xlu1 %4428, %v5480_v1   ;;  %1848 = vperm.xlu2 %4429, %v5416_v41  }
 0x1c0   : > { %4251 = vmatmul.msk.f32.gmra.mxu0 %vm866_vm1, %v5667_v31  ;;  %4257 = vmatmul.msk.f32.gmra.mxu1 %vm866_vm1, %v5667_v31 }
 0x1c1   : > { %4263 = vmatmul.msk.f32.gmra.mxu2 %vm866_vm1, %v5667_v31  ;;  %4269 = vmatmul.msk.f32.gmra.mxu3 %vm866_vm1, %v5667_v31 }
 0x1c4   : > { %1864 = vperm.xlu1 %4428, %v5527_v50   ;;  %1860 = vperm.xlu2 %4429, %v5474_v16   ;;  %v4519_v50 = vld [vmem:[%s8961_s4 + $0x178] sm:$0xff] }
 0x1c8   : > { %4270 = vmatmul.msk.f32.vlgmr.msra.gmra.mxu0 %vm866_vm1, %v1040_v59  ;;  %4276 = vmatmul.msk.f32.vlgmr.msra.gmra.mxu1 %vm866_vm1, %v1040_v59 }
 0x1c9   : > { %4282 = vmatmul.msk.f32.vlgmr.msra.gmra.mxu2 %vm866_vm1, %v1040_v59  ;;  %4288 = vmatmul.msk.f32.vlgmr.msra.gmra.mxu3 %vm866_vm1, %v1040_v59 }
 0x1ca   : > { %3207 = vmatpush.msra.mxu0 %v5341_v11  ;;  %3242 = vmatpush.msra.mxu1 %v5347_v0  ;;  %v4522_v11 = vld [vmem:[%s8961_s4 + $0x1f0] sm:$0xff]  ;;  %v1041_v0 = vsub.f32 %v1022_v44, %v1011_v3 }
 0x1cb   : > { %3277 = vmatpush.msra.mxu2 %v4519_v50  ;;  %3312 = vmatpush.msra.mxu3 %v4520_v20 }
 0x1cc   : > { %3208 = vmatpush.msra.mxu0 %v5357_v33  ;;  %3243 = vmatpush.msra.mxu1 %v5363_v22  ;;  %v4523_v33 = vld [vmem:[%s8961_s4 + $0x168] sm:$0xff] }
 0x1cd   : > { %3278 = vmatpush.msra.mxu2 %v4521_v34  ;;  %3313 = vmatpush.msra.mxu3 %v4522_v11  ;;  %v4524_v22 = vld [vmem:[%s8961_s4 + $0x1e8] sm:$0xff] }
 0x1ce   : > { %3209 = vmatpush.msra.mxu0 %v5373_v52  ;;  %3244 = vmatpush.msra.mxu1 %v5379_v17  ;;  %v9011_v52 = vmov 3   ;;  %v9013_v17 = vmov 2  }
 0x1cf   : > { %3279 = vmatpush.msra.mxu2 %v4523_v33  ;;  %3314 = vmatpush.msra.mxu3 %v4524_v22 }
 0x1d0   : > { %4271 = vmatmul.msk.f32.gmra.mxu0 %vm866_vm1, %v1041_v0  ;;  %4277 = vmatmul.msk.f32.gmra.mxu1 %vm866_vm1, %v1041_v0 }
 0x1d1   : > { %4283 = vmatmul.msk.f32.gmra.mxu2 %vm866_vm1, %v1041_v0  ;;  %4289 = vmatmul.msk.f32.gmra.mxu3 %vm866_vm1, %v1041_v0 }
 0x1d2   : > { %4435 = vset.pattern.permute.xlu1 %v9011_v52  ;;  %4431 = vset.pattern.permute.xlu2 %v9013_v17 }
 0x1d3   : > { %2208 = vperm.xlu1 %4435, %v5416_v41   ;;  %2024 = vperm.xlu2 %4431, %v5403_v35  }
 0x1d4   : > { %4432 = vset.pattern.permute.xlu0 %v9011_v52  ;;  %3210 = vmatpush.msra.mxu0 %v5410_v60  ;;  %v1013_v60 = vmul.f32 %v5584_v9, %v5328_v19  ;;  %v4532_v9 = vld [vmem:[%s8961_s4 + $0x38] sm:$0xff] }
 0x1d5   : > { %2204 = vperm.xlu0 %4432, %v5403_v35   ;;  %3245 = vmatpush.msra.mxu1 %v5422_v14  ;;  %v4525_v14 = vld [vmem:[%s8961_s4 + $0x1d8] sm:$0xff] }
 0x1d6   : > { %3280 = vmatpush.msra.mxu2 %v5428_v5  ;;  %3315 = vmatpush.msra.mxu3 %v5434_v37  ;;  %v4526_v5 = vld [vmem:[%s8961_s4 + $0x150] sm:$0xff]  ;;  %v1030_v37 = vpop.permute.xlu1 %1029 }
 0x1d7   : > { %3211 = vmatpush.msra.mxu0 %v5440_v21  ;;  %3246 = vmatpush.msra.mxu1 %v5446_v13  ;;  %v4527_v21 = vld [vmem:[%s8961_s4 + $0x1d0] sm:$0xff]  ;;  %v1043_v13 = vsub.f32 %v1030_v37, %v1013_v60 }
 0x1d8   : > { %4272 = vmatmul.msk.f32.gmra.mxu0 %vm866_vm1, %v1042_v61  ;;  %4278 = vmatmul.msk.f32.gmra.mxu1 %vm866_vm1, %v1042_v61 }
 0x1d9   : > { %4284 = vmatmul.msk.f32.gmra.mxu2 %vm866_vm1, %v1042_v61  ;;  %4290 = vmatmul.msk.f32.gmra.mxu3 %vm866_vm1, %v1042_v61 }
 0x1da   : > { %3281 = vmatpush.msra.mxu2 %v5452_v39  ;;  %3316 = vmatpush.msra.mxu3 %v4525_v14  ;;  %v4528_v39 = vld [vmem:[%s8961_s4 + $0x148] sm:$0xff] }
 0x1db   : > { %2028 = vperm.xlu2 %4431, %v5416_v41   ;;  %3212 = vmatpush.msra.mxu0 %v5459_v23  ;;  %v4529_v23 = vld [vmem:[%s8961_s4 + $0x1c8] sm:$0xff] }
 0x1dc   : > { %3247 = vmatpush.msra.mxu1 %v5465_v62  ;;  %3282 = vmatpush.msra.mxu2 %v4526_v5  ;;  %v1014_v62 = vmul.f32 %v5625_v15, %v5328_v19  ;;  %v9016_v15 = vmov 6  }
 0x1dd   : > { %3317 = vmatpush.msra.mxu3 %v4527_v21  ;;  %3213 = vmatpush.msra.mxu0 %v5486_v47  ;;  %v4530_v47 = vld [vmem:[%s8961_s4 + $0x140] sm:$0xff] }
 0x1de   : > { %3248 = vmatpush.msra.mxu1 %v5492_v49  ;;  %3283 = vmatpush.msra.mxu2 %v4528_v39  ;;  %v1034_v49 = vpop.permute.xlu2 %1033  ;;  %v1038_v7 = vpop.permute.xlu1 %1037 }
 0x1df   : > { %3318 = vmatpush.msra.mxu3 %v4529_v23  ;;  %3214 = vmatpush.msra.mxu0 %v5500_v4  ;;  %v4531_v4 = vld [vmem:[%s8961_s4 + $0x1c0] sm:$0xff]  ;;  %v1044_v58 = vsub.f32 %v1034_v49, %v1014_v62  ;;  %v9380_v23 = vld [vmem:[#allocation15_spill] sm:$0xff] }
 0x1e0   : > { %4273 = vmatmul.msk.f32.gmra.mxu0 %vm866_vm1, %v1043_v13  ;;  %4279 = vmatmul.msk.f32.gmra.mxu1 %vm866_vm1, %v1043_v13 }
 0x1e1   : > { %4285 = vmatmul.msk.f32.gmra.mxu2 %vm866_vm1, %v1043_v13  ;;  %4291 = vmatmul.msk.f32.gmra.mxu3 %vm866_vm1, %v1043_v13 }
 0x1e2   : > { %3249 = vmatpush.msra.mxu1 %v5506_v36  ;;  %3284 = vmatpush.msra.mxu2 %v4530_v47  ;;  %v4533_v36 = vld [vmem:[%s8961_s4 + $0x138] sm:$0xff]  ;;  %v9381_v47 = vld [vmem:[#allocation16_spill] sm:$0xff] }
 0x1e3   : > { %3319 = vmatpush.msra.mxu3 %v4531_v4  ;;  %3215 = vmatpush.msra.mxu0 %v4532_v9 }
 0x1e4   : > { %3250 = vmatpush.msra.mxu1 %v5515_v51  ;;  %3285 = vmatpush.msra.mxu2 %v4533_v36  ;;  %v4536_v51 = vld [vmem:[%s8961_s4 + $0x130] sm:$0xff] }
 0x1e5   : > { %3320 = vmatpush.msra.mxu3 %v4534_v2  ;;  %3216 = vmatpush.msra.mxu0 %v4535_v43 }
 0x1e6   : > { %3251 = vmatpush.msra.mxu1 %v5537_v54  ;;  %3286 = vmatpush.msra.mxu2 %v4536_v51  ;;  %v1015_v54 = vmul.f32 %v5667_v31, %v5328_v19  ;;  %v4540_v19 = vld [vmem:[%s8961_s4 + $0x120] sm:$0xff]  ;;  %v4544_v31 = vld [vmem:[%s8961_s4 + $0x110] sm:$0xff] }
 0x1e7   : > { %4438 = vset.pattern.permute.xlu1 %v9016_v15  ;;  %3321 = vmatpush.msra.mxu3 %v4537_v10 }
 0x1e8   : > { %4274 = vmatmul.msk.f32.gmra.mxu0 %vm866_vm1, %v1044_v58  ;;  %4280 = vmatmul.msk.f32.gmra.mxu1 %vm866_vm1, %v1044_v58 }
 0x1e9   : > { %4286 = vmatmul.msk.f32.gmra.mxu2 %vm866_vm1, %v1044_v58  ;;  %4292 = vmatmul.msk.f32.gmra.mxu3 %vm866_vm1, %v1044_v58 }
 0x1ea   : > { %2568 = vperm.xlu1 %4438, %v5416_v41   ;;  %3217 = vmatpush.msra.mxu0 %v5548_v6  ;;  %v1045_v6 = vsub.f32 %v1038_v7, %v1015_v54 }
 0x1eb   : > { %3252 = vmatpush.msra.mxu1 %v5554_v38  ;;  %3287 = vmatpush.msra.mxu2 %v4538_v29  ;;  %v4541_v38 = vld [vmem:[%s8961_s4 + $0x1a0] sm:$0xff] }
 0x1ec   : > { %3322 = vmatpush.msra.mxu3 %v4539_v30  ;;  %3218 = vmatpush.msra.mxu0 %v5571_v63  ;;  %v9010_v63 = vmov 7  }
 0x1ed   : > { %3253 = vmatpush.msra.mxu1 %v5580_v8  ;;  %3288 = vmatpush.msra.mxu2 %v4540_v19  ;;  %v4542_v8 = vld [vmem:[%s8961_s4 + $0x118] sm:$0xff]  ;;  %v5956_v19 = vpop.permute.xlu0 %1511 }
 0x1ee   : > { %3323 = vmatpush.msra.mxu3 %v4541_v38  ;;  %3219 = vmatpush.msra.mxu0 %v5591_v26  ;;  %v4543_v26 = vld [vmem:[%s8961_s4 + $0x198] sm:$0xff]  ;;  %9384 = vst [vmem:[#allocation13_spill] sm:$0xff] %v5956_v19 }
 0x1ef   : > { %4436 = vset.pattern.permute.xlu2 %v9009_v45  ;;  %3254 = vmatpush.msra.mxu1 %v5597_v46  ;;  %v9012_v46 = vmov 5  }
 0x1f0   : > { %4275 = vmatmul.msk.f32.gmra.mxu0 %vm866_vm1, %v1045_v6  ;;  %4281 = vmatmul.msk.f32.gmra.mxu1 %vm866_vm1, %v1045_v6 }
 0x1f1   : > { %4287 = vmatmul.msk.f32.gmra.mxu2 %vm866_vm1, %v1045_v6  ;;  %4293 = vmatmul.msk.f32.gmra.mxu3 %vm866_vm1, %v1045_v6 }
 0x1f2   : > { %4441 = vset.pattern.permute.xlu1 %v9010_v63  ;;  %2924 = vperm.xlu2 %4436, %v5403_v35  }
 0x1f3   : > { %2748 = vperm.xlu1 %4441, %v5416_v41   ;;  %3289 = vmatpush.msra.mxu2 %v4542_v8 }
 0x1f4   : > { %3324 = vmatpush.msra.mxu3 %v4543_v26  ;;  %3220 = vmatpush.msra.mxu0 %v5613_v56  ;;  %v4546_v56 = vld [vmem:[%s8961_s4 + $0x108] sm:$0xff] }
 0x1f5   : > { %4433 = vset.pattern.permute.xlu0 %v9012_v46  ;;  %3255 = vmatpush.msra.mxu1 %v5619_v48  ;;  %v4547_v48 = vld [vmem:[%s8961_s4 + $0x188] sm:$0xff] }
 0x1f6   : > { %2384 = vperm.xlu0 %4433, %v5403_v35   ;;  %3290 = vmatpush.msra.mxu2 %v4544_v31 }
 0x1f7   : > { %3325 = vmatpush.msra.mxu3 %v4545_v40  ;;  %3221 = vmatpush.msra.mxu0 %v5633_v25  ;;  %v4548_v25 = vld [vmem:[%s8961_s4 + $0x100] sm:$0xff] }
 0x1f8   : > { %3256 = vmatpush.msra.mxu1 %v5647_v27  ;;  %3291 = vmatpush.msra.mxu2 %v4546_v56  ;;  %v4549_v27 = vld [vmem:[%s8961_s4 + $0x180] sm:$0xff] }
 0x1f9   : > { %3326 = vmatpush.msra.mxu3 %v4547_v48  ;;  %3222 = vmatpush.msra.mxu0 %v5655_v28  ;;  %v9014_v28 = vmov 12  }
 0x1fa   : > { %4437 = vset.pattern.permute.xlu2 %v9012_v46  ;;  %3257 = vmatpush.msra.mxu1 %v5661_v24  ;;  %v5870_v24 = vpop.permute.xlu2 %1507 }
 0x1fb   : > { %4443 = vset.pattern.permute.xlu1 %v9012_v46  ;;  %2388 = vperm.xlu2 %4437, %v5416_v41   ;;  %9371 = vst [vmem:[#allocation2_spill] sm:$0xff] %v5870_v24 }
 0x1fc   : > { %2392 = vperm.xlu1 %4443, %v5397_v32   ;;  %3292 = vmatpush.msra.mxu2 %v4548_v25 }
 0x1fd   : > { %3327 = vmatpush.msra.mxu3 %v4549_v27 }
 0x1fe   : > { %4434 = vset.pattern.permute.xlu0 %v9010_v63 }
 0x1ff   : > { %2744 = vperm.xlu0 %4434, %v5403_v35  }
 0x202   : > { %v5878_v55 = vpop.permute.xlu2 %1519 }
 0x203   : > { %4439 = vset.pattern.permute.xlu2 %v9014_v28  ;;  %9372 = vst [vmem:[#allocation3_spill] sm:$0xff] %v5878_v55 }
 0x204   : > { %4444 = vset.pattern.permute.xlu1 %v9014_v28  ;;  %2996 = vperm.xlu2 %4439, %v5403_v35   ;;  %v5897_v50 = vpop.permute.xlu1 %1515 }
 0x205   : > { %3000 = vperm.xlu1 %4444, %v5416_v41   ;;  %v1081_v53 = vpop.f32.mrf.mxu0  ;;  %v1116_v35 = vpop.f32.mrf.mxu1 }
 0x206   : > { %v1362_v62 = vmul.f32 %v1081_v53, %v9380_v23  ;;  %v1363_v49 = vmul.f32 %v1116_v35, %v9381_v47  ;;  %v9391_v23 = vld [vmem:[#allocation17_spill] sm:$0xff] }
 0x207   : > { %4440 = vset.pattern.permute.xlu0 %v9013_v17 }
 0x208   : > { %2032 = vperm.xlu0 %4440, %v5397_v32  }
 0x20a   : > { %v5891_v3 = vpop.permute.xlu2 %1527 }
 0x20b   : > { %9373 = vst [vmem:[#allocation5_spill] sm:$0xff] %v5891_v3  ;;  %v5972_v56 = vpop.permute.xlu0 %1664  ;;  %v9444_v3 = vld [vmem:[#allocation24_spill] sm:$0xff] }
 0x20c   : > { %4442 = vset.pattern.permute.xlu2 %v9011_v52  ;;  %v5895_v44 = vpop.f32.mrf.mxu2  ;;  %v5918_v22 = vpop.permute.xlu1 %1523  ;;  %9387 = vst [vmem:[#allocation16_spill] sm:$0xff] %v5972_v56 }
 0x20d   : > { %4446 = vset.pattern.permute.xlu1 %v9010_v63  ;;  %2212 = vperm.xlu2 %4442, %v5397_v32   ;;  %v5884_v57 = vpop.f32.mrf.mxu0  ;;  %v5886_v59 = vpop.f32.mrf.mxu1  ;;  %9375 = vst [vmem:[#allocation6_spill] sm:$0xff] %v5918_v22 }
 0x20e   : > { %2752 = vperm.xlu1 %4446, %v5397_v32  }
 0x210   : > { %2036 = vperm.xlu0 %4440, %v5480_v1  }
 0x212   : > { %v5905_v34 = vpop.permute.xlu2 %1672 }
 0x213   : > { %9374 = vst [vmem:[#allocation4_spill] sm:$0xff] %v5905_v34 }
 0x214   : > { %v5912_v11 = vpop.f32.mrf.mxu2 }
 0x215   : > { %2216 = vperm.xlu2 %4442, %v5480_v1   ;;  %v5932_v60 = vpop.permute.xlu1 %1668 }
 0x216   : > { %4447 = vset.pattern.permute.xlu1 %v9012_v46  ;;  %9377 = vst [vmem:[#allocation8_spill] sm:$0xff] %v5932_v60 }
 0x217   : > { %2396 = vperm.xlu1 %4447, %v5480_v1  }
 0x218   : > { %4445 = vset.pattern.permute.xlu0 %v9009_v45 }
 0x219   : > { %2928 = vperm.xlu0 %4445, %v5416_v41  }
 0x21a   : > { %v5922_v18 = vpop.permute.xlu2 %1680 }
 0x21b   : > { %9376 = vst [vmem:[#allocation7_spill] sm:$0xff] %v5922_v18 }
 0x21d   : > { %4450 = vset.pattern.permute.xlu2 %v9010_v63  ;;  %v5944_v39 = vpop.permute.xlu1 %1676 }
 0x21e   : > { %2756 = vperm.xlu2 %4450, %v5480_v1   ;;  %9379 = vst [vmem:[#allocation10_spill] sm:$0xff] %v5944_v39  ;;  %v6433_v39 = vld [vmem:[%s8960_s3] ss:$8 sm:$0xf] }
 0x21f   : > { %4448 = vset.pattern.permute.xlu1 %v9014_v28 }
 0x220   : > { %3004 = vperm.xlu1 %4448, %v5397_v32  }
 0x221   : > { %2932 = vperm.xlu0 %4445, %v5397_v32   ;;  %v5910_v32 = vpop.f32.mrf.mxu3 }
 0x222   : > { %v5936_v5 = vpop.permute.xlu2 %1848 }
 0x223   : > { %9378 = vst [vmem:[#allocation9_spill] sm:$0xff] %v5936_v5 }
 0x225   : > { %v5899_v41 = vpop.f32.mrf.mxu0  ;;  %v5901_v20 = vpop.f32.mrf.mxu1 }
 0x226   : > { %4451 = vset.pattern.permute.xlu2 %v9011_v52  ;;  %v5954_v30 = vpop.permute.xlu1 %1844  ;;  %v9408_v52 = vld [vmem:[#allocation20_spill] sm:$0xff] }
 0x227   : > { %2220 = vperm.xlu2 %4451, %v5474_v16   ;;  %9383 = vst [vmem:[#allocation12_spill] sm:$0xff] %v5954_v30 }
 0x228   : > { %4449 = vset.pattern.permute.xlu1 %v9013_v17 }
 0x229   : > { %2040 = vperm.xlu1 %4449, %v5474_v16   ;;  %2936 = vperm.xlu0 %4445, %v5480_v1   ;;  %v5924_v12 = vpop.f32.mrf.mxu3 }
 0x22a   : > { %v5950_v58 = vpop.permute.xlu2 %1860 }
 0x22b   : > { %9382 = vst [vmem:[#allocation11_spill] sm:$0xff] %v5950_v58 }
 0x22c   : > { %v5926_v16 = vpop.f32.mrf.mxu2 }
 0x22d   : > { %v5914_v0 = vpop.f32.mrf.mxu0  ;;  %v5916_v33 = vpop.f32.mrf.mxu1 }
 0x22e   : > { %v5976_v25 = vpop.permute.xlu1 %1856 }
 0x22f   : > { %4455 = vset.pattern.permute.xlu2 %v9010_v63  ;;  %9389 = vst [vmem:[#allocation40_spill] sm:$0xff] %v5976_v25 }
 0x231   : > { %4452 = vset.pattern.permute.xlu1 %v9012_v46  ;;  %v5934_v14 = vpop.f32.mrf.mxu3  ;;  %v1367_v46 = vmul.f32 %v5886_v59, %v9408_v52 }
 0x232   : > { %v5966_v26 = vpop.permute.xlu2 %2024 }
 0x233   : > { %9386 = vst [vmem:[#allocation15_spill] sm:$0xff] %v5966_v26 }
 0x234   : > { %v5942_v13 = vpop.f32.mrf.mxu2 }
 0x235   : > { %v5928_v1 = vpop.f32.mrf.mxu0  ;;  %v5930_v61 = vpop.f32.mrf.mxu1 }
 0x239   : > { %v5948_v36 = vpop.f32.mrf.mxu3 }
 0x23a   : > { %v5986_v53 = vpop.permute.xlu2 %2028 }
 0x23b   : > { %9390 = vst [vmem:[#allocation41_spill] sm:$0xff] %v5986_v53 }
 0x23c   : > { %v5952_v51 = vpop.f32.mrf.mxu2 }
 0x23d   : > { %v5938_v37 = vpop.f32.mrf.mxu0  ;;  %v5940_v21 = vpop.f32.mrf.mxu1 }
 0x241   : > { %v5960_v8 = vpop.f32.mrf.mxu3 }
 0x244   : > { %v5970_v31 = vpop.f32.mrf.mxu2 }
 0x245   : > { %v1239_v4 = vpop.f32.mrf.mxu0  ;;  %v1274_v9 = vpop.f32.mrf.mxu1 }
 0x246   : > { %v1386_v2 = vadd.f32 %v1362_v62, %v1239_v4  ;;  %v1387_v43 = vadd.f32 %v1363_v49, %v1274_v9  ;;  %v1364_v62 = vmul.f32 %v5895_v44, %v9391_v23  ;;  %v5990_v49 = vpop.permute.xlu0 %1684  ;;  %v5992_v4 = vpop.permute.xlu1 %1864  ;;  %v9395_v44 = vld [vmem:[#allocation18_spill] sm:$0xff] }
 0x247   : > { %9392 = vst [vmem:[#allocation17_spill] sm:$0xff] %v5990_v49 }
 0x248   : > { %v1410_v10 = vadd.f32 3.0, %v1386_v2  ;;  %v1411_v7 = vadd.f32 3.0, %v1387_v43  ;;  %9393 = vst [vmem:[#allocation42_spill] sm:$0xff] %v5992_v4  ;;  %v9423_v4 = vld [vmem:[#allocation21_spill] sm:$0xff] }
 0x249   : > { %v5984_v27 = vpop.f32.mrf.mxu3 }
 0x24a   : > { %v1434_v54 = vmax.f32 %v1410_v10, 0.0  ;;  %v1435_v38 = vmax.f32 %v1411_v7, 0.0  ;;  %v1365_v10 = vmul.f32 %v5910_v32, %v9395_v44 }
 0x24c   : > { %v1458_v29 = vmin.f32 %v1434_v54, 6.0  ;;  %v1459_v40 = vmin.f32 %v1435_v38, 6.0  ;;  %v1309_v35 = vpop.f32.mrf.mxu2 }
 0x24d   : > { %v1388_v47 = vadd.f32 %v1364_v62, %v1309_v35  ;;  %v1277_v63 = vpop.f32.mrf.mxu1 }
 0x24e   : > { %v5958_v6 = vmul.f32 %v1458_v29, %v1386_v2  ;;  %v5974_v48 = vmul.f32 %v1459_v40, %v1387_v43  ;;  %v6000_v43 = vpop.permute.xlu2 %2924  ;;  %v6008_v29 = vpop.permute.xlu1 %2208 }
 0x24f   : > { %v1412_v9 = vadd.f32 3.0, %v1388_v47  ;;  %9394 = vst [vmem:[#allocation43_spill] sm:$0xff] %v6000_v43  ;;  %v6012_v38 = vpop.permute.xlu0 %1852 }
 0x250   : > { %9385 = vst [vmem:[#allocation14_spill] sm:$0xff] %v5958_v6  ;;  %1915 = vrot.lane.b32.xlu2 %v5958_v6, %s4586_s25  ;;  %1735 = vrot.lane.b32.xlu1 %v5958_v6, %s4587_s26 }
 0x251   : > { %1554 = vrot.lane.b32.xlu0 %v5958_v6, %s4588_s29  ;;  %9388 = vst [vmem:[#allocation39_spill] sm:$0xff] %v5974_v48  ;;  %v1344_v2 = vpop.f32.mrf.mxu3  ;;  %v1436_v54 = vmax.f32 %v1412_v9, 0.0 }
 0x252   : > { %v1389_v7 = vadd.f32 %v1365_v10, %v1344_v2  ;;  %9396 = vst [vmem:[#allocation18_spill] sm:$0xff] %v6008_v29 }
 0x253   : > { %9397 = vst [vmem:[#allocation44_spill] sm:$0xff] %v6012_v38  ;;  %v1460_v40 = vmin.f32 %v1436_v54, 6.0  ;;  %v1242_v54 = vpop.f32.mrf.mxu0 }
 0x254   : > { %v1413_v35 = vadd.f32 3.0, %v1389_v7  ;;  %v1312_v49 = vpop.f32.mrf.mxu2 }
 0x255   : > { %v6016_v23 = vmul.f32 %v1460_v40, %v1388_v47 }
 0x256   : > { %v6014_v32 = vpop.permute.xlu2 %2388  ;;  %v1437_v62 = vmax.f32 %v1413_v35, 0.0  ;;  %v9405_v35 = vld [vmem:[#allocation19_spill] sm:$0xff] }
 0x257   : > { %9398 = vst [vmem:[#allocation45_spill] sm:$0xff] %v6014_v32  ;;  %v6026_v44 = vpop.permute.xlu0 %2204 }
 0x258   : > { %1927 = vrot.lane.b32.xlu2 %v5974_v48, %s4586_s25  ;;  %1747 = vrot.lane.b32.xlu1 %v5974_v48, %s4587_s26  ;;  %9399 = vst [vmem:[#allocation46_spill] sm:$0xff] %v6016_v23  ;;  %v1461_v2 = vmin.f32 %v1437_v62, 6.0  ;;  %v1366_v62 = vmul.f32 %v5884_v57, %v9405_v35 }
 0x259   : > { %1566 = vrot.lane.b32.xlu0 %v5974_v48, %s4588_s29  ;;  %9401 = vst [vmem:[#allocation48_spill] sm:$0xff] %v6026_v44 }
 0x25a   : > { %v6028_v10 = vmul.f32 %v1461_v2, %v1389_v7  ;;  %v1390_v7 = vadd.f32 %v1366_v62, %v1242_v54  ;;  %v1391_v54 = vadd.f32 %v1367_v46, %v1277_v63 }
 0x25c   : > { %v6024_v9 = vpop.permute.xlu1 %2568  ;;  %9402 = vst [vmem:[#allocation49_spill] sm:$0xff] %v6028_v10  ;;  %v1414_v45 = vadd.f32 3.0, %v1390_v7  ;;  %v1415_v28 = vadd.f32 3.0, %v1391_v54 }
 0x25d   : > { %9400 = vst [vmem:[#allocation47_spill] sm:$0xff] %v6024_v9 }
 0x25e   : > { %v6034_v47 = vpop.permute.xlu2 %2996  ;;  %v1438_v35 = vmax.f32 %v1414_v45, 0.0  ;;  %v1439_v59 = vmax.f32 %v1415_v28, 0.0 }
 0x25f   : > { %9403 = vst [vmem:[#allocation50_spill] sm:$0xff] %v6034_v47 }
 0x260   : > { %2275 = vrot.lane.b32.xlu2 %v5958_v6, %s4589_s30  ;;  %2095 = vrot.lane.b32.xlu1 %v5958_v6, %s4590_s9  ;;  %v1462_v17 = vmin.f32 %v1438_v35, 6.0  ;;  %v1463_v46 = vmin.f32 %v1439_v59, 6.0 }
 0x261   : > { %2107 = vrot.lane.b32.xlu0 %v5974_v48, %s4590_s9 }
 0x262   : > { %v6066_v52 = vmul.f32 %v1462_v17, %v1390_v7  ;;  %v6080_v47 = vmul.f32 %v1463_v46, %v1391_v54 }
 0x264   : > { %9412 = vst [vmem:[#allocation55_spill] sm:$0xff] %v6066_v52 }
 0x265   : > { %v6038_v40 = vpop.permute.xlu1 %2748  ;;  %9416 = vst [vmem:[#allocation59_spill] sm:$0xff] %v6080_v47 }
 0x266   : > { %9404 = vst [vmem:[#allocation51_spill] sm:$0xff] %v6038_v40 }
 0x267   : > { %v6050_v2 = vpop.permute.xlu2 %2212 }
 0x268   : > { %2455 = vrot.lane.b32.xlu2 %v5958_v6, %s4591_s10  ;;  %2287 = vrot.lane.b32.xlu1 %v5974_v48, %s4589_s30  ;;  %v6042_v42 = vpop.permute.xlu0 %2384  ;;  %9407 = vst [vmem:[#allocation52_spill] sm:$0xff] %v6050_v2 }
 0x269   : > { %2815 = vrot.lane.b32.xlu0 %v5958_v6, %s4592_s11  ;;  %9406 = vst [vmem:[#allocation19_spill] sm:$0xff] %v6042_v42 }
 0x26e   : > { %v6054_v57 = vpop.permute.xlu1 %2392 }
 0x26f   : > { %9409 = vst [vmem:[#allocation20_spill] sm:$0xff] %v6054_v57  ;;  %v6064_v15 = vpop.permute.xlu2 %2216 }
 0x270   : > { %2635 = vrot.lane.b32.xlu2 %v5958_v6, %s4593_s12  ;;  %2467 = vrot.lane.b32.xlu1 %v5974_v48, %s4591_s10  ;;  %9411 = vst [vmem:[#allocation54_spill] sm:$0xff] %v6064_v15 }
 0x271   : > { %1578 = vrot.lane.b32.xlu0 %v6016_v23, %s4588_s29  ;;  %v6056_v62 = vpop.permute.xlu0 %2744 }
 0x272   : > { %9410 = vst [vmem:[#allocation53_spill] sm:$0xff] %v6056_v62 }
 0x277   : > { %v6072_v45 = vpop.permute.xlu1 %3000 }
 0x278   : > { %2647 = vrot.lane.b32.xlu2 %v5974_v48, %s4593_s12  ;;  %2827 = vrot.lane.b32.xlu1 %v5974_v48, %s4592_s11  ;;  %9413 = vst [vmem:[#allocation56_spill] sm:$0xff] %v6072_v45  ;;  %v6078_v35 = vpop.permute.xlu2 %2756 }
 0x279   : > { %1590 = vrot.lane.b32.xlu0 %v6028_v10, %s4588_s29  ;;  %9415 = vst [vmem:[#allocation58_spill] sm:$0xff] %v6078_v35  ;;  %v1368_v35 = vmul.f32 %v5912_v11, %v9423_v4 }
 0x27a   : > { %v6076_v63 = vpop.permute.xlu0 %2032 }
 0x27b   : > { %9414 = vst [vmem:[#allocation57_spill] sm:$0xff] %v6076_v63 }
 0x280   : > { %1939 = vrot.lane.b32.xlu2 %v6016_v23, %s4586_s25  ;;  %1759 = vrot.lane.b32.xlu1 %v6016_v23, %s4587_s26  ;;  %v6088_v17 = vpop.permute.xlu1 %2752 }
 0x281   : > { %2131 = vrot.lane.b32.xlu0 %v6028_v10, %s4590_s9  ;;  %9417 = vst [vmem:[#allocation60_spill] sm:$0xff] %v6088_v17  ;;  %v6096_v7 = vpop.permute.xlu2 %2220 }
 0x282   : > { %v6090_v28 = vpop.permute.xlu0 %2036  ;;  %9419 = vst [vmem:[#allocation62_spill] sm:$0xff] %v6096_v7  ;;  %v1392_v7 = vadd.f32 %v1368_v35, %v1312_v49 }
 0x283   : > { %9418 = vst [vmem:[#allocation61_spill] sm:$0xff] %v6090_v28 }
 0x284   : > { %v1416_v18 = vadd.f32 3.0, %v1392_v7 }
 0x286   : > { %v1440_v49 = vmax.f32 %v1416_v18, 0.0 }
 0x288   : > { %1951 = vrot.lane.b32.xlu2 %v6028_v10, %s4586_s25  ;;  %1771 = vrot.lane.b32.xlu1 %v6028_v10, %s4587_s26 }
 0x289   : > { %2839 = vrot.lane.b32.xlu0 %v6016_v23, %s4592_s11  ;;  %v6100_v54 = vpop.permute.xlu1 %2396 }
 0x28a   : > { %9420 = vst [vmem:[#allocation63_spill] sm:$0xff] %v6100_v54  ;;  %v9427_v54 = vld [vmem:[#allocation22_spill] sm:$0xff] }
 0x28b   : > { %v6102_v59 = vpop.permute.xlu0 %2928  ;;  %v1369_v11 = vmul.f32 %v5924_v12, %v9427_v54 }
 0x28c   : > { %9421 = vst [vmem:[#allocation64_spill] sm:$0xff] %v6102_v59  ;;  %v1347_v59 = vpop.f32.mrf.mxu3 }
 0x28d   : > { %v1393_v4 = vadd.f32 %v1369_v11, %v1347_v59 }
 0x28f   : > { %v1417_v43 = vadd.f32 3.0, %v1393_v4 }
 0x290   : > { %2311 = vrot.lane.b32.xlu2 %v6028_v10, %s4589_s30  ;;  %2119 = vrot.lane.b32.xlu1 %v6016_v23, %s4590_s9 }
 0x291   : > { %1917 = vrot.lane.b32.xlu0 %v6066_v52, %s4586_s25  ;;  %v1441_v18 = vmax.f32 %v1417_v43, 0.0 }
 0x292   : > { %v6114_v17 = vpop.permute.xlu1 %3004 }
 0x293   : > { %9424 = vst [vmem:[#allocation21_spill] sm:$0xff] %v6114_v17  ;;  %v6116_v58 = vpop.permute.xlu0 %2932  ;;  %v1465_v54 = vmin.f32 %v1441_v18, 6.0 }
 0x294   : > { %9425 = vst [vmem:[#allocation66_spill] sm:$0xff] %v6116_v58  ;;  %v1464_v58 = vmin.f32 %v1440_v49, 6.0 }
 0x296   : > { %v6140_v12 = vmul.f32 %v1464_v58, %v1392_v7 }
 0x298   : > { %2491 = vrot.lane.b32.xlu2 %v6028_v10, %s4591_s10  ;;  %2299 = vrot.lane.b32.xlu1 %v6016_v23, %s4589_s30 }
 0x299   : > { %1929 = vrot.lane.b32.xlu0 %v6080_v47, %s4586_s25 }
 0x29b   : > { %v6132_v35 = vpop.permute.xlu1 %2040  ;;  %v6136_v17 = vpop.permute.xlu0 %2936 }
 0x29c   : > { %9428 = vst [vmem:[#allocation22_spill] sm:$0xff] %v6132_v35  ;;  %v1245_v35 = vpop.f32.mrf.mxu0 }
 0x29d   : > { %9429 = vst [vmem:[#allocation68_spill] sm:$0xff] %v6136_v17  ;;  %v6154_v17 = vmul.f32 %v1465_v54, %v1393_v4 }
 0x2a0   : > { %2671 = vrot.lane.b32.xlu2 %v6028_v10, %s4593_s12  ;;  %2479 = vrot.lane.b32.xlu1 %v6016_v23, %s4591_s10 }
 0x2a1   : > { %2097 = vrot.lane.b32.xlu0 %v6066_v52, %s4590_s9 }
 0x2a8   : > { %2659 = vrot.lane.b32.xlu1 %v6016_v23, %s4593_s12  ;;  %1737 = vrot.lane.b32.xlu2 %v6066_v52, %s4587_s26  ;;  %v9491_v23 = vld [vmem:[#allocation30_spill] sm:$0xff] }
 0x2a9   : > { %2289 = vrot.lane.b32.xlu0 %v6080_v47, %s4589_s30 }
 0x2aa   : > { %v6110_v46 = vpop.permute.xlu2 %1915 }
 0x2ab   : > { %9422 = vst [vmem:[#allocation65_spill] sm:$0xff] %v6110_v46 }
 0x2b0   : > { %2851 = vrot.lane.b32.xlu1 %v6028_v10, %s4592_s11  ;;  %1749 = vrot.lane.b32.xlu2 %v6080_v47, %s4587_s26 }
 0x2b1   : > { %2637 = vrot.lane.b32.xlu0 %v6066_v52, %s4593_s12 }
 0x2b2   : > { %v6124_v45 = vpop.permute.xlu2 %1927 }
 0x2b3   : > { %9426 = vst [vmem:[#allocation67_spill] sm:$0xff] %v6124_v45 }
 0x2b8   : > { %2469 = vrot.lane.b32.xlu2 %v6080_v47, %s4591_s10  ;;  %1556 = vrot.lane.b32.xlu1 %v6066_v52, %s4588_s29 }
 0x2b9   : > { %2649 = vrot.lane.b32.xlu0 %v6080_v47, %s4593_s12 }
 0x2ba   : > { %v6138_v42 = vpop.permute.xlu2 %2275 }
 0x2bb   : > { %9430 = vst [vmem:[#allocation69_spill] sm:$0xff] %v6138_v42 }
 0x2c0   : > { %1761 = vrot.lane.b32.xlu2 %v6140_v12, %s4587_s26  ;;  %1568 = vrot.lane.b32.xlu1 %v6080_v47, %s4588_s29 }
 0x2c1   : > { %2829 = vrot.lane.b32.xlu0 %v6080_v47, %s4592_s11 }
 0x2c2   : > { %v6148_v59 = vpop.permute.xlu2 %2455  ;;  %v6150_v11 = vpop.permute.xlu1 %1735 }
 0x2c3   : > { %9431 = vst [vmem:[#allocation70_spill] sm:$0xff] %v6148_v59  ;;  %v6152_v49 = vpop.permute.xlu0 %1554  ;;  %v9440_v59 = vld [vmem:[#allocation23_spill] sm:$0xff] }
 0x2c4   : > { %9432 = vst [vmem:[#allocation71_spill] sm:$0xff] %v6150_v11  ;;  %v1370_v62 = vmul.f32 %v5899_v41, %v9440_v59  ;;  %v1371_v41 = vmul.f32 %v5901_v20, %v9444_v3 }
 0x2c5   : > { %9433 = vst [vmem:[#allocation72_spill] sm:$0xff] %v6152_v49 }
 0x2c6   : > { %v1394_v44 = vadd.f32 %v1370_v62, %v1245_v35 }
 0x2c8   : > { %1773 = vrot.lane.b32.xlu2 %v6154_v17, %s4587_s26  ;;  %2109 = vrot.lane.b32.xlu1 %v6080_v47, %s4590_s9  ;;  %v1418_v26 = vadd.f32 3.0, %v1394_v44 }
 0x2c9   : > { %1941 = vrot.lane.b32.xlu0 %v6140_v12, %s4586_s25 }
 0x2ca   : > { %v6162_v58 = vpop.permute.xlu2 %2635  ;;  %v6164_v43 = vpop.permute.xlu1 %1747  ;;  %v1442_v62 = vmax.f32 %v1418_v26, 0.0 }
 0x2cb   : > { %9434 = vst [vmem:[#allocation73_spill] sm:$0xff] %v6162_v58  ;;  %v6166_v7 = vpop.permute.xlu0 %1566 }
 0x2cc   : > { %9435 = vst [vmem:[#allocation74_spill] sm:$0xff] %v6164_v43 }
 0x2cd   : > { %9436 = vst [vmem:[#allocation75_spill] sm:$0xff] %v6166_v7 }
 0x2d0   : > { %2121 = vrot.lane.b32.xlu2 %v6140_v12, %s4590_s9  ;;  %2277 = vrot.lane.b32.xlu1 %v6066_v52, %s4589_s30 }
 0x2d1   : > { %1953 = vrot.lane.b32.xlu0 %v6154_v17, %s4586_s25 }
 0x2d2   : > { %v6174_v4 = vpop.permute.xlu2 %2647  ;;  %v6176_v18 = vpop.permute.xlu1 %2095 }
 0x2d3   : > { %9437 = vst [vmem:[#allocation76_spill] sm:$0xff] %v6174_v4  ;;  %v6178_v54 = vpop.permute.xlu0 %2107  ;;  %v1280_v4 = vpop.f32.mrf.mxu1 }
 0x2d4   : > { %9438 = vst [vmem:[#allocation77_spill] sm:$0xff] %v6176_v18  ;;  %v1395_v35 = vadd.f32 %v1371_v41, %v1280_v4 }
 0x2d5   : > { %9439 = vst [vmem:[#allocation78_spill] sm:$0xff] %v6178_v54  ;;  %v9468_v54 = vld [vmem:[#allocation26_spill] sm:$0xff] }
 0x2d8   : > { %2301 = vrot.lane.b32.xlu2 %v6140_v12, %s4589_s30  ;;  %2457 = vrot.lane.b32.xlu1 %v6066_v52, %s4591_s10 }
 0x2d9   : > { %2493 = vrot.lane.b32.xlu0 %v6154_v17, %s4591_s10 }
 0x2da   : > { %v6188_v42 = vpop.permute.xlu2 %1939  ;;  %v6190_v30 = vpop.permute.xlu1 %2287 }
 0x2db   : > { %9441 = vst [vmem:[#allocation23_spill] sm:$0xff] %v6188_v42  ;;  %v6192_v58 = vpop.permute.xlu0 %2815  ;;  %v1419_v42 = vadd.f32 3.0, %v1395_v35 }
 0x2dc   : > { %9442 = vst [vmem:[#allocation79_spill] sm:$0xff] %v6190_v30 }
 0x2dd   : > { %9443 = vst [vmem:[#allocation80_spill] sm:$0xff] %v6192_v58  ;;  %v1466_v58 = vmin.f32 %v1442_v62, 6.0  ;;  %v1443_v20 = vmax.f32 %v1419_v42, 0.0 }
 0x2df   : > { %v6208_v3 = vmul.f32 %v1466_v58, %v1394_v44  ;;  %v1467_v41 = vmin.f32 %v1443_v20, 6.0 }
 0x2e0   : > { %2481 = vrot.lane.b32.xlu2 %v6140_v12, %s4591_s10  ;;  %2817 = vrot.lane.b32.xlu1 %v6066_v52, %s4592_s11 }
 0x2e1   : > { %2673 = vrot.lane.b32.xlu0 %v6154_v17, %s4593_s12  ;;  %9448 = vst [vmem:[#allocation83_spill] sm:$0xff] %v6208_v3 }
 0x2e2   : > { %v6202_v59 = vpop.permute.xlu2 %1951  ;;  %v6204_v30 = vpop.permute.xlu1 %2467 }
 0x2e3   : > { %9445 = vst [vmem:[#allocation24_spill] sm:$0xff] %v6202_v59  ;;  %v6206_v18 = vpop.permute.xlu0 %1578 }
 0x2e4   : > { %9446 = vst [vmem:[#allocation81_spill] sm:$0xff] %v6204_v30  ;;  %v6222_v30 = vmul.f32 %v1467_v41, %v1395_v35 }
 0x2e5   : > { %9447 = vst [vmem:[#allocation82_spill] sm:$0xff] %v6206_v18 }
 0x2e8   : > { %2661 = vrot.lane.b32.xlu2 %v6140_v12, %s4593_s12  ;;  %1580 = vrot.lane.b32.xlu1 %v6140_v12, %s4588_s29 }
 0x2e9   : > { %1739 = vrot.lane.b32.xlu0 %v6208_v3, %s4587_s26 }
 0x2ea   : > { %v6216_v26 = vpop.permute.xlu2 %2311  ;;  %v6218_v4 = vpop.permute.xlu1 %2827 }
 0x2eb   : > { %9449 = vst [vmem:[#allocation84_spill] sm:$0xff] %v6216_v26  ;;  %v6220_v62 = vpop.permute.xlu0 %1590 }
 0x2ec   : > { %9450 = vst [vmem:[#allocation85_spill] sm:$0xff] %v6218_v4 }
 0x2ed   : > { %9451 = vst [vmem:[#allocation86_spill] sm:$0xff] %v6220_v62 }
 0x2f0   : > { %2853 = vrot.lane.b32.xlu2 %v6154_v17, %s4592_s11  ;;  %1592 = vrot.lane.b32.xlu1 %v6154_v17, %s4588_s29 }
 0x2f1   : > { %1751 = vrot.lane.b32.xlu0 %v6222_v30, %s4587_s26 }
 0x2f2   : > { %v6230_v42 = vpop.permute.xlu2 %2491  ;;  %v6232_v44 = vpop.permute.xlu1 %1759 }
 0x2f3   : > { %9452 = vst [vmem:[#allocation87_spill] sm:$0xff] %v6230_v42  ;;  %v6234_v58 = vpop.permute.xlu0 %2131 }
 0x2f4   : > { %9453 = vst [vmem:[#allocation88_spill] sm:$0xff] %v6232_v44  ;;  %v1350_v44 = vpop.f32.mrf.mxu3 }
 0x2f5   : > { %9454 = vst [vmem:[#allocation89_spill] sm:$0xff] %v6234_v58 }
 0x2f8   : > { %2133 = vrot.lane.b32.xlu1 %v6154_v17, %s4590_s9  ;;  %1558 = vrot.lane.b32.xlu2 %v6208_v3, %s4588_s29 }
 0x2f9   : > { %2111 = vrot.lane.b32.xlu0 %v6222_v30, %s4590_s9 }
 0x2fa   : > { %v6242_v35 = vpop.permute.xlu2 %2671  ;;  %v6244_v20 = vpop.permute.xlu1 %1771 }
 0x2fb   : > { %9455 = vst [vmem:[#allocation90_spill] sm:$0xff] %v6242_v35  ;;  %v6246_v41 = vpop.permute.xlu0 %2839 }
 0x2fc   : > { %9456 = vst [vmem:[#allocation91_spill] sm:$0xff] %v6244_v20  ;;  %v1315_v20 = vpop.f32.mrf.mxu2  ;;  %v1353_v6 = vpop.f32.mrf.mxu3 }
 0x2fd   : > { %9457 = vst [vmem:[#allocation92_spill] sm:$0xff] %v6246_v41 }
 0x300   : > { %2313 = vrot.lane.b32.xlu1 %v6154_v17, %s4589_s30  ;;  %1570 = vrot.lane.b32.xlu2 %v6222_v30, %s4588_s29 }
 0x301   : > { %2459 = vrot.lane.b32.xlu0 %v6208_v3, %s4591_s10 }
 0x302   : > { %v6254_v42 = vpop.permute.xlu1 %2119  ;;  %v6256_v58 = vpop.permute.xlu2 %1737 }
 0x303   : > { %9458 = vst [vmem:[#allocation93_spill] sm:$0xff] %v6254_v42  ;;  %v6258_v4 = vpop.permute.xlu0 %1917  ;;  %v9464_v42 = vld [vmem:[#allocation25_spill] sm:$0xff] }
 0x304   : > { %9459 = vst [vmem:[#allocation94_spill] sm:$0xff] %v6256_v58  ;;  %v1372_v58 = vmul.f32 %v5926_v16, %v9464_v42  ;;  %v1373_v16 = vmul.f32 %v5934_v14, %v9468_v54  ;;  %v1248_v14 = vpop.f32.mrf.mxu0  ;;  %v9471_v54 = vld [vmem:[#allocation27_spill] sm:$0xff] }
 0x305   : > { %9460 = vst [vmem:[#allocation95_spill] sm:$0xff] %v6258_v4 }
 0x306   : > { %v1396_v4 = vadd.f32 %v1372_v58, %v1315_v20  ;;  %v1397_v58 = vadd.f32 %v1373_v16, %v1350_v44 }
 0x308   : > { %2841 = vrot.lane.b32.xlu1 %v6140_v12, %s4592_s11  ;;  %2279 = vrot.lane.b32.xlu2 %v6208_v3, %s4589_s30  ;;  %v1420_v62 = vadd.f32 3.0, %v1396_v4 }
 0x309   : > { %2639 = vrot.lane.b32.xlu0 %v6208_v3, %s4593_s12 }
 0x30a   : > { %v6266_v41 = vpop.permute.xlu1 %2299  ;;  %v6268_v35 = vpop.permute.xlu2 %1749  ;;  %v1444_v42 = vmax.f32 %v1420_v62, 0.0  ;;  %v1374_v62 = vmul.f32 %v5914_v0, %v9471_v54 }
 0x30b   : > { %9461 = vst [vmem:[#allocation96_spill] sm:$0xff] %v6266_v41  ;;  %v6270_v26 = vpop.permute.xlu0 %1929 }
 0x30c   : > { %9462 = vst [vmem:[#allocation97_spill] sm:$0xff] %v6268_v35  ;;  %v1468_v20 = vmin.f32 %v1444_v42, 6.0  ;;  %v1398_v56 = vadd.f32 %v1374_v62, %v1248_v14 }
 0x30d   : > { %9463 = vst [vmem:[#allocation98_spill] sm:$0xff] %v6270_v26 }
 0x30e   : > { %v6302_v44 = vmul.f32 %v1468_v20, %v1396_v4  ;;  %v1422_v47 = vadd.f32 3.0, %v1398_v56  ;;  %v1283_v4 = vpop.f32.mrf.mxu1 }
 0x310   : > { %1919 = vrot.lane.b32.xlu1 %v6208_v3, %s4586_s25  ;;  %2291 = vrot.lane.b32.xlu2 %v6222_v30, %s4589_s30  ;;  %9472 = vst [vmem:[#allocation27_spill] sm:$0xff] %v6302_v44  ;;  %v1446_v54 = vmax.f32 %v1422_v47, 0.0 }
 0x311   : > { %2651 = vrot.lane.b32.xlu0 %v6222_v30, %s4593_s12 }
 0x312   : > { %v6280_v41 = vpop.permute.xlu1 %2479  ;;  %v6282_v59 = vpop.permute.xlu2 %2469  ;;  %v1470_v10 = vmin.f32 %v1446_v54, 6.0 }
 0x313   : > { %9465 = vst [vmem:[#allocation25_spill] sm:$0xff] %v6280_v41  ;;  %v6284_v18 = vpop.permute.xlu0 %2097  ;;  %v1421_v41 = vadd.f32 3.0, %v1397_v58 }
 0x314   : > { %9466 = vst [vmem:[#allocation99_spill] sm:$0xff] %v6282_v59 }
 0x315   : > { %9467 = vst [vmem:[#allocation100_spill] sm:$0xff] %v6284_v18  ;;  %v1445_v16 = vmax.f32 %v1421_v41, 0.0  ;;  %v9476_v41 = vld [vmem:[#allocation28_spill] sm:$0xff] }
 0x316   : > { %v1375_v20 = vmul.f32 %v5916_v33, %v9476_v41 }
 0x317   : > { %v1469_v42 = vmin.f32 %v1445_v16, 6.0 }
 0x318   : > { %1931 = vrot.lane.b32.xlu1 %v6222_v30, %s4586_s25  ;;  %2471 = vrot.lane.b32.xlu2 %v6222_v30, %s4591_s10  ;;  %v1399_v62 = vadd.f32 %v1375_v20, %v1283_v4 }
 0x319   : > { %2831 = vrot.lane.b32.xlu0 %v6222_v30, %s4592_s11  ;;  %v6318_v14 = vmul.f32 %v1469_v42, %v1397_v58  ;;  %v6332_v58 = vmul.f32 %v1470_v10, %v1398_v56 }
 0x31a   : > { %v6294_v59 = vpop.permute.xlu1 %2659  ;;  %v6296_v22 = vpop.permute.xlu2 %1761  ;;  %v1423_v11 = vadd.f32 3.0, %v1399_v62 }
 0x31b   : > { %9469 = vst [vmem:[#allocation26_spill] sm:$0xff] %v6294_v59  ;;  %v6298_v18 = vpop.permute.xlu0 %2289 }
 0x31c   : > { %9470 = vst [vmem:[#allocation101_spill] sm:$0xff] %v6298_v18  ;;  %v1447_v47 = vmax.f32 %v1423_v11, 0.0  ;;  %v1602_v11 = vlaneseq }
 0x31d   : > { %9477 = vst [vmem:[#allocation28_spill] sm:$0xff] %v6318_v14 }
 0x31e   : > { %v1471_v41 = vmin.f32 %v1447_v47, 6.0  ;;  %v6360_v47 = vand.u32 127, %v1602_v11 }
 0x320   : > { %2099 = vrot.lane.b32.xlu1 %v6208_v3, %s4590_s9  ;;  %1582 = vrot.lane.b32.xlu2 %v6302_v44, %s4588_s29  ;;  %v6346_v54 = vmul.f32 %v1471_v41, %v1399_v62  ;;  %vm1963_vm8 = vcmp.lt.s32.totalorder %v6360_v47, 15  ;;  %vm1604_vm9 = vcmp.lt.s32.totalorder %v6360_v47, 17  ;;  %vm1783_vm10 = vcmp.lt.s32.totalorder %v6360_v47, 16 }
 0x321   : > { %1763 = vrot.lane.b32.xlu0 %v6302_v44, %s4587_s26  ;;  %vm2143_vm11 = vcmp.lt.s32.totalorder %v6360_v47, 1  ;;  %vm2683_vm12 = vcmp.lt.s32.totalorder %v6360_v47, 112  ;;  %vm2323_vm13 = vcmp.lt.s32.totalorder %v6360_v47, 127  ;;  %vm2503_vm14 = vcmp.lt.s32.totalorder %v6360_v47, 113 }
 0x322   : > { %v6310_v59 = vpop.permute.xlu1 %2851  ;;  %v6312_v18 = vpop.permute.xlu2 %1773  ;;  %vm2863_vm15 = vcmp.lt.s32.totalorder %v6360_v47, 111 }
 0x323   : > { %9473 = vst [vmem:[#allocation102_spill] sm:$0xff] %v6310_v59  ;;  %v6314_v0 = vpop.permute.xlu0 %2637 }
 0x324   : > { %9474 = vst [vmem:[#allocation103_spill] sm:$0xff] %v6312_v18 }
 0x325   : > { %9475 = vst [vmem:[#allocation104_spill] sm:$0xff] %v6314_v0 }
 0x328   : > { %2819 = vrot.lane.b32.xlu1 %v6208_v3, %s4592_s11  ;;  %1594 = vrot.lane.b32.xlu2 %v6318_v14, %s4588_s29  ;;  %v9488_v3 = vld [vmem:[#allocation29_spill] sm:$0xff] }
 0x329   : > { %1775 = vrot.lane.b32.xlu0 %v6318_v14, %s4587_s26  ;;  %v1376_v43 = vmul.f32 %v5942_v13, %v9488_v3  ;;  %v1377_v13 = vmul.f32 %v5948_v36, %v9491_v23 }
 0x32a   : > { %v6326_v16 = vpop.permute.xlu2 %2121  ;;  %v6328_v59 = vpop.permute.xlu1 %1556 }
 0x32b   : > { %9478 = vst [vmem:[#allocation105_spill] sm:$0xff] %v6328_v59  ;;  %v6330_v33 = vpop.permute.xlu0 %2649  ;;  %v1318_v59 = vpop.f32.mrf.mxu2 }
 0x32c   : > { %9479 = vst [vmem:[#allocation106_spill] sm:$0xff] %v6330_v33  ;;  %v1400_v46 = vadd.f32 %v1376_v43, %v1318_v59  ;;  %v1401_v59 = vadd.f32 %v1377_v13, %v1353_v6  ;;  %v1251_v6 = vpop.f32.mrf.mxu0 }
 0x32e   : > { %v1424_v15 = vadd.f32 3.0, %v1400_v46  ;;  %v1425_v48 = vadd.f32 3.0, %v1401_v59 }
 0x330   : > { %1943 = vrot.lane.b32.xlu1 %v6302_v44, %s4586_s25  ;;  %2135 = vrot.lane.b32.xlu2 %v6318_v14, %s4590_s9  ;;  %v1448_v43 = vmax.f32 %v1424_v15, 0.0  ;;  %v1449_v15 = vmax.f32 %v1425_v48, 0.0  ;;  %v1286_v48 = vpop.f32.mrf.mxu1 }
 0x331   : > { %1560 = vrot.lane.b32.xlu0 %v6332_v58, %s4588_s29 }
 0x332   : > { %v6340_v42 = vpop.permute.xlu2 %2301  ;;  %v6342_v4 = vpop.permute.xlu1 %1568  ;;  %v1472_v24 = vmin.f32 %v1448_v43, 6.0  ;;  %v9494_v43 = vld [vmem:[#allocation31_spill] sm:$0xff] }
 0x333   : > { %9480 = vst [vmem:[#allocation107_spill] sm:$0xff] %v6340_v42  ;;  %v6344_v20 = vpop.permute.xlu0 %2829 }
 0x334   : > { %9481 = vst [vmem:[#allocation108_spill] sm:$0xff] %v6342_v4  ;;  %v6409_v36 = vmul.f32 %v1472_v24, %v1400_v46  ;;  %v9496_v46 = vld [vmem:[#allocation32_spill] sm:$0xff] }
 0x335   : > { %9482 = vst [vmem:[#allocation109_spill] sm:$0xff] %v6344_v20  ;;  %v1379_v7 = vmul.f32 %v5930_v61, %v9496_v46 }
 0x337   : > { %v6428_v55 = vadd.f32 %v1379_v7, %v1286_v48  ;;  %v6448_v7 = vperm.slane %v6433_v39, 3 }
 0x338   : > { %1955 = vrot.lane.b32.xlu1 %v6318_v14, %s4586_s25  ;;  %2315 = vrot.lane.b32.xlu2 %v6318_v14, %s4589_s30 }
 0x339   : > { %1572 = vrot.lane.b32.xlu0 %v6346_v54, %s4588_s29  ;;  %9498 = vst [vmem:[#allocation117_spill] sm:$0xff] %v6448_v7 }
 0x33a   : > { %v6354_v56 = vpop.permute.xlu2 %2481  ;;  %v6356_v10 = vpop.permute.xlu1 %2109 }
 0x33b   : > { %9483 = vst [vmem:[#allocation110_spill] sm:$0xff] %v6354_v56  ;;  %v6358_v33 = vpop.permute.xlu0 %1941 }
 0x33c   : > { %9484 = vst [vmem:[#allocation111_spill] sm:$0xff] %v6356_v10 }
 0x340   : > { %2123 = vrot.lane.b32.xlu1 %v6302_v44, %s4590_s9  ;;  %2495 = vrot.lane.b32.xlu2 %v6318_v14, %s4591_s10 }
 0x341   : > { %2461 = vrot.lane.b32.xlu0 %v6332_v58, %s4591_s10 }
 0x342   : > { %v6368_v62 = vpop.permute.xlu2 %2661  ;;  %v6370_v41 = vpop.permute.xlu1 %2277 }
 0x343   : > { %9485 = vst [vmem:[#allocation112_spill] sm:$0xff] %v6368_v62  ;;  %v6373_v20 = vpop.permute.xlu0 %1953 }
 0x344   : > { %9486 = vst [vmem:[#allocation113_spill] sm:$0xff] %v6370_v41  ;;  %v6379_v11 = vsel %vm1963_vm8, %v6358_v33, %v6373_v20 }
 0x345   : > { %9487 = vst [vmem:[#allocation114_spill] sm:$0xff] %v6373_v20 }
 0x348   : > { %2303 = vrot.lane.b32.xlu1 %v6302_v44, %s4589_s30  ;;  %2675 = vrot.lane.b32.xlu2 %v6318_v14, %s4593_s12 }
 0x349   : > { %2473 = vrot.lane.b32.xlu0 %v6346_v54, %s4591_s10 }
 0x34a   : > { %v6389_v45 = vpop.permute.xlu2 %2853  ;;  %v6391_v52 = vpop.permute.xlu1 %2457 }
 0x34b   : > { %9489 = vst [vmem:[#allocation29_spill] sm:$0xff] %v6389_v45  ;;  %v6393_v20 = vpop.permute.xlu0 %2493 }
 0x34c   : > { %9490 = vst [vmem:[#allocation115_spill] sm:$0xff] %v6391_v52 }
 0x350   : > { %2483 = vrot.lane.b32.xlu1 %v6302_v44, %s4591_s10  ;;  %2855 = vrot.lane.b32.xlu2 %v6318_v14, %s4592_s11  ;;  %v1473_v14 = vmin.f32 %v1449_v15, 6.0  ;;  %v6439_v15 = vperm.slane %v6433_v39, 2 }
 0x351   : > { %2653 = vrot.lane.b32.xlu0 %v6346_v54, %s4593_s12 }
 0x352   : > { %v6403_v3 = vpop.permute.xlu1 %2817  ;;  %v6405_v45 = vpop.permute.xlu2 %1558  ;;  %v6426_v25 = vmul.f32 %v1473_v14, %v1401_v59  ;;  %9497 = vst [vmem:[#allocation32_spill] sm:$0xff] %v6439_v15 }
 0x353   : > { %9492 = vst [vmem:[#allocation30_spill] sm:$0xff] %v6403_v3  ;;  %v6407_v49 = vpop.permute.xlu0 %2673  ;;  %v1378_v3 = vmul.f32 %v5928_v1, %v9494_v43 }
 0x354   : > { %9493 = vst [vmem:[#allocation116_spill] sm:$0xff] %v6405_v45 }
 0x355   : > { %v1402_v28 = vadd.f32 %v1378_v3, %v1251_v6  ;;  %v1427_v6 = vadd.f32 3.0, %v6428_v55 }
 0x357   : > { %v1426_v61 = vadd.f32 3.0, %v1402_v28  ;;  %v1451_v2 = vmax.f32 %v1427_v6, 0.0 }
 0x358   : > { %2663 = vrot.lane.b32.xlu1 %v6302_v44, %s4593_s12  ;;  %1921 = vrot.lane.b32.xlu2 %v6332_v58, %s4586_s25 }
 0x359   : > { %1584 = vrot.lane.b32.xlu0 %v6409_v36, %s4588_s29 }
 0x35a   : > { %v1581_v23 = vpop.permute.xlu1 %1580  ;;  %v6417_v13 = vpop.permute.xlu2 %1570 }
 0x35b   : > { %v6421_v24 = vpop.permute.xlu0 %1739  ;;  %v1612_v1 = vsel %vm1604_vm9, %v6342_v4, %v1581_v23  ;;  %v1450_v4 = vmax.f32 %v1426_v61, 0.0  ;;  %v9503_v61 = vld [vmem:[#allocation34_spill] sm:$0xff] }
 0x35c   : > { %9495 = vst [vmem:[#allocation31_spill] sm:$0xff] %v6421_v24  ;;  %v1645_v14 = vmul.f32 %v6439_v15, %v1612_v1  ;;  %v6486_v15 = vmul.f32 %v5960_v8, %v9503_v61 }
 0x360   : > { %2843 = vrot.lane.b32.xlu1 %v6302_v44, %s4592_s11  ;;  %1933 = vrot.lane.b32.xlu2 %v6346_v54, %s4586_s25  ;;  %v1693_v44 = vmul.f32 %v5932_v60, %v1645_v14 }
 0x361   : > { %1596 = vrot.lane.b32.xlu0 %v6426_v25, %s4588_s29 }
 0x362   : > { %v6451_v59 = vpop.permute.xlu1 %1592  ;;  %v6453_v3 = vpop.permute.xlu2 %2279 }
 0x363   : > { %9499 = vst [vmem:[#allocation118_spill] sm:$0xff] %v6451_v59  ;;  %v1606_v43 = vsel %vm1604_vm9, %v1581_v23, %v6451_v59  ;;  %v6460_v48 = vpop.permute.xlu0 %1751  ;;  %v1791_v23 = vsel %vm1783_vm10, %v6268_v35, %v6296_v22  ;;  %v9501_v59 = vld [vmem:[#allocation33_spill] sm:$0xff]  ;;  %v1785_v35 = vsel %vm1783_vm10, %v6296_v22, %v6312_v18  ;;  %v1474_v22 = vmin.f32 %v1450_v4, 6.0 }
 0x364   : > { %9500 = vst [vmem:[#allocation119_spill] sm:$0xff] %v6453_v3  ;;  %v1646_v46 = vmul.f32 %v6448_v7, %v1606_v43  ;;  %v6467_v1 = vsel %vm1783_vm10, %v6421_v24, %v6460_v48  ;;  %v6472_v3 = vld [vmem:[%s8960_s3 + $0x1] ss:$8 sm:$0xf]  ;;  %v1380_v43 = vmul.f32 %v5952_v51, %v9501_v59  ;;  %v1321_v7 = vpop.f32.mrf.mxu2  ;;  %v1536_v24 = vmul.f32 %v5956_v19, %v6140_v12 }
 0x365   : > { %v6481_v57 = vperm.slane %v6472_v3, 2  ;;  %v6497_v51 = vld [vmem:[%s8960_s3 + $0x2] ss:$8 sm:$0xf]  ;;  %v6500_v14 = vperm.slane %v6472_v3, 3  ;;  %v1971_v12 = vsel %vm1963_vm8, %v6270_v26, %v6358_v33  ;;  %v1537_v33 = vmul.f32 %v5956_v19, %v6154_v17 }
 0x366   : > { %v1694_v59 = vmul.f32 %v5932_v60, %v1646_v46  ;;  %v6512_v6 = vadd.f32 %v1380_v43, %v1321_v7  ;;  %v6525_v46 = vld [vmem:[%s8960_s3 + $0x3] ss:$8 sm:$0xf]  ;;  %v2151_v7 = vsel %vm2143_vm11, %v6356_v10, %v6326_v16  ;;  %v1717_v43 = vadd.f32 %v1693_v44, %v1536_v24 }
 0x367   : > { %9502 = vst [vmem:[#allocation33_spill] sm:$0xff] %v6481_v57  ;;  %v1825_v8 = vmul.f32 %v6481_v57, %v1791_v23  ;;  %v6516_v23 = vperm.slane %v6497_v51, 2  ;;  %v1826_v4 = vmul.f32 %v6500_v14, %v1785_v35  ;;  %v1475_v60 = vmin.f32 %v1451_v2, 6.0 }
 0x368   : > { %9504 = vst [vmem:[#allocation34_spill] sm:$0xff] %v6500_v14  ;;  %2113 = vrot.lane.b32.xlu2 %v6346_v54, %s4590_s9  ;;  %1741 = vrot.lane.b32.xlu1 %v6332_v58, %s4587_s26  ;;  %v6537_v17 = vperm.slane %v6525_v46, 2  ;;  %v6547_v10 = vperm.slane %v6497_v51, 3  ;;  %v6550_v44 = vperm.slane %v6525_v46, 3  ;;  %v1718_v24 = vadd.f32 %v1694_v59, %v1537_v33 }
 0x369   : > { %9505 = vst [vmem:[#allocation120_spill] sm:$0xff] %v6516_v23  ;;  %2857 = vrot.lane.b32.xlu0 %v6426_v25, %s4592_s11  ;;  %v2005_v18 = vmul.f32 %v6516_v23, %v1971_v12  ;;  %v1873_v2 = vmul.f32 %v5936_v5, %v1825_v8  ;;  %v6553_v19 = vmul.f32 %v1474_v22, %v1402_v28  ;;  %v6556_v12 = vadd.f32 3.0, %v6512_v6  ;;  %v6574_v22 = vld [vmem:[%s8960_s3 + $0x6] ss:$8 sm:$0xf] }
 0x36a   : > { %v6532_v61 = vpop.permute.xlu1 %2133  ;;  %v6534_v26 = vpop.permute.xlu2 %2291  ;;  %9508 = vst [vmem:[#allocation123_spill] sm:$0xff] %v6537_v17  ;;  %v2006_v8 = vmul.f32 %v6547_v10, %v6379_v11  ;;  %v6583_v11 = vld [vmem:[%s8960_s3 + $0x7] ss:$8 sm:$0xf] }
 0x36b   : > { %9506 = vst [vmem:[#allocation121_spill] sm:$0xff] %v6532_v61  ;;  %v2145_v35 = vsel %vm2143_vm11, %v6326_v16, %v6532_v61  ;;  %v6544_v14 = vpop.permute.xlu0 %2111  ;;  %v2185_v16 = vmul.f32 %v6537_v17, %v2151_v7  ;;  %v6563_v61 = vld [vmem:[%s8960_s3 + $0x5] ss:$8 sm:$0xf]  ;;  %v1897_v59 = vadd.f32 %v1873_v2, %v1717_v43  ;;  %v6586_v7 = vperm.slane %v6574_v22, 3 }
 0x36c   : > { %9507 = vst [vmem:[#allocation122_spill] sm:$0xff] %v6534_v26  ;;  %v1874_v26 = vmul.f32 %v5936_v5, %v1826_v4  ;;  %v2186_v28 = vmul.f32 %v6550_v44, %v2145_v35  ;;  %v6577_v33 = vperm.slane %v6563_v61, 3  ;;  %v2053_v4 = vmul.f32 %v5986_v53, %v2005_v18  ;;  %v1356_v18 = vpop.f32.mrf.mxu3 }
 0x36d   : > { %9509 = vst [vmem:[#allocation124_spill] sm:$0xff] %v6547_v10  ;;  %v2505_v43 = vsel %vm2503_vm14, %v6354_v56, %v6393_v20  ;;  %v2523_v35 = vsel %vm2503_vm14, %v6393_v20, %v6391_v52  ;;  %v6601_v5 = vperm.slane %v6563_v61, 2  ;;  %v6607_v56 = vperm.slane %v6583_v11, 2 }
 0x36e   : > { %9510 = vst [vmem:[#allocation125_spill] sm:$0xff] %v6550_v44  ;;  %v1898_v2 = vadd.f32 %v1874_v26, %v1718_v24  ;;  %v6604_v44 = vperm.slane %v6574_v22, 2  ;;  %v2233_v10 = vmul.f32 %v6008_v29, %v2185_v16  ;;  %v2054_v26 = vmul.f32 %v5986_v53, %v2006_v8 }
 0x36f   : > { %9511 = vst [vmem:[#allocation126_spill] sm:$0xff] %v6553_v19  ;;  %v2685_v20 = vsel %vm2683_vm12, %v6368_v62, %v6407_v49  ;;  %v2234_v24 = vmul.f32 %v6008_v29, %v2186_v28  ;;  %v2077_v52 = vadd.f32 %v2053_v4, %v1897_v59  ;;  %v2546_v16 = vmul.f32 %v6586_v7, %v2523_v35  ;;  %v9590_v29 = vld [vmem:[#allocation72_spill] sm:$0xff] }
 0x370   : > { %9512 = vst [vmem:[#allocation127_spill] sm:$0xff] %v6563_v61  ;;  %2281 = vrot.lane.b32.xlu2 %v6332_v58, %s4589_s30  ;;  %1753 = vrot.lane.b32.xlu1 %v6346_v54, %s4587_s26  ;;  %v2545_v17 = vmul.f32 %v6604_v44, %v2505_v43  ;;  %v2703_v59 = vsel %vm2683_vm12, %v6407_v49, %v6314_v0  ;;  %v9588_v0 = vld [vmem:[#allocation61_spill] sm:$0xff] }
 0x371   : > { %9513 = vst [vmem:[#allocation128_spill] sm:$0xff] %v6574_v22  ;;  %1923 = vrot.lane.b32.xlu0 %v6553_v19, %s4586_s25  ;;  %v2078_v28 = vadd.f32 %v2054_v26, %v1898_v2  ;;  %v1405_v35 = vadd.f32 %v6486_v15, %v1356_v18  ;;  %v2257_v62 = vadd.f32 %v2233_v10, %v2077_v52 }
 0x372   : > { %9514 = vst [vmem:[#allocation129_spill] sm:$0xff] %v6577_v33  ;;  %v2314_v22 = vpop.permute.xlu1 %2313  ;;  %v6618_v61 = vpop.permute.xlu2 %2471  ;;  %v6644_v49 = vmul.f32 %v1475_v60, %v6428_v55  ;;  %v2593_v2 = vmul.f32 %v6024_v9, %v2545_v17  ;;  %v2594_v18 = vmul.f32 %v6024_v9, %v2546_v16  ;;  %v9528_v16 = vld [vmem:[#allocation35_spill] sm:$0xff]  ;;  %v9587_v9 = vld [vmem:[#allocation40_spill] sm:$0xff] }
 0x373   : > { %9515 = vst [vmem:[#allocation130_spill] sm:$0xff] %v6583_v11  ;;  %v2325_v19 = vsel %vm2323_vm13, %v6340_v42, %v2314_v22  ;;  %v2343_v8 = vsel %vm2323_vm13, %v2314_v22, %v6370_v41  ;;  %v6628_v53 = vpop.permute.xlu0 %2459  ;;  %v2258_v22 = vadd.f32 %v2234_v24, %v2078_v28 }
 0x374   : > { %9516 = vst [vmem:[#allocation131_spill] sm:$0xff] %v6586_v7  ;;  %v2365_v4 = vmul.f32 %v6601_v5, %v2325_v19  ;;  %v2366_v43 = vmul.f32 %v6577_v33, %v2343_v8  ;;  %v1452_v19 = vmax.f32 %v6556_v12, 0.0 }
 0x375   : > { %9517 = vst [vmem:[#allocation132_spill] sm:$0xff] %v6601_v5 }
 0x376   : > { %9518 = vst [vmem:[#allocation133_spill] sm:$0xff] %v6604_v44  ;;  %v2725_v44 = vmul.f32 %v6607_v56, %v2685_v20  ;;  %v2414_v42 = vmul.f32 %v6014_v32, %v2366_v43  ;;  %v1476_v12 = vmin.f32 %v1452_v19, 6.0  ;;  %v1254_v20 = vpop.f32.mrf.mxu0 }
 0x377   : > { %9519 = vst [vmem:[#allocation134_spill] sm:$0xff] %v6607_v56 }
 0x378   : > { %9520 = vst [vmem:[#allocation135_spill] sm:$0xff] %v6618_v61  ;;  %v6638_v61 = vperm.slane %v6583_v11, 3  ;;  %v2438_v8 = vadd.f32 %v2414_v42, %v2258_v22  ;;  %2293 = vrot.lane.b32.xlu2 %v6346_v54, %s4589_s30  ;;  %2101 = vrot.lane.b32.xlu1 %v6332_v58, %s4590_s9  ;;  %v2773_v55 = vmul.f32 %v6038_v40, %v2725_v44 }
 0x379   : > { %9521 = vst [vmem:[#allocation136_spill] sm:$0xff] %v6628_v53  ;;  %v2413_v53 = vmul.f32 %v6014_v32, %v2365_v4  ;;  %1935 = vrot.lane.b32.xlu0 %v6644_v49, %s4586_s25  ;;  %v6671_v44 = vmul.f32 %v1476_v12, %v6512_v6  ;;  %v1289_v6 = vpop.f32.mrf.mxu1  ;;  %v6694_v12 = vperm.slane %v6433_v39, 1 }
 0x37a   : > { %9522 = vst [vmem:[#allocation137_spill] sm:$0xff] %v6638_v61  ;;  %v2726_v15 = vmul.f32 %v6638_v61, %v2703_v59  ;;  %v6657_v60 = vpop.permute.xlu1 %2841  ;;  %v6659_v52 = vpop.permute.xlu2 %1582  ;;  %v2618_v17 = vadd.f32 %v2594_v18, %v2438_v8  ;;  %v1382_v59 = vmul.f32 %v5938_v37, %v9528_v16  ;;  %v9534_v18 = vld [vmem:[#allocation36_spill] sm:$0xff]  ;;  %v9599_v61 = vld [vmem:[#allocation54_spill] sm:$0xff] }
 0x37b   : > { %9523 = vst [vmem:[#allocation138_spill] sm:$0xff] %v6644_v49  ;;  %v2437_v26 = vadd.f32 %v2413_v53, %v2257_v62  ;;  %v1429_v53 = vadd.f32 3.0, %v1405_v35  ;;  %v6662_v62 = vpop.permute.xlu0 %2639 }
 0x37c   : > { %9524 = vst [vmem:[#allocation139_spill] sm:$0xff] %v6657_v60  ;;  %v2774_v42 = vmul.f32 %v6038_v40, %v2726_v15  ;;  %v1406_v43 = vadd.f32 %v1382_v59, %v1254_v20 }
 0x37d   : > { %9525 = vst [vmem:[#allocation140_spill] sm:$0xff] %v6659_v52  ;;  %v2617_v10 = vadd.f32 %v2593_v2, %v2437_v26  ;;  %v1453_v4 = vmax.f32 %v1429_v53, 0.0  ;;  %v1383_v26 = vmul.f32 %v5940_v21, %v9534_v18  ;;  %v6703_v21 = vperm.slane %v6472_v3, 1  ;;  %v9541_v18 = vld [vmem:[#allocation37_spill] sm:$0xff] }
 0x37e   : > { %9526 = vst [vmem:[#allocation141_spill] sm:$0xff] %v6662_v62  ;;  %v6668_v28 = vadd.f32 %v2774_v42, %v2618_v17  ;;  %v1430_v2 = vadd.f32 3.0, %v1406_v43  ;;  %v1619_v17 = vsel %vm1604_vm9, %v6405_v45, %v6417_v13 }
 0x37f   : > { %v6664_v24 = vadd.f32 %v2773_v55, %v2617_v10  ;;  %9530 = vst [vmem:[#allocation143_spill] sm:$0xff] %v6671_v44  ;;  %v1477_v37 = vmin.f32 %v1453_v4, 6.0  ;;  %v1407_v10 = vadd.f32 %v1383_v26, %v1289_v6  ;;  %v1828_v6 = vmul.f32 %v6703_v21, %v6467_v1 }
 0x380   : > { %9529 = vst [vmem:[#allocation35_spill] sm:$0xff] %v6668_v28  ;;  %1945 = vrot.lane.b32.xlu2 %v6409_v36, %s4586_s25  ;;  %2641 = vrot.lane.b32.xlu1 %v6332_v58, %s4593_s12  ;;  %v1454_v55 = vmax.f32 %v1430_v2, 0.0  ;;  %v6717_v2 = vperm.slane %v6497_v51, 1  ;;  %v1384_v26 = vmul.f32 %v5970_v31, %v9541_v18  ;;  %v6737_v31 = vperm.slane %v6525_v46, 1 }
 0x381   : > { %9527 = vst [vmem:[#allocation142_spill] sm:$0xff] %v6664_v24  ;;  %1947 = vrot.lane.b32.xlu0 %v6671_v44, %s4586_s25  ;;  %v6687_v8 = vmul.f32 %v1477_v37, %v1405_v35  ;;  %v1648_v35 = vmul.f32 %v6694_v12, %v1619_v17  ;;  %v1431_v16 = vadd.f32 3.0, %v1407_v10  ;;  %v1324_v37 = vpop.f32.mrf.mxu2  ;;  %v1876_v28 = vmul.f32 %v6012_v38, %v1828_v6  ;;  %v1359_v6 = vpop.f32.mrf.mxu3 }
 0x382   : > { %v6679_v22 = vpop.permute.xlu1 %1919  ;;  %v6681_v19 = vpop.permute.xlu2 %1594  ;;  %9536 = vst [vmem:[#allocation147_spill] sm:$0xff] %v6694_v12  ;;  %v1478_v20 = vmin.f32 %v1454_v55, 6.0  ;;  %v1408_v62 = vadd.f32 %v1384_v26, %v1324_v37 }
 0x383   : > { %9531 = vst [vmem:[#allocation144_spill] sm:$0xff] %v6679_v22  ;;  %v6683_v15 = vpop.permute.xlu0 %2651  ;;  %v1696_v55 = vmul.f32 %v5905_v34, %v1648_v35  ;;  %v1455_v24 = vmax.f32 %v1431_v16, 0.0 }
 0x384   : > { %9532 = vst [vmem:[#allocation145_spill] sm:$0xff] %v6681_v19  ;;  %v1432_v16 = vadd.f32 3.0, %v1408_v62 }
 0x385   : > { %9533 = vst [vmem:[#allocation146_spill] sm:$0xff] %v6683_v15  ;;  %v1539_v15 = vmul.f32 %v5897_v50, %v6222_v30 }
 0x386   : > { %9535 = vst [vmem:[#allocation36_spill] sm:$0xff] %v6687_v8  ;;  %v1456_v40 = vmax.f32 %v1432_v16, 0.0 }
 0x387   : > { %9537 = vst [vmem:[#allocation148_spill] sm:$0xff] %v6703_v21  ;;  %v1720_v1 = vadd.f32 %v1696_v55, %v1539_v15  ;;  %v9546_v55 = vld [vmem:[#allocation38_spill] sm:$0xff] }
 0x388   : > { %1957 = vrot.lane.b32.xlu2 %v6426_v25, %s4586_s25  ;;  %2821 = vrot.lane.b32.xlu1 %v6332_v58, %s4592_s11  ;;  %9540 = vst [vmem:[#allocation151_spill] sm:$0xff] %v6717_v2 }
 0x389   : > { %2139 = vrot.lane.b32.xlu0 %v6687_v8, %s4590_s9  ;;  %9543 = vst [vmem:[#allocation152_spill] sm:$0xff] %v6737_v31  ;;  %v1900_v18 = vadd.f32 %v1876_v28, %v1720_v1  ;;  %v1480_v28 = vmin.f32 %v1456_v40, 6.0 }
 0x38a   : > { %v6706_v53 = vpop.permute.xlu1 %1931  ;;  %v6708_v42 = vpop.permute.xlu2 %2135 }
 0x38b   : > { %9538 = vst [vmem:[#allocation149_spill] sm:$0xff] %v6708_v42  ;;  %v1978_v59 = vsel %vm1963_vm8, %v6679_v22, %v6706_v53  ;;  %v6714_v4 = vpop.permute.xlu0 %2831  ;;  %v6725_v42 = vmul.f32 %v1478_v20, %v1406_v43  ;;  %v1479_v20 = vmin.f32 %v1455_v24, 6.0  ;;  %v9547_v24 = vld [vmem:[#allocation52_spill] sm:$0xff] }
 0x38c   : > { %9539 = vst [vmem:[#allocation150_spill] sm:$0xff] %v6714_v4  ;;  %v2008_v17 = vmul.f32 %v6717_v2, %v1978_v59 }
 0x38d   : > { %9542 = vst [vmem:[#allocation37_spill] sm:$0xff] %v6725_v42  ;;  %v6755_v19 = vmul.f32 %v1479_v20, %v1407_v10  ;;  %v6778_v20 = vmul.f32 %v1480_v28, %v1408_v62  ;;  %v1613_v62 = vsel %vm1604_vm9, %v6417_v13, %v6659_v52 }
 0x38e   : > { %v2056_v43 = vmul.f32 %v6076_v63, %v2008_v17  ;;  %v1385_v17 = vmul.f32 %v5984_v27, %v9546_v55 }
 0x38f   : > { %9548 = vst [vmem:[#allocation38_spill] sm:$0xff] %v6755_v19 }
 0x390   : > { %2137 = vrot.lane.b32.xlu2 %v6426_v25, %s4590_s9  ;;  %1765 = vrot.lane.b32.xlu1 %v6409_v36, %s4587_s26  ;;  %v2080_v22 = vadd.f32 %v2056_v43, %v1900_v18  ;;  %v1409_v60 = vadd.f32 %v1385_v17, %v1359_v6  ;;  %9554 = vst [vmem:[#allocation158_spill] sm:$0xff] %v6778_v20 }
 0x391   : > { %1745 = vrot.lane.b32.xlu0 %v6725_v42, %s4587_s26 }
 0x392   : > { %v6740_v35 = vpop.permute.xlu1 %2099  ;;  %v6742_v30 = vpop.permute.xlu2 %2315  ;;  %v1433_v10 = vadd.f32 3.0, %v1409_v60 }
 0x393   : > { %9544 = vst [vmem:[#allocation153_spill] sm:$0xff] %v6740_v35  ;;  %v2158_v59 = vsel %vm2143_vm11, %v6740_v35, %v6544_v14  ;;  %v1764_v37 = vpop.permute.xlu0 %1763 }
 0x394   : > { %9545 = vst [vmem:[#allocation154_spill] sm:$0xff] %v6742_v30  ;;  %v2188_v26 = vmul.f32 %v6737_v31, %v2158_v59  ;;  %v1792_v15 = vsel %vm1783_vm10, %v6460_v48, %v1764_v37  ;;  %v1457_v16 = vmax.f32 %v1433_v10, 0.0 }
 0x395   : > { %v1829_v10 = vmul.f32 %v6481_v57, %v1792_v15 }
 0x396   : > { %v2236_v45 = vmul.f32 %v9547_v24, %v2188_v26  ;;  %v9558_v26 = vld [vmem:[#allocation32_spill] sm:$0xff] }
 0x397   : > { %v1649_v55 = vmul.f32 %v9558_v26, %v1613_v62 }
 0x398   : > { %v6757_v35 = vadd.f32 %v2236_v45, %v2080_v22  ;;  %2317 = vrot.lane.b32.xlu2 %v6426_v25, %s4589_s30  ;;  %1777 = vrot.lane.b32.xlu1 %v6426_v25, %s4587_s26  ;;  %v9552_v22 = vld [vmem:[#allocation31_spill] sm:$0xff] }
 0x399   : > { %1757 = vrot.lane.b32.xlu0 %v6755_v19, %s4587_s26 }
 0x39a   : > { %v6765_v48 = vpop.permute.xlu1 %2819  ;;  %v6767_v27 = vpop.permute.xlu2 %2495 }
 0x39b   : > { %9549 = vst [vmem:[#allocation155_spill] sm:$0xff] %v6765_v48  ;;  %v1776_v1 = vpop.permute.xlu0 %1775  ;;  %v9564_v48 = vld [vmem:[#allocation123_spill] sm:$0xff] }
 0x39c   : > { %9550 = vst [vmem:[#allocation156_spill] sm:$0xff] %v6767_v27  ;;  %v6771_v45 = vsel %vm1783_vm10, %v1764_v37, %v1776_v1  ;;  %v6776_v43 = vsel %vm1783_vm10, %v1776_v1, %v9552_v22  ;;  %v1481_v37 = vmin.f32 %v1457_v16, 6.0  ;;  %v1697_v22 = vmul.f32 %v5905_v34, %v1649_v55 }
 0x39d   : > { %9551 = vst [vmem:[#allocation157_spill] sm:$0xff] %v6771_v45  ;;  %v1877_v27 = vmul.f32 %v6012_v38, %v1829_v10 }
 0x39e   : > { %9553 = vst [vmem:[#allocation31_spill] sm:$0xff] %v6776_v43  ;;  %v6792_v18 = vmul.f32 %v1481_v37, %v1409_v60  ;;  %v9561_v37 = vld [vmem:[#allocation27_spill] sm:$0xff] }
 0x39f   : > { %v1540_v62 = vmul.f32 %v5897_v50, %v9561_v37 }
 0x3a0   : > { %2497 = vrot.lane.b32.xlu2 %v6426_v25, %s4591_s10  ;;  %2125 = vrot.lane.b32.xlu1 %v6409_v36, %s4590_s9  ;;  %9557 = vst [vmem:[#allocation161_spill] sm:$0xff] %v6792_v18 }
 0x3a1   : > { %1769 = vrot.lane.b32.xlu0 %v6778_v20, %s4587_s26 }
 0x3a2   : > { %v6786_v40 = vpop.permute.xlu1 %1943  ;;  %v6788_v59 = vpop.permute.xlu2 %2675 }
 0x3a3   : > { %9555 = vst [vmem:[#allocation159_spill] sm:$0xff] %v6786_v40  ;;  %v6790_v6 = vpop.permute.xlu0 %1560  ;;  %v1972_v13 = vsel %vm1963_vm8, %v6706_v53, %v6786_v40  ;;  %v1721_v53 = vadd.f32 %v1697_v22, %v1540_v62  ;;  %v9566_v62 = vld [vmem:[#allocation127_spill] sm:$0xff] }
 0x3a4   : > { %9556 = vst [vmem:[#allocation160_spill] sm:$0xff] %v6788_v59  ;;  %v2009_v16 = vmul.f32 %v6516_v23, %v1972_v13 }
 0x3a5   : > { %v1901_v59 = vadd.f32 %v1877_v27, %v1721_v53 }
 0x3a6   : > { %v2057_v15 = vmul.f32 %v6076_v63, %v2009_v16  ;;  %v9565_v16 = vld [vmem:[#allocation126_spill] sm:$0xff] }
 0x3a8   : > { %2677 = vrot.lane.b32.xlu2 %v6426_v25, %s4593_s12  ;;  %2305 = vrot.lane.b32.xlu1 %v6409_v36, %s4589_s30  ;;  %v2081_v40 = vadd.f32 %v2057_v15, %v1901_v59 }
 0x3a9   : > { %1781 = vrot.lane.b32.xlu0 %v6792_v18, %s4587_s26 }
 0x3aa   : > { %v6805_v17 = vpop.permute.xlu1 %1955  ;;  %v6807_v60 = vpop.permute.xlu2 %2855 }
 0x3ab   : > { %9559 = vst [vmem:[#allocation162_spill] sm:$0xff] %v6805_v17  ;;  %v1573_v28 = vpop.permute.xlu0 %1572 }
 0x3ac   : > { %9560 = vst [vmem:[#allocation163_spill] sm:$0xff] %v6807_v60  ;;  %v6817_v1 = vsel %vm1604_vm9, %v6790_v6, %v1573_v28 }
 0x3b0   : > { %2845 = vrot.lane.b32.xlu2 %v6409_v36, %s4592_s11  ;;  %2485 = vrot.lane.b32.xlu1 %v6409_v36, %s4591_s10 }
 0x3b1   : > { %2833 = vrot.lane.b32.xlu0 %v6346_v54, %s4592_s11 }
 0x3b2   : > { %v6831_v55 = vpop.permute.xlu1 %2123  ;;  %v6833_v13 = vpop.permute.xlu2 %1921 }
 0x3b3   : > { %9562 = vst [vmem:[#allocation27_spill] sm:$0xff] %v6831_v55  ;;  %v2152_v10 = vsel %vm2143_vm11, %v6544_v14, %v6831_v55  ;;  %v6839_v37 = vpop.permute.xlu0 %2461  ;;  %v6850_v14 = vperm.slane %v9566_v62, 1 }
 0x3b4   : > { %9563 = vst [vmem:[#allocation164_spill] sm:$0xff] %v6839_v37  ;;  %v2189_v38 = vmul.f32 %v9564_v48, %v2152_v10  ;;  %v9597_v48 = vld [vmem:[#allocation46_spill] sm:$0xff] }
 0x3b5   : > { %9567 = vst [vmem:[#allocation127_spill] sm:$0xff] %v6850_v14 }
 0x3b6   : > { %v2237_v45 = vmul.f32 %v9547_v24, %v2189_v38  ;;  %v9568_v38 = vld [vmem:[#allocation122_spill] sm:$0xff]  ;;  %v9570_v24 = vld [vmem:[#allocation20_spill] sm:$0xff] }
 0x3b8   : > { %v2261_v22 = vadd.f32 %v2237_v45, %v2081_v40  ;;  %2665 = vrot.lane.b32.xlu1 %v6409_v36, %s4593_s12  ;;  %1743 = vrot.lane.b32.xlu2 %v9565_v16, %s4587_s26 }
 0x3b9   : > { %2463 = vrot.lane.b32.xlu0 %v9565_v16, %s4591_s10 }
 0x3ba   : > { %v2304_v63 = vpop.permute.xlu1 %2303  ;;  %v1934_v27 = vpop.permute.xlu2 %1933 }
 0x3bb   : > { %v2326_v59 = vsel %vm2323_vm13, %v2304_v63, %v6742_v30  ;;  %v2332_v45 = vsel %vm2323_vm13, %v9568_v38, %v2304_v63  ;;  %v1979_v40 = vsel %vm1963_vm8, %v6833_v13, %v1934_v27  ;;  %v6861_v53 = vpop.permute.xlu0 %2473 }
 0x3bc   : > { %9569 = vst [vmem:[#allocation165_spill] sm:$0xff] %v6861_v53  ;;  %v2368_v15 = vmul.f32 %v6850_v14, %v2332_v45  ;;  %v2369_v10 = vmul.f32 %v6601_v5, %v2326_v59  ;;  %v2012_v38 = vmul.f32 %v6717_v2, %v1979_v40  ;;  %v9591_v40 = vmov 6   ;;  %v9596_v5 = vld [vmem:[#allocation2_spill] sm:$0xff] }
 0x3be   : > { %v2416_v55 = vmul.f32 %v9570_v24, %v2368_v15  ;;  %v2417_v34 = vmul.f32 %v9570_v24, %v2369_v10 }
 0x3c0   : > { %v6868_v30 = vadd.f32 %v2416_v55, %v6757_v35  ;;  %v6870_v43 = vadd.f32 %v2417_v34, %v2261_v22  ;;  %1755 = vrot.lane.b32.xlu2 %v6644_v49, %s4587_s26  ;;  %1562 = vrot.lane.b32.xlu1 %v9565_v16, %s4588_s29 }
 0x3c1   : > { %2475 = vrot.lane.b32.xlu0 %v6644_v49, %s4591_s10 }
 0x3c2   : > { %9571 = vst [vmem:[#allocation166_spill] sm:$0xff] %v6868_v30  ;;  %v6878_v63 = vpop.permute.xlu1 %2483  ;;  %v6880_v59 = vpop.permute.xlu2 %2113 }
 0x3c3   : > { %9572 = vst [vmem:[#allocation167_spill] sm:$0xff] %v6870_v43  ;;  %v6882_v45 = vpop.permute.xlu0 %2653 }
 0x3c4   : > { %9573 = vst [vmem:[#allocation168_spill] sm:$0xff] %v6878_v63 }
 0x3c5   : > { %9574 = vst [vmem:[#allocation169_spill] sm:$0xff] %v6880_v59 }
 0x3c6   : > { %9575 = vst [vmem:[#allocation170_spill] sm:$0xff] %v6882_v45 }
 0x3c8   : > { %2283 = vrot.lane.b32.xlu2 %v9565_v16, %s4589_s30  ;;  %1574 = vrot.lane.b32.xlu1 %v6644_v49, %s4588_s29 }
 0x3c9   : > { %2859 = vrot.lane.b32.xlu0 %v6687_v8, %s4592_s11 }
 0x3ca   : > { %v6890_v34 = vpop.permute.xlu1 %2663  ;;  %v6892_v35 = vpop.permute.xlu2 %2281 }
 0x3cb   : > { %9576 = vst [vmem:[#allocation171_spill] sm:$0xff] %v6890_v34  ;;  %v1585_v55 = vpop.permute.xlu0 %1584 }
 0x3cc   : > { %v6896_v22 = vsel %vm1604_vm9, %v1573_v28, %v1585_v55 }
 0x3d0   : > { %1767 = vrot.lane.b32.xlu2 %v6671_v44, %s4587_s26  ;;  %2115 = vrot.lane.b32.xlu1 %v6644_v49, %s4590_s9 }
 0x3d1   : > { %2141 = vrot.lane.b32.xlu0 %v6792_v18, %s4590_s9 }
 0x3d2   : > { %v2844_v15 = vpop.permute.xlu1 %2843  ;;  %v6905_v10 = vpop.permute.xlu2 %2293 }
 0x3d3   : > { %9577 = vst [vmem:[#allocation172_spill] sm:$0xff] %v6905_v10  ;;  %v6910_v43 = vsel %vm2863_vm15, %v2844_v15, %v6807_v60  ;;  %v6915_v28 = vsel %vm2863_vm15, %v6714_v4, %v2844_v15  ;;  %v1597_v30 = vpop.permute.xlu0 %1596  ;;  %v9612_v10 = vld [vmem:[#allocation28_spill] sm:$0xff] }
 0x3d4   : > { %9578 = vst [vmem:[#allocation173_spill] sm:$0xff] %v6910_v43  ;;  %v6919_v63 = vsel %vm1604_vm9, %v1585_v55, %v1597_v30  ;;  %v6924_v53 = vsel %vm1604_vm9, %v1597_v30, %v6790_v6  ;;  %v1652_v30 = vmul.f32 %v6694_v12, %v6817_v1  ;;  %v6949_v6 = vld [vmem:[%s8959_s2 + $0x20] sm:$0xff] }
 0x3d5   : > { %9579 = vst [vmem:[#allocation174_spill] sm:$0xff] %v6915_v28 }
 0x3d6   : > { %9581 = vst [vmem:[#allocation176_spill] sm:$0xff] %v6949_v6 }
 0x3d8   : > { %1779 = vrot.lane.b32.xlu2 %v6687_v8, %s4587_s26  ;;  %2103 = vrot.lane.b32.xlu1 %v9565_v16, %s4590_s9 }
 0x3d9   : > { %2655 = vrot.lane.b32.xlu0 %v6644_v49, %s4593_s12 }
 0x3da   : > { %v1946_v15 = vpop.permute.xlu2 %1945  ;;  %v6932_v43 = vpop.permute.xlu1 %1741 }
 0x3db   : > { %9580 = vst [vmem:[#allocation175_spill] sm:$0xff] %v6932_v43  ;;  %v6936_v55 = vsel %vm1963_vm8, %v1934_v27, %v1946_v15  ;;  %v6938_v28 = vpop.permute.xlu0 %2857  ;;  %v9582_v27 = vld [vmem:[#allocation10_spill] sm:$0xff] }
 0x3dc   : > { %v1700_v45 = vmul.f32 %v9582_v27, %v1652_v30  ;;  %v9586_v30 = vld [vmem:[#allocation3_spill] sm:$0xff] }
 0x3dd   : > { %v1543_v52 = vmul.f32 %v9586_v30, %v6346_v54 }
 0x3df   : > { %v1724_v56 = vadd.f32 %v1700_v45, %v1543_v52  ;;  %v4551_v52 = vld [vmem:[%s8959_s2] sm:$0xff] }
 0x3e0   : > { %1959 = vrot.lane.b32.xlu2 %v6687_v8, %s4586_s25  ;;  %1586 = vrot.lane.b32.xlu1 %v6671_v44, %s4588_s29 }
 0x3e1   : > { %2940 = vperm.xlu0 %4445, %v6949_v6  }
 0x3e2   : > { %v1958_v34 = vpop.permute.xlu2 %1957  ;;  %v6953_v60 = vpop.permute.xlu1 %1753 }
 0x3e3   : > { %v6957_v1 = vsel %vm1963_vm8, %v1946_v15, %v1958_v34  ;;  %v6962_v4 = vsel %vm1963_vm8, %v1958_v34, %v6833_v13  ;;  %v1799_v17 = vsel %vm1783_vm10, %v6932_v43, %v6953_v60  ;;  %v6968_v24 = vpop.permute.xlu0 %1923  ;;  %v2060_v13 = vmul.f32 %v9588_v0, %v2012_v38  ;;  %v9607_v43 = vld [vmem:[#allocation49_spill] sm:$0xff] }
 0x3e4   : > { %9583 = vst [vmem:[#allocation10_spill] sm:$0xff] %v6957_v1  ;;  %v1832_v15 = vmul.f32 %v6703_v21, %v1799_v17  ;;  %v9606_v1 = vld [vmem:[#allocation71_spill] sm:$0xff]  ;;  %v7042_v0 = vmul.f32 %v5897_v50, %v9612_v10  ;;  %v7060_v10 = vmul.f32 %v9586_v30, %v6426_v25 }
 0x3e5   : > { %9584 = vst [vmem:[#allocation177_spill] sm:$0xff] %v6962_v4  ;;  %v9608_v4 = vld [vmem:[#allocation59_spill] sm:$0xff] }
 0x3e6   : > { %9585 = vst [vmem:[#allocation178_spill] sm:$0xff] %v6968_v24  ;;  %v1880_v32 = vmul.f32 %v9587_v9, %v1832_v15  ;;  %v9589_v24 = vld [vmem:[#allocation75_spill] sm:$0xff] }
 0x3e7   : > { %v1617_v54 = vsel %vm1604_vm9, %v9590_v29, %v9589_v24  ;;  %9613 = vst [vmem:[#allocation46_spill] sm:$0xff] %v7042_v0  ;;  %v9623_v0 = vld [vmem:[#allocation77_spill] sm:$0xff] }
 0x3e8   : > { %v1904_v34 = vadd.f32 %v1880_v32, %v1724_v56  ;;  %2127 = vrot.lane.b32.xlu2 %v6671_v44, %s4590_s9  ;;  %1598 = vrot.lane.b32.xlu1 %v6687_v8, %s4588_s29 }
 0x3e9   : > { %4457 = vset.pattern.permute.xlu0 %v9591_v40  ;;  %v1640_v40 = vmul.f32 %v6694_v12, %v1617_v54  ;;  %v9603_v54 = vld [vmem:[#allocation67_spill] sm:$0xff]  ;;  %v9604_v12 = vld [vmem:[#allocation65_spill] sm:$0xff] }
 0x3ea   : > { %2564 = vperm.xlu0 %4457, %v4551_v52   ;;  %v6988_v17 = vpop.permute.xlu2 %2137  ;;  %v2102_v32 = vpop.permute.xlu1 %2101  ;;  %v2084_v56 = vadd.f32 %v2060_v13, %v1904_v34  ;;  %v9595_v52 = vld [vmem:[#allocation39_spill] sm:$0xff]  ;;  %v7006_v13 = vmul.f32 %v9596_v5, %v9597_v48  ;;  %v9598_v34 = vld [vmem:[#allocation14_spill] sm:$0xff] }
 0x3eb   : > { %9592 = vst [vmem:[#allocation3_spill] sm:$0xff] %v6988_v17  ;;  %v2159_v38 = vsel %vm2143_vm11, %v2102_v32, %v6880_v59  ;;  %v6996_v45 = vsel %vm2143_vm11, %v6988_v17, %v2102_v32  ;;  %v6998_v15 = vpop.permute.xlu0 %1935  ;;  %v1531_v14 = vmul.f32 %v9596_v5, %v9595_v52  ;;  %v7010_v59 = vmul.f32 %v9596_v5, %v9598_v34  ;;  %v9600_v17 = vld [vmem:[#allocation55_spill] sm:$0xff]  ;;  %v9605_v52 = vld [vmem:[#allocation74_spill] sm:$0xff] }
 0x3ec   : > { %9593 = vst [vmem:[#allocation40_spill] sm:$0xff] %v6996_v45  ;;  %v2192_v41 = vmul.f32 %v6737_v31, %v2159_v38  ;;  %v9601_v45 = vld [vmem:[#allocation13_spill] sm:$0xff]  ;;  %v1976_v38 = vsel %vm1963_vm8, %v9604_v12, %v9603_v54  ;;  %v1796_v48 = vsel %vm1783_vm10, %v9606_v1, %v9605_v52  ;;  %v7027_v34 = vmul.f32 %v9596_v5, %v9607_v43  ;;  %v9614_v5 = vld [vmem:[#allocation83_spill] sm:$0xff] }
 0x3ed   : > { %9594 = vst [vmem:[#allocation75_spill] sm:$0xff] %v6998_v15  ;;  %v7015_v15 = vmul.f32 %v9601_v45, %v9600_v17  ;;  %v9610_v17 = vld [vmem:[#allocation16_spill] sm:$0xff]  ;;  %v7046_v43 = vmul.f32 %v5897_v50, %v9614_v5 }
 0x3ee   : > { %v2240_v32 = vmul.f32 %v9599_v61, %v2192_v41  ;;  %v7031_v41 = vmul.f32 %v9601_v45, %v9608_v4  ;;  %v7050_v4 = vmul.f32 %v9586_v30, %v6409_v36  ;;  %v2000_v45 = vmul.f32 %v6717_v2, %v1976_v38  ;;  %9617 = vst [vmem:[#allocation13_spill] sm:$0xff] %v7060_v10  ;;  %v4552_v50 = vld [vmem:[%s8959_s2 + $0x10] sm:$0xff]  ;;  %v9622_v38 = vld [vmem:[#allocation78_spill] sm:$0xff] }
 0x3ef   : > { %9602 = vst [vmem:[#allocation72_spill] sm:$0xff] %v7015_v15  ;;  %v1688_v15 = vmul.f32 %v9610_v17, %v1640_v40  ;;  %v1820_v40 = vmul.f32 %v6703_v21, %v1796_v48  ;;  %v2156_v48 = vsel %vm2143_vm11, %v9623_v0, %v9622_v38  ;;  %v7137_v38 = vperm.slane %v9566_v62, 0 }
 0x3f0   : > { %9609 = vst [vmem:[#allocation39_spill] sm:$0xff] %v7031_v41  ;;  %v7034_v61 = vadd.f32 %v2240_v32, %v2084_v56  ;;  %2319 = vrot.lane.b32.xlu2 %v6687_v8, %s4589_s30  ;;  %2307 = vrot.lane.b32.xlu1 %v6671_v44, %s4589_s30  ;;  %v7054_v56 = vmul.f32 %v9586_v30, %v6332_v58  ;;  %v9620_v58 = vld [vmem:[#allocation6_spill] sm:$0xff]  ;;  %v7094_v41 = vperm.slane %v6583_v11, 0  ;;  %v7159_v62 = vperm.slane %v6433_v39, 0 }
 0x3f1   : > { %9615 = vst [vmem:[#allocation14_spill] sm:$0xff] %v7046_v43  ;;  %v7071_v5 = vmul.f32 %v9620_v58, %v6644_v49  ;;  %v1712_v43 = vadd.f32 %v1688_v15, %v1531_v14  ;;  %v7098_v2 = vmul.f32 %v9620_v58, %v6687_v8  ;;  %v7111_v14 = vld [vmem:[%s8960_s3 + $0x20] ss:$8 sm:$0xf]  ;;  %v2180_v11 = vmul.f32 %v6737_v31, %v2156_v48 }
 0x3f2   : > { %9611 = vst [vmem:[#allocation2_spill] sm:$0xff] %v7034_v61  ;;  %2572 = vperm.xlu0 %4457, %v4552_v50   ;;  %v7065_v32 = vpop.permute.xlu2 %2317  ;;  %v7067_v36 = vpop.permute.xlu1 %2641  ;;  %v7087_v50 = vmul.f32 %v9620_v58, %v6671_v44  ;;  %v9630_v61 = vld [vmem:[#allocation5_spill] sm:$0xff]  ;;  %v9639_v8 = vld [vmem:[#allocation82_spill] sm:$0xff]  ;;  %v9645_v31 = vld [vmem:[#allocation79_spill] sm:$0xff]  ;;  %v7151_v44 = vperm.slane %v7111_v14, 0 }
 0x3f3   : > { %9616 = vst [vmem:[#allocation55_spill] sm:$0xff] %v7054_v56  ;;  %v7081_v25 = vsel %vm2323_vm13, %v7065_v32, %v6892_v35  ;;  %v7083_v30 = vpop.permute.xlu0 %1947  ;;  %v7102_v21 = vmul.f32 %v9630_v61, %v6755_v19  ;;  %v7115_v15 = vmul.f32 %v9630_v61, %v6778_v20  ;;  %v9663_v49 = vld [vmem:[#allocation81_spill] sm:$0xff] }
 0x3f4   : > { %9618 = vst [vmem:[#allocation67_spill] sm:$0xff] %v7065_v32  ;;  %v9633_v32 = vld [vmem:[#allocation73_spill] sm:$0xff] }
 0x3f5   : > { %9619 = vst [vmem:[#allocation65_spill] sm:$0xff] %v7067_v36 }
 0x3f6   : > { %9621 = vst [vmem:[#allocation74_spill] sm:$0xff] %v7071_v5  ;;  %v7091_v5 = vmul.f32 %v9620_v58, %v9565_v16  ;;  %v7119_v58 = vmul.f32 %v9630_v61, %v6792_v18  ;;  %v9638_v16 = vld [vmem:[#allocation12_spill] sm:$0xff]  ;;  %v9646_v18 = vld [vmem:[#allocation69_spill] sm:$0xff] }
 0x3f7   : > { %9624 = vst [vmem:[#allocation71_spill] sm:$0xff] %v7081_v25  ;;  %v1611_v25 = vsel %vm1604_vm9, %v9589_v24, %v9639_v8  ;;  %v2336_v24 = vsel %vm2323_vm13, %v9646_v18, %v9645_v31 }
 0x3f8   : > { %9625 = vst [vmem:[#allocation49_spill] sm:$0xff] %v7083_v30  ;;  %v9632_v30 = vld [vmem:[#allocation76_spill] sm:$0xff]  ;;  %1925 = vrot.lane.b32.xlu1 %v6725_v42, %s4586_s25  ;;  %1564 = vrot.lane.b32.xlu2 %v6725_v42, %s4588_s29 }
 0x3f9   : > { %9626 = vst [vmem:[#allocation59_spill] sm:$0xff] %v7087_v50  ;;  %v2696_v50 = vsel %vm2683_vm12, %v9633_v32, %v9632_v30  ;;  %v1868_v30 = vmul.f32 %v9638_v16, %v1820_v40 }
 0x3fa   : > { %9627 = vst [vmem:[#allocation16_spill] sm:$0xff] %v7091_v5 }
 0x3fb   : > { %9628 = vst [vmem:[#allocation28_spill] sm:$0xff] %v7094_v41  ;;  %v1892_v48 = vadd.f32 %v1868_v30, %v1712_v43  ;;  %v7166_v30 = vperm.slane %v6525_v46, 0  ;;  %v7184_v46 = vpop.permute.xlu2 %2497 }
 0x3fc   : > { %9629 = vst [vmem:[#allocation83_spill] sm:$0xff] %v7098_v2  ;;  %v9637_v2 = vld [vmem:[#allocation15_spill] sm:$0xff] }
 0x3fd   : > { %9631 = vst [vmem:[#allocation6_spill] sm:$0xff] %v7102_v21  ;;  %v7123_v21 = vmul.f32 %v9630_v61, %v6725_v42  ;;  %v2048_v5 = vmul.f32 %v9637_v2, %v2000_v45  ;;  %v7140_v61 = vperm.slane %v6497_v51, 0  ;;  %v9643_v45 = vld [vmem:[#allocation128_spill] sm:$0xff]  ;;  %v1641_v51 = vmul.f32 %v9558_v26, %v1611_v25 }
 0x3fe   : > { %9634 = vst [vmem:[#allocation77_spill] sm:$0xff] %v7115_v15  ;;  %v9640_v15 = vld [vmem:[#allocation23_spill] sm:$0xff]  ;;  %v7143_v40 = vperm.slane %v9643_v45, 0  ;;  %v9652_v45 = vld [vmem:[#allocation24_spill] sm:$0xff] }
 0x3ff   : > { %9635 = vst [vmem:[#allocation5_spill] sm:$0xff] %v7119_v58  ;;  %v1970_v58 = vsel %vm1963_vm8, %v9603_v54, %v9640_v15  ;;  %v9649_v54 = vld [vmem:[#allocation88_spill] sm:$0xff]  ;;  %v1964_v25 = vsel %vm1963_vm8, %v9640_v15, %v9652_v45  ;;  %v1982_v39 = vsel %vm1963_vm8, %v9652_v45, %v9604_v12  ;;  %v9656_v15 = vld [vmem:[#allocation86_spill] sm:$0xff]  ;;  %v7197_v12 = vsel %vm2503_vm14, %v7184_v46, %v6839_v37 }
 0x400   : > { %9636 = vst [vmem:[#allocation73_spill] sm:$0xff] %v7123_v21  ;;  %v2719_v21 = vmul.f32 %v7094_v41, %v2696_v50  ;;  %v1790_v43 = vsel %vm1783_vm10, %v9605_v52, %v9649_v54  ;;  %v9651_v50 = vld [vmem:[#allocation48_spill] sm:$0xff]  ;;  %v2001_v31 = vmul.f32 %v6516_v23, %v1970_v58  ;;  %v7181_v52 = vld [vmem:[%s8959_s2 + $0x18] sm:$0xff]  ;;  %v2359_v58 = vmul.f32 %v7137_v38, %v2336_v24 }
 0x401   : > { %9641 = vst [vmem:[#allocation15_spill] sm:$0xff] %v7137_v38  ;;  %v2228_v41 = vmul.f32 %v9651_v50, %v2180_v11  ;;  %2576 = vperm.xlu0 %4457, %v7181_v52   ;;  %v7186_v11 = vpop.permute.xlu1 %2821  ;;  %v1623_v42 = vsel %vm1604_vm9, %v9656_v15, %v9590_v29  ;;  %v9660_v24 = vld [vmem:[#allocation53_spill] sm:$0xff]  ;;  %v2072_v56 = vadd.f32 %v2048_v5, %v1892_v48  ;;  %v9665_v5 = vld [vmem:[#allocation84_spill] sm:$0xff] }
 0x402   : > { %9642 = vst [vmem:[#allocation12_spill] sm:$0xff] %v7140_v61  ;;  %v7203_v45 = vsel %vm2863_vm15, %v6938_v28, %v7186_v11  ;;  %v7208_v38 = vmul.f32 %v9660_v24, %v2719_v21  ;;  %v1605_v29 = vsel %vm1604_vm9, %v9639_v8, %v9656_v15  ;;  %v1821_v37 = vmul.f32 %v6481_v57, %v1790_v43  ;;  %v9667_v8 = vld [vmem:[#allocation80_spill] sm:$0xff]  ;;  %v9669_v24 = vld [vmem:[#allocation117_spill] sm:$0xff] }
 0x403   : > { %9644 = vst [vmem:[#allocation82_spill] sm:$0xff] %v7143_v40  ;;  %v1689_v21 = vmul.f32 %v9610_v17, %v1641_v51  ;;  %v2342_v48 = vsel %vm2323_vm13, %v9665_v5, %v9646_v18  ;;  %v7233_v15 = vadd.f32 %v2228_v41, %v2072_v56  ;;  %v9668_v51 = vld [vmem:[#allocation19_spill] sm:$0xff]  ;;  %1937 = vrot.lane.b32.xlu1 %v6755_v19, %s4586_s25 }
 0x404   : > { %9647 = vst [vmem:[#allocation23_spill] sm:$0xff] %v7151_v44  ;;  %v1869_v5 = vmul.f32 %v9638_v16, %v1821_v37  ;;  %1576 = vrot.lane.b32.xlu2 %v6755_v19, %s4588_s29  ;;  %v2362_v37 = vmul.f32 %v6577_v33, %v2342_v48 }
 0x405   : > { %9648 = vst [vmem:[#allocation69_spill] sm:$0xff] %v7159_v62 }
 0x406   : > { %9650 = vst [vmem:[#allocation88_spill] sm:$0xff] %v7166_v30 }
 0x407   : > { %9653 = vst [vmem:[#allocation48_spill] sm:$0xff] %v7181_v52  ;;  %v7205_v52 = vpop.permute.xlu0 %2139 }
 0x408   : > { %9654 = vst [vmem:[#allocation24_spill] sm:$0xff] %v7184_v46  ;;  %v9662_v46 = vld [vmem:[#allocation124_spill] sm:$0xff] }
 0x409   : > { %9655 = vst [vmem:[#allocation179_spill] sm:$0xff] %v7186_v11  ;;  %v2002_v10 = vmul.f32 %v9662_v46, %v1964_v25  ;;  %v9664_v11 = vld [vmem:[#allocation70_spill] sm:$0xff]  ;;  %v1653_v25 = vmul.f32 %v9558_v26, %v6896_v22  ;;  %v1642_v46 = vmul.f32 %v9669_v24, %v1605_v29  ;;  %v7249_v22 = vperm.slane %v6472_v3, 0  ;;  %2580 = vperm.xlu0 %4457, %v6949_v6  }
 0x40a   : > { %9657 = vst [vmem:[#allocation86_spill] sm:$0xff] %v7197_v12  ;;  %v1999_v12 = vmul.f32 %v7140_v61, %v1982_v39  ;;  %v1639_v39 = vmul.f32 %v7159_v62, %v1623_v42 }
 0x40b   : > { %9658 = vst [vmem:[#allocation180_spill] sm:$0xff] %v7203_v45  ;;  %v2049_v45 = vmul.f32 %v9637_v2, %v2001_v31  ;;  %v7259_v41 = vmul.f32 %v9637_v2, %v2002_v10  ;;  %v1701_v29 = vmul.f32 %v9582_v27, %v1653_v25  ;;  %v1690_v10 = vmul.f32 %v9610_v17, %v1642_v46 }
 0x40c   : > { %9659 = vst [vmem:[#allocation181_spill] sm:$0xff] %v7205_v52  ;;  %v2516_v52 = vsel %vm2503_vm14, %v9664_v11, %v9663_v49  ;;  %v7237_v49 = vmul.f32 %v9668_v51, %v2359_v58  ;;  %v7256_v31 = vmul.f32 %v9637_v2, %v1999_v12  ;;  %v1687_v3 = vmul.f32 %v9610_v17, %v1639_v39  ;;  %v7271_v12 = vpop.permute.xlu2 %2677  ;;  %v1766_v2 = vpop.permute.xlu1 %1765 }
 0x40d   : > { %9661 = vst [vmem:[#allocation182_spill] sm:$0xff] %v7208_v38  ;;  %v9666_v38 = vld [vmem:[#allocation85_spill] sm:$0xff]  ;;  %v7241_v18 = vmul.f32 %v7143_v40, %v2516_v52  ;;  %v9673_v52 = vld [vmem:[#allocation91_spill] sm:$0xff]  ;;  %v2013_v46 = vmul.f32 %v6516_v23, %v6936_v55  ;;  %v1725_v55 = vadd.f32 %v1701_v29, %v7050_v4  ;;  %1949 = vrot.lane.b32.xlu1 %v6778_v20, %s4586_s25 }
 0x40e   : > { %v2876_v43 = vsel %vm2863_vm15, %v9667_v8, %v9666_v38  ;;  %v9671_v8 = vld [vmem:[#allocation89_spill] sm:$0xff]  ;;  %9672 = vst [vmem:[#allocation85_spill] sm:$0xff] %v7249_v22  ;;  %v1802_v58 = vsel %vm1783_vm10, %v9673_v52, %v9606_v1  ;;  %v1793_v1 = vsel %vm1783_vm10, %v6953_v60, %v1766_v2  ;;  %1588 = vrot.lane.b32.xlu2 %v6778_v20, %s4588_s29 }
 0x40f   : > { %9670 = vst [vmem:[#allocation70_spill] sm:$0xff] %v7241_v18  ;;  %v2162_v42 = vsel %vm2143_vm11, %v9671_v8, %v9623_v0  ;;  %v2899_v56 = vmul.f32 %v7151_v44, %v2876_v43  ;;  %v1713_v0 = vadd.f32 %v1689_v21, %v7006_v13  ;;  %v7279_v13 = vsel %vm2683_vm12, %v7271_v12, %v7067_v36  ;;  %v7284_v21 = vpop.permute.xlu0 %1745  ;;  %v9675_v43 = vld [vmem:[#allocation87_spill] sm:$0xff]  ;;  %v9680_v4 = vld [vmem:[#allocation61_spill] sm:$0xff] }
 0x410   : > { %v2179_v48 = vmul.f32 %v7166_v30, %v2162_v42  ;;  %9674 = vst [vmem:[#allocation19_spill] sm:$0xff] %v7279_v13  ;;  %v2522_v39 = vsel %vm2503_vm14, %v9675_v43, %v9664_v11  ;;  %v1833_v25 = vmul.f32 %v6481_v57, %v1793_v1  ;;  %v7294_v42 = vmul.f32 %v9668_v51, %v2362_v37  ;;  %v9676_v18 = vld [vmem:[#allocation43_spill] sm:$0xff]  ;;  %v9690_v57 = vld [vmem:[#allocation124_spill] sm:$0xff] }
 0x411   : > { %v1893_v17 = vadd.f32 %v1869_v5, %v1713_v0  ;;  %v7297_v26 = vmul.f32 %v9676_v18, %v2899_v56  ;;  %v1819_v60 = vmul.f32 %v7249_v22, %v1802_v58  ;;  %v1654_v13 = vmul.f32 %v9669_v24, %v6919_v63  ;;  %v9695_v24 = vld [vmem:[#allocation40_spill] sm:$0xff] }
 0x412   : > { %v1784_v11 = vsel %vm1783_vm10, %v9649_v54, %v9673_v52  ;;  %v1651_v5 = vmul.f32 %v7159_v62, %v6924_v53  ;;  %v1881_v37 = vmul.f32 %v9587_v9, %v1833_v25  ;;  %v1711_v56 = vadd.f32 %v1687_v3, %v7010_v59  ;;  %v9681_v59 = vld [vmem:[#allocation90_spill] sm:$0xff] }
 0x413   : > { %9677 = vst [vmem:[#allocation89_spill] sm:$0xff] %v7297_v26  ;;  %v1714_v0 = vadd.f32 %v1690_v10, %v7027_v34  ;;  %v7313_v58 = vmul.f32 %v6586_v7, %v2522_v39  ;;  %v7316_v63 = vmul.f32 %v9651_v50, %v2179_v48  ;;  %v7319_v1 = vperm.slane %v7111_v14, 1  ;;  %v9682_v3 = vld [vmem:[#allocation34_spill] sm:$0xff]  ;;  %v9683_v48 = vld [vmem:[#allocation92_spill] sm:$0xff]  ;;  %v9693_v7 = vld [vmem:[#allocation13_spill] sm:$0xff] }
 0x414   : > { %v7321_v54 = vadd.f32 %v2049_v45, %v1893_v17  ;;  %v2061_v52 = vmul.f32 %v9680_v4, %v2013_v46  ;;  %v1905_v53 = vadd.f32 %v1881_v37, %v1725_v55  ;;  %v2702_v34 = vsel %vm2683_vm12, %v9681_v59, %v9633_v32  ;;  %v9684_v17 = vld [vmem:[#allocation172_spill] sm:$0xff]  ;;  %v9685_v32 = vld [vmem:[#allocation138_spill] sm:$0xff] }
 0x415   : > { %9678 = vst [vmem:[#allocation91_spill] sm:$0xff] %v7313_v58  ;;  %v1822_v29 = vmul.f32 %v9682_v3, %v1784_v11  ;;  %v1867_v10 = vmul.f32 %v9638_v16, %v1819_v60  ;;  %v1702_v45 = vmul.f32 %v9582_v27, %v1654_v13  ;;  %v2870_v39 = vsel %vm2863_vm15, %v9666_v38, %v9683_v48  ;;  %v7346_v11 = vpop.permute.xlu2 %2845  ;;  %v1778_v60 = vpop.permute.xlu1 %1777  ;;  %v9686_v13 = vld [vmem:[#allocation177_spill] sm:$0xff]  ;;  %v9689_v58 = vld [vmem:[#allocation10_spill] sm:$0xff] }
 0x416   : > { %9679 = vst [vmem:[#allocation87_spill] sm:$0xff] %v7319_v1  ;;  %v2339_v46 = vsel %vm2323_vm13, %v6892_v35, %v9684_v17  ;;  %v1699_v25 = vmul.f32 %v9582_v27, %v1651_v5  ;;  %2835 = vrot.lane.b32.xlu0 %v9685_v32, %s4592_s11  ;;  %v2085_v55 = vadd.f32 %v2061_v52, %v1905_v53  ;;  %v9688_v27 = vld [vmem:[#allocation175_spill] sm:$0xff] }
 0x417   : > { %v2011_v37 = vmul.f32 %v7140_v61, %v9686_v13  ;;  %v7354_v38 = vsel %vm2863_vm15, %v7346_v11, %v6938_v28  ;;  %v1787_v35 = vsel %vm1783_vm10, %v1766_v2, %v1778_v60  ;;  %v1805_v5 = vsel %vm1783_vm10, %v1778_v60, %v9688_v27  ;;  %v1758_v26 = vpop.permute.xlu0 %1757  ;;  %v9694_v27 = vld [vmem:[#allocation55_spill] sm:$0xff] }
 0x418   : > { %9687 = vst [vmem:[#allocation61_spill] sm:$0xff] %v7354_v38  ;;  %v2014_v52 = vmul.f32 %v9690_v57, %v9689_v58  ;;  %v1831_v53 = vmul.f32 %v7249_v22, %v1805_v5  ;;  %v1834_v13 = vmul.f32 %v9682_v3, %v1787_v35  ;;  %v7368_v28 = vsel %vm1783_vm10, %v7284_v21, %v1758_v26  ;;  %v9692_v38 = vld [vmem:[#allocation137_spill] sm:$0xff] }
 0x419   : > { %9691 = vst [vmem:[#allocation90_spill] sm:$0xff] %v7368_v28  ;;  %v2722_v23 = vmul.f32 %v9692_v38, %v2702_v34  ;;  %v1870_v2 = vmul.f32 %v9638_v16, %v1822_v29  ;;  %v1891_v36 = vadd.f32 %v1867_v10, %v1711_v56  ;;  %v1726_v60 = vadd.f32 %v1702_v45, %v9693_v7  ;;  %v9696_v3 = vld [vmem:[#allocation105_spill] sm:$0xff]  ;;  %v9697_v28 = vld [vmem:[#allocation118_spill] sm:$0xff]  ;;  %v9698_v16 = vld [vmem:[#allocation15_spill] sm:$0xff] }
 0x41a   : > { %v1723_v20 = vadd.f32 %v1699_v25, %v9694_v27  ;;  %v2191_v58 = vmul.f32 %v7166_v30, %v9695_v24  ;;  %v1879_v5 = vmul.f32 %v9587_v9, %v1831_v53  ;;  %v1882_v35 = vmul.f32 %v9587_v9, %v1834_v13  ;;  %v9699_v24 = vld [vmem:[#allocation143_spill] sm:$0xff]  ;;  %v9700_v9 = vld [vmem:[#allocation161_spill] sm:$0xff] }
 0x41b   : > { %v2900_v57 = vmul.f32 %v7319_v1, %v2870_v39  ;;  %v1624_v34 = vsel %vm1604_vm9, %v9697_v28, %v9696_v3  ;;  %v2371_v56 = vmul.f32 %v9698_v16, %v2339_v46  ;;  %v2059_v7 = vmul.f32 %v9680_v4, %v2011_v37  ;;  %2487 = vrot.lane.b32.xlu1 %v9699_v24, %s4591_s10  ;;  %v9701_v53 = vld [vmem:[#allocation93_spill] sm:$0xff]  ;;  %v9702_v37 = vld [vmem:[#allocation78_spill] sm:$0xff] }
 0x41c   : > { %v2062_v29 = vmul.f32 %v9680_v4, %v2014_v52  ;;  %v1903_v10 = vadd.f32 %v1879_v5, %v1723_v20  ;;  %v1906_v45 = vadd.f32 %v1882_v35, %v1726_v60  ;;  %1600 = vrot.lane.b32.xlu2 %v9700_v9, %s4588_s29  ;;  %v1894_v39 = vadd.f32 %v1870_v2, %v1714_v0  ;;  %v9703_v52 = vld [vmem:[#allocation54_spill] sm:$0xff]  ;;  %v9704_v60 = vld [vmem:[#allocation37_spill] sm:$0xff]  ;;  %v9705_v2 = vld [vmem:[#allocation63_spill] sm:$0xff] }
 0x41d   : > { %v2071_v25 = vadd.f32 %v7256_v31, %v1891_v36  ;;  %v2144_v46 = vsel %vm2143_vm11, %v9701_v53, %v9671_v8  ;;  %v2150_v20 = vsel %vm2143_vm11, %v9702_v37, %v9701_v53  ;;  %v1643_v4 = vmul.f32 %v7159_v62, %v1624_v34  ;;  %v2126_v0 = vpop.permute.xlu1 %2125  ;;  %v7403_v31 = vpop.permute.xlu2 %1743  ;;  %v9706_v8 = vld [vmem:[#allocation71_spill] sm:$0xff]  ;;  %v9708_v34 = vld [vmem:[#allocation169_spill] sm:$0xff] }
 0x41e   : > { %v2239_v13 = vmul.f32 %v9703_v52, %v2191_v58  ;;  %v2083_v28 = vadd.f32 %v2059_v7, %v1903_v10  ;;  %2465 = vrot.lane.b32.xlu0 %v9704_v60, %s4591_s10  ;;  %v2086_v36 = vadd.f32 %v2062_v29, %v1906_v45  ;;  %v2419_v27 = vmul.f32 %v9705_v2, %v2371_v56  ;;  %v9707_v35 = vld [vmem:[#allocation3_spill] sm:$0xff]  ;;  %v9710_v29 = vld [vmem:[#allocation125_spill] sm:$0xff] }
 0x41f   : > { %v2374_v5 = vmul.f32 %v6577_v33, %v9706_v8  ;;  %v2147_v53 = vsel %vm2143_vm11, %v2126_v0, %v9707_v35  ;;  %v2153_v58 = vsel %vm2143_vm11, %v9708_v34, %v2126_v0  ;;  %v1770_v7 = vpop.permute.xlu0 %1769  ;;  %v9709_v37 = vld [vmem:[#allocation123_spill] sm:$0xff]  ;;  %v9712_v62 = vld [vmem:[#allocation53_spill] sm:$0xff]  ;;  %v7424_v33 = vmul.f32 %v9676_v18, %v2900_v57  ;;  %v9715_v34 = vld [vmem:[#allocation94_spill] sm:$0xff] }
 0x420   : > { %v2263_v10 = vadd.f32 %v2239_v13, %v2083_v28  ;;  %v2193_v38 = vmul.f32 %v9709_v37, %v2153_v58  ;;  %v2194_v45 = vmul.f32 %v9710_v29, %v2147_v53  ;;  %v7418_v56 = vsel %vm1783_vm10, %v1758_v26, %v1770_v7  ;;  %v9716_v13 = vld [vmem:[#allocation103_spill] sm:$0xff] }
 0x421   : > { %9711 = vst [vmem:[#allocation92_spill] sm:$0xff] %v7418_v56  ;;  %v7421_v8 = vmul.f32 %v9712_v62, %v2722_v23  ;;  %v2074_v35 = vadd.f32 %v7259_v41, %v1894_v39  ;;  %v2182_v0 = vmul.f32 %v9710_v29, %v2144_v46  ;;  %v1803_v28 = vsel %vm1783_vm10, %v9716_v13, %v9715_v34  ;;  %v9719_v41 = vld [vmem:[#allocation8_spill] sm:$0xff] }
 0x422   : > { %9714 = vst [vmem:[#allocation138_spill] sm:$0xff] %v7424_v33  ;;  %v2241_v53 = vmul.f32 %v9703_v52, %v2193_v38  ;;  %v2242_v26 = vmul.f32 %v9703_v52, %v2194_v45  ;;  %v7434_v58 = vadd.f32 %v2419_v27, %v2263_v10  ;;  %v2181_v23 = vmul.f32 %v9709_v37, %v2150_v20  ;;  %v9720_v33 = vld [vmem:[#allocation128_spill] sm:$0xff] }
 0x423   : > { %9713 = vst [vmem:[#allocation172_spill] sm:$0xff] %v7421_v8  ;;  %v9718_v8 = vld [vmem:[#allocation108_spill] sm:$0xff]  ;;  %v1691_v39 = vmul.f32 %v9719_v41, %v1643_v4  ;;  %v7443_v46 = vadd.f32 %v7316_v63, %v2071_v25  ;;  %v7446_v13 = vperm.slane %v9720_v33, 1  ;;  %v2422_v38 = vmul.f32 %v9705_v2, %v2374_v5  ;;  %2400 = vperm.xlu1 %4452, %v6949_v6   ;;  %v9725_v25 = vld [vmem:[#allocation79_spill] sm:$0xff] }
 0x424   : > { %9717 = vst [vmem:[#allocation177_spill] sm:$0xff] %v7434_v58  ;;  %v1618_v57 = vsel %vm1604_vm9, %v9696_v3, %v9718_v8  ;;  %v2265_v52 = vadd.f32 %v2241_v53, %v2085_v55  ;;  %v2266_v27 = vadd.f32 %v2242_v26, %v2086_v36  ;;  %v9722_v20 = vld [vmem:[#allocation36_spill] sm:$0xff]  ;;  %v2230_v10 = vmul.f32 %v9651_v50, %v2182_v0  ;;  %v9726_v4 = vld [vmem:[#allocation147_spill] sm:$0xff]  ;;  %v9728_v8 = vld [vmem:[#allocation114_spill] sm:$0xff] }
 0x425   : > { %9721 = vst [vmem:[#allocation175_spill] sm:$0xff] %v7446_v13  ;;  %2499 = vrot.lane.b32.xlu2 %v9722_v20, %s4591_s10  ;;  %v9723_v3 = vld [vmem:[#allocation84_spill] sm:$0xff]  ;;  %v1823_v55 = vmul.f32 %v7249_v22, %v1803_v28  ;;  %v1644_v36 = vmul.f32 %v9726_v4, %v1618_v57  ;;  %v9727_v5 = vld [vmem:[#allocation95_spill] sm:$0xff]  ;;  %v9730_v26 = vld [vmem:[#allocation121_spill] sm:$0xff]  ;;  %v2306_v28 = vpop.permute.xlu1 %2305  ;;  %v7479_v57 = vpop.permute.xlu2 %1755 }
 0x426   : > { %v9724_v45 = vld [vmem:[#allocation96_spill] sm:$0xff]  ;;  %v1983_v53 = vsel %vm1963_vm8, %v9728_v8, %v9727_v5  ;;  %v9733_v8 = vld [vmem:[#allocation67_spill] sm:$0xff] }
 0x427   : > { %v2324_v63 = vsel %vm2323_vm13, %v9724_v45, %v9723_v3  ;;  %v2330_v33 = vsel %vm2323_vm13, %v9725_v25, %v9724_v45  ;;  %v9729_v0 = vld [vmem:[#allocation100_spill] sm:$0xff]  ;;  %v7471_v3 = vadd.f32 %v2422_v38, %v2266_v27  ;;  %v7476_v45 = vld [vmem:[%s8959_s2 + $0x28] sm:$0xff]  ;;  %v2327_v56 = vsel %vm2323_vm13, %v2306_v28, %v9733_v8 }
 0x428   : > { %v2163_v58 = vsel %vm2143_vm11, %v9730_v26, %v9729_v0  ;;  %2584 = vperm.xlu0 %4457, %v7476_v45   ;;  %v9732_v25 = vld [vmem:[#allocation72_spill] sm:$0xff]  ;;  %v2333_v38 = vsel %vm2323_vm13, %v9684_v17, %v2306_v28  ;;  %v7492_v27 = vsel %vm1783_vm10, %v7403_v31, %v7479_v57  ;;  %v1782_v26 = vpop.permute.xlu0 %1781  ;;  %v9739_v17 = vld [vmem:[#allocation9_spill] sm:$0xff]  ;;  %v2003_v22 = vmul.f32 %v7140_v61, %v1983_v53 }
 0x429   : > { %9731 = vst [vmem:[#allocation10_spill] sm:$0xff] %v7471_v3  ;;  %v1715_v37 = vadd.f32 %v1691_v39, %v9732_v25  ;;  %v9735_v3 = vld [vmem:[#allocation97_spill] sm:$0xff]  ;;  %v9736_v25 = vld [vmem:[#allocation127_spill] sm:$0xff]  ;;  %v9737_v29 = vld [vmem:[#allocation132_spill] sm:$0xff]  ;;  %v7502_v4 = vsel %vm1783_vm10, %v1770_v7, %v1782_v26  ;;  %v1871_v28 = vmul.f32 %v9739_v17, %v1823_v55  ;;  %v7510_v18 = vsel %vm1783_vm10, %v1782_v26, %v7284_v21 }
 0x42a   : > { %9734 = vst [vmem:[#allocation13_spill] sm:$0xff] %v7492_v27  ;;  %v1797_v39 = vsel %vm1783_vm10, %v9715_v34, %v9735_v3  ;;  %v2372_v6 = vmul.f32 %v9736_v25, %v2333_v38  ;;  %v2373_v8 = vmul.f32 %v9737_v29, %v2327_v56  ;;  %v2183_v27 = vmul.f32 %v7166_v30, %v2163_v58  ;;  %v9741_v55 = vld [vmem:[#allocation98_spill] sm:$0xff]  ;;  %v9742_v53 = vld [vmem:[#allocation148_spill] sm:$0xff] }
 0x42b   : > { %9738 = vst [vmem:[#allocation55_spill] sm:$0xff] %v7502_v4  ;;  %v2360_v34 = vmul.f32 %v9736_v25, %v2330_v33  ;;  %v1692_v3 = vmul.f32 %v9719_v41, %v1644_v36  ;;  %v2361_v38 = vmul.f32 %v9737_v29, %v2324_v63  ;;  %v1977_v58 = vsel %vm1963_vm8, %v9727_v5, %v9741_v55  ;;  %v9743_v21 = vld [vmem:[#allocation130_spill] sm:$0xff]  ;;  %v9745_v33 = vld [vmem:[#allocation101_spill] sm:$0xff] }
 0x42c   : > { %9740 = vst [vmem:[#allocation40_spill] sm:$0xff] %v7510_v18  ;;  %v2420_v56 = vmul.f32 %v9705_v2, %v2372_v6  ;;  %v2421_v7 = vmul.f32 %v9705_v2, %v2373_v8  ;;  %v1824_v4 = vmul.f32 %v9742_v53, %v1797_v39  ;;  %v1895_v30 = vadd.f32 %v1871_v28, %v1715_v37  ;;  %v9746_v18 = vld [vmem:[#allocation113_spill] sm:$0xff]  ;;  %v9747_v41 = vld [vmem:[#allocation2_spill] sm:$0xff] }
 0x42d   : > { %v7523_v26 = vperm.slane %v9743_v21, 1  ;;  %v2337_v6 = vsel %vm2323_vm13, %v9746_v18, %v9745_v33  ;;  %2667 = vrot.lane.b32.xlu1 %v9699_v24, %s4593_s12  ;;  %2295 = vrot.lane.b32.xlu2 %v9685_v32, %s4589_s30  ;;  %v2229_v37 = vmul.f32 %v9651_v50, %v2181_v23  ;;  %v2254_v36 = vadd.f32 %v2230_v10, %v2074_v35  ;;  %v9750_v5 = vld [vmem:[#allocation41_spill] sm:$0xff]  ;;  %v9751_v8 = vld [vmem:[#allocation18_spill] sm:$0xff]  ;;  %v7551_v50 = vpop.permute.xlu1 %2485 }
 0x42e   : > { %v7530_v2 = vadd.f32 %v2420_v56, %v9747_v41  ;;  %v7532_v63 = vadd.f32 %v2421_v7, %v2265_v52  ;;  %v2051_v39 = vmul.f32 %v9750_v5, %v2003_v22  ;;  %v2231_v28 = vmul.f32 %v9751_v8, %v2183_v27  ;;  %v9753_v56 = vld [vmem:[#allocation151_spill] sm:$0xff]  ;;  %9756 = vst [vmem:[#allocation161_spill] sm:$0xff] %v7551_v50  ;;  %v7553_v22 = vpop.permute.xlu2 %2283  ;;  %v9758_v27 = vld [vmem:[#allocation24_spill] sm:$0xff] }
 0x42f   : > { %9744 = vst [vmem:[#allocation105_spill] sm:$0xff] %v7523_v26  ;;  %v9752_v55 = vmov 12   ;;  %v2408_v18 = vmul.f32 %v9668_v51, %v2360_v34  ;;  %v2004_v52 = vmul.f32 %v9753_v56, %v1977_v58  ;;  %v9754_v7 = vld [vmem:[#allocation39_spill] sm:$0xff]  ;;  %v2409_v35 = vmul.f32 %v9668_v51, %v2361_v38 }
 0x430   : > { %9748 = vst [vmem:[#allocation118_spill] sm:$0xff] %v7530_v2  ;;  %4453 = vset.pattern.permute.xlu1 %v9752_v55  ;;  %v1716_v21 = vadd.f32 %v1692_v3, %v9754_v7  ;;  %v9755_v41 = vld [vmem:[#allocation111_spill] sm:$0xff]  ;;  %2861 = vrot.lane.b32.xlu0 %v9700_v9, %s4592_s11  ;;  %v2363_v23 = vmul.f32 %v9698_v16, %v2337_v6  ;;  %v2834_v3 = vpop.permute.xlu0 %2833  ;;  %v7580_v6 = vperm.slane %v7111_v14, 2 }
 0x431   : > { %9749 = vst [vmem:[#allocation143_spill] sm:$0xff] %v7532_v63  ;;  %v2157_v32 = vsel %vm2143_vm11, %v9729_v0, %v9755_v41  ;;  %v2075_v10 = vadd.f32 %v2051_v39, %v1895_v30  ;;  %v7561_v34 = vsel %vm2503_vm14, %v7551_v50, %v9758_v27  ;;  %4462 = vset.pattern.permute.xlu0 %v9752_v55  ;;  %v9760_v58 = vld [vmem:[#allocation99_spill] sm:$0xff]  ;;  %v9766_v39 = vld [vmem:[#allocation152_spill] sm:$0xff]  ;;  %v9858_v50 = vld [vmem:[#allocation74_spill] sm:$0xff] }
 0x432   : > { %9757 = vst [vmem:[#allocation93_spill] sm:$0xff] %v7553_v22  ;;  %v1872_v0 = vmul.f32 %v9739_v17, %v1824_v4  ;;  %v9761_v7 = vld [vmem:[#allocation115_spill] sm:$0xff]  ;;  %v7572_v30 = vsel %vm2863_vm15, %v2834_v3, %v7346_v11  ;;  %v2184_v4 = vmul.f32 %v9766_v39, %v2157_v32  ;;  %v7585_v27 = vadd.f32 %v7237_v49, %v7443_v46  ;;  %v9772_v49 = vld [vmem:[#allocation45_spill] sm:$0xff] }
 0x433   : > { %9759 = vst [vmem:[#allocation78_spill] sm:$0xff] %v7561_v34  ;;  %v2517_v41 = vsel %vm2503_vm14, %v9761_v7, %v9760_v58  ;;  %v9763_v51 = vld [vmem:[#allocation179_spill] sm:$0xff]  ;;  %v2255_v17 = vadd.f32 %v2231_v28, %v2075_v10  ;;  %v2253_v7 = vadd.f32 %v2229_v37, %v7321_v54  ;;  %v2052_v11 = vmul.f32 %v9750_v5, %v2004_v52  ;;  %v9846_v34 = vld [vmem:[#allocation153_spill] sm:$0xff] }
 0x434   : > { %9762 = vst [vmem:[#allocation54_spill] sm:$0xff] %v7572_v30  ;;  %v7577_v38 = vsel %vm2863_vm15, %v9763_v51, %v2834_v3  ;;  %v1896_v29 = vadd.f32 %v1872_v0, %v1716_v21  ;;  %v7590_v22 = vadd.f32 %v7294_v42, %v2254_v36  ;;  %v9769_v3 = vld [vmem:[#allocation106_spill] sm:$0xff]  ;;  %v9770_v51 = vld [vmem:[#allocation104_spill] sm:$0xff]  ;;  %v9771_v63 = vld [vmem:[#allocation107_spill] sm:$0xff]  ;;  %v2411_v46 = vmul.f32 %v9772_v49, %v2363_v23 }
 0x435   : > { %9764 = vst [vmem:[#allocation63_spill] sm:$0xff] %v7577_v38  ;;  %v2697_v55 = vsel %vm2683_vm12, %v9770_v51, %v9769_v3  ;;  %v2331_v28 = vsel %vm2323_vm13, %v9745_v33, %v9771_v63  ;;  %v2543_v54 = vmul.f32 %v7143_v40, %v2517_v41  ;;  %v7603_v37 = vadd.f32 %v2408_v18, %v7233_v15  ;;  %v9775_v42 = vld [vmem:[#allocation26_spill] sm:$0xff]  ;;  %v9777_v21 = vld [vmem:[#allocation48_spill] sm:$0xff]  ;;  %v7634_v41 = vpop.permute.xlu1 %2665  ;;  %v9795_v2 = vld [vmem:[#allocation51_spill] sm:$0xff] }
 0x436   : > { %9765 = vst [vmem:[#allocation71_spill] sm:$0xff] %v7580_v6  ;;  %v7605_v5 = vadd.f32 %v2409_v35, %v2253_v7  ;;  %v2684_v36 = vsel %vm2683_vm12, %v9775_v42, %v9681_v59  ;;  %v7612_v52 = vperm.slane %v7111_v14, 3  ;;  %3008 = vperm.xlu1 %4453, %v9777_v21   ;;  %2679 = vrot.lane.b32.xlu2 %v9722_v20, %s4593_s12  ;;  %v9778_v33 = vld [vmem:[#allocation76_spill] sm:$0xff]  ;;  %v9779_v63 = vld [vmem:[#allocation110_spill] sm:$0xff]  ;;  %v1768_v7 = vpop.permute.xlu2 %1767  ;;  %v9855_v30 = vld [vmem:[#allocation57_spill] sm:$0xff] }
 0x437   : > { %9767 = vst [vmem:[#allocation3_spill] sm:$0xff] %v7585_v27  ;;  %v2690_v15 = vsel %vm2683_vm12, %v9778_v33, %v9775_v42  ;;  %v2511_v18 = vsel %vm2503_vm14, %v9760_v58, %v9779_v63  ;;  %v2232_v59 = vmul.f32 %v9751_v8, %v2184_v4  ;;  %v2435_v32 = vadd.f32 %v2411_v46, %v2255_v17  ;;  %v9780_v14 = vld [vmem:[#allocation28_spill] sm:$0xff]  ;;  %v9783_v58 = vld [vmem:[#allocation47_spill] sm:$0xff]  ;;  %v9784_v8 = vld [vmem:[#allocation109_spill] sm:$0xff] }
 0x438   : > { %9768 = vst [vmem:[#allocation169_spill] sm:$0xff] %v7590_v22  ;;  %v2723_v35 = vmul.f32 %v9780_v14, %v2697_v55  ;;  %v2364_v23 = vmul.f32 %v9736_v25, %v2331_v28  ;;  %v2076_v10 = vadd.f32 %v2052_v11, %v1896_v29  ;;  %v9781_v0 = vld [vmem:[#allocation112_spill] sm:$0xff]  ;;  %2825 = vrot.lane.b32.xlu0 %v9704_v60, %s4592_s11  ;;  %v9785_v4 = vld [vmem:[#allocation30_spill] sm:$0xff]  ;;  %v7652_v11 = vpop.permute.xlu0 %2463  ;;  %v9790_v46 = vld [vmem:[#allocation81_spill] sm:$0xff] }
 0x439   : > { %9773 = vst [vmem:[#allocation53_spill] sm:$0xff] %v7603_v37  ;;  %v2691_v20 = vsel %vm2683_vm12, %v9769_v3, %v9781_v0  ;;  %v2591_v51 = vmul.f32 %v9783_v58, %v2543_v54  ;;  %v2877_v55 = vsel %vm2863_vm15, %v9785_v4, %v9784_v8  ;;  %v7645_v29 = vsel %vm2683_vm12, %v7634_v41, %v7271_v12  ;;  %v9789_v3 = vld [vmem:[#allocation25_spill] sm:$0xff]  ;;  %v9791_v21 = vld [vmem:[#allocation102_spill] sm:$0xff]  ;;  %v9792_v33 = vld [vmem:[#allocation80_spill] sm:$0xff] }
 0x43a   : > { %9774 = vst [vmem:[#allocation94_spill] sm:$0xff] %v7605_v5  ;;  %v7650_v17 = vsel %vm1783_vm10, %v7479_v57, %v1768_v7  ;;  %v2504_v28 = vsel %vm2503_vm14, %v9789_v3, %v9675_v43  ;;  %v2510_v54 = vsel %vm2503_vm14, %v9790_v46, %v9789_v3  ;;  %v2720_v12 = vmul.f32 %v7523_v26, %v2690_v15  ;;  %v9793_v25 = vld [vmem:[#allocation134_spill] sm:$0xff]  ;;  %v9794_v46 = vld [vmem:[#allocation139_spill] sm:$0xff]  ;;  %v9796_v5 = vld [vmem:[#allocation29_spill] sm:$0xff] }
 0x43b   : > { %9776 = vst [vmem:[#allocation103_spill] sm:$0xff] %v7612_v52  ;;  %v2544_v42 = vmul.f32 %v7446_v13, %v2511_v18  ;;  %v2864_v57 = vsel %vm2863_vm15, %v9683_v48, %v9791_v21  ;;  %v2882_v63 = vsel %vm2863_vm15, %v9791_v21, %v9792_v33  ;;  %v2256_v43 = vadd.f32 %v2232_v59, %v2076_v10  ;;  %v9833_v37 = vld [vmem:[#allocation4_spill] sm:$0xff] }
 0x43c   : > { %9782 = vst [vmem:[#allocation108_spill] sm:$0xff] %v7634_v41  ;;  %v2615_v0 = vadd.f32 %v2591_v51, %v2435_v32  ;;  %v2724_v3 = vmul.f32 %v7523_v26, %v2691_v20  ;;  %v2903_v15 = vmul.f32 %v7151_v44, %v2877_v55  ;;  %v2871_v18 = vsel %vm2863_vm15, %v9784_v8, %v9794_v46  ;;  %v9797_v32 = vld [vmem:[#allocation122_spill] sm:$0xff] }
 0x43d   : > { %9786 = vst [vmem:[#allocation8_spill] sm:$0xff] %v7645_v29  ;;  %v2771_v48 = vmul.f32 %v9795_v2, %v2723_v35  ;;  %v2412_v22 = vmul.f32 %v9772_v49, %v2364_v23  ;;  %v2883_v59 = vsel %vm2863_vm15, %v9796_v5, %v9785_v4  ;;  %v2901_v20 = vmul.f32 %v7580_v6, %v2864_v57  ;;  %v9854_v41 = vld [vmem:[#allocation46_spill] sm:$0xff] }
 0x43e   : > { %9787 = vst [vmem:[#allocation128_spill] sm:$0xff] %v7650_v17  ;;  %v2902_v51 = vmul.f32 %v7612_v52, %v2882_v63  ;;  %v2592_v8 = vmul.f32 %v9783_v58, %v2544_v42  ;;  %2117 = vrot.lane.b32.xlu1 %v6755_v19, %s4590_s9  ;;  %1961 = vrot.lane.b32.xlu2 %v9700_v9, %s4586_s25  ;;  %v9799_v4 = vmov 2   ;;  %v9800_v42 = vld [vmem:[#allocation64_spill] sm:$0xff]  ;;  %v1780_v63 = vpop.permute.xlu2 %1779  ;;  %v9853_v17 = vld [vmem:[#allocation14_spill] sm:$0xff] }
 0x43f   : > { %9788 = vst [vmem:[#allocation36_spill] sm:$0xff] %v7652_v11  ;;  %v2721_v11 = vmul.f32 %v9793_v25, %v2684_v36  ;;  %v9798_v36 = vld [vmem:[#allocation119_spill] sm:$0xff]  ;;  %v2436_v49 = vadd.f32 %v2412_v22, %v2256_v43  ;;  %v2865_v35 = vsel %vm2863_vm15, %v9794_v46, %v9796_v5  ;;  %v2904_v23 = vmul.f32 %v7319_v1, %v2871_v18  ;;  %v7706_v22 = vpop.permute.xlu1 %1562  ;;  %v9802_v43 = vld [vmem:[#allocation145_spill] sm:$0xff]  ;;  %v9803_v5 = vld [vmem:[#allocation140_spill] sm:$0xff] }
 0x440   : > { %v2338_v10 = vsel %vm2323_vm13, %v9798_v36, %v9797_v32  ;;  %4454 = vset.pattern.permute.xlu1 %v9799_v4  ;;  %v2795_v55 = vadd.f32 %v2771_v48, %v2615_v0  ;;  %v2772_v21 = vmul.f32 %v9795_v2, %v2724_v3  ;;  %v2906_v58 = vmul.f32 %v7612_v52, %v2883_v59  ;;  %v9804_v18 = vld [vmem:[#allocation116_spill] sm:$0xff]  ;;  %v9809_v59 = vld [vmem:[#allocation133_spill] sm:$0xff] }
 0x441   : > { %v2951_v57 = vmul.f32 %v9800_v42, %v2903_v15  ;;  %v2367_v33 = vmul.f32 %v9698_v16, %v2338_v10  ;;  %9801 = vst [vmem:[#allocation84_spill] sm:$0xff] %v7706_v22  ;;  %3016 = vperm.xlu0 %4462, %v7476_v45   ;;  %v1607_v46 = vsel %vm1604_vm9, %v9803_v5, %v9802_v43  ;;  %v7726_v15 = vpop.permute.xlu0 %2475  ;;  %v9815_v16 = vld [vmem:[#allocation69_spill] sm:$0xff] }
 0x442   : > { %v1625_v2 = vsel %vm1604_vm9, %v9802_v43, %v9804_v18  ;;  %v7719_v0 = vsel %vm1783_vm10, %v1768_v7, %v1780_v63  ;;  %v7724_v3 = vsel %vm1783_vm10, %v1780_v63, %v7403_v31  ;;  %9807 = vst [vmem:[#allocation95_spill] sm:$0xff] %v7726_v15  ;;  %v7729_v48 = vmul.f32 %v7446_v13, %v2510_v54  ;;  %v9813_v18 = vld [vmem:[#allocation135_spill] sm:$0xff]  ;;  %v9814_v54 = vld [vmem:[#allocation136_spill] sm:$0xff] }
 0x443   : > { %9805 = vst [vmem:[#allocation96_spill] sm:$0xff] %v7719_v0  ;;  %v7732_v32 = vmul.f32 %v9809_v59, %v2504_v28  ;;  %v7735_v10 = vmul.f32 %v9712_v62, %v2720_v12  ;;  %v2905_v4 = vmul.f32 %v7580_v6, %v2865_v35  ;;  %v7739_v7 = vmul.f32 %v9712_v62, %v2721_v11  ;;  %v9816_v12 = vld [vmem:[#allocation117_spill] sm:$0xff]  ;;  %v9820_v11 = vld [vmem:[#allocation20_spill] sm:$0xff] }
 0x444   : > { %9806 = vst [vmem:[#allocation79_spill] sm:$0xff] %v7724_v3  ;;  %v2952_v43 = vmul.f32 %v9800_v42, %v2904_v23  ;;  %v2975_v31 = vadd.f32 %v2951_v57, %v2795_v55  ;;  %v2616_v63 = vadd.f32 %v2592_v8, %v2436_v49  ;;  %v2954_v5 = vmul.f32 %v9800_v42, %v2906_v58  ;;  %v9821_v55 = vld [vmem:[#allocation144_spill] sm:$0xff]  ;;  %v9822_v58 = vld [vmem:[#allocation162_spill] sm:$0xff] }
 0x445   : > { %9808 = vst [vmem:[#allocation114_spill] sm:$0xff] %v7729_v48  ;;  %v2518_v28 = vsel %vm2503_vm14, %v9814_v54, %v9813_v18  ;;  %v1647_v15 = vmul.f32 %v9815_v16, %v1625_v2  ;;  %v1650_v19 = vmul.f32 %v9816_v12, %v1607_v46  ;;  %v7756_v23 = vmul.f32 %v9820_v11, %v2367_v33  ;;  %v9823_v2 = vld [vmem:[#allocation126_spill] sm:$0xff]  ;;  %v9825_v46 = vld [vmem:[#allocation35_spill] sm:$0xff] }
 0x446   : > { %9810 = vst [vmem:[#allocation100_spill] sm:$0xff] %v7732_v32  ;;  %v2796_v8 = vadd.f32 %v2772_v21, %v2616_v63  ;;  %v2953_v49 = vmul.f32 %v9800_v42, %v2905_v4  ;;  %v1984_v57 = vsel %vm1963_vm8, %v9822_v58, %v9821_v55  ;;  %2643 = vrot.lane.b32.xlu1 %v9823_v2, %s4593_s12  ;;  %v9827_v33 = vld [vmem:[#allocation31_spill] sm:$0xff]  ;;  %v9828_v21 = vld [vmem:[#allocation85_spill] sm:$0xff]  ;;  %v9829_v42 = vld [vmem:[#allocation56_spill] sm:$0xff] }
 0x447   : > { %9811 = vst [vmem:[#allocation121_spill] sm:$0xff] %v7735_v10  ;;  %v9817_v10 = vld [vmem:[#allocation43_spill] sm:$0xff]  ;;  %v1827_v63 = vmul.f32 %v9828_v21, %v9827_v33  ;;  %v7774_v4 = vadd.f32 %v9829_v42, %v2975_v31  ;;  %v9832_v55 = vld [vmem:[#allocation141_spill] sm:$0xff]  ;;  %v1695_v27 = vmul.f32 %v9833_v37, %v1647_v15  ;;  %v1698_v32 = vmul.f32 %v9833_v37, %v1650_v19  ;;  %v7786_v48 = vpop.permute.xlu1 %1574 }
 0x448   : > { %9812 = vst [vmem:[#allocation72_spill] sm:$0xff] %v7739_v7  ;;  %v7750_v35 = vmul.f32 %v9817_v10, %v2901_v20  ;;  %v7753_v62 = vmul.f32 %v9817_v10, %v2902_v51  ;;  %v9824_v20 = vld [vmem:[#allocation158_spill] sm:$0xff]  ;;  %v2978_v51 = vadd.f32 %v2954_v5, %v9825_v46  ;;  %v7769_v10 = vmul.f32 %v7143_v40, %v2518_v28  ;;  %v9834_v5 = vld [vmem:[#allocation157_spill] sm:$0xff]  ;;  %v9838_v31 = vld [vmem:[#allocation159_spill] sm:$0xff] }
 0x449   : > { %2129 = vrot.lane.b32.xlu2 %v9824_v20, %s4590_s9  ;;  %9830 = vst [vmem:[#allocation98_spill] sm:$0xff] %v7774_v4  ;;  %v9835_v46 = vld [vmem:[#allocation34_spill] sm:$0xff]  ;;  %v9839_v33 = vld [vmem:[#allocation75_spill] sm:$0xff]  ;;  %v1621_v19 = vsel %vm1604_vm9, %v7706_v22, %v7786_v48  ;;  %v7801_v37 = vpop.permute.xlu0 %2859  ;;  %v9848_v22 = vld [vmem:[#allocation44_spill] sm:$0xff] }
 0x44a   : > { %9818 = vst [vmem:[#allocation67_spill] sm:$0xff] %v7750_v35  ;;  %v9831_v35 = vld [vmem:[#allocation146_spill] sm:$0xff]  ;;  %v1830_v28 = vmul.f32 %v9835_v46, %v9834_v5  ;;  %v9842_v5 = vld [vmem:[#allocation13_spill] sm:$0xff]  ;;  %v9843_v16 = vld [vmem:[#allocation147_spill] sm:$0xff]  ;;  %v1875_v3 = vmul.f32 %v9848_v22, %v1827_v63  ;;  %v1722_v63 = vadd.f32 %v1698_v32, %v9854_v41 }
 0x44b   : > { %9819 = vst [vmem:[#allocation97_spill] sm:$0xff] %v7753_v62  ;;  %v2976_v62 = vadd.f32 %v2952_v43, %v2796_v8  ;;  %v2698_v7 = vsel %vm2683_vm12, %v9832_v55, %v9831_v35  ;;  %v1966_v43 = vsel %vm1963_vm8, %v9838_v31, %v9822_v58  ;;  %v2007_v8 = vmul.f32 %v7140_v61, %v1984_v57  ;;  %v9840_v4 = vld [vmem:[#allocation178_spill] sm:$0xff]  ;;  %v9847_v61 = vld [vmem:[#allocation149_spill] sm:$0xff]  ;;  %v9862_v32 = vld [vmem:[#allocation155_spill] sm:$0xff] }
 0x44c   : > { %9826 = vst [vmem:[#allocation9_spill] sm:$0xff] %v7769_v10  ;;  %v7784_v10 = vpop.permute.xlu2 %1959  ;;  %v1980_v15 = vsel %vm1963_vm8, %v9840_v4, %v9839_v33  ;;  %v1836_v12 = vmul.f32 %v9742_v53, %v9842_v5  ;;  %v1656_v29 = vmul.f32 %v9843_v16, %v1621_v19  ;;  %v9844_v58 = vld [vmem:[#allocation142_spill] sm:$0xff]  ;;  %v7808_v57 = vadd.f32 %v9829_v42, %v2978_v51  ;;  %v9851_v51 = vld [vmem:[#allocation124_spill] sm:$0xff] }
 0x44d   : > { %9836 = vst [vmem:[#allocation148_spill] sm:$0xff] %v7784_v10  ;;  %v2977_v31 = vadd.f32 %v2953_v49, %v9844_v58  ;;  %v2727_v60 = vmul.f32 %v9780_v14, %v2698_v7  ;;  %v2164_v0 = vsel %vm2143_vm11, %v9847_v61, %v9846_v34  ;;  %v9850_v19 = vld [vmem:[#allocation154_spill] sm:$0xff]  ;;  %v2010_v58 = vmul.f32 %v9851_v51, %v1966_v43  ;;  %v9857_v10 = vld [vmem:[#allocation11_spill] sm:$0xff] }
 0x44e   : > { %9837 = vst [vmem:[#allocation130_spill] sm:$0xff] %v7786_v48  ;;  %v2344_v49 = vsel %vm2323_vm13, %v9850_v19, %v9798_v36  ;;  %v2016_v7 = vmul.f32 %v9753_v56, %v1980_v15  ;;  %v1719_v34 = vadd.f32 %v1695_v27, %v9853_v17  ;;  %v1878_v48 = vmul.f32 %v9848_v22, %v1830_v28  ;;  %v9860_v27 = vld [vmem:[#allocation129_spill] sm:$0xff]  ;;  %v9861_v41 = vld [vmem:[#allocation150_spill] sm:$0xff]  ;;  %v9865_v19 = vld [vmem:[#allocation156_spill] sm:$0xff] }
 0x44f   : > { %9841 = vst [vmem:[#allocation101_spill] sm:$0xff] %v7801_v37  ;;  %v9849_v37 = vld [vmem:[#allocation27_spill] sm:$0xff]  ;;  %v2055_v38 = vmul.f32 %v9855_v30, %v2007_v8  ;;  %v1884_v4 = vmul.f32 %v9857_v10, %v1836_v12  ;;  %2044 = vperm.xlu1 %4454, %v7476_v45   ;;  %v2370_v17 = vmul.f32 %v9860_v27, %v2344_v49  ;;  %v9863_v8 = vld [vmem:[#allocation160_spill] sm:$0xff]  ;;  %v9864_v12 = vld [vmem:[#allocation22_spill] sm:$0xff] }
 0x450   : > { %9845 = vst [vmem:[#allocation113_spill] sm:$0xff] %v7808_v57  ;;  %v2146_v5 = vsel %vm2143_vm11, %v9849_v37, %v9847_v61  ;;  %v9852_v57 = vld [vmem:[#allocation7_spill] sm:$0xff]  ;;  %v9856_v61 = vld [vmem:[#allocation125_spill] sm:$0xff]  ;;  %v2878_v22 = vsel %vm2863_vm15, %v9862_v32, %v9861_v41  ;;  %v1899_v28 = vadd.f32 %v1875_v3, %v1719_v34  ;;  %v2064_v15 = vmul.f32 %v9864_v12, %v2016_v7  ;;  %v9869_v34 = vld [vmem:[#allocation52_spill] sm:$0xff] }
 0x451   : > { %v1704_v16 = vmul.f32 %v9852_v57, %v1656_v29  ;;  %v2190_v37 = vmul.f32 %v9856_v61, %v2146_v5  ;;  %2847 = vrot.lane.b32.xlu2 %v9699_v24, %s4592_s11  ;;  %v9859_v29 = vld [vmem:[#allocation88_spill] sm:$0xff]  ;;  %v2524_v49 = vsel %vm2503_vm14, %v9865_v19, %v9814_v54  ;;  %v9870_v56 = vld [vmem:[#allocation137_spill] sm:$0xff]  ;;  %v9873_v61 = vld [vmem:[#allocation171_spill] sm:$0xff] }
 0x452   : > { %v2187_v43 = vmul.f32 %v9859_v29, %v2164_v0  ;;  %v2116_v0 = vpop.permute.xlu1 %2115  ;;  %v2079_v41 = vadd.f32 %v2055_v38, %v1899_v28  ;;  %v2907_v28 = vmul.f32 %v7151_v44, %v2878_v22 }
 0x453   : > { %v1728_v36 = vadd.f32 %v1704_v16, %v9858_v50  ;;  %v2704_v16 = vsel %vm2683_vm12, %v9863_v8, %v9832_v55  ;;  %v2058_v50 = vmul.f32 %v9855_v30, %v2010_v58  ;;  %v7860_v55 = vpop.permute.xlu0 %2141  ;;  %v7863_v30 = vadd.f32 %v9829_v42, %v2976_v62  ;;  %v9868_v58 = vld [vmem:[#allocation163_spill] sm:$0xff]  ;;  %v9872_v62 = vld [vmem:[#allocation60_spill] sm:$0xff] }
 0x454   : > { %v7849_v5 = vpop.permute.xlu2 %2127  ;;  %9866 = vst [vmem:[#allocation2_spill] sm:$0xff] %v7860_v55  ;;  %v2884_v7 = vsel %vm2863_vm15, %v9868_v58, %v9862_v32  ;;  %v2235_v38 = vmul.f32 %v9869_v34, %v2187_v43  ;;  %v2730_v27 = vmul.f32 %v9870_v56, %v2704_v16  ;;  %v7874_v55 = vadd.f32 %v9829_v42, %v2977_v31  ;;  %v9874_v32 = vld [vmem:[#allocation131_spill] sm:$0xff]  ;;  %v9875_v31 = vld [vmem:[#allocation170_spill] sm:$0xff] }
 0x455   : > { %v1908_v24 = vadd.f32 %v1884_v4, %v1728_v36  ;;  %v7858_v3 = vsel %vm2143_vm11, %v2116_v0, %v7849_v5  ;;  %9867 = vst [vmem:[#allocation41_spill] sm:$0xff] %v7863_v30  ;;  %v1902_v4 = vadd.f32 %v1878_v48, %v1722_v63  ;;  %v2238_v36 = vmul.f32 %v9869_v34, %v2190_v37 }
 0x456   : > { %9871 = vst [vmem:[#allocation18_spill] sm:$0xff] %v7874_v55  ;;  %v7877_v30 = vmul.f32 %v9872_v62, %v2727_v60  ;;  %v2418_v48 = vmul.f32 %v9820_v11, %v2370_v17  ;;  %v2692_v37 = vsel %vm2683_vm12, %v9831_v35, %v9873_v61  ;;  %v7885_v43 = vmul.f32 %v9874_v32, %v2524_v49  ;;  %v9876_v11 = vld [vmem:[#allocation65_spill] sm:$0xff] }
 0x457   : > { %v2088_v54 = vadd.f32 %v2064_v15, %v1908_v24  ;;  %v2082_v63 = vadd.f32 %v2058_v50, %v1902_v4  ;;  %v2259_v22 = vadd.f32 %v2235_v38, %v2079_v41  ;;  %v2910_v16 = vmul.f32 %v7612_v52, %v2884_v7  ;;  %v9877_v50 = vld [vmem:[#allocation49_spill] sm:$0xff]  ;;  %2309 = vrot.lane.b32.xlu1 %v9824_v20, %s4589_s30  ;;  %v9878_v15 = vld [vmem:[#allocation176_spill] sm:$0xff]  ;;  %v9879_v24 = vld [vmem:[#allocation66_spill] sm:$0xff] }
 0x458   : > { %v2686_v60 = vsel %vm2683_vm12, %v9873_v61, %v9863_v8  ;;  %v2699_v17 = vsel %vm2683_vm12, %v9876_v11, %v9875_v31  ;;  %v1974_v35 = vsel %vm1963_vm8, %v9839_v33, %v9877_v50  ;;  %v7904_v49 = vmul.f32 %v9879_v24, %v2907_v28  ;;  %v9881_v8 = vld [vmem:[#allocation165_spill] sm:$0xff]  ;;  %v9882_v41 = vld [vmem:[#allocation164_spill] sm:$0xff]  ;;  %v9885_v38 = vld [vmem:[#allocation174_spill] sm:$0xff] }
 0x459   : > { %v2262_v42 = vadd.f32 %v2238_v36, %v2082_v63  ;;  %2760 = vperm.xlu2 %4455, %v9878_v15   ;;  %v7907_v61 = vmul.f32 %v9872_v62, %v2730_v27  ;;  %v2519_v4 = vsel %vm2503_vm14, %v9882_v41, %v9881_v8  ;;  %v2728_v58 = vmul.f32 %v7523_v26, %v2692_v37  ;;  %v9884_v33 = vld [vmem:[#allocation168_spill] sm:$0xff]  ;;  %v9886_v11 = vld [vmem:[#allocation173_spill] sm:$0xff] }
 0x45a   : > { %9880 = vst [vmem:[#allocation39_spill] sm:$0xff] %v7904_v49  ;;  %v9883_v7 = vmov 5   ;;  %v2506_v34 = vsel %vm2503_vm14, %v9884_v33, %v9865_v19  ;;  %v2512_v27 = vsel %vm2503_vm14, %v9813_v18, %v9884_v33  ;;  %v2729_v36 = vmul.f32 %v9793_v25, %v2686_v60  ;;  %v2104_v37 = vpop.permute.xlu1 %2103 }
 0x45b   : > { %4458 = vset.pattern.permute.xlu1 %v9883_v7  ;;  %v2908_v28 = vmul.f32 %v7319_v1, %v9885_v38  ;;  %v2909_v15 = vmul.f32 %v7580_v6, %v9886_v11  ;;  %v2731_v41 = vmul.f32 %v9780_v14, %v2699_v17  ;;  %v9887_v7 = vld [vmem:[#allocation120_spill] sm:$0xff]  ;;  %v2160_v55 = vsel %vm2143_vm11, %v2104_v37, %v2116_v0  ;;  %v7934_v49 = vpop.permute.xlu0 %2655 }
 0x45c   : > { %v7926_v63 = vpop.permute.xlu2 %2319  ;;  %v2017_v19 = vmul.f32 %v9887_v7, %v1974_v35  ;;  %9888 = vst [vmem:[#allocation111_spill] sm:$0xff] %v7934_v49  ;;  %v7937_v18 = vmul.f32 %v9879_v24, %v2910_v16  ;;  %v2196_v60 = vmul.f32 %v9766_v39, %v2160_v55  ;;  %v7941_v33 = vadd.f32 %v7756_v23, %v2259_v22  ;;  %v9890_v55 = vld [vmem:[#allocation90_spill] sm:$0xff]  ;;  %v9892_v22 = vld [vmem:[#allocation33_spill] sm:$0xff] }
 0x45d   : > { %v7943_v38 = vadd.f32 %v2418_v48, %v2262_v42  ;;  %v7946_v11 = vmul.f32 %v7143_v40, %v2519_v4  ;;  %v7949_v17 = vmul.f32 %v7446_v13, %v2512_v27  ;;  %v7952_v0 = vmul.f32 %v9809_v59, %v2506_v34  ;;  %v9891_v48 = vld [vmem:[#allocation92_spill] sm:$0xff]  ;;  %v9893_v4 = vld [vmem:[#allocation62_spill] sm:$0xff] }
 0x45e   : > { %9889 = vst [vmem:[#allocation24_spill] sm:$0xff] %v7937_v18  ;;  %v7955_v35 = vmul.f32 %v9872_v62, %v2728_v58  ;;  %v7958_v16 = vmul.f32 %v9872_v62, %v2729_v36  ;;  %v1840_v23 = vmul.f32 %v9742_v53, %v9890_v55  ;;  %v1841_v42 = vmul.f32 %v9892_v22, %v9891_v48  ;;  %v9894_v39 = vld [vmem:[#allocation58_spill] sm:$0xff]  ;;  %v9897_v53 = vld [vmem:[#allocation55_spill] sm:$0xff]  ;;  %v9945_v18 = vld [vmem:[#allocation169_spill] sm:$0xff] }
 0x45f   : > { %v2244_v14 = vmul.f32 %v9893_v4, %v2196_v60  ;;  %v7966_v27 = vmul.f32 %v9879_v24, %v2908_v28  ;;  %v7969_v34 = vmul.f32 %v9879_v24, %v2909_v15  ;;  %v7972_v58 = vmul.f32 %v9894_v39, %v2731_v41  ;;  %v9896_v36 = vld [vmem:[#allocation86_spill] sm:$0xff]  ;;  %2823 = vrot.lane.b32.xlu1 %v9823_v2, %s4592_s11  ;;  %v9899_v24 = vld [vmem:[#allocation180_spill] sm:$0xff]  ;;  %v9901_v15 = vld [vmem:[#allocation19_spill] sm:$0xff] }
 0x460   : > { %v2065_v62 = vmul.f32 %v9864_v12, %v2017_v19  ;;  %v7977_v7 = vmul.f32 %v9874_v32, %v9896_v36  ;;  %v1842_v55 = vmul.f32 %v9835_v46, %v9897_v53  ;;  %v7989_v28 = vmul.f32 %v7612_v52, %v9899_v24  ;;  %v9903_v19 = vld [vmem:[#allocation61_spill] sm:$0xff]  ;;  %v9907_v2 = vld [vmem:[#allocation42_spill] sm:$0xff]  ;;  %v9947_v39 = vld [vmem:[#allocation83_spill] sm:$0xff] }
 0x461   : > { %9895 = vst [vmem:[#allocation99_spill] sm:$0xff] %v7972_v58  ;;  %v7981_v48 = vadd.f32 %v2244_v14, %v2088_v54  ;;  %2321 = vrot.lane.b32.xlu2 %v9700_v9, %s4589_s30  ;;  %v7993_v41 = vmul.f32 %v9870_v56, %v9901_v15  ;;  %v7997_v60 = vmul.f32 %v7580_v6, %v9903_v19  ;;  %v9905_v14 = vld [vmem:[#allocation40_spill] sm:$0xff]  ;;  %v9906_v36 = vmov 3   ;;  %v9908_v24 = vld [vmem:[#allocation161_spill] sm:$0xff]  ;;  %v9909_v52 = vld [vmem:[#allocation178_spill] sm:$0xff] }
 0x462   : > { %9900 = vst [vmem:[#allocation179_spill] sm:$0xff] %v7989_v28  ;;  %v1839_v54 = vmul.f32 %v9828_v21, %v9905_v14  ;;  %4456 = vset.pattern.permute.xlu2 %v9906_v36  ;;  %v8003_v53 = vmul.f32 %v9907_v2, %v1840_v23  ;;  %v8006_v49 = vmul.f32 %v9907_v2, %v1841_v42  ;;  %v9910_v56 = vld [vmem:[#allocation148_spill] sm:$0xff]  ;;  %v1587_v6 = vpop.permute.xlu1 %1586  ;;  %v9911_v36 = vld [vmem:[#allocation63_spill] sm:$0xff] }
 0x463   : > { %9898 = vst [vmem:[#allocation115_spill] sm:$0xff] %v7981_v48  ;;  %v2513_v15 = vsel %vm2503_vm14, %v9881_v8, %v9908_v24  ;;  %v1986_v19 = vsel %vm1963_vm8, %v9910_v56, %v9909_v52  ;;  %v2911_v23 = vmul.f32 %v7151_v44, %v9911_v36  ;;  %v9912_v48 = vld [vmem:[#allocation54_spill] sm:$0xff]  ;;  %v1968_v40 = vsel %vm1963_vm8, %v9877_v50, %v9910_v56  ;;  %v8029_v32 = vpop.permute.xlu0 %2940  ;;  %v9916_v28 = vld [vmem:[#allocation108_spill] sm:$0xff]  ;;  %v9920_v50 = vld [vmem:[#allocation79_spill] sm:$0xff] }
 0x464   : > { %9902 = vst [vmem:[#allocation106_spill] sm:$0xff] %v7993_v41  ;;  %v8016_v14 = vpop.permute.xlu2 %1564  ;;  %v2912_v42 = vmul.f32 %v7319_v1, %v9912_v48  ;;  %v9913_v8 = vld [vmem:[#allocation130_spill] sm:$0xff]  ;;  %v8032_v52 = vmul.f32 %v9907_v2, %v1842_v55  ;;  %v2693_v36 = vsel %vm2683_vm12, %v9875_v31, %v9916_v28  ;;  %v9917_v48 = vld [vmem:[#allocation128_spill] sm:$0xff]  ;;  %v8042_v56 = vmul.f32 %v9907_v2, %v1839_v54 }
 0x465   : > { %9904 = vst [vmem:[#allocation104_spill] sm:$0xff] %v7997_v60  ;;  %v1615_v24 = vsel %vm1604_vm9, %v9913_v8, %v1587_v6  ;;  %v1837_v1 = vmul.f32 %v9892_v22, %v9917_v48  ;;  %v9918_v44 = vld [vmem:[#allocation32_spill] sm:$0xff]  ;;  %v1835_v8 = vmul.f32 %v9828_v21, %v9920_v50  ;;  %v8050_v58 = vmul.f32 %v7446_v13, %v2513_v15  ;;  %v9923_v22 = vld [vmem:[#allocation123_spill] sm:$0xff]  ;;  %v9924_v54 = vld [vmem:[#allocation78_spill] sm:$0xff] }
 0x466   : > { %9914 = vst [vmem:[#allocation107_spill] sm:$0xff] %v8029_v32  ;;  %v1657_v60 = vmul.f32 %v9918_v44, %v1615_v24  ;;  %v9921_v32 = vld [vmem:[#allocation96_spill] sm:$0xff]  ;;  %v2018_v31 = vmul.f32 %v9851_v51, %v1968_v40  ;;  %v2197_v28 = vmul.f32 %v9923_v22, %v7858_v3  ;;  %v8058_v2 = vmul.f32 %v9809_v59, %v9924_v54  ;;  %v9928_v15 = vld [vmem:[#allocation181_spill] sm:$0xff] }
 0x467   : > { %9915 = vst [vmem:[#allocation45_spill] sm:$0xff] %v8032_v52  ;;  %v1838_v55 = vmul.f32 %v9835_v46, %v9921_v32  ;;  %v9922_v41 = vld [vmem:[#allocation12_spill] sm:$0xff]  ;;  %v8067_v32 = vmul.f32 %v7523_v26, %v2693_v36  ;;  %v1885_v40 = vmul.f32 %v9857_v10, %v1837_v1  ;;  %v2166_v3 = vsel %vm2143_vm11, %v9928_v15, %v2104_v37  ;;  %v9930_v50 = vld [vmem:[#allocation37_spill] sm:$0xff]  ;;  %v9938_v26 = vld [vmem:[#allocation114_spill] sm:$0xff] }
 0x468   : > { %9919 = vst [vmem:[#allocation26_spill] sm:$0xff] %v8042_v56  ;;  %v2015_v52 = vmul.f32 %v9922_v41, %v1986_v19  ;;  %v1705_v24 = vmul.f32 %v9852_v57, %v1657_v60  ;;  %v9925_v21 = vld [vmem:[#allocation68_spill] sm:$0xff]  ;;  %v9929_v60 = vld [vmem:[#allocation59_spill] sm:$0xff]  ;;  %2105 = vrot.lane.b32.xlu1 %v9930_v50, %s4590_s9  ;;  %v1883_v36 = vmul.f32 %v9857_v10, %v1835_v8  ;;  %v9944_v56 = vld [vmem:[#allocation94_spill] sm:$0xff] }
 0x469   : > { %v8061_v48 = vmul.f32 %v9925_v21, %v2911_v23  ;;  %v8064_v46 = vmul.f32 %v9925_v21, %v2912_v42  ;;  %2224 = vperm.xlu2 %4456, %v7476_v45   ;;  %v9931_v23 = vld [vmem:[#allocation8_spill] sm:$0xff]  ;;  %v1886_v54 = vmul.f32 %v9857_v10, %v1838_v55  ;;  %v2066_v22 = vmul.f32 %v9864_v12, %v2018_v31 }
 0x46a   : > { %v1729_v19 = vadd.f32 %v1705_v24, %v9929_v60  ;;  %v8079_v42 = vmul.f32 %v9793_v25, %v9931_v23  ;;  %v2063_v1 = vmul.f32 %v9864_v12, %v2015_v52  ;;  %v2148_v37 = vsel %vm2143_vm11, %v7849_v5, %v9928_v15  ;;  %v1599_v51 = vpop.permute.xlu1 %1598  ;;  %v9933_v10 = vld [vmem:[#allocation84_spill] sm:$0xff]  ;;  %v9934_v5 = vld [vmem:[#allocation69_spill] sm:$0xff]  ;;  %v9936_v15 = vld [vmem:[#allocation147_spill] sm:$0xff] }
 0x46b   : > { %9926 = vst [vmem:[#allocation48_spill] sm:$0xff] %v8061_v48  ;;  %v2245_v24 = vmul.f32 %v9893_v4, %v2197_v28  ;;  %v2195_v23 = vmul.f32 %v9859_v29, %v2166_v3  ;;  %v1609_v8 = vsel %vm1604_vm9, %v1587_v6, %v1599_v51  ;;  %v1627_v52 = vsel %vm1604_vm9, %v1599_v51, %v9933_v10  ;;  %v9935_v28 = vld [vmem:[#allocation117_spill] sm:$0xff]  ;;  %v2565_v25 = vpop.permute.xlu0 %2564  ;;  %v9937_v3 = vld [vmem:[#allocation70_spill] sm:$0xff]  ;;  %v9939_v59 = vld [vmem:[#allocation100_spill] sm:$0xff] }
 0x46c   : > { %9927 = vst [vmem:[#allocation76_spill] sm:$0xff] %v8064_v46  ;;  %v1909_v60 = vadd.f32 %v1885_v40, %v1729_v19  ;;  %v1577_v41 = vpop.permute.xlu2 %1576  ;;  %v1655_v31 = vmul.f32 %v9934_v5, %v1627_v52  ;;  %v1658_v40 = vmul.f32 %v9935_v28, %v1609_v8  ;;  %v2587_v29 = vmul.f32 %v2565_v25, %v9937_v3  ;;  %v9940_v46 = vld [vmem:[#allocation91_spill] sm:$0xff] }
 0x46d   : > { %9932 = vst [vmem:[#allocation110_spill] sm:$0xff] %v8079_v42  ;;  %v1622_v12 = vsel %vm1604_vm9, %v8016_v14, %v1577_v41  ;;  %v2588_v6 = vmul.f32 %v2565_v25, %v9938_v26  ;;  %v2589_v13 = vmul.f32 %v2565_v25, %v9939_v59  ;;  %v2590_v51 = vmul.f32 %v2565_v25, %v9940_v46  ;;  %v9942_v8 = vld [vmem:[#allocation3_spill] sm:$0xff]  ;;  %v9946_v42 = vld [vmem:[#allocation16_spill] sm:$0xff]  ;;  %v9948_v46 = vld [vmem:[#allocation6_spill] sm:$0xff] }
 0x46e   : > { %v2089_v55 = vadd.f32 %v2065_v62, %v1909_v60  ;;  %v1660_v19 = vmul.f32 %v9936_v15, %v1622_v12  ;;  %v1703_v10 = vmul.f32 %v9852_v57, %v1655_v31  ;;  %v1706_v21 = vmul.f32 %v9852_v57, %v1658_v40  ;;  %v9941_v62 = vld [vmem:[#allocation17_spill] sm:$0xff]  ;;  %v9949_v57 = vld [vmem:[#allocation182_spill] sm:$0xff]  ;;  %v9951_v40 = vld [vmem:[#allocation72_spill] sm:$0xff] }
 0x46f   : > { %v2611_v48 = vadd.f32 %v2587_v29, %v9942_v8  ;;  %v9943_v12 = vld [vmem:[#allocation53_spill] sm:$0xff]  ;;  %v2613_v3 = vadd.f32 %v2589_v13, %v9944_v56  ;;  %v2614_v26 = vadd.f32 %v2590_v51, %v9945_v18  ;;  %v9952_v56 = vld [vmem:[#allocation172_spill] sm:$0xff] }
 0x470   : > { %v1708_v60 = vmul.f32 %v9941_v62, %v1660_v19  ;;  %v8109_v52 = vadd.f32 %v2245_v24, %v2089_v55  ;;  %v2612_v15 = vadd.f32 %v2588_v6, %v9943_v12  ;;  %v1727_v59 = vadd.f32 %v1703_v10, %v9946_v42  ;;  %2489 = vrot.lane.b32.xlu1 %v9824_v20, %s4591_s10  ;;  %v9950_v24 = vld [vmem:[#allocation121_spill] sm:$0xff] }
 0x471   : > { %v1730_v25 = vadd.f32 %v1706_v21, %v9947_v39  ;;  %2285 = vrot.lane.b32.xlu2 %v9930_v50, %s4589_s30  ;;  %v2791_v29 = vadd.f32 %v9949_v57, %v2611_v48  ;;  %v2793_v13 = vadd.f32 %v9951_v40, %v2613_v3  ;;  %v2794_v18 = vadd.f32 %v9952_v56, %v2614_v26  ;;  %v9953_v19 = vld [vmem:[#allocation125_spill] sm:$0xff]  ;;  %v9955_v48 = vld [vmem:[#allocation138_spill] sm:$0xff] }
 0x472   : > { %v1732_v31 = vadd.f32 %v1708_v60, %v9948_v46  ;;  %v2792_v55 = vadd.f32 %v9950_v24, %v2612_v15  ;;  %v8127_v42 = vmul.f32 %v9953_v19, %v2148_v37  ;;  %v1907_v39 = vadd.f32 %v1883_v36, %v1727_v59  ;;  %v8132_v51 = vpop.permute.xlu1 %2307  ;;  %v9954_v60 = vld [vmem:[#allocation89_spill] sm:$0xff]  ;;  %v9956_v15 = vld [vmem:[#allocation67_spill] sm:$0xff]  ;;  %v9960_v56 = vld [vmem:[#allocation166_spill] sm:$0xff] }
 0x473   : > { %v1910_v21 = vadd.f32 %v1886_v54, %v1730_v25  ;;  %v2971_v8 = vadd.f32 %v9954_v60, %v2791_v29  ;;  %v2973_v46 = vadd.f32 %v9956_v15, %v2793_v13  ;;  %v9957_v3 = vld [vmem:[#allocation97_spill] sm:$0xff]  ;;  %v2573_v54 = vpop.permute.xlu0 %2572  ;;  %v2243_v37 = vmul.f32 %v9893_v4, %v2195_v23 }
 0x474   : > { %v8130_v6 = vadd.f32 %v8003_v53, %v1732_v31  ;;  %v1589_v10 = vpop.permute.xlu2 %1588  ;;  %v2972_v12 = vadd.f32 %v9955_v48, %v2792_v55  ;;  %v2974_v57 = vadd.f32 %v9957_v3, %v2794_v18  ;;  %v2087_v26 = vadd.f32 %v2063_v1, %v1907_v39  ;;  %v9958_v25 = vld [vmem:[#allocation9_spill] sm:$0xff]  ;;  %v9959_v55 = vld [vmem:[#allocation50_spill] sm:$0xff] }
 0x475   : > { %v8138_v24 = vadd.f32 %v2066_v22, %v1910_v21  ;;  %v8144_v53 = vsel %vm2323_vm13, %v8132_v51, %v7926_v63  ;;  %v1616_v36 = vsel %vm1604_vm9, %v1577_v41, %v1589_v10  ;;  %v2595_v31 = vmul.f32 %v2573_v54, %v9958_v25  ;;  %v9962_v21 = vld [vmem:[#allocation77_spill] sm:$0xff] }
 0x476   : > { %v1661_v59 = vmul.f32 %v9918_v44, %v1616_v36  ;;  %v2596_v1 = vmul.f32 %v2573_v54, %v7949_v17  ;;  %v2597_v22 = vmul.f32 %v2573_v54, %v7952_v0  ;;  %v2598_v29 = vmul.f32 %v2573_v54, %v7885_v43  ;;  %v9961_v17 = vld [vmem:[#allocation167_spill] sm:$0xff] }
 0x477   : > { %v8155_v40 = vadd.f32 %v9959_v55, %v2971_v8  ;;  %v8158_v13 = vadd.f32 %v9959_v55, %v2972_v12  ;;  %v2619_v23 = vadd.f32 %v2595_v31, %v7941_v33  ;;  %v8164_v18 = vadd.f32 %v9959_v55, %v2973_v46 }
 0x478   : > { %v1709_v41 = vmul.f32 %v9941_v62, %v1661_v59  ;;  %v2620_v44 = vadd.f32 %v2596_v1, %v9960_v56  ;;  %v2621_v39 = vadd.f32 %v2597_v22, %v9961_v17  ;;  %v2622_v0 = vadd.f32 %v2598_v29, %v7943_v38  ;;  %2404 = vperm.xlu1 %4458, %v7476_v45   ;;  %v9966_v22 = vld [vmem:[#allocation118_spill] sm:$0xff]  ;;  %v9970_v56 = vld [vmem:[#allocation73_spill] sm:$0xff] }
 0x479   : > { %3059 = vmatmul.f32.vlgmr.msrb.gmra.mxu0 %v8155_v40  ;;  %3094 = vmatmul.f32.vlgmr.msrb.gmra.mxu1 %v8158_v13  ;;  %v8171_v43 = vadd.f32 %v9959_v55, %v2974_v57  ;;  %v2799_v33 = vadd.f32 %v7877_v30, %v2619_v23  ;;  %v8185_v46 = vadd.f32 %v2243_v37, %v2087_v26  ;;  %v9963_v57 = vld [vmem:[#allocation39_spill] sm:$0xff] }
 0x47a   : > { %v1733_v60 = vadd.f32 %v1709_v41, %v9962_v21  ;;  %3129 = vmatmul.f32.vlgmr.msrb.gmra.mxu2 %v8164_v18  ;;  %v2800_v8 = vadd.f32 %v7955_v35, %v2620_v44  ;;  %2501 = vrot.lane.b32.xlu2 %v9700_v9, %s4591_s10  ;;  %v8181_v38 = vpop.permute.xlu1 %1925  ;;  %v2801_v12 = vadd.f32 %v7958_v16, %v2621_v39  ;;  %v8199_v16 = vld [vmem:[%s8962_s5] sm:$0xff]  ;;  %v9967_v55 = vld [vmem:[#allocation143_spill] sm:$0xff]  ;;  %v9971_v44 = vld [vmem:[#allocation5_spill] sm:$0xff] }
 0x47b   : > { %3164 = vmatmul.f32.vlgmr.msrb.gmra.mxu3 %v8171_v43  ;;  %v2802_v15 = vadd.f32 %v7907_v61, %v2622_v0  ;;  %v2979_v36 = vadd.f32 %v9963_v57, %v2799_v33  ;;  %3534 = vmatpush.msrb.mxu0 %v8199_v16  ;;  %v2577_v26 = vpop.permute.xlu0 %2576  ;;  %v2246_v31 = vmul.f32 %v9893_v4, %v8127_v42  ;;  %v9968_v41 = vld [vmem:[#allocation10_spill] sm:$0xff]  ;;  %v9973_v0 = vld [vmem:[#allocation41_spill] sm:$0xff] }
 0x47c   : > { %v1601_v48 = vpop.permute.xlu2 %1600  ;;  %v8188_v3 = vadd.f32 %v8006_v49, %v1733_v60  ;;  %v2981_v54 = vadd.f32 %v7969_v34, %v2801_v12  ;;  %v2599_v37 = vmul.f32 %v2577_v26, %v7946_v11  ;;  %v2600_v59 = vmul.f32 %v2577_v26, %v8050_v58  ;;  %v9964_v34 = vld [vmem:[#allocation58_spill] sm:$0xff]  ;;  %v9975_v60 = vld [vmem:[#allocation24_spill] sm:$0xff]  ;;  %v9978_v57 = vld [vmem:[#allocation45_spill] sm:$0xff] }
 0x47d   : > { %v1610_v30 = vsel %vm1604_vm9, %v1589_v10, %v1601_v48  ;;  %v1628_v35 = vsel %vm1604_vm9, %v1601_v48, %v8016_v14  ;;  %v2980_v10 = vadd.f32 %v7966_v27, %v2800_v8  ;;  %v8209_v14 = vld [vmem:[%s8962_s5 + $0x8] sm:$0xff]  ;;  %v8219_v27 = vld [vmem:[%s8962_s5 + $0x10] sm:$0xff]  ;;  %v2780_v25 = vmul.f32 %v9964_v34, %v8067_v32  ;;  %v9969_v4 = vld [vmem:[#allocation110_spill] sm:$0xff] }
 0x47e   : > { %v1659_v61 = vmul.f32 %v9934_v5, %v1628_v35  ;;  %v1662_v49 = vmul.f32 %v9935_v28, %v1610_v30  ;;  %3569 = vmatpush.msrb.mxu1 %v8209_v14  ;;  %v2601_v5 = vmul.f32 %v2577_v26, %v8058_v2  ;;  %v2602_v28 = vmul.f32 %v2577_v26, %v7977_v7  ;;  %v8231_v7 = vld [vmem:[%s8962_s5 + $0x18] sm:$0xff]  ;;  %v9972_v39 = vld [vmem:[#allocation98_spill] sm:$0xff]  ;;  %v9976_v48 = vld [vmem:[#allocation99_spill] sm:$0xff] }
 0x47f   : > { %3604 = vmatpush.msrb.mxu2 %v8219_v27  ;;  %3639 = vmatpush.msrb.mxu3 %v8231_v7  ;;  %v9965_v2 = vld [vmem:[#allocation177_spill] sm:$0xff]  ;;  %v2624_v29 = vadd.f32 %v2600_v59, %v9966_v22  ;;  %v2781_v42 = vmul.f32 %v9964_v34, %v9969_v4  ;;  %v9974_v21 = vld [vmem:[#allocation18_spill] sm:$0xff]  ;;  %v2982_v33 = vadd.f32 %v9975_v60, %v2802_v15  ;;  %v9985_v22 = vld [vmem:[#allocation104_spill] sm:$0xff] }
 0x480   : > { %v1707_v11 = vmul.f32 %v9941_v62, %v1659_v61  ;;  %v1710_v58 = vmul.f32 %v9941_v62, %v1662_v49  ;;  %v2623_v1 = vadd.f32 %v2599_v37, %v9965_v2  ;;  %v2625_v32 = vadd.f32 %v2601_v5, %v9967_v55  ;;  %2669 = vrot.lane.b32.xlu1 %v9824_v20, %s4593_s12  ;;  %v9977_v30 = vld [vmem:[#allocation26_spill] sm:$0xff]  ;;  %v9979_v49 = vld [vmem:[#allocation113_spill] sm:$0xff]  ;;  %v9984_v2 = vld [vmem:[#allocation48_spill] sm:$0xff] }
 0x481   : > { %v2626_v23 = vadd.f32 %v2602_v28, %v9968_v41  ;;  %3062 = vmatmul.f32.gmra.mxu0 %v9972_v39  ;;  %3097 = vmatmul.f32.gmra.mxu1 %v9973_v0  ;;  %v8249_v8 = vadd.f32 %v2246_v31, %v8138_v24  ;;  %v9980_v26 = vld [vmem:[#allocation38_spill] sm:$0xff]  ;;  %v2804_v5 = vadd.f32 %v2780_v25, %v2624_v29  ;;  %v9982_v31 = vld [vmem:[#allocation36_spill] sm:$0xff]  ;;  %v9988_v4 = vld [vmem:[#allocation179_spill] sm:$0xff] }
 0x482   : > { %v1731_v62 = vadd.f32 %v1707_v11, %v9970_v56  ;;  %v1734_v17 = vadd.f32 %v1710_v58, %v9971_v44  ;;  %3132 = vmatmul.f32.gmra.mxu2 %v9974_v21  ;;  %v2803_v12 = vadd.f32 %v9976_v48, %v2623_v1  ;;  %2297 = vrot.lane.b32.xlu2 %v9980_v26, %s4589_s30  ;;  %v1938_v37 = vpop.permute.xlu1 %1937  ;;  %v9981_v15 = vld [vmem:[#allocation106_spill] sm:$0xff]  ;;  %v9983_v58 = vmov 12   ;;  %v9986_v55 = vld [vmem:[#allocation68_spill] sm:$0xff]  ;;  %v9989_v44 = vld [vmem:[#allocation21_spill] sm:$0xff] }
 0x483   : > { %3167 = vmatmul.f32.gmra.mxu3 %v9979_v49  ;;  %v2782_v24 = vmul.f32 %v9964_v34, %v9981_v15  ;;  %v8266_v28 = vsel %vm1963_vm8, %v8181_v38, %v1938_v37  ;;  %4459 = vset.pattern.permute.xlu1 %v9983_v58  ;;  %v2961_v25 = vmul.f32 %v9986_v55, %v9985_v22  ;;  %v9987_v29 = vld [vmem:[#allocation76_spill] sm:$0xff]  ;;  %v9998_v58 = vld [vmem:[#allocation131_spill] sm:$0xff]  ;;  %v2581_v22 = vpop.permute.xlu0 %2580 }
 0x484   : > { %v8253_v35 = vadd.f32 %v9977_v30, %v1731_v62  ;;  %v8256_v61 = vadd.f32 %v9978_v57, %v1734_v17  ;;  %v2500_v59 = vpop.permute.xlu2 %2499  ;;  %v8273_v1 = vadd.f32 %v9984_v2, %v2803_v12  ;;  %v8278_v41 = vadd.f32 %v9987_v29, %v2804_v5  ;;  %v10000_v29 = vld [vmem:[#allocation175_spill] sm:$0xff] }
 0x485   : > { %v2526_v11 = vsel %vm2503_vm14, %v2500_v59, %v9982_v31  ;;  %v2805_v34 = vadd.f32 %v2781_v42, %v2625_v32  ;;  %v2962_v56 = vmul.f32 %v9986_v55, %v9988_v4  ;;  %v2806_v62 = vadd.f32 %v2782_v24, %v2626_v23  ;;  %v9999_v55 = vld [vmem:[#allocation82_spill] sm:$0xff] }
 0x486   : > { %v8283_v17 = vadd.f32 %v9989_v44, %v2979_v36  ;;  %v8286_v60 = vadd.f32 %v9989_v44, %v2980_v10  ;;  %v8291_v12 = vadd.f32 %v9989_v44, %v2981_v54  ;;  %v8298_v32 = vadd.f32 %v9989_v44, %v2982_v33  ;;  %v8304_v36 = vld [vmem:[%s8959_s2 + $0x20] sm:$0xff]  ;;  %v10003_v44 = vld [vmem:[#allocation132_spill] sm:$0xff] }
 0x487   : > { %v8288_v48 = vadd.f32 %v2961_v25, %v2805_v34  ;;  %v8293_v30 = vadd.f32 %v2962_v56, %v2806_v62  ;;  %9994 = vst [vmem:[#allocation25_spill] sm:$0xff] %v8304_v36  ;;  %v2558_v2 = vmul.f32 %v9998_v58, %v2526_v11  ;;  %v10001_v34 = vld [vmem:[#allocation133_spill] sm:$0xff] }
 0x488   : > { %9990 = vst [vmem:[#allocation112_spill] sm:$0xff] %v8283_v17  ;;  %3012 = vperm.xlu1 %4459, %v8304_v36   ;;  %v10002_v56 = vld [vmem:[#allocation129_spill] sm:$0xff] }
 0x489   : > { %9991 = vst [vmem:[#allocation47_spill] sm:$0xff] %v8286_v60  ;;  %3065 = vmatmul.f32.gmra.mxu0 %v8283_v17  ;;  %3100 = vmatmul.f32.gmra.mxu1 %v8286_v60 }
 0x48a   : > { %9992 = vst [vmem:[#allocation109_spill] sm:$0xff] %v8291_v12  ;;  %3135 = vmatmul.f32.gmra.mxu2 %v8291_v12  ;;  %2681 = vrot.lane.b32.xlu2 %v9700_v9, %s4593_s12  ;;  %v1950_v10 = vpop.permute.xlu1 %1949  ;;  %v9995_v9 = vmov 7  }
 0x48b   : > { %9993 = vst [vmem:[#allocation30_spill] sm:$0xff] %v8298_v32  ;;  %3170 = vmatmul.f32.gmra.mxu3 %v8298_v32  ;;  %v8312_v23 = vsel %vm1963_vm8, %v1938_v37, %v1950_v10  ;;  %v9996_v37 = vld [vmem:[#allocation95_spill] sm:$0xff] }
 0x48c   : > { %v2296_v54 = vpop.permute.xlu2 %2295  ;;  %v2520_v15 = vsel %vm2503_vm14, %v9982_v31, %v9996_v37 }
 0x48d   : > { %v2334_v42 = vsel %vm2323_vm13, %v2296_v54, %v8132_v51  ;;  %v9997_v51 = vld [vmem:[#allocation93_spill] sm:$0xff]  ;;  %v2555_v25 = vmul.f32 %v9999_v55, %v2520_v15 }
 0x48e   : > { %v2346_v24 = vsel %vm2323_vm13, %v7926_v63, %v9997_v51 }
 0x48f   : > { %v2378_v62 = vmul.f32 %v10002_v56, %v2346_v24  ;;  %v2603_v32 = vmul.f32 %v2581_v22, %v2555_v25 }
 0x490   : > { %2645 = vrot.lane.b32.xlu1 %v9930_v50, %s4593_s12 }
 0x491   : > { %4460 = vset.pattern.permute.xlu1 %v9995_v9  ;;  %v10004_v9 = vld [vmem:[#allocation15_spill] sm:$0xff] }
 0x492   : > { %2477 = vrot.lane.b32.xlu2 %v9980_v26, %s4591_s10  ;;  %v2488_v33 = vpop.permute.xlu1 %2487 }
 0x493   : > { %v2508_v5 = vsel %vm2503_vm14, %v2488_v33, %v2500_v59  ;;  %v2514_v50 = vsel %vm2503_vm14, %v9996_v37, %v2488_v33  ;;  %v2340_v59 = vsel %vm2323_vm13, %v9997_v51, %v2296_v54  ;;  %v2377_v33 = vmul.f32 %v10003_v44, %v8144_v53  ;;  %v10005_v37 = vld [vmem:[#allocation127_spill] sm:$0xff] }
 0x494   : > { %v8321_v57 = vpop.permute.xlu2 %2679  ;;  %v2556_v31 = vmul.f32 %v10000_v29, %v2514_v50  ;;  %v2557_v4 = vmul.f32 %v10001_v34, %v2508_v5  ;;  %v2375_v63 = vmul.f32 %v10004_v9, %v2340_v59  ;;  %v2376_v11 = vmul.f32 %v10005_v37, %v2334_v42  ;;  %v10006_v59 = vld [vmem:[#allocation115_spill] sm:$0xff] }
 0x495   : > { %v2606_v54 = vmul.f32 %v2581_v22, %v2558_v2 }
 0x496   : > { %v2604_v60 = vmul.f32 %v2581_v22, %v2556_v31  ;;  %v2605_v17 = vmul.f32 %v2581_v22, %v2557_v4  ;;  %v10007_v31 = vmov 8   ;;  %v10014_v4 = vld [vmem:[#allocation134_spill] sm:$0xff] }
 0x498   : > { %2764 = vperm.xlu1 %4460, %v7476_v45  }
 0x49a   : > { %2849 = vrot.lane.b32.xlu2 %v9824_v20, %s4592_s11  ;;  %v2401_v15 = vpop.permute.xlu1 %2400 }
 0x49b   : > { %v2423_v51 = vmul.f32 %v2401_v15, %v2375_v63  ;;  %v2424_v5 = vmul.f32 %v2401_v15, %v2376_v11  ;;  %v2425_v12 = vmul.f32 %v2401_v15, %v2377_v33  ;;  %v2426_v24 = vmul.f32 %v2401_v15, %v2378_v62 }
 0x49c   : > { %v1962_v50 = vpop.permute.xlu2 %1961 }
 0x49d   : > { %v1969_v53 = vsel %vm1963_vm8, %v1950_v10, %v1962_v50  ;;  %v1987_v42 = vsel %vm1963_vm8, %v1962_v50, %v8181_v38  ;;  %v2447_v2 = vadd.f32 %v2423_v51, %v8185_v46  ;;  %v2448_v25 = vadd.f32 %v2424_v5, %v10006_v59 }
 0x49e   : > { %v2449_v20 = vadd.f32 %v2425_v12, %v8109_v52  ;;  %v2450_v63 = vadd.f32 %v2426_v24, %v8249_v8 }
 0x49f   : > { %v2628_v11 = vadd.f32 %v2604_v60, %v2448_v25  ;;  %v8361_v62 = vadd.f32 %v2603_v32, %v2447_v2 }
 0x4a0   : > { %v2629_v33 = vadd.f32 %v2605_v17, %v2449_v20  ;;  %v2630_v22 = vadd.f32 %v2606_v54, %v2450_v63  ;;  %4461 = vset.pattern.permute.xlu1 %v10007_v31  ;;  %v10015_v20 = vld [vmem:[#allocation137_spill] sm:$0xff] }
 0x4a1   : > { %2944 = vperm.xlu1 %4461, %v7476_v45  }
 0x4a2   : > { %2657 = vrot.lane.b32.xlu2 %v9980_v26, %s4593_s12  ;;  %v2668_v38 = vpop.permute.xlu1 %2667 }
 0x4a3   : > { %v2688_v52 = vsel %vm2683_vm12, %v2668_v38, %v8321_v57 }
 0x4a4   : > { %v2130_v46 = vpop.permute.xlu2 %2129 }
 0x4aa   : > { %2837 = vrot.lane.b32.xlu2 %v9980_v26, %s4592_s11  ;;  %v3009_v8 = vpop.permute.xlu1 %3008  ;;  %v10012_v26 = vld [vmem:[#allocation111_spill] sm:$0xff] }
 0x4ab   : > { %v8375_v60 = vadd.f32 %v3009_v8, %v8273_v1  ;;  %v8378_v12 = vadd.f32 %v3009_v8, %v8278_v41  ;;  %v8381_v45 = vadd.f32 %v3009_v8, %v8288_v48  ;;  %v8384_v32 = vadd.f32 %v3009_v8, %v8293_v30  ;;  %v10013_v1 = vld [vmem:[#allocation105_spill] sm:$0xff] }
 0x4ac   : > { %v8372_v17 = vpop.permute.xlu2 %2847  ;;  %v2694_v10 = vsel %vm2683_vm12, %v10012_v26, %v2668_v38  ;;  %v2737_v48 = vmul.f32 %v10014_v4, %v2688_v52  ;;  %v10016_v38 = vld [vmem:[#allocation2_spill] sm:$0xff] }
 0x4ad   : > { %10008 = vst [vmem:[#allocation81_spill] sm:$0xff] %v8375_v60  ;;  %3068 = vmatmul.f32.gmra.mxu0 %v8375_v60  ;;  %3103 = vmatmul.f32.gmra.mxu1 %v8378_v12  ;;  %v2736_v41 = vmul.f32 %v10013_v1, %v2694_v10  ;;  %v2149_v52 = vsel %vm2143_vm11, %v2130_v46, %v10016_v38  ;;  %v10018_v10 = vld [vmem:[#allocation120_spill] sm:$0xff] }
 0x4ae   : > { %10009 = vst [vmem:[#allocation102_spill] sm:$0xff] %v8378_v12  ;;  %3138 = vmatmul.f32.gmra.mxu2 %v8381_v45  ;;  %3173 = vmatmul.f32.gmra.mxu3 %v8384_v32 }
 0x4af   : > { %10010 = vst [vmem:[#allocation80_spill] sm:$0xff] %v8381_v45 }
 0x4b0   : > { %10011 = vst [vmem:[#allocation139_spill] sm:$0xff] %v8384_v32  ;;  %v10021_v32 = vld [vmem:[#allocation123_spill] sm:$0xff] }
 0x4b2   : > { %v2118_v54 = vpop.permute.xlu1 %2117 }
 0x4b3   : > { %v2155_v30 = vsel %vm2143_vm11, %v2118_v54, %v2130_v46 }
 0x4b4   : > { %v8395_v15 = vpop.permute.xlu2 %2760 }
 0x4b5   : > { %v2784_v50 = vmul.f32 %v8395_v15, %v2736_v41  ;;  %v2785_v51 = vmul.f32 %v8395_v15, %v2737_v48  ;;  %v2021_v41 = vmul.f32 %v10018_v10, %v8312_v23  ;;  %v10019_v48 = vld [vmem:[#allocation12_spill] sm:$0xff] }
 0x4b7   : > { %v8401_v5 = vadd.f32 %v2784_v50, %v2628_v11  ;;  %v8403_v24 = vadd.f32 %v2785_v51, %v2629_v33  ;;  %v10017_v11 = vld [vmem:[#allocation151_spill] sm:$0xff]  ;;  %v2019_v50 = vmul.f32 %v10019_v48, %v1987_v42  ;;  %v10020_v51 = vld [vmem:[#allocation124_spill] sm:$0xff] }
 0x4b8   : > { %v2020_v33 = vmul.f32 %v10017_v11, %v8266_v28 }
 0x4ba   : > { %v2644_v2 = vpop.permute.xlu1 %2643 }
 0x4bb   : > { %v2706_v25 = vsel %vm2683_vm12, %v8321_v57, %v2644_v2  ;;  %v2022_v57 = vmul.f32 %v10020_v51, %v1969_v53 }
 0x4bc   : > { %v2322_v59 = vpop.permute.xlu2 %2321  ;;  %v2738_v63 = vmul.f32 %v10015_v20, %v2706_v25  ;;  %v2202_v25 = vmul.f32 %v9953_v19, %v2149_v52 }
 0x4be   : > { %v2786_v31 = vmul.f32 %v8395_v15, %v2738_v63  ;;  %v2201_v63 = vmul.f32 %v10021_v32, %v2155_v30 }
 0x4c0   : > { %v8413_v8 = vadd.f32 %v2786_v31, %v2630_v22 }
 0x4c2   : > { %v2045_v45 = vpop.permute.xlu1 %2044 }
 0x4c3   : > { %v2067_v46 = vmul.f32 %v2045_v45, %v2019_v50  ;;  %v2068_v22 = vmul.f32 %v2045_v45, %v2020_v33  ;;  %v2069_v31 = vmul.f32 %v2045_v45, %v2021_v41  ;;  %v2070_v60 = vmul.f32 %v2045_v45, %v2022_v57 }
 0x4c4   : > { %v8423_v12 = vpop.permute.xlu2 %2224 }
 0x4c5   : > { %v2249_v28 = vmul.f32 %v8423_v12, %v2201_v63  ;;  %v2250_v11 = vmul.f32 %v8423_v12, %v2202_v25  ;;  %v8428_v23 = vadd.f32 %v2067_v46, %v8253_v35  ;;  %v2092_v53 = vadd.f32 %v2068_v22, %v8130_v6  ;;  %v10022_v6 = vld [vmem:[#allocation152_spill] sm:$0xff] }
 0x4c6   : > { %v2093_v19 = vadd.f32 %v2069_v31, %v8188_v3  ;;  %v2094_v42 = vadd.f32 %v2070_v60, %v8256_v61  ;;  %v2836_v60 = vpop.permute.xlu0 %2835 }
 0x4c8   : > { %v2273_v32 = vadd.f32 %v2249_v28, %v2093_v19  ;;  %v2274_v30 = vadd.f32 %v2250_v11, %v2094_v42  ;;  %v2700_v42 = vsel %vm2683_vm12, %v2644_v2, %v10012_v26  ;;  %v2874_v2 = vsel %vm2863_vm15, %v2836_v60, %v8372_v17 }
 0x4ca   : > { %v2310_v52 = vpop.permute.xlu1 %2309 }
 0x4cb   : > { %v2329_v45 = vsel %vm2323_vm13, %v2310_v52, %v2322_v59 }
 0x4cc   : > { %v8433_v10 = vpop.permute.xlu2 %2285  ;;  %v2381_v22 = vmul.f32 %v10003_v44, %v2329_v45  ;;  %v10023_v45 = vld [vmem:[#allocation101_spill] sm:$0xff] }
 0x4cd   : > { %v2347_v63 = vsel %vm2323_vm13, %v2322_v59, %v8433_v10  ;;  %v2868_v26 = vsel %vm2863_vm15, %v8372_v17, %v10023_v45 }
 0x4ce   : > { %v8455_v46 = vpop.permute.xlu0 %2465  ;;  %v2382_v31 = vmul.f32 %v10002_v56, %v2347_v63 }
 0x4d2   : > { %v2824_v33 = vpop.permute.xlu1 %2823 }
 0x4d4   : > { %v8437_v41 = vpop.permute.xlu2 %2501 }
 0x4da   : > { %v2106_v48 = vpop.permute.xlu1 %2105 }
 0x4db   : > { %v2161_v35 = vsel %vm2143_vm11, %v2106_v48, %v2118_v54 }
 0x4dc   : > { %v2200_v50 = vmul.f32 %v10022_v6, %v2161_v35  ;;  %v8442_v3 = vpop.permute.xlu2 %2297  ;;  %v2886_v6 = vsel %vm2863_vm15, %v10023_v45, %v2824_v33  ;;  %v10031_v45 = vld [vmem:[#allocation107_spill] sm:$0xff] }
 0x4dd   : > { %v2335_v54 = vsel %vm2323_vm13, %v8442_v3, %v2310_v52 }
 0x4de   : > { %v2248_v61 = vmul.f32 %v8423_v12, %v2200_v50  ;;  %v2380_v28 = vmul.f32 %v10005_v37, %v2335_v54  ;;  %v2880_v37 = vsel %vm2863_vm15, %v2824_v33, %v2836_v60  ;;  %v10024_v50 = vld [vmem:[#allocation28_spill] sm:$0xff] }
 0x4e0   : > { %v2272_v51 = vadd.f32 %v2248_v61, %v2092_v53  ;;  %v2735_v61 = vmul.f32 %v10024_v50, %v2700_v42 }
 0x4e2   : > { %v8445_v57 = vpop.permute.xlu1 %2489 }
 0x4e4   : > { %v8447_v25 = vpop.permute.xlu2 %2681 }
 0x4ea   : > { %v8460_v11 = vpop.permute.xlu1 %2404 }
 0x4eb   : > { %v2428_v53 = vmul.f32 %v8460_v11, %v2380_v28  ;;  %v2429_v19 = vmul.f32 %v8460_v11, %v2381_v22  ;;  %v2430_v59 = vmul.f32 %v8460_v11, %v2382_v31  ;;  %v8489_v22 = vpop.permute.xlu0 %2584  ;;  %v10027_v31 = vld [vmem:[#allocation87_spill] sm:$0xff] }
 0x4ec   : > { %v2478_v56 = vpop.permute.xlu2 %2477  ;;  %v2916_v33 = vmul.f32 %v10027_v31, %v2874_v2  ;;  %v10028_v28 = vld [vmem:[#allocation71_spill] sm:$0xff] }
 0x4ed   : > { %v8468_v52 = vadd.f32 %v2428_v53, %v2272_v51  ;;  %v8470_v35 = vadd.f32 %v2429_v19, %v2273_v32  ;;  %v8472_v44 = vadd.f32 %v2430_v59, %v2274_v30  ;;  %v10025_v32 = vld [vmem:[#allocation23_spill] sm:$0xff]  ;;  %v2917_v53 = vmul.f32 %v10028_v28, %v2868_v26 }
 0x4ee   : > { %v2915_v30 = vmul.f32 %v10025_v32, %v2880_v37  ;;  %v10026_v51 = vld [vmem:[#allocation103_spill] sm:$0xff]  ;;  %v2783_v19 = vmul.f32 %v8395_v15, %v2735_v61  ;;  %v2964_v60 = vmul.f32 %v10031_v45, %v2916_v33 }
 0x4ef   : > { %v2918_v63 = vmul.f32 %v10026_v51, %v2886_v6  ;;  %v2965_v37 = vmul.f32 %v10031_v45, %v2917_v53 }
 0x4f0   : > { %v2963_v36 = vmul.f32 %v10031_v45, %v2915_v30  ;;  %v2807_v6 = vadd.f32 %v2783_v19, %v8361_v62  ;;  %v2988_v26 = vadd.f32 %v2964_v60, %v8401_v5  ;;  %v10033_v19 = vld [vmem:[#allocation88_spill] sm:$0xff]  ;;  %v2341_v60 = vsel %vm2323_vm13, %v8433_v10, %v8442_v3 }
 0x4f1   : > { %v2966_v17 = vmul.f32 %v10031_v45, %v2918_v63  ;;  %v2989_v15 = vadd.f32 %v2965_v37, %v8403_v24  ;;  %v2515_v10 = vsel %vm2503_vm14, %v2478_v56, %v8445_v57  ;;  %v2521_v3 = vsel %vm2503_vm14, %v8455_v46, %v2478_v56 }
 0x4f2   : > { %v2670_v54 = vpop.permute.xlu1 %2669  ;;  %v2987_v2 = vadd.f32 %v2963_v36, %v2807_v6 }
 0x4f3   : > { %v2990_v61 = vadd.f32 %v2966_v17, %v8413_v8  ;;  %v2862_v24 = vpop.permute.xlu0 %2861  ;;  %v2167_v8 = vsel %vm2143_vm11, %v10016_v38, %v2106_v48  ;;  %v2527_v38 = vsel %vm2503_vm14, %v8437_v41, %v8455_v46  ;;  %v2509_v48 = vsel %vm2503_vm14, %v8445_v57, %v8437_v41 }
 0x4f4   : > { %v8503_v49 = vpop.permute.xlu2 %2849  ;;  %v2561_v41 = vmul.f32 %v10001_v34, %v2509_v48  ;;  %v2689_v46 = vsel %vm2683_vm12, %v2670_v54, %v8447_v25 }
 0x4f6   : > { %v8494_v59 = vpop.f32.mrf.mxu0  ;;  %v8496_v42 = vpop.f32.mrf.mxu1 }
 0x4f7   : > { %10029 = vst [vmem:[#allocation51_spill] sm:$0xff] %v8494_v59 }
 0x4f8   : > { %10030 = vst [vmem:[#allocation29_spill] sm:$0xff] %v8496_v42 }
 0x4fa   : > { %v3013_v42 = vpop.permute.xlu1 %3012 }
 0x4fb   : > { %v8510_v30 = vadd.f32 %v3013_v42, %v2987_v2  ;;  %v8512_v63 = vadd.f32 %v3013_v42, %v2988_v26  ;;  %v8514_v33 = vadd.f32 %v3013_v42, %v2989_v15  ;;  %v8516_v53 = vadd.f32 %v3013_v42, %v2990_v61 }
 0x4fc   : > { %v2199_v42 = vmul.f32 %v10033_v19, %v2167_v8  ;;  %v2658_v45 = vpop.permute.xlu2 %2657  ;;  %v2379_v61 = vmul.f32 %v10004_v9, %v2341_v60  ;;  %v2562_v19 = vmul.f32 %v9998_v58, %v2527_v38 }
 0x4fd   : > { %v8508_v59 = vpop.f32.mrf.mxu2  ;;  %3071 = vmatmul.f32.gmra.mxu0 %v8510_v30  ;;  %3106 = vmatmul.f32.gmra.mxu1 %v8512_v63  ;;  %v2695_v9 = vsel %vm2683_vm12, %v2658_v45, %v2670_v54 }
 0x4fe   : > { %v8518_v62 = vpop.f32.mrf.mxu3  ;;  %v8520_v36 = vpop.f32.mrf.mxu0  ;;  %3141 = vmatmul.f32.gmra.mxu2 %v8514_v33  ;;  %3176 = vmatmul.f32.gmra.mxu3 %v8516_v53  ;;  %v2247_v26 = vmul.f32 %v8423_v12, %v2199_v42  ;;  %v2559_v12 = vmul.f32 %v9999_v55, %v2521_v3  ;;  %v2560_v42 = vmul.f32 %v10000_v29, %v2515_v10 }
 0x4ff   : > { %10032 = vst [vmem:[#allocation122_spill] sm:$0xff] %v8518_v62  ;;  %v8522_v5 = vpop.f32.mrf.mxu1  ;;  %v2826_v62 = vpop.permute.xlu0 %2825  ;;  %v2610_v29 = vmul.f32 %v8489_v22, %v2562_v19  ;;  %v2869_v3 = vsel %vm2863_vm15, %v8503_v49, %v2862_v24 }
 0x500   : > { %v2271_v57 = vadd.f32 %v2247_v26, %v8428_v23  ;;  %v2887_v55 = vsel %vm2863_vm15, %v2862_v24, %v2826_v62  ;;  %v2609_v23 = vmul.f32 %v8489_v22, %v2561_v41  ;;  %v2607_v54 = vmul.f32 %v8489_v22, %v2559_v12 }
 0x501   : > { %v2608_v48 = vmul.f32 %v8489_v22, %v2560_v42  ;;  %v2634_v24 = vadd.f32 %v2610_v29, %v8472_v44  ;;  %v2922_v41 = vmul.f32 %v10026_v51, %v2887_v55 }
 0x502   : > { %v2646_v17 = vpop.permute.xlu1 %2645  ;;  %v2633_v19 = vadd.f32 %v2609_v23, %v8470_v35 }
 0x503   : > { %v2701_v58 = vsel %vm2683_vm12, %v2646_v17, %v2658_v45  ;;  %v2707_v34 = vsel %vm2683_vm12, %v8447_v25, %v2646_v17  ;;  %v2740_v25 = vmul.f32 %v10013_v1, %v2695_v9 }
 0x504   : > { %v2838_v56 = vpop.permute.xlu2 %2837  ;;  %v2739_v17 = vmul.f32 %v10024_v50, %v2701_v58  ;;  %v2742_v26 = vmul.f32 %v10015_v20, %v2707_v34  ;;  %v2632_v20 = vadd.f32 %v2608_v48, %v8468_v52  ;;  %v3187_v48 = vmul.f32 %v9972_v39, %v9972_v39 }
 0x505   : > { %v8536_v37 = vpop.f32.mrf.mxu2  ;;  %v2881_v22 = vsel %vm2863_vm15, %v2826_v62, %v2838_v56 }
 0x506   : > { %v8546_v6 = vpop.f32.mrf.mxu3  ;;  %v3066_v2 = vpop.f32.mrf.mxu0  ;;  %v2919_v47 = vmul.f32 %v10025_v32, %v2881_v22  ;;  %v10039_v22 = vld [vmem:[#allocation109_spill] sm:$0xff] }
 0x507   : > { %10034 = vst [vmem:[#allocation119_spill] sm:$0xff] %v8546_v6  ;;  %v3101_v15 = vpop.f32.mrf.mxu1  ;;  %v2427_v6 = vmul.f32 %v8460_v11, %v2379_v61  ;;  %v3017_v35 = vpop.permute.xlu0 %3016 }
 0x508   : > { %v3102_v8 = vadd.f32 %v3101_v15, %v3066_v2  ;;  %v2741_v2 = vmul.f32 %v10014_v4, %v2689_v46 }
 0x509   : > { %v2451_v38 = vadd.f32 %v2427_v6, %v2271_v57  ;;  %v2875_v6 = vsel %vm2863_vm15, %v2838_v56, %v8503_v49  ;;  %v2921_v49 = vmul.f32 %v10028_v28, %v2869_v3  ;;  %v3183_v56 = vmul.f32 %v8155_v40, %v8155_v40  ;;  %v10038_v3 = vld [vmem:[#allocation47_spill] sm:$0xff] }
 0x50a   : > { %v2765_v11 = vpop.permute.xlu1 %2764  ;;  %v2920_v62 = vmul.f32 %v10027_v31, %v2875_v6  ;;  %v3192_v6 = vmul.f32 %v10038_v3, %v10038_v3 }
 0x50b   : > { %v2787_v4 = vmul.f32 %v2765_v11, %v2739_v17  ;;  %v2788_v1 = vmul.f32 %v2765_v11, %v2740_v25  ;;  %v2789_v61 = vmul.f32 %v2765_v11, %v2741_v2  ;;  %v2790_v50 = vmul.f32 %v2765_v11, %v2742_v26  ;;  %v10035_v25 = vld [vmem:[#allocation113_spill] sm:$0xff]  ;;  %v10037_v26 = vld [vmem:[#allocation112_spill] sm:$0xff] }
 0x50c   : > { %v3189_v2 = vmul.f32 %v9974_v21, %v9974_v21  ;;  %v3190_v17 = vmul.f32 %v10035_v25, %v10035_v25 }
 0x50d   : > { %v3136_v60 = vpop.f32.mrf.mxu2  ;;  %v2812_v42 = vadd.f32 %v2788_v1, %v2632_v20  ;;  %v2813_v57 = vadd.f32 %v2789_v61, %v2633_v19  ;;  %v2814_v46 = vadd.f32 %v2790_v50, %v2634_v24  ;;  %v10040_v1 = vld [vmem:[#allocation30_spill] sm:$0xff]  ;;  %v4562_v50 = vld [vmem:[%s8959_s2 + $0x10] sm:$0xff]  ;;  %v4595_v20 = vmov 14   ;;  %v10041_v19 = vld [vmem:[#allocation81_spill] sm:$0xff] }
 0x50e   : > { %v3137_v45 = vadd.f32 %v3136_v60, %v3102_v8  ;;  %v3171_v10 = vpop.f32.mrf.mxu3  ;;  %v2631_v8 = vadd.f32 %v2607_v54, %v2451_v38  ;;  %v3184_v60 = vmul.f32 %v8158_v13, %v8158_v13  ;;  %v3185_v38 = vmul.f32 %v8164_v18, %v8164_v18 }
 0x50f   : > { %v3186_v54 = vmul.f32 %v8171_v43, %v8171_v43  ;;  %v3194_v61 = vmul.f32 %v10040_v1, %v10040_v1  ;;  %v3195_v24 = vmul.f32 %v10041_v19, %v10041_v19 }
 0x510   : > { %v8590_v15 = vadd.f32 %v3171_v10, %v3137_v45  ;;  %v2811_v12 = vadd.f32 %v2787_v4, %v2631_v8  ;;  %v3188_v45 = vmul.f32 %v9973_v0, %v9973_v0  ;;  %v3191_v10 = vmul.f32 %v10037_v26, %v10037_v26  ;;  %v4563_v8 = vld [vmem:[%s8959_s2 + $0x18] sm:$0xff] }
 0x511   : > { %v3193_v4 = vmul.f32 %v10039_v22, %v10039_v22 }
 0x513   : > { %v2945_v9 = vpop.permute.xlu1 %2944 }
 0x514   : > { %v2967_v58 = vmul.f32 %v2945_v9, %v2919_v47  ;;  %v2968_v34 = vmul.f32 %v2945_v9, %v2920_v62  ;;  %v2969_v52 = vmul.f32 %v2945_v9, %v2921_v49  ;;  %v2970_v11 = vmul.f32 %v2945_v9, %v2922_v41  ;;  %v10042_v41 = vld [vmem:[#allocation102_spill] sm:$0xff]  ;;  %v10043_v47 = vld [vmem:[#allocation80_spill] sm:$0xff] }
 0x515   : > { %v3196_v49 = vmul.f32 %v10042_v41, %v10042_v41  ;;  %v3197_v62 = vmul.f32 %v10043_v47, %v10043_v47  ;;  %v3200_v9 = vmul.f32 %v8512_v63, %v8512_v63 }
 0x516   : > { %v2991_v23 = vadd.f32 %v2967_v58, %v2811_v12  ;;  %v2992_v44 = vadd.f32 %v2968_v34, %v2812_v42  ;;  %v2993_v29 = vadd.f32 %v2969_v52, %v2813_v57  ;;  %v2994_v51 = vadd.f32 %v2970_v11, %v2814_v46  ;;  %v10044_v12 = vld [vmem:[#allocation139_spill] sm:$0xff] }
 0x517   : > { %v3198_v42 = vmul.f32 %v10044_v12, %v10044_v12  ;;  %v4564_v57 = vld [vmem:[%s8959_s2 + $0x28] sm:$0xff]  ;;  %v3199_v46 = vmul.f32 %v8510_v30, %v8510_v30  ;;  %v10045_v58 = vmov 0   ;;  %v3201_v34 = vmul.f32 %v8514_v33, %v8514_v33 }
 0x518   : > { %v8599_v55 = vadd.f32 %v3017_v35, %v2991_v23  ;;  %v8601_v28 = vadd.f32 %v3017_v35, %v2992_v44  ;;  %v8603_v32 = vadd.f32 %v3017_v35, %v2993_v29  ;;  %v8605_v31 = vadd.f32 %v3017_v35, %v2994_v51 }
 0x519   : > { %v3202_v52 = vmul.f32 %v8516_v53, %v8516_v53 }
 0x51a   : > { %3074 = vmatmul.f32.gmra.mxu0 %v8599_v55  ;;  %3109 = vmatmul.f32.gmra.mxu1 %v8601_v28  ;;  %v3203_v11 = vmul.f32 %v8599_v55, %v8599_v55  ;;  %v3204_v35 = vmul.f32 %v8601_v28, %v8601_v28  ;;  %v3205_v23 = vmul.f32 %v8603_v32, %v8603_v32 }
 0x51b   : > { %3144 = vmatmul.f32.gmra.mxu2 %v8603_v32  ;;  %3179 = vmatmul.f32.gmra.mxu3 %v8605_v31  ;;  %v3206_v44 = vmul.f32 %v8605_v31, %v8605_v31 }
 0x522   : > { %3223 = vmatmul.f32.vlgmr.msra.gmra.mxu0 %v3183_v56  ;;  %3258 = vmatmul.f32.vlgmr.msra.gmra.mxu1 %v3184_v60 }
 0x523   : > { %3293 = vmatmul.f32.vlgmr.msra.gmra.mxu2 %v3185_v38  ;;  %3328 = vmatmul.f32.vlgmr.msra.gmra.mxu3 %v3186_v54 }
 0x524   : > { %3762 = vmatpush.msra.mxu2 %v8219_v27  ;;  %3797 = vmatpush.msra.mxu3 %v8231_v7  ;;  %v4594_v27 = vmov 13   ;;  %v10036_v7 = vld [vmem:[#allocation25_spill] sm:$0xff] }
 0x525   : > { %3692 = vmatpush.msra.mxu0 %v8199_v16  ;;  %3727 = vmatpush.msra.mxu1 %v8209_v14  ;;  %v4560_v16 = vld [vmem:[%s8959_s2] sm:$0xff]  ;;  %v4561_v14 = vld [vmem:[%s8959_s2 + $0x8] sm:$0xff] }
 0x526   : > { %4463 = vset.pattern.permute.xlu1 %v4594_v27  ;;  %4464 = vset.pattern.permute.xlu2 %v4594_v27 }
 0x527   : > { %3436 = vperm.xlu1 %4463, %v4560_v16   ;;  %3440 = vperm.xlu2 %4464, %v4561_v14  }
 0x528   : > { %4465 = vset.pattern.permute.xlu0 %v4594_v27  ;;  %v10047_v27 = vld [vmem:[#allocation29_spill] sm:$0xff] }
 0x529   : > { %3452 = vperm.xlu0 %4465, %v10036_v7  }
 0x52a   : > { %3226 = vmatmul.f32.gmra.mxu0 %v3187_v48  ;;  %3261 = vmatmul.f32.gmra.mxu1 %v3188_v45  ;;  %v3069_v29 = vpop.f32.mrf.mxu0  ;;  %v3104_v51 = vpop.f32.mrf.mxu1  ;;  %v3099_v48 = vadd.f32 %v8522_v5, %v8520_v36 }
 0x52b   : > { %3296 = vmatmul.f32.gmra.mxu2 %v3189_v2  ;;  %3331 = vmatmul.f32.gmra.mxu3 %v3190_v17  ;;  %v10046_v17 = vld [vmem:[#allocation51_spill] sm:$0xff] }
 0x52f   : > { %3444 = vperm.xlu1 %4463, %v4562_v50   ;;  %3448 = vperm.xlu2 %4464, %v4563_v8  }
 0x531   : > { %4468 = vset.pattern.permute.xlu0 %v4595_v20  ;;  %v3139_v56 = vpop.f32.mrf.mxu2  ;;  %v3174_v60 = vpop.f32.mrf.mxu3 }
 0x532   : > { %3229 = vmatmul.f32.gmra.mxu0 %v3191_v10  ;;  %3264 = vmatmul.f32.gmra.mxu1 %v3192_v6 }
 0x533   : > { %3299 = vmatmul.f32.gmra.mxu2 %v3193_v4  ;;  %3334 = vmatmul.f32.gmra.mxu3 %v3194_v61  ;;  %v10048_v4 = vld [vmem:[#allocation119_spill] sm:$0xff] }
 0x534   : > { %3484 = vperm.xlu0 %4468, %v4563_v8  }
 0x537   : > { %3456 = vperm.xlu1 %4463, %v4564_v57   ;;  %4466 = vset.pattern.permute.xlu2 %v4595_v20 }
 0x538   : > { %3472 = vperm.xlu2 %4466, %v4560_v16   ;;  %v3096_v16 = vadd.f32 %v10047_v27, %v10046_v17 }
 0x53a   : > { %3232 = vmatmul.f32.gmra.mxu0 %v3195_v24  ;;  %3267 = vmatmul.f32.gmra.mxu1 %v3196_v49  ;;  %v3131_v6 = vadd.f32 %v8508_v59, %v3096_v16 }
 0x53b   : > { %3302 = vmatmul.f32.gmra.mxu2 %v3197_v62  ;;  %3337 = vmatmul.f32.gmra.mxu3 %v3198_v42 }
 0x53c   : > { %4471 = vset.pattern.permute.xlu0 %v10045_v58 }
 0x53f   : > { %4467 = vset.pattern.permute.xlu1 %v4595_v20 }
 0x540   : > { %3476 = vperm.xlu1 %4467, %v4561_v14   ;;  %3480 = vperm.xlu2 %4466, %v4562_v50   ;;  %v3134_v14 = vadd.f32 %v8536_v37, %v3099_v48  ;;  %v10049_v50 = vld [vmem:[#allocation122_spill] sm:$0xff] }
 0x541   : > { %v3166_v8 = vadd.f32 %v10049_v50, %v3131_v6 }
 0x542   : > { %3235 = vmatmul.f32.gmra.mxu0 %v3199_v46  ;;  %3270 = vmatmul.f32.gmra.mxu1 %v3200_v9  ;;  %v3169_v61 = vadd.f32 %v10048_v4, %v3134_v14  ;;  %v3105_v14 = vadd.f32 %v3104_v51, %v3069_v29 }
 0x543   : > { %3305 = vmatmul.f32.gmra.mxu2 %v3201_v34  ;;  %3340 = vmatmul.f32.gmra.mxu3 %v3202_v52  ;;  %v3347_v62 = vsel %vm866_vm1, %v3166_v8, 0.0 }
 0x544   : > { %v3348_v49 = vsel %vm866_vm1, %v3169_v61, 0.0  ;;  %v3140_v61 = vadd.f32 %v3139_v56, %v3105_v14 }
 0x545   : > { %v3349_v42 = vadd.f32 %v3348_v49, %v3347_v62 }
 0x548   : > { %3488 = vperm.xlu1 %4467, %v10036_v7   ;;  %3492 = vperm.xlu2 %4466, %v4564_v57   ;;  %v3350_v57 = vrot.slane %v3349_v42, 4 }
 0x54a   : > { %3238 = vmatmul.f32.gmra.mxu0 %v3203_v11  ;;  %3273 = vmatmul.f32.gmra.mxu1 %v3204_v35  ;;  %v3351_v59 = vadd.f32 %v3350_v57, %v3349_v42 }
 0x54b   : > { %3308 = vmatmul.f32.gmra.mxu2 %v3205_v23  ;;  %3343 = vmatmul.f32.gmra.mxu3 %v3206_v44 }
 0x54c   : > { %v3352_v35 = vrot.slane %v3351_v59, 2 }
 0x54e   : > { %v3353_v4 = vadd.f32 %v3352_v35, %v3351_v59 }
 0x550   : > { %4469 = vset.pattern.permute.xlu1 %v10045_v58  ;;  %4470 = vset.pattern.permute.xlu2 %v10045_v58  ;;  %v3354_v42 = vrot.slane %v3353_v4, 1 }
 0x552   : > { %v3355_v59 = vadd.f32 %v3354_v42, %v3353_v4 }
 0x57a   : > { %v3072_v38 = vpop.f32.mrf.mxu0  ;;  %v3107_v54 = vpop.f32.mrf.mxu1 }
 0x57b   : > { %v3108_v50 = vadd.f32 %v3107_v54, %v3072_v38 }
 0x581   : > { %v3142_v45 = vpop.f32.mrf.mxu2  ;;  %v3177_v2 = vpop.f32.mrf.mxu3 }
 0x597   : > { %v3075_v7 = vpop.f32.mrf.mxu0  ;;  %v3110_v10 = vpop.f32.mrf.mxu1 }
 0x598   : > { %v3111_v62 = vadd.f32 %v3110_v10, %v3075_v7  ;;  %v8699_v10 = vmul.f32 0.00024414063, %v3355_v59 }
 0x59a   : > { %v3394_v4 = vmul.f32 %v8699_v10, %v8699_v10 }
 0x59e   : > { %v3145_v20 = vpop.f32.mrf.mxu2  ;;  %v3180_v24 = vpop.f32.mrf.mxu3 }
 0x59f   : > { %v3224_v36 = vpop.f32.mrf.mxu0  ;;  %v3259_v5 = vpop.f32.mrf.mxu1 }
 0x5a0   : > { %v3260_v34 = vadd.f32 %v3259_v5, %v3224_v36  ;;  %v3143_v5 = vadd.f32 %v3142_v45, %v3108_v50  ;;  %v3356_v45 = vsel %vm866_vm1, %v8590_v15, 0.0 }
 0x5a2   : > { %v3178_v51 = vadd.f32 %v3177_v2, %v3143_v5 }
 0x5a4   : > { %v3359_v7 = vsel %vm866_vm1, %v3178_v51, 0.0 }
 0x5a6   : > { %v3294_v46 = vpop.f32.mrf.mxu2  ;;  %v3329_v37 = vpop.f32.mrf.mxu3 }
 0x5a7   : > { %v3227_v9 = vpop.f32.mrf.mxu0  ;;  %v3262_v58 = vpop.f32.mrf.mxu1  ;;  %v3295_v52 = vadd.f32 %v3294_v46, %v3260_v34 }
 0x5a8   : > { %v3263_v11 = vadd.f32 %v3262_v58, %v3227_v9  ;;  %v3146_v58 = vadd.f32 %v3145_v20, %v3111_v62 }
 0x5a9   : > { %v3330_v48 = vadd.f32 %v3329_v37, %v3295_v52  ;;  %v3175_v37 = vadd.f32 %v3174_v60, %v3140_v61 }
 0x5aa   : > { %v3181_v54 = vadd.f32 %v3180_v24, %v3146_v58 }
 0x5ab   : > { %v3369_v8 = vsel %vm866_vm1, %v3330_v48, 0.0  ;;  %v3357_v38 = vsel %vm866_vm1, %v3175_v37, 0.0 }
 0x5ac   : > { %v3358_v35 = vadd.f32 %v3357_v38, %v3356_v45 }
 0x5ae   : > { %v3297_v23 = vpop.f32.mrf.mxu2  ;;  %v3332_v44 = vpop.f32.mrf.mxu3  ;;  %v3360_v2 = vadd.f32 %v3359_v7, %v3358_v35 }
 0x5af   : > { %v3298_v17 = vadd.f32 %v3297_v23, %v3263_v11  ;;  %v3230_v27 = vpop.f32.mrf.mxu0  ;;  %v3265_v16 = vpop.f32.mrf.mxu1 }
 0x5b0   : > { %v3266_v50 = vadd.f32 %v3265_v16, %v3230_v27 }
 0x5b1   : > { %v3333_v6 = vadd.f32 %v3332_v44, %v3298_v17  ;;  %v3361_v44 = vsel %vm866_vm1, %v3181_v54, 0.0 }
 0x5b3   : > { %v3370_v49 = vsel %vm866_vm1, %v3333_v6, 0.0  ;;  %v3362_v6 = vadd.f32 %v3361_v44, %v3360_v2 }
 0x5b4   : > { %v3371_v36 = vadd.f32 %v3370_v49, %v3369_v8 }
 0x5b6   : > { %v3372_v57 = vrot.slane %v3371_v36, 4  ;;  %v3300_v46 = vpop.f32.mrf.mxu2  ;;  %v3335_v9 = vpop.f32.mrf.mxu3 }
 0x5b7   : > { %v3233_v34 = vpop.f32.mrf.mxu0  ;;  %v3268_v52 = vpop.f32.mrf.mxu1 }
 0x5b8   : > { %v3373_v29 = vadd.f32 %v3372_v57, %v3371_v36  ;;  %v3269_v15 = vadd.f32 %v3268_v52, %v3233_v34  ;;  %v3363_v36 = vrot.slane %v3362_v6, 4  ;;  %v3301_v57 = vadd.f32 %v3300_v46, %v3266_v50 }
 0x5ba   : > { %v3374_v56 = vrot.slane %v3373_v29, 2  ;;  %v3364_v51 = vadd.f32 %v3363_v36, %v3362_v6  ;;  %v3336_v38 = vadd.f32 %v3335_v9, %v3301_v57 }
 0x5bc   : > { %v3375_v11 = vadd.f32 %v3374_v56, %v3373_v29  ;;  %v3365_v27 = vrot.slane %v3364_v51, 2 }
 0x5be   : > { %v3376_v60 = vrot.slane %v3375_v11, 1  ;;  %v3303_v20 = vpop.f32.mrf.mxu2  ;;  %v3338_v23 = vpop.f32.mrf.mxu3  ;;  %v3366_v44 = vadd.f32 %v3365_v27, %v3364_v51 }
 0x5bf   : > { %v3236_v17 = vpop.f32.mrf.mxu0  ;;  %v3271_v14 = vpop.f32.mrf.mxu1  ;;  %v3304_v8 = vadd.f32 %v3303_v20, %v3269_v15 }
 0x5c0   : > { %v3377_v48 = vadd.f32 %v3376_v60, %v3375_v11  ;;  %v3272_v49 = vadd.f32 %v3271_v14, %v3236_v17  ;;  %v3378_v11 = vsel %vm866_vm1, %v3336_v38, 0.0  ;;  %v3367_v6 = vrot.slane %v3366_v44, 1  ;;  %v3441_v51 = vpop.permute.xlu2 %3440 }
 0x5c1   : > { %v3339_v29 = vadd.f32 %v3338_v23, %v3304_v8 }
 0x5c2   : > { %v3393_v24 = vmul.f32 0.00024414063, %v3377_v48  ;;  %v3368_v50 = vadd.f32 %v3367_v6, %v3366_v44 }
 0x5c3   : > { %v3379_v34 = vsel %vm866_vm1, %v3339_v29, 0.0 }
 0x5c4   : > { %v3395_v61 = vsub.f32 %v3393_v24, %v3394_v4  ;;  %v3380_v35 = vadd.f32 %v3379_v34, %v3378_v11 }
 0x5c6   : > { %v3306_v5 = vpop.f32.mrf.mxu2  ;;  %v3341_v62 = vpop.f32.mrf.mxu3  ;;  %v3396_v42 = vmax.f32 %v3395_v61, 0.0 }
 0x5c7   : > { %v3307_v37 = vadd.f32 %v3306_v5, %v3272_v49  ;;  %v3239_v59 = vpop.f32.mrf.mxu0  ;;  %v3274_v56 = vpop.f32.mrf.mxu1 }
 0x5c8   : > { %v3401_v58 = vadd.f32 1e-05, %v3396_v42  ;;  %v3275_v52 = vadd.f32 %v3274_v56, %v3239_v59  ;;  %v3437_v49 = vpop.permute.xlu1 %3436  ;;  %v8708_v42 = vmul.f32 0.00012207031, %v3368_v50 }
 0x5c9   : > { %v3342_v54 = vadd.f32 %v3341_v62, %v3307_v37 }
 0x5ca   : > { %4476 = vrsqrt.f32 %v3401_v58  ;;  %vm3408_vm2 = vweird.f32 %v3401_v58  ;;  %v3398_v29 = vmul.f32 %v8708_v42, %v8708_v42 }
 0x5cb   : > { %v3381_v45 = vsel %vm866_vm1, %v3342_v54, 0.0 }
 0x5cc   : > { %v3382_v2 = vadd.f32 %v3381_v45, %v3380_v35 }
 0x5ce   : > { %v3309_v16 = vpop.f32.mrf.mxu2  ;;  %v3344_v60 = vpop.f32.mrf.mxu3 }
 0x5cf   : > { %v3310_v7 = vadd.f32 %v3309_v16, %v3275_v52 }
 0x5d0   : > { %v4477_v46 = vpop.eup %4476 }
 0x5d1   : > { %v3403_v20 = vmul.f32 %v4477_v46, %v3401_v58  ;;  %v3345_v23 = vadd.f32 %v3344_v60, %v3310_v7  ;;  %vm3409_vm0 = vweird.f32 %v4477_v46  ;;  %v3445_v7 = vpop.permute.xlu1 %3444  ;;  %v3449_v60 = vpop.permute.xlu2 %3448 }
 0x5d2   : > { %vm3410_vm3 = vmor %vm3408_vm2, %vm3409_vm0 }
 0x5d3   : > { %v3404_v48 = vmul.f32 %v4477_v46, %v3403_v20  ;;  %v3383_v9 = vsel %vm866_vm1, %v3345_v23, 0.0  ;;  %v3453_v23 = vpop.permute.xlu0 %3452 }
 0x5d4   : > { %v3384_v17 = vadd.f32 %v3383_v9, %v3382_v2 }
 0x5d5   : > { %v3405_v14 = vmul.f32 0.5, %v3404_v48 }
 0x5d6   : > { %v3385_v24 = vrot.slane %v3384_v17, 4 }
 0x5d7   : > { %v3406_v4 = vsub.f32 1.5, %v3405_v14 }
 0x5d8   : > { %v3386_v15 = vadd.f32 %v3385_v24, %v3384_v17 }
 0x5d9   : > { %v3407_v61 = vmul.f32 %v4477_v46, %v3406_v4  ;;  %v3457_v2 = vpop.permute.xlu1 %3456  ;;  %v3473_v17 = vpop.permute.xlu2 %3472 }
 0x5da   : > { %v3387_v8 = vrot.slane %v3386_v15, 2 }
 0x5db   : > { %v3411_v36 = vsel %vm3410_vm3, %v4477_v46, %v3407_v61 }
 0x5dc   : > { %v3459_v5 = vmul.f32 %v3437_v49, %v3411_v36  ;;  %v3388_v62 = vadd.f32 %v3387_v8, %v3386_v15  ;;  %v3460_v56 = vmul.f32 %v3441_v51, %v3411_v36  ;;  %v3485_v8 = vpop.permute.xlu0 %3484 }
 0x5de   : > { %v3389_v57 = vrot.slane %v3388_v62, 1  ;;  %4301 = vmatmul.msk.f32.vlgmr.msrb.gmra.mxu0 %vm866_vm1, %v3459_v5  ;;  %4307 = vmatmul.msk.f32.vlgmr.msrb.gmra.mxu1 %vm866_vm1, %v3459_v5  ;;  %v3465_v9 = vmul.f32 %v3459_v5, %v8699_v10  ;;  %v3466_v6 = vmul.f32 %v3460_v56, %v8699_v10 }
 0x5df   : > { %4313 = vmatmul.msk.f32.vlgmr.msrb.gmra.mxu2 %vm866_vm1, %v3459_v5  ;;  %4319 = vmatmul.msk.f32.vlgmr.msrb.gmra.mxu3 %vm866_vm1, %v3459_v5 }
 0x5e0   : > { %v3390_v37 = vadd.f32 %v3389_v57, %v3388_v62  ;;  %v3495_v14 = vsub.f32 %v3473_v17, %v3465_v9 }
 0x5e1   : > { %v3477_v24 = vpop.permute.xlu1 %3476  ;;  %v3481_v61 = vpop.permute.xlu2 %3480 }
 0x5e2   : > { %v3397_v58 = vmul.f32 0.00012207031, %v3390_v37  ;;  %v3496_v4 = vsub.f32 %v3477_v24, %v3466_v6 }
 0x5e4   : > { %v3399_v59 = vsub.f32 %v3397_v58, %v3398_v29 }
 0x5e6   : > { %v3400_v38 = vmax.f32 %v3399_v59, 0.0  ;;  %4302 = vmatmul.msk.f32.gmra.mxu0 %vm866_vm1, %v3460_v56  ;;  %4308 = vmatmul.msk.f32.gmra.mxu1 %vm866_vm1, %v3460_v56 }
 0x5e7   : > { %4314 = vmatmul.msk.f32.gmra.mxu2 %vm866_vm1, %v3460_v56  ;;  %4320 = vmatmul.msk.f32.gmra.mxu3 %vm866_vm1, %v3460_v56 }
 0x5e8   : > { %v3412_v54 = vadd.f32 1e-05, %v3400_v38 }
 0x5e9   : > { %v3489_v5 = vpop.permute.xlu1 %3488  ;;  %v3493_v37 = vpop.permute.xlu2 %3492 }
 0x5ea   : > { %4478 = vrsqrt.f32 %v3412_v54  ;;  %vm3419_vm5 = vweird.f32 %v3412_v54 }
 0x5f0   : > { %v4479_v34 = vpop.eup %4478 }
 0x5f1   : > { %v3414_v52 = vmul.f32 %v4479_v34, %v3412_v54  ;;  %vm3420_vm4 = vweird.f32 %v4479_v34 }
 0x5f2   : > { %vm3421_vm6 = vmor %vm3419_vm5, %vm3420_vm4 }
 0x5f3   : > { %v3415_v27 = vmul.f32 %v4479_v34, %v3414_v52 }
 0x5f5   : > { %v3416_v16 = vmul.f32 0.5, %v3415_v27 }
 0x5f7   : > { %v3417_v11 = vsub.f32 1.5, %v3416_v16 }
 0x5f9   : > { %v3418_v45 = vmul.f32 %v4479_v34, %v3417_v11 }
 0x5fb   : > { %v3422_v46 = vsel %vm3421_vm6, %v4479_v34, %v3418_v45 }
 0x5fc   : > { %v3461_v35 = vmul.f32 %v3445_v7, %v3422_v46  ;;  %v3462_v20 = vmul.f32 %v3449_v60, %v3422_v46  ;;  %v3463_v44 = vmul.f32 %v3453_v23, %v3422_v46  ;;  %v3464_v48 = vmul.f32 %v3457_v2, %v3422_v46 }
 0x5fe   : > { %4303 = vmatmul.msk.f32.gmra.mxu0 %vm866_vm1, %v3461_v35  ;;  %4309 = vmatmul.msk.f32.gmra.mxu1 %vm866_vm1, %v3461_v35  ;;  %v3467_v15 = vmul.f32 %v3461_v35, %v8708_v42  ;;  %v3468_v10 = vmul.f32 %v3462_v20, %v8708_v42  ;;  %v3469_v36 = vmul.f32 %v3463_v44, %v8708_v42 }
 0x5ff   : > { %4315 = vmatmul.msk.f32.gmra.mxu2 %vm866_vm1, %v3461_v35  ;;  %4321 = vmatmul.msk.f32.gmra.mxu3 %vm866_vm1, %v3461_v35  ;;  %v3470_v57 = vmul.f32 %v3464_v48, %v8708_v42 }
 0x600   : > { %v3497_v50 = vsub.f32 %v3481_v61, %v3467_v15  ;;  %v3498_v49 = vsub.f32 %v3485_v8, %v3468_v10  ;;  %v3499_v62 = vsub.f32 %v3489_v5, %v3469_v36 }
 0x601   : > { %v3500_v58 = vsub.f32 %v3493_v37, %v3470_v57 }
 0x606   : > { %4304 = vmatmul.msk.f32.gmra.mxu0 %vm866_vm1, %v3462_v20  ;;  %4310 = vmatmul.msk.f32.gmra.mxu1 %vm866_vm1, %v3462_v20 }
 0x607   : > { %4316 = vmatmul.msk.f32.gmra.mxu2 %vm866_vm1, %v3462_v20  ;;  %4322 = vmatmul.msk.f32.gmra.mxu3 %vm866_vm1, %v3462_v20 }
 0x60e   : > { %4305 = vmatmul.msk.f32.gmra.mxu0 %vm866_vm1, %v3463_v44  ;;  %4311 = vmatmul.msk.f32.gmra.mxu1 %vm866_vm1, %v3463_v44 }
 0x60f   : > { %4317 = vmatmul.msk.f32.gmra.mxu2 %vm866_vm1, %v3463_v44  ;;  %4323 = vmatmul.msk.f32.gmra.mxu3 %vm866_vm1, %v3463_v44 }
 0x616   : > { %4306 = vmatmul.msk.f32.gmra.mxu0 %vm866_vm1, %v3464_v48  ;;  %4312 = vmatmul.msk.f32.gmra.mxu1 %vm866_vm1, %v3464_v48 }
 0x617   : > { %4318 = vmatmul.msk.f32.gmra.mxu2 %vm866_vm1, %v3464_v48  ;;  %4324 = vmatmul.msk.f32.gmra.mxu3 %vm866_vm1, %v3464_v48 }
 0x61e   : > { %4325 = vmatmul.msk.f32.vlgmr.msra.gmra.mxu0 %vm866_vm1, %v3495_v14  ;;  %4331 = vmatmul.msk.f32.vlgmr.msra.gmra.mxu1 %vm866_vm1, %v3495_v14 }
 0x61f   : > { %4337 = vmatmul.msk.f32.vlgmr.msra.gmra.mxu2 %vm866_vm1, %v3495_v14  ;;  %4343 = vmatmul.msk.f32.vlgmr.msra.gmra.mxu3 %vm866_vm1, %v3495_v14 }
 0x626   : > { %4326 = vmatmul.msk.f32.gmra.mxu0 %vm866_vm1, %v3496_v4  ;;  %4332 = vmatmul.msk.f32.gmra.mxu1 %vm866_vm1, %v3496_v4 }
 0x627   : > { %4338 = vmatmul.msk.f32.gmra.mxu2 %vm866_vm1, %v3496_v4  ;;  %4344 = vmatmul.msk.f32.gmra.mxu3 %vm866_vm1, %v3496_v4 }
 0x62e   : > { %4327 = vmatmul.msk.f32.gmra.mxu0 %vm866_vm1, %v3497_v50  ;;  %4333 = vmatmul.msk.f32.gmra.mxu1 %vm866_vm1, %v3497_v50 }
 0x62f   : > { %4339 = vmatmul.msk.f32.gmra.mxu2 %vm866_vm1, %v3497_v50  ;;  %4345 = vmatmul.msk.f32.gmra.mxu3 %vm866_vm1, %v3497_v50 }
 0x636   : > { %4328 = vmatmul.msk.f32.gmra.mxu0 %vm866_vm1, %v3498_v49  ;;  %4334 = vmatmul.msk.f32.gmra.mxu1 %vm866_vm1, %v3498_v49 }
 0x637   : > { %4340 = vmatmul.msk.f32.gmra.mxu2 %vm866_vm1, %v3498_v49  ;;  %4346 = vmatmul.msk.f32.gmra.mxu3 %vm866_vm1, %v3498_v49 }
 0x63e   : > { %4329 = vmatmul.msk.f32.gmra.mxu0 %vm866_vm1, %v3499_v62  ;;  %4335 = vmatmul.msk.f32.gmra.mxu1 %vm866_vm1, %v3499_v62 }
 0x63f   : > { %4341 = vmatmul.msk.f32.gmra.mxu2 %vm866_vm1, %v3499_v62  ;;  %4347 = vmatmul.msk.f32.gmra.mxu3 %vm866_vm1, %v3499_v62 }
 0x646   : > { %4330 = vmatmul.msk.f32.gmra.mxu0 %vm866_vm1, %v3500_v58  ;;  %4336 = vmatmul.msk.f32.gmra.mxu1 %vm866_vm1, %v3500_v58 }
 0x647   : > { %4342 = vmatmul.msk.f32.gmra.mxu2 %vm866_vm1, %v3500_v58  ;;  %4348 = vmatmul.msk.f32.gmra.mxu3 %vm866_vm1, %v3500_v58  ;;  %vm4021_vm1 = vcmask 392192  }
 0x65b   : > { %v3536_v29 = vpop.f32.mrf.mxu0  ;;  %v3571_v51 = vpop.f32.mrf.mxu1 }
 0x65c   : > { %v3817_v9 = vmul.f32 %v3536_v29, %v8155_v40  ;;  %v3818_v17 = vmul.f32 %v3571_v51, %v8158_v13 }
 0x662   : > { %v3606_v59 = vpop.f32.mrf.mxu2  ;;  %v3641_v56 = vpop.f32.mrf.mxu3 }
 0x663   : > { %v3539_v38 = vpop.f32.mrf.mxu0  ;;  %v3574_v54 = vpop.f32.mrf.mxu1  ;;  %v3819_v8 = vmul.f32 %v3606_v59, %v8164_v18  ;;  %v3820_v49 = vmul.f32 %v3641_v56, %v8171_v43 }
 0x664   : > { %v3821_v36 = vmul.f32 %v3539_v38, %v9972_v39  ;;  %v3822_v40 = vmul.f32 %v3574_v54, %v9973_v0 }
 0x66a   : > { %v3609_v34 = vpop.f32.mrf.mxu2  ;;  %v3644_v52 = vpop.f32.mrf.mxu3 }
 0x66b   : > { %v3823_v0 = vmul.f32 %v3609_v34, %v9974_v21  ;;  %v3824_v38 = vmul.f32 %v3644_v52, %v10035_v25 }
 0x67b   : > { %v3542_v27 = vpop.f32.mrf.mxu0  ;;  %v3577_v42 = vpop.f32.mrf.mxu1 }
 0x682   : > { %v8766_v16 = vpop.f32.mrf.mxu2  ;;  %v8768_v11 = vpop.f32.mrf.mxu3 }
 0x683   : > { %v8770_v45 = vpop.f32.mrf.mxu0  ;;  %v8772_v7 = vpop.f32.mrf.mxu1 }
 0x68a   : > { %v8774_v46 = vpop.f32.mrf.mxu2  ;;  %v8776_v35 = vpop.f32.mrf.mxu3 }
 0x68b   : > { %v8778_v60 = vpop.f32.mrf.mxu0  ;;  %v8780_v20 = vpop.f32.mrf.mxu1 }
 0x692   : > { %v8782_v23 = vpop.f32.mrf.mxu2  ;;  %v8784_v44 = vpop.f32.mrf.mxu3 }
 0x693   : > { %v8786_v2 = vpop.f32.mrf.mxu0  ;;  %v8788_v48 = vpop.f32.mrf.mxu1 }
 0x69a   : > { %v8792_v14 = vpop.f32.mrf.mxu2  ;;  %v8794_v6 = vpop.f32.mrf.mxu3 }
 0x69b   : > { %10050 = vst [vmem:[#allocation64_spill] sm:$0xff] %v8794_v6  ;;  %v3694_v24 = vpop.f32.mrf.mxu0  ;;  %v3729_v4 = vpop.f32.mrf.mxu1 }
 0x69c   : > { %v3841_v15 = vadd.f32 %v3817_v9, %v3694_v24  ;;  %v3842_v61 = vadd.f32 %v3818_v17, %v3729_v4 }
 0x69e   : > { %v3865_v50 = vadd.f32 3.0, %v3841_v15  ;;  %v3866_v10 = vadd.f32 3.0, %v3842_v61 }
 0x6a0   : > { %v3889_v62 = vmax.f32 %v3865_v50, 0.0  ;;  %v3890_v57 = vmax.f32 %v3866_v10, 0.0  ;;  %v3825_v10 = vmul.f32 %v3542_v27, %v10037_v26 }
 0x6a2   : > { %v3764_v5 = vpop.f32.mrf.mxu2  ;;  %v3799_v13 = vpop.f32.mrf.mxu3  ;;  %v3913_v59 = vmin.f32 %v3889_v62, 6.0  ;;  %v3914_v43 = vmin.f32 %v3890_v57, 6.0 }
 0x6a3   : > { %v3843_v37 = vadd.f32 %v3819_v8, %v3764_v5  ;;  %v3844_v58 = vadd.f32 %v3820_v49, %v3799_v13  ;;  %v3697_v29 = vpop.f32.mrf.mxu0  ;;  %v3732_v51 = vpop.f32.mrf.mxu1  ;;  %v3826_v8 = vmul.f32 %v3577_v42, %v10038_v3 }
 0x6a4   : > { %v3845_v9 = vadd.f32 %v3821_v36, %v3697_v29  ;;  %v3846_v17 = vadd.f32 %v3822_v40, %v3732_v51  ;;  %v8804_v13 = vmul.f32 %v3913_v59, %v3841_v15  ;;  %v8806_v62 = vmul.f32 %v3914_v43, %v3842_v61 }
 0x6a5   : > { %v3867_v24 = vadd.f32 3.0, %v3843_v37  ;;  %v3868_v4 = vadd.f32 3.0, %v3844_v58  ;;  %v3829_v43 = vmul.f32 %v8770_v45, %v10041_v19 }
 0x6a6   : > { %v3869_v6 = vadd.f32 3.0, %v3845_v9  ;;  %v3870_v18 = vadd.f32 3.0, %v3846_v17 }
 0x6a7   : > { %v3891_v54 = vmax.f32 %v3867_v24, 0.0  ;;  %v3892_v50 = vmax.f32 %v3868_v4, 0.0 }
 0x6a8   : > { %v3893_v56 = vmax.f32 %v3869_v6, 0.0  ;;  %v3894_v39 = vmax.f32 %v3870_v18, 0.0 }
 0x6a9   : > { %v3915_v27 = vmin.f32 %v3891_v54, 6.0  ;;  %v3916_v3 = vmin.f32 %v3892_v50, 6.0 }
 0x6aa   : > { %v3917_v49 = vmin.f32 %v3893_v56, 6.0  ;;  %v3918_v36 = vmin.f32 %v3894_v39, 6.0  ;;  %v3767_v40 = vpop.f32.mrf.mxu2  ;;  %v3802_v5 = vpop.f32.mrf.mxu3  ;;  %v3830_v56 = vmul.f32 %v8772_v7, %v10042_v41 }
 0x6ab   : > { %v3847_v6 = vadd.f32 %v3823_v0, %v3767_v40  ;;  %v3848_v57 = vadd.f32 %v3824_v38, %v3802_v5  ;;  %v3700_v29 = vpop.f32.mrf.mxu0  ;;  %v3735_v21 = vpop.f32.mrf.mxu1  ;;  %v8824_v38 = vmul.f32 %v3915_v27, %v3843_v37  ;;  %v8826_v54 = vmul.f32 %v3916_v3, %v3844_v58 }
 0x6ac   : > { %v8808_v34 = vmul.f32 %v3917_v49, %v3845_v9  ;;  %v8810_v25 = vmul.f32 %v3918_v36, %v3846_v17  ;;  %v3849_v52 = vadd.f32 %v3825_v10, %v3700_v29  ;;  %v3850_v26 = vadd.f32 %v3826_v8, %v3735_v21 }
 0x6ad   : > { %v3871_v42 = vadd.f32 3.0, %v3847_v6  ;;  %v3872_v51 = vadd.f32 3.0, %v3848_v57  ;;  %v3827_v9 = vmul.f32 %v8766_v16, %v10039_v22  ;;  %v3828_v17 = vmul.f32 %v8768_v11, %v10040_v1 }
 0x6ae   : > { %v3873_v24 = vadd.f32 3.0, %v3849_v52  ;;  %v3874_v4 = vadd.f32 3.0, %v3850_v26  ;;  %v3966_v15 = vpack.c.bf16 %v8808_v34, %v8804_v13  ;;  %v3967_v61 = vpack.c.bf16 %v8810_v25, %v8806_v62  ;;  %v3981_v13 = vld [vmem:[%s8964_s7 + $0x18] sm:$0xff]  ;;  %v3980_v62 = vld [vmem:[%s8964_s7 + $0x10] sm:$0xff]  ;;  %v3979_v34 = vld [vmem:[%s8964_s7 + $0x8] sm:$0xff] }
 0x6af   : > { %v3895_v18 = vmax.f32 %v3871_v42, 0.0  ;;  %v3896_v59 = vmax.f32 %v3872_v51, 0.0  ;;  %v3831_v3 = vmul.f32 %v8774_v46, %v10043_v47  ;;  %v3832_v42 = vmul.f32 %v8776_v35, %v10044_v12  ;;  %3995 = vperm.xlu0 %4471, %v3980_v62   ;;  %3990 = vperm.xlu2 %4470, %v3979_v34   ;;  %v4380_v25 = vld [vmem:[%s8963_s6 + $0x8] sm:$0xff] }
 0x6b0   : > { %v3897_v50 = vmax.f32 %v3873_v24, 0.0  ;;  %v3898_v10 = vmax.f32 %v3874_v4, 0.0  ;;  %v3833_v51 = vmul.f32 %v8778_v60, %v8510_v30  ;;  %v3834_v24 = vmul.f32 %v8780_v20, %v8512_v63 }
 0x6b1   : > { %v3919_v39 = vmin.f32 %v3895_v18, 6.0  ;;  %v3920_v0 = vmin.f32 %v3896_v59, 6.0 }
 0x6b2   : > { %v3770_v8 = vpop.f32.mrf.mxu2  ;;  %v3805_v49 = vpop.f32.mrf.mxu3  ;;  %v3922_v21 = vmin.f32 %v3898_v10, 6.0 }
 0x6b3   : > { %v8828_v22 = vmul.f32 %v3919_v39, %v3847_v6  ;;  %v8830_v16 = vmul.f32 %v3920_v0, %v3848_v57  ;;  %v3851_v1 = vadd.f32 %v3827_v9, %v3770_v8  ;;  %v3852_v11 = vadd.f32 %v3828_v17, %v3805_v49  ;;  %v3703_v19 = vpop.f32.mrf.mxu0  ;;  %v3738_v45 = vpop.f32.mrf.mxu1 }
 0x6b4   : > { %v3853_v36 = vadd.f32 %v3829_v43, %v3703_v19  ;;  %v3854_v41 = vadd.f32 %v3830_v56, %v3738_v45  ;;  %v3921_v6 = vmin.f32 %v3897_v50, 6.0  ;;  %v8846_v39 = vmul.f32 %v3922_v21, %v3850_v26 }
 0x6b5   : > { %v3968_v7 = vpack.c.bf16 %v8828_v22, %v8824_v38  ;;  %v3969_v37 = vpack.c.bf16 %v8830_v16, %v8826_v54  ;;  %v3875_v58 = vadd.f32 3.0, %v3851_v1  ;;  %v3876_v40 = vadd.f32 3.0, %v3852_v11 }
 0x6b6   : > { %v3877_v5 = vadd.f32 3.0, %v3853_v36  ;;  %v3878_v29 = vadd.f32 3.0, %v3854_v41  ;;  %v8844_v56 = vmul.f32 %v3921_v6, %v3849_v52  ;;  %v3838_v6 = vmul.f32 %v8788_v48, %v8601_v28 }
 0x6b7   : > { %v3899_v4 = vmax.f32 %v3875_v58, 0.0  ;;  %v3900_v18 = vmax.f32 %v3876_v40, 0.0 }
 0x6b8   : > { %v3901_v57 = vmax.f32 %v3877_v5, 0.0  ;;  %v3902_v27 = vmax.f32 %v3878_v29, 0.0  ;;  %v3837_v29 = vmul.f32 %v8786_v2, %v8599_v55 }
 0x6b9   : > { %v3923_v10 = vmin.f32 %v3899_v4, 6.0  ;;  %v3924_v8 = vmin.f32 %v3900_v18, 6.0 }
 0x6ba   : > { %v3925_v59 = vmin.f32 %v3901_v57, 6.0  ;;  %v3926_v9 = vmin.f32 %v3902_v27, 6.0  ;;  %v3773_v17 = vpop.f32.mrf.mxu2  ;;  %v3808_v43 = vpop.f32.mrf.mxu3 }
 0x6bb   : > { %v3855_v47 = vadd.f32 %v3831_v3, %v3773_v17  ;;  %v3856_v46 = vadd.f32 %v3832_v42, %v3808_v43  ;;  %v3706_v0 = vpop.f32.mrf.mxu0  ;;  %v3741_v12 = vpop.f32.mrf.mxu1  ;;  %v8864_v21 = vmul.f32 %v3923_v10, %v3851_v1  ;;  %v8866_v57 = vmul.f32 %v3924_v8, %v3852_v11 }
 0x6bc   : > { %v8848_v35 = vmul.f32 %v3925_v59, %v3853_v36  ;;  %v8850_v30 = vmul.f32 %v3926_v9, %v3854_v41  ;;  %v3857_v60 = vadd.f32 %v3833_v51, %v3706_v0  ;;  %v3858_v63 = vadd.f32 %v3834_v24, %v3741_v12  ;;  %v10051_v0 = vld [vmem:[#allocation64_spill] sm:$0xff] }
 0x6bd   : > { %v3879_v20 = vadd.f32 3.0, %v3855_v47  ;;  %v3880_v50 = vadd.f32 3.0, %v3856_v46  ;;  %v3835_v36 = vmul.f32 %v8782_v23, %v8514_v33  ;;  %v3836_v41 = vmul.f32 %v8784_v44, %v8516_v53 }
 0x6be   : > { %v3970_v52 = vpack.c.bf16 %v8848_v35, %v8844_v56  ;;  %v3971_v26 = vpack.c.bf16 %v8850_v30, %v8846_v39  ;;  %v3881_v45 = vadd.f32 3.0, %v3857_v60  ;;  %v3882_v58 = vadd.f32 3.0, %v3858_v63  ;;  %v4379_v56 = vld [vmem:[%s8963_s6] sm:$0xff] }
 0x6bf   : > { %v3903_v49 = vmax.f32 %v3879_v20, 0.0  ;;  %v3904_v19 = vmax.f32 %v3880_v50, 0.0  ;;  %v3840_v12 = vmul.f32 %v10051_v0, %v8605_v31 }
 0x6c0   : > { %v3905_v44 = vmax.f32 %v3881_v45, 0.0  ;;  %v3906_v4 = vmax.f32 %v3882_v58, 0.0 }
 0x6c1   : > { %v3927_v40 = vmin.f32 %v3903_v49, 6.0  ;;  %v3928_v5 = vmin.f32 %v3904_v19, 6.0 }
 0x6c2   : > { %v3776_v27 = vpop.f32.mrf.mxu2  ;;  %v3811_v3 = vpop.f32.mrf.mxu3  ;;  %v3929_v9 = vmin.f32 %v3905_v44, 6.0  ;;  %v3930_v17 = vmin.f32 %v3906_v4, 6.0 }
 0x6c3   : > { %v3951_v42 = vmul.f32 %v3927_v40, %v3855_v47  ;;  %v3952_v51 = vmul.f32 %v3928_v5, %v3856_v46  ;;  %v3859_v33 = vadd.f32 %v3835_v36, %v3776_v27  ;;  %v3860_v23 = vadd.f32 %v3836_v41, %v3811_v3  ;;  %v3709_v24 = vpop.f32.mrf.mxu0  ;;  %v3744_v53 = vpop.f32.mrf.mxu1 }
 0x6c4   : > { %v3861_v18 = vadd.f32 %v3837_v29, %v3709_v24  ;;  %v3862_v59 = vadd.f32 %v3838_v6, %v3744_v53  ;;  %v3839_v46 = vmul.f32 %v8792_v14, %v8603_v32  ;;  %v3953_v36 = vmul.f32 %v3929_v9, %v3857_v60 }
 0x6c5   : > { %v3972_v55 = vpack.c.bf16 %v3951_v42, %v8864_v21  ;;  %v3973_v28 = vpack.c.bf16 %v3952_v51, %v8866_v57  ;;  %v3883_v1 = vadd.f32 3.0, %v3859_v33  ;;  %v3884_v11 = vadd.f32 3.0, %v3860_v23  ;;  %v3978_v51 = vld [vmem:[%s8964_s7] sm:$0xff] }
 0x6c6   : > { %v3885_v2 = vadd.f32 3.0, %v3861_v18  ;;  %v3886_v48 = vadd.f32 3.0, %v3862_v59  ;;  %v3954_v41 = vmul.f32 %v3930_v17, %v3858_v63  ;;  %3985 = vperm.xlu1 %4469, %v3978_v51  }
 0x6c7   : > { %v3907_v49 = vmax.f32 %v3883_v1, 0.0  ;;  %v3908_v19 = vmax.f32 %v3884_v11, 0.0 }
 0x6c8   : > { %v3909_v43 = vmax.f32 %v3885_v2, 0.0  ;;  %v3910_v47 = vmax.f32 %v3886_v48, 0.0 }
 0x6c9   : > { %v3931_v32 = vmin.f32 %v3907_v49, 6.0  ;;  %v3932_v14 = vmin.f32 %v3908_v19, 6.0 }
 0x6ca   : > { %v3933_v20 = vmin.f32 %v3909_v43, 6.0  ;;  %v3934_v50 = vmin.f32 %v3910_v47, 6.0  ;;  %v3779_v10 = vpop.f32.mrf.mxu2  ;;  %v3814_v8 = vpop.f32.mrf.mxu3 }
 0x6cb   : > { %v3863_v45 = vadd.f32 %v3839_v46, %v3779_v10  ;;  %v3864_v58 = vadd.f32 %v3840_v12, %v3814_v8  ;;  %v3955_v60 = vmul.f32 %v3931_v32, %v3859_v33  ;;  %v3956_v63 = vmul.f32 %v3932_v14, %v3860_v23 }
 0x6cc   : > { %v3957_v40 = vmul.f32 %v3933_v20, %v3861_v18  ;;  %v3958_v5 = vmul.f32 %v3934_v50, %v3862_v59 }
 0x6cd   : > { %v3887_v29 = vadd.f32 3.0, %v3863_v45  ;;  %v3888_v6 = vadd.f32 3.0, %v3864_v58 }
 0x6ce   : > { %v3974_v21 = vpack.c.bf16 %v3957_v40, %v3953_v36  ;;  %v3975_v57 = vpack.c.bf16 %v3958_v5, %v3954_v41  ;;  %4000 = vperm.xlu1 %4469, %v3981_v13  }
 0x6cf   : > { %v3911_v27 = vmax.f32 %v3887_v29, 0.0  ;;  %v3912_v31 = vmax.f32 %v3888_v6, 0.0 }
 0x6d0   : > { %4036 = vmatpush.bf16.msrb.mxu0 %v3974_v21  ;;  %4059 = vmatpush.bf16.msrb.mxu1 %v3975_v57 }
 0x6d1   : > { %v3935_v3 = vmin.f32 %v3911_v27, 6.0  ;;  %v3936_v42 = vmin.f32 %v3912_v31, 6.0 }
 0x6d3   : > { %v3959_v24 = vmul.f32 %v3935_v3, %v3863_v45  ;;  %v3960_v53 = vmul.f32 %v3936_v42, %v3864_v58 }
 0x6d4   : > { %4037 = vmatpush.bf16.msrb.mxu0 %v3970_v52  ;;  %4060 = vmatpush.bf16.msrb.mxu1 %v3971_v26 }
 0x6d5   : > { %v3976_v44 = vpack.c.bf16 %v3959_v24, %v3955_v60  ;;  %v3977_v4 = vpack.c.bf16 %v3960_v53, %v3956_v63 }
 0x6d7   : > { %4082 = vmatpush.bf16.msrb.mxu2 %v3976_v44  ;;  %4105 = vmatpush.bf16.msrb.mxu3 %v3977_v4 }
 0x6d8   : > { %4038 = vmatpush.bf16.msrb.mxu0 %v3966_v15  ;;  %4061 = vmatpush.bf16.msrb.mxu1 %v3967_v61  ;;  %v3982_v15 = vld [vmem:[%s8964_s7 + $0x20] sm:$0xff]  ;;  %v3965_v61 = vld [vmem:[%s8963_s6 + $0x10] sm:$0xf] }
 0x6d9   : > { %4005 = vperm.xlu2 %4470, %v3982_v15   ;;  %v4017_v38 = vunpack.c.l.b16 %v3965_v61 }
 0x6db   : > { %4083 = vmatpush.bf16.msrb.mxu2 %v3972_v55  ;;  %4106 = vmatpush.bf16.msrb.mxu3 %v3973_v28  ;;  %v4020_v54 = vpack.c.b16 %v4017_v38, %v4017_v38 }
 0x6dc   : > { %4357 = vmatmul.msk.bf16.vlgmr.msrb.gmra.mxu0 %vm4021_vm1, %v4379_v56  ;;  %4360 = vmatmul.msk.bf16.vlgmr.msrb.gmra.mxu1 %vm4021_vm1, %v4379_v56 }
 0x6df   : > { %4084 = vmatpush.bf16.msrb.mxu2 %v3968_v7  ;;  %4107 = vmatpush.bf16.msrb.mxu3 %v3969_v37 }
 0x6e2   : > { %4363 = vmatmul.msk.bf16.vlgmr.msrb.gmra.mxu2 %vm4021_vm1, %v4379_v56  ;;  %4366 = vmatmul.msk.bf16.vlgmr.msrb.gmra.mxu3 %vm4021_vm1, %v4379_v56 }
 0x6ec   : > { %4358 = vmatmul.msk.bf16.gmra.mxu0 %vm4021_vm1, %v4380_v25  ;;  %4361 = vmatmul.msk.bf16.gmra.mxu1 %vm4021_vm1, %v4380_v25 }
 0x6f2   : > { %4364 = vmatmul.msk.bf16.gmra.mxu2 %vm4021_vm1, %v4380_v25  ;;  %4367 = vmatmul.msk.bf16.gmra.mxu3 %vm4021_vm1, %v4380_v25 }
 0x6fc   : > { %4359 = vmatmul.msk.bf16.gmra.mxu0 %vm4021_vm1, %v4020_v54  ;;  %4362 = vmatmul.msk.bf16.gmra.mxu1 %vm4021_vm1, %v4020_v54 }
 0x702   : > { %4365 = vmatmul.msk.bf16.gmra.mxu2 %vm4021_vm1, %v4020_v54  ;;  %4368 = vmatmul.msk.bf16.gmra.mxu3 %vm4021_vm1, %v4020_v54 }
 0x709   : > { %v3991_v35 = vpop.permute.xlu2 %3990 }
 0x721   : > { %v3996_v28 = vpop.permute.xlu0 %3995 }
 0x733   : > { %v4006_v45 = vpop.permute.xlu2 %4005 }
 0x738   : > { %v3986_v22 = vpop.permute.xlu1 %3985 }
 0x740   : > { %v4001_v46 = vpop.permute.xlu1 %4000 }
 0x759   : > { %v4040_v16 = vpop.f32.mrf.mxu0  ;;  %v4063_v7 = vpop.f32.mrf.mxu1 }
 0x75a   : > { %v4041_v37 = vadd.f32 %v4040_v16, %v3986_v22  ;;  %v4064_v39 = vadd.f32 %v4063_v7, %v3986_v22 }
 0x75c   : > { %4123 = vst [vmem:[%s8932_s24] sm:$0xff] %v4041_v37 }
 0x75d   : > { %4124 = vst [vmem:[%s8932_s24 + $0x8] sm:$0xff] %v4064_v39 }
 0x761   : > { %v4042_v30 = vpop.f32.mrf.mxu0  ;;  %v4065_v52 = vpop.f32.mrf.mxu1 }
 0x762   : > { %v4043_v26 = vadd.f32 %v4042_v30, %v3991_v35  ;;  %v4066_v33 = vadd.f32 %v4065_v52, %v3991_v35 }
 0x764   : > { %4127 = vst [vmem:[%s8932_s24 + $0x20] sm:$0xff] %v4043_v26 }
 0x765   : > { %v4086_v23 = vpop.f32.mrf.mxu2  ;;  %v4109_v18 = vpop.f32.mrf.mxu3  ;;  %4128 = vst [vmem:[%s8932_s24 + $0x28] sm:$0xff] %v4066_v33 }
 0x766   : > { %v4087_v59 = vadd.f32 %v4086_v23, %v3986_v22  ;;  %v4110_v55 = vadd.f32 %v4109_v18, %v3986_v22 }
 0x768   : > { %4125 = vst [vmem:[%s8932_s24 + $0x10] sm:$0xff] %v4087_v59 }
 0x769   : > { %4126 = vst [vmem:[%s8932_s24 + $0x18] sm:$0xff] %v4110_v55  ;;  %v4045_v2 = vpop.f32.mrf.mxu0  ;;  %v4068_v48 = vpop.f32.mrf.mxu1 }
 0x76a   : > { %v4046_v1 = vadd.f32 %v4045_v2, %v3996_v28  ;;  %v4069_v11 = vadd.f32 %v4068_v48, %v3996_v28 }
 0x76c   : > { %4131 = vst [vmem:[%s8932_s24 + $0x40] sm:$0xff] %v4046_v1 }
 0x76d   : > { %v4088_v9 = vpop.f32.mrf.mxu2  ;;  %v4111_v17 = vpop.f32.mrf.mxu3  ;;  %4132 = vst [vmem:[%s8932_s24 + $0x48] sm:$0xff] %v4069_v11 }
 0x76e   : > { %v4089_v43 = vadd.f32 %v4088_v9, %v3991_v35  ;;  %v4112_v47 = vadd.f32 %v4111_v17, %v3991_v35 }
 0x770   : > { %4129 = vst [vmem:[%s8932_s24 + $0x30] sm:$0xff] %v4089_v43 }
 0x771   : > { %4130 = vst [vmem:[%s8932_s24 + $0x38] sm:$0xff] %v4112_v47  ;;  %v4047_v0 = vpop.f32.mrf.mxu0  ;;  %v4070_v12 = vpop.f32.mrf.mxu1 }
 0x772   : > { %v4048_v20 = vadd.f32 %v4047_v0, %v4001_v46  ;;  %v4071_v50 = vadd.f32 %v4070_v12, %v4001_v46 }
 0x774   : > { %4135 = vst [vmem:[%s8932_s24 + $0x60] sm:$0xff] %v4048_v20 }
 0x775   : > { %v4091_v10 = vpop.f32.mrf.mxu2  ;;  %v4114_v8 = vpop.f32.mrf.mxu3  ;;  %4136 = vst [vmem:[%s8932_s24 + $0x68] sm:$0xff] %v4071_v50 }
 0x776   : > { %v4092_v49 = vadd.f32 %v4091_v10, %v3996_v28  ;;  %v4115_v19 = vadd.f32 %v4114_v8, %v3996_v28 }
 0x778   : > { %4133 = vst [vmem:[%s8932_s24 + $0x50] sm:$0xff] %v4092_v49 }
 0x779   : > { %4134 = vst [vmem:[%s8932_s24 + $0x58] sm:$0xff] %v4115_v19  ;;  %v4050_v58 = vpop.f32.mrf.mxu0  ;;  %v4073_v36 = vpop.f32.mrf.mxu1 }
 0x77a   : > { %v4051_v41 = vadd.f32 %v4050_v58, %v4006_v45  ;;  %v4074_v40 = vadd.f32 %v4073_v36, %v4006_v45 }
 0x77c   : > { %4139 = vst [vmem:[%s8932_s24 + $0x80] sm:$0xff] %v4051_v41 }
 0x77d   : > { %v4093_v5 = vpop.f32.mrf.mxu2  ;;  %v4116_v29 = vpop.f32.mrf.mxu3  ;;  %4140 = vst [vmem:[%s8932_s24 + $0x88] sm:$0xff] %v4074_v40 }
 0x77e   : > { %v4094_v6 = vadd.f32 %v4093_v5, %v4001_v46  ;;  %v4117_v21 = vadd.f32 %v4116_v29, %v4001_v46 }
 0x780   : > { %4137 = vst [vmem:[%s8932_s24 + $0x70] sm:$0xff] %v4094_v6 }
 0x781   : > { %4138 = vst [vmem:[%s8932_s24 + $0x78] sm:$0xff] %v4117_v21  ;;  %v4052_v57 = vpop.f32.mrf.mxu0  ;;  %v4075_v32 = vpop.f32.mrf.mxu1 }
 0x785   : > { %v4096_v14 = vpop.f32.mrf.mxu2  ;;  %v4119_v27 = vpop.f32.mrf.mxu3 }
 0x786   : > { %v4097_v31 = vadd.f32 %v4096_v14, %v4006_v45  ;;  %v4120_v3 = vadd.f32 %v4119_v27, %v4006_v45 }
 0x788   : > { %4141 = vst [vmem:[%s8932_s24 + $0x90] sm:$0xff] %v4097_v31 }
 0x789   : > { %4142 = vst [vmem:[%s8932_s24 + $0x98] sm:$0xff] %v4120_v3 }
 0x78d   : > { %v4098_v42 = vpop.f32.mrf.mxu2  ;;  %v4121_v51 = vpop.f32.mrf.mxu3 }
 0x78e PF: > { %s18_s27 = sadd.s32 1, %s4571_s27  }
 0x78f   : > { %p15_p4 = scmp.ge.s32.totalorder %s18_s27, 4  }
 0x791   :  { %17 = sbr.rel (!%p15_p4) target bundleno = 1 (0x1), region = 89 }

</bundles_post_ra>
